<compile_context>
chip_gen: v7x
topology: tpu7x:2x2x1
jax: 0.10.0
libtpu: 0.0.40
codegen_flags: <defaults>
</compile_context>

<pallas_src>
import functools

import numpy as np
import jax
import jax.numpy as jnp
from jax.experimental import pallas as pl

CNN_DIM = 8       # args.cnn_dim
INPUT_DIM = 8     # conv1 input channels (module default 48, shrunk for the demo)
BATCH = 2
H_IN, W_IN = 24, 72   # -> 12x36 -> 6x18 -> 3x9 (= 27) after the three pools


# ----------------------------------------------------------------------------
# Constant layout-transform matrices (built once with numpy at trace time).
# ----------------------------------------------------------------------------
def _pool_transform(H, W):
    """4-way-maxed conv output of an (H, W) stage -> padded-flat input of the (H/2, W/2) stage."""
    wp = W + 2
    L = (H - 1) * wp - 1                      # length of the 4-way shifted max
    hn, wn = H // 2, W // 2
    wpn = wn + 2
    nflat = (hn + 2) * wpn + 2
    S = np.zeros((L, nflat), np.float32)
    for yn in range(hn):
        for xn in range(wn):
            S[2 * yn * wp + 2 * xn, (yn + 1) * wpn + (xn + 1)] = 1.0
    return S


def _pad_transform(H, W):
    """Conv output of an (H, W) stage -> padded-flat input of the same-size next stage."""
    wp = W + 2
    nflat = (H + 2) * wp + 2
    T = np.zeros((H * wp, nflat), np.float32)
    for y in range(H):
        for x in range(W):
            T[y * wp + x, (y + 1) * wp + (x + 1)] = 1.0
    return T


def _fc_placement(H, W):
    """Dense (H*W) fc-weight rows -> padded-flat (H, W) layout (for the in-kernel FC)."""
    wp = W + 2
    nflat = (H + 2) * wp + 2
    P = np.zeros((H * W, nflat), np.float32)
    for y in range(H):
        for x in range(W):
            P[y * W + x, (y + 1) * wp + (x + 1)] = 1.0
    return P


# ----------------------------------------------------------------------------
# The fused Pallas kernel (single invocation, whole batch, fully VMEM-resident)
# ----------------------------------------------------------------------------
def _res_cnn_kernel(x_ref, w1_ref, b1_ref, wr_ref, br_ref,
                    s1_ref, s2_ref, t3_ref, s4_ref, t5_ref,
                    fcw_ref, fcb_ref, o_ref, *, B, C, H, W):
    f32 = jnp.float32
    bf16 = jnp.bfloat16

    def conv_tanh(xp, wt, b, h, wdt):
        # xp: (B*Cin, nflat) f32 padded-flat; wt: (3, B*Cout, 3*B*Cin); b: (B*Cout, 1).
        # Accumulate 3 dots (one per kernel row dy) -- no single big im2col buffer.
        wp = wdt + 2
        m = h * wp
        acc = jnp.zeros((wt.shape[1], m), f32)
        for dy in range(3):
            x3 = jnp.concatenate(
                [xp[:, dy * wp + dx: dy * wp + dx + m] for dx in range(3)], axis=0)
            acc = acc + jnp.dot(wt[dy], x3, preferred_element_type=f32)
        return jnp.tanh(acc + b)

    def pool_max(y, h, wdt):
        # Elementwise max of the four 2x2 phases via shifted slices (lane-dense, f32 VPU).
        wp = wdt + 2
        L = (h - 1) * wp - 1
        return jnp.maximum(jnp.maximum(y[:, 0:L], y[:, 1:L + 1]),
                           jnp.maximum(y[:, wp:wp + L], y[:, wp + 1:wp + 1 + L]))

    def gather(act, s_ref):
        # 0/1 gather / re-pad matmul on the MXU in bf16 (single pass).  The 0/1 matrix is
        # exact in bf16 and act is a tanh output (or a max of tanh outputs), so |act|<=1.
        return jnp.dot(act.astype(bf16), s_ref[...], preferred_element_type=f32)

    x0 = x_ref[...]                                                # (B*Cin, nflat0)

    # ---- conv1: Conv-Tanh-Pool-Conv-Tanh-Pool ----
    a = conv_tanh(x0, w1_ref[...], b1_ref[...], H, W)
    xb = gather(pool_max(a, H, W), s1_ref)
    h2, w2 = H // 2, W // 2
    bm = conv_tanh(xb, wr_ref[0], br_ref[0], h2, w2)
    x1 = gather(pool_max(bm, h2, w2), s2_ref)

    # ---- conv2 + residual ----
    h3, w3 = H // 4, W // 4
    c = conv_tanh(x1, wr_ref[1], br_ref[1], h3, w3)
    d = conv_tanh(gather(c, t3_ref), wr_ref[2], br_ref[2], h3, w3)
    x2 = gather(d, t3_ref) + x1

    # ---- conv3: Conv-Tanh-Pool ----
    e = conv_tanh(x2, wr_ref[3], br_ref[3], h3, w3)
    x3 = gather(pool_max(e, h3, w3), s4_ref)

    # ---- conv4 + residual ----
    h4, w4 = H // 8, W // 8
    f = conv_tanh(x3, wr_ref[4], br_ref[4], h4, w4)
    g = conv_tanh(gather(f, t5_ref), wr_ref[5], br_ref[5], h4, w4)
    x4 = gather(g, t5_ref) + x3

    # ---- fc: PyTorch NCHW-flatten order is baked into the fcw placement ----
    fcw = fcw_ref[...]                                             # (C, nflat4) f32
    outs = []
    for bi in range(B):
        p = x4[bi * C:(bi + 1) * C, :] * fcw
        outs.append(jnp.sum(p, axis=1, keepdims=True).sum(axis=0, keepdims=True))
    o_ref[...] = jnp.concatenate(outs, axis=1) + fcb_ref[...]      # (1, B) lane-dense


# ----------------------------------------------------------------------------
# RES_CNN forward (single grid-less pallas_call)
# ----------------------------------------------------------------------------
def res_cnn_forward(params, x_nchw):
    # nn.Dropout is identity at inference.
    # TODO(synk): training-mode dropout (RNG masking) not implemented.
    B, cin, H, W = x_nchw.shape
    assert H % 8 == 0 and W % 8 == 0
    cnn = params["c1b"][0].shape[0]

    # XLA-side prep: pad/flatten the network input once + fold batch into block-diag weights.
    xp = jnp.pad(x_nchw, ((0, 0), (0, 0), (1, 1), (1, 1)))
    x0 = jnp.pad(xp.reshape(B, cin, (H + 2) * (W + 2)), ((0, 0), (0, 0), (0, 2)))
    x0 = x0.reshape(B * cin, -1)                                   # (B*Cin, nflat0)

    eye_b = jnp.eye(B, dtype=jnp.float32)

    def batched_rowgroup_weights(w_oihw):
        # (Cout, Cin, 3, 3) -> (3, B*Cout, 3*B*Cin): one K = 3*B*Cin row-group per kernel
        # row dy, block-diagonal over the batch samples stacked on sublanes.
        return jnp.stack([
            jnp.concatenate(
                [jnp.kron(eye_b, w_oihw[:, :, dy, dx]) for dx in range(3)], axis=1)
            for dy in range(3)])

    def batched_bias(bvec):
        return jnp.tile(bvec.reshape(-1, 1), (B, 1))               # (B*Cout, 1)

    w1 = batched_rowgroup_weights(params["c1a"][0])
    b1 = batched_bias(params["c1a"][1])
    rest = ("c1b", "c2a", "c2b", "c3a", "c4a", "c4b")
    wr = jnp.stack([batched_rowgroup_weights(params[k][0]) for k in rest])
    br = jnp.stack([batched_bias(params[k][1]) for k in rest])

    # 0/1 selection / re-pad matrices in bf16 (exact) -> single-pass MXU + half the DMA.
    bf16 = jnp.bfloat16
    s1 = jnp.asarray(_pool_transform(H, W), dtype=bf16)
    s2 = jnp.asarray(_pool_transform(H // 2, W // 2), dtype=bf16)
    t3 = jnp.asarray(_pad_transform(H // 4, W // 4), dtype=bf16)
    s4 = jnp.asarray(_pool_transform(H // 4, W // 4), dtype=bf16)
    t5 = jnp.asarray(_pad_transform(H // 8, W // 8), dtype=bf16)

    h4, w4 = H // 8, W // 8
    pfc = jnp.asarray(_fc_placement(h4, w4))                       # (h4*w4, nflat4)
    fcw = params["fc_w"].reshape(cnn, h4 * w4) @ pfc               # (cnn, nflat4) f32
    fcb = params["fc_b"].reshape(1, 1)

    kern = functools.partial(_res_cnn_kernel, B=B, C=cnn, H=H, W=W)

    # No grid: the whole batch is one invocation, every operand is a full-array VMEM ref
    # (so all grid-invariant constants are single-buffered by construction).  Total VMEM
    # use is ~4 MB, well under the scoped limits of v5e/v6e/v7x.
    out = pl.pallas_call(
        kern,
        out_shape=jax.ShapeDtypeStruct((1, B), jnp.float32),
    )(x0, w1, b1, wr, br, s1, s2, t3, s4, t5, fcw, fcb)
    return out.reshape(B, 1)


# ----------------------------------------------------------------------------
# Pure-JAX reference (NCHW, lax.conv) for correctness checking
# ----------------------------------------------------------------------------
def _conv_ref(x, w, b):
    y = jax.lax.conv_general_dilated(
        x, w, window_strides=(1, 1), padding=((1, 1), (1, 1)),
        dimension_numbers=("NCHW", "OIHW", "NCHW"),
        precision=jax.lax.Precision.HIGHEST)
    return jnp.tanh(y + b[None, :, None, None])


def _pool_ref(x):
    return jax.lax.reduce_window(x, -jnp.inf, jax.lax.max,
                                 (1, 1, 2, 2), (1, 1, 2, 2), "VALID")


def res_cnn_ref(params, x):
    x1 = _pool_ref(_conv_ref(_pool_ref(_conv_ref(x, *params["c1a"])), *params["c1b"]))
    x2 = _conv_ref(_conv_ref(x1, *params["c2a"]), *params["c2b"]) + x1
    x3 = _pool_ref(_conv_ref(x2, *params["c3a"]))
    x4 = _conv_ref(_conv_ref(x3, *params["c4a"]), *params["c4b"]) + x3
    flat = x4.reshape(x4.shape[0], -1)
    return flat @ params["fc_w"] + params["fc_b"]


# ----------------------------------------------------------------------------
# Deterministic parameter init
# ----------------------------------------------------------------------------
def init_params(key):
    ks = jax.random.split(key, 8)

    def conv_p(k, cin, cout):
        k1, k2 = jax.random.split(k)
        w = jax.random.normal(k1, (cout, cin, 3, 3), jnp.float32) * 0.1
        b = jax.random.normal(k2, (cout,), jnp.float32) * 0.1
        return w, b

    p = {
        "c1a": conv_p(ks[0], INPUT_DIM, CNN_DIM),
        "c1b": conv_p(ks[1], CNN_DIM, CNN_DIM),
        "c2a": conv_p(ks[2], CNN_DIM, CNN_DIM),
        "c2b": conv_p(ks[3], CNN_DIM, CNN_DIM),
        "c3a": conv_p(ks[4], CNN_DIM, CNN_DIM),
        "c4a": conv_p(ks[5], CNN_DIM, CNN_DIM),
        "c4b": conv_p(ks[6], CNN_DIM, CNN_DIM),
    }
    kfw, kfb = jax.random.split(ks[7])
    p["fc_w"] = jax.random.normal(kfw, (CNN_DIM * 27, 1), jnp.float32) * 0.05
    p["fc_b"] = jax.random.normal(kfb, (1,), jnp.float32) * 0.05
    return p


if __name__ == "__main__":
    key = jax.random.PRNGKey(0)
    kx, kp = jax.random.split(key)
    x = jax.random.normal(kx, (BATCH, INPUT_DIM, H_IN, W_IN), jnp.float32)
    params = init_params(kp)

    out = jax.jit(res_cnn_forward)(params, x)
    out = jax.block_until_ready(out)
    assert out.shape == (BATCH, 1), out.shape

    ref = res_cnn_ref(params, x)
    # Tolerance covers MXU f32-matmul (3-pass) differences plus the bf16-quantized
    # activations at the 0/1 gather/re-pad matmuls (tanh outputs in [-1,1]).
    if not jnp.allclose(out, ref, rtol=2e-2, atol=1e-2):
        raise AssertionError(f"mismatch: pallas={out.ravel()} ref={ref.ravel()}")
    print("KERNEL_OK")
</pallas_src>

<mosaic_0001>
module attributes {stable_mosaic.version = 11 : i64} {
  func.func @_res_cnn_kernel(%arg0: memref<16x1926xf32, #tpu.memory_space<vmem>>, %arg1: memref<3x16x48xf32, #tpu.memory_space<vmem>>, %arg2: memref<16x1xf32, #tpu.memory_space<vmem>>, %arg3: memref<6x3x16x48xf32, #tpu.memory_space<vmem>>, %arg4: memref<6x16x1xf32, #tpu.memory_space<vmem>>, %arg5: memref<1701x534xbf16, #tpu.memory_space<vmem>>, %arg6: memref<417x162xbf16, #tpu.memory_space<vmem>>, %arg7: memref<120x162xbf16, #tpu.memory_space<vmem>>, %arg8: memref<99x57xbf16, #tpu.memory_space<vmem>>, %arg9: memref<33x57xbf16, #tpu.memory_space<vmem>>, %arg10: memref<8x57xf32, #tpu.memory_space<vmem>>, %arg11: memref<1x1xf32, #tpu.memory_space<vmem>>, %arg12: memref<1x2xf32, #tpu.memory_space<vmem>>) attributes {dimension_semantics = [], scalar_prefetch = 0 : i64, scratch_operands = 0 : i64, tpu.core_type = #tpu.core_type<tc>} {
    %c0 = arith.constant 0 : index
    %c0_0 = arith.constant 0 : index
    %0 = vector.load %arg0[%c0, %c0_0] : memref<16x1926xf32, #tpu.memory_space<vmem>>, vector<16x1926xf32>
    %c0_1 = arith.constant 0 : index
    %c0_2 = arith.constant 0 : index
    %c0_3 = arith.constant 0 : index
    %1 = vector.load %arg1[%c0_1, %c0_2, %c0_3] : memref<3x16x48xf32, #tpu.memory_space<vmem>>, vector<3x16x48xf32>
    %c0_4 = arith.constant 0 : index
    %c0_5 = arith.constant 0 : index
    %2 = vector.load %arg2[%c0_4, %c0_5] : memref<16x1xf32, #tpu.memory_space<vmem>>, vector<16x1xf32>
    %cst = arith.constant 0.000000e+00 : f32
    %3 = vector.broadcast %cst : f32 to vector<16x1776xf32>
    %4 = vector.extract_strided_slice %0 {offsets = [0, 0], sizes = [16, 1776], strides = [1, 1]} : vector<16x1926xf32> to vector<16x1776xf32>
    %5 = vector.extract_strided_slice %0 {offsets = [0, 1], sizes = [16, 1776], strides = [1, 1]} : vector<16x1926xf32> to vector<16x1776xf32>
    %6 = vector.extract_strided_slice %0 {offsets = [0, 2], sizes = [16, 1776], strides = [1, 1]} : vector<16x1926xf32> to vector<16x1776xf32>
    %7 = tpu.concatenate %4, %5, %6 in 0 : vector<16x1776xf32>, vector<16x1776xf32>, vector<16x1776xf32> -> vector<48x1776xf32>
    %8 = vector.extract_strided_slice %1 {offsets = [0, 0, 0], sizes = [1, 16, 48], strides = [1, 1, 1]} : vector<3x16x48xf32> to vector<1x16x48xf32>
    %9 = vector.shape_cast %8 : vector<1x16x48xf32> to vector<16x48xf32>
    %cst_6 = arith.constant dense<0.000000e+00> : vector<16x1776xf32>
    %10 = tpu.matmul %9, %7, %cst_6 {dimension_numbers = #tpu.dot_dimension_numbers<[1], [0], [0], [1], [0, 0, 1, 1], [], []>} : vector<16x48xf32>, vector<48x1776xf32>, vector<16x1776xf32> -> vector<16x1776xf32>
    %11 = arith.addf %3, %10 : vector<16x1776xf32>
    %12 = vector.extract_strided_slice %0 {offsets = [0, 74], sizes = [16, 1776], strides = [1, 1]} : vector<16x1926xf32> to vector<16x1776xf32>
    %13 = vector.extract_strided_slice %0 {offsets = [0, 75], sizes = [16, 1776], strides = [1, 1]} : vector<16x1926xf32> to vector<16x1776xf32>
    %14 = vector.extract_strided_slice %0 {offsets = [0, 76], sizes = [16, 1776], strides = [1, 1]} : vector<16x1926xf32> to vector<16x1776xf32>
    %15 = tpu.concatenate %12, %13, %14 in 0 : vector<16x1776xf32>, vector<16x1776xf32>, vector<16x1776xf32> -> vector<48x1776xf32>
    %16 = vector.extract_strided_slice %1 {offsets = [1, 0, 0], sizes = [1, 16, 48], strides = [1, 1, 1]} : vector<3x16x48xf32> to vector<1x16x48xf32>
    %17 = vector.shape_cast %16 : vector<1x16x48xf32> to vector<16x48xf32>
    %cst_7 = arith.constant dense<0.000000e+00> : vector<16x1776xf32>
    %18 = tpu.matmul %17, %15, %cst_7 {dimension_numbers = #tpu.dot_dimension_numbers<[1], [0], [0], [1], [0, 0, 1, 1], [], []>} : vector<16x48xf32>, vector<48x1776xf32>, vector<16x1776xf32> -> vector<16x1776xf32>
    %19 = arith.addf %11, %18 : vector<16x1776xf32>
    %20 = vector.extract_strided_slice %0 {offsets = [0, 148], sizes = [16, 1776], strides = [1, 1]} : vector<16x1926xf32> to vector<16x1776xf32>
    %21 = vector.extract_strided_slice %0 {offsets = [0, 149], sizes = [16, 1776], strides = [1, 1]} : vector<16x1926xf32> to vector<16x1776xf32>
    %22 = vector.extract_strided_slice %0 {offsets = [0, 150], sizes = [16, 1776], strides = [1, 1]} : vector<16x1926xf32> to vector<16x1776xf32>
    %23 = tpu.concatenate %20, %21, %22 in 0 : vector<16x1776xf32>, vector<16x1776xf32>, vector<16x1776xf32> -> vector<48x1776xf32>
    %24 = vector.extract_strided_slice %1 {offsets = [2, 0, 0], sizes = [1, 16, 48], strides = [1, 1, 1]} : vector<3x16x48xf32> to vector<1x16x48xf32>
    %25 = vector.shape_cast %24 : vector<1x16x48xf32> to vector<16x48xf32>
    %cst_8 = arith.constant dense<0.000000e+00> : vector<16x1776xf32>
    %26 = tpu.matmul %25, %23, %cst_8 {dimension_numbers = #tpu.dot_dimension_numbers<[1], [0], [0], [1], [0, 0, 1, 1], [], []>} : vector<16x48xf32>, vector<48x1776xf32>, vector<16x1776xf32> -> vector<16x1776xf32>
    %27 = arith.addf %19, %26 : vector<16x1776xf32>
    %28 = vector.broadcast %2 : vector<16x1xf32> to vector<16x1776xf32>
    %29 = arith.addf %27, %28 : vector<16x1776xf32>
    %30 = math.tanh %29 : vector<16x1776xf32>
    %31 = vector.extract_strided_slice %30 {offsets = [0, 0], sizes = [16, 1701], strides = [1, 1]} : vector<16x1776xf32> to vector<16x1701xf32>
    %32 = vector.extract_strided_slice %30 {offsets = [0, 1], sizes = [16, 1701], strides = [1, 1]} : vector<16x1776xf32> to vector<16x1701xf32>
    %33 = arith.maximumf %31, %32 : vector<16x1701xf32>
    %34 = vector.extract_strided_slice %30 {offsets = [0, 74], sizes = [16, 1701], strides = [1, 1]} : vector<16x1776xf32> to vector<16x1701xf32>
    %35 = vector.extract_strided_slice %30 {offsets = [0, 75], sizes = [16, 1701], strides = [1, 1]} : vector<16x1776xf32> to vector<16x1701xf32>
    %36 = arith.maximumf %34, %35 : vector<16x1701xf32>
    %37 = arith.maximumf %33, %36 : vector<16x1701xf32>
    %38 = arith.truncf %37 : vector<16x1701xf32> to vector<16x1701xbf16>
    %c0_9 = arith.constant 0 : index
    %c0_10 = arith.constant 0 : index
    %39 = vector.load %arg5[%c0_9, %c0_10] : memref<1701x534xbf16, #tpu.memory_space<vmem>>, vector<1701x534xbf16>
    %cst_11 = arith.constant dense<0.000000e+00> : vector<16x534xf32>
    %40 = tpu.matmul %38, %39, %cst_11 {dimension_numbers = #tpu.dot_dimension_numbers<[1], [0], [0], [1], [0, 0, 1, 1], [], []>} : vector<16x1701xbf16>, vector<1701x534xbf16>, vector<16x534xf32> -> vector<16x534xf32>
    %c0_12 = arith.constant 0 : index
    %c0_13 = arith.constant 0 : index
    %c0_14 = arith.constant 0 : index
    %c0_15 = arith.constant 0 : index
    %41 = vector.load %arg3[%c0_12, %c0_13, %c0_14, %c0_15] : memref<6x3x16x48xf32, #tpu.memory_space<vmem>>, vector<1x3x16x48xf32>
    %42 = vector.shape_cast %41 : vector<1x3x16x48xf32> to vector<3x16x48xf32>
    %c0_16 = arith.constant 0 : index
    %c0_17 = arith.constant 0 : index
    %c0_18 = arith.constant 0 : index
    %43 = vector.load %arg4[%c0_16, %c0_17, %c0_18] : memref<6x16x1xf32, #tpu.memory_space<vmem>>, vector<1x16x1xf32>
    %44 = vector.shape_cast %43 : vector<1x16x1xf32> to vector<16x1xf32>
    %cst_19 = arith.constant 0.000000e+00 : f32
    %45 = vector.broadcast %cst_19 : f32 to vector<16x456xf32>
    %46 = vector.extract_strided_slice %40 {offsets = [0, 0], sizes = [16, 456], strides = [1, 1]} : vector<16x534xf32> to vector<16x456xf32>
    %47 = vector.extract_strided_slice %40 {offsets = [0, 1], sizes = [16, 456], strides = [1, 1]} : vector<16x534xf32> to vector<16x456xf32>
    %48 = vector.extract_strided_slice %40 {offsets = [0, 2], sizes = [16, 456], strides = [1, 1]} : vector<16x534xf32> to vector<16x456xf32>
    %49 = tpu.concatenate %46, %47, %48 in 0 : vector<16x456xf32>, vector<16x456xf32>, vector<16x456xf32> -> vector<48x456xf32>
    %50 = vector.extract_strided_slice %42 {offsets = [0, 0, 0], sizes = [1, 16, 48], strides = [1, 1, 1]} : vector<3x16x48xf32> to vector<1x16x48xf32>
    %51 = vector.shape_cast %50 : vector<1x16x48xf32> to vector<16x48xf32>
    %cst_20 = arith.constant dense<0.000000e+00> : vector<16x456xf32>
    %52 = tpu.matmul %51, %49, %cst_20 {dimension_numbers = #tpu.dot_dimension_numbers<[1], [0], [0], [1], [0, 0, 1, 1], [], []>} : vector<16x48xf32>, vector<48x456xf32>, vector<16x456xf32> -> vector<16x456xf32>
    %53 = arith.addf %45, %52 : vector<16x456xf32>
    %54 = vector.extract_strided_slice %40 {offsets = [0, 38], sizes = [16, 456], strides = [1, 1]} : vector<16x534xf32> to vector<16x456xf32>
    %55 = vector.extract_strided_slice %40 {offsets = [0, 39], sizes = [16, 456], strides = [1, 1]} : vector<16x534xf32> to vector<16x456xf32>
    %56 = vector.extract_strided_slice %40 {offsets = [0, 40], sizes = [16, 456], strides = [1, 1]} : vector<16x534xf32> to vector<16x456xf32>
    %57 = tpu.concatenate %54, %55, %56 in 0 : vector<16x456xf32>, vector<16x456xf32>, vector<16x456xf32> -> vector<48x456xf32>
    %58 = vector.extract_strided_slice %42 {offsets = [1, 0, 0], sizes = [1, 16, 48], strides = [1, 1, 1]} : vector<3x16x48xf32> to vector<1x16x48xf32>
    %59 = vector.shape_cast %58 : vector<1x16x48xf32> to vector<16x48xf32>
    %cst_21 = arith.constant dense<0.000000e+00> : vector<16x456xf32>
    %60 = tpu.matmul %59, %57, %cst_21 {dimension_numbers = #tpu.dot_dimension_numbers<[1], [0], [0], [1], [0, 0, 1, 1], [], []>} : vector<16x48xf32>, vector<48x456xf32>, vector<16x456xf32> -> vector<16x456xf32>
    %61 = arith.addf %53, %60 : vector<16x456xf32>
    %62 = vector.extract_strided_slice %40 {offsets = [0, 76], sizes = [16, 456], strides = [1, 1]} : vector<16x534xf32> to vector<16x456xf32>
    %63 = vector.extract_strided_slice %40 {offsets = [0, 77], sizes = [16, 456], strides = [1, 1]} : vector<16x534xf32> to vector<16x456xf32>
    %64 = vector.extract_strided_slice %40 {offsets = [0, 78], sizes = [16, 456], strides = [1, 1]} : vector<16x534xf32> to vector<16x456xf32>
    %65 = tpu.concatenate %62, %63, %64 in 0 : vector<16x456xf32>, vector<16x456xf32>, vector<16x456xf32> -> vector<48x456xf32>
    %66 = vector.extract_strided_slice %42 {offsets = [2, 0, 0], sizes = [1, 16, 48], strides = [1, 1, 1]} : vector<3x16x48xf32> to vector<1x16x48xf32>
    %67 = vector.shape_cast %66 : vector<1x16x48xf32> to vector<16x48xf32>
    %cst_22 = arith.constant dense<0.000000e+00> : vector<16x456xf32>
    %68 = tpu.matmul %67, %65, %cst_22 {dimension_numbers = #tpu.dot_dimension_numbers<[1], [0], [0], [1], [0, 0, 1, 1], [], []>} : vector<16x48xf32>, vector<48x456xf32>, vector<16x456xf32> -> vector<16x456xf32>
    %69 = arith.addf %61, %68 : vector<16x456xf32>
    %70 = vector.broadcast %44 : vector<16x1xf32> to vector<16x456xf32>
    %71 = arith.addf %69, %70 : vector<16x456xf32>
    %72 = math.tanh %71 : vector<16x456xf32>
    %73 = vector.extract_strided_slice %72 {offsets = [0, 0], sizes = [16, 417], strides = [1, 1]} : vector<16x456xf32> to vector<16x417xf32>
    %74 = vector.extract_strided_slice %72 {offsets = [0, 1], sizes = [16, 417], strides = [1, 1]} : vector<16x456xf32> to vector<16x417xf32>
    %75 = arith.maximumf %73, %74 : vector<16x417xf32>
    %76 = vector.extract_strided_slice %72 {offsets = [0, 38], sizes = [16, 417], strides = [1, 1]} : vector<16x456xf32> to vector<16x417xf32>
    %77 = vector.extract_strided_slice %72 {offsets = [0, 39], sizes = [16, 417], strides = [1, 1]} : vector<16x456xf32> to vector<16x417xf32>
    %78 = arith.maximumf %76, %77 : vector<16x417xf32>
    %79 = arith.maximumf %75, %78 : vector<16x417xf32>
    %80 = arith.truncf %79 : vector<16x417xf32> to vector<16x417xbf16>
    %c0_23 = arith.constant 0 : index
    %c0_24 = arith.constant 0 : index
    %81 = vector.load %arg6[%c0_23, %c0_24] : memref<417x162xbf16, #tpu.memory_space<vmem>>, vector<417x162xbf16>
    %cst_25 = arith.constant dense<0.000000e+00> : vector<16x162xf32>
    %82 = tpu.matmul %80, %81, %cst_25 {dimension_numbers = #tpu.dot_dimension_numbers<[1], [0], [0], [1], [0, 0, 1, 1], [], []>} : vector<16x417xbf16>, vector<417x162xbf16>, vector<16x162xf32> -> vector<16x162xf32>
    %c1 = arith.constant 1 : index
    %c0_26 = arith.constant 0 : index
    %c0_27 = arith.constant 0 : index
    %c0_28 = arith.constant 0 : index
    %83 = vector.load %arg3[%c1, %c0_26, %c0_27, %c0_28] : memref<6x3x16x48xf32, #tpu.memory_space<vmem>>, vector<1x3x16x48xf32>
    %84 = vector.shape_cast %83 : vector<1x3x16x48xf32> to vector<3x16x48xf32>
    %c1_29 = arith.constant 1 : index
    %c0_30 = arith.constant 0 : index
    %c0_31 = arith.constant 0 : index
    %85 = vector.load %arg4[%c1_29, %c0_30, %c0_31] : memref<6x16x1xf32, #tpu.memory_space<vmem>>, vector<1x16x1xf32>
    %86 = vector.shape_cast %85 : vector<1x16x1xf32> to vector<16x1xf32>
    %cst_32 = arith.constant 0.000000e+00 : f32
    %87 = vector.broadcast %cst_32 : f32 to vector<16x120xf32>
    %88 = vector.extract_strided_slice %82 {offsets = [0, 0], sizes = [16, 120], strides = [1, 1]} : vector<16x162xf32> to vector<16x120xf32>
    %89 = vector.extract_strided_slice %82 {offsets = [0, 1], sizes = [16, 120], strides = [1, 1]} : vector<16x162xf32> to vector<16x120xf32>
    %90 = vector.extract_strided_slice %82 {offsets = [0, 2], sizes = [16, 120], strides = [1, 1]} : vector<16x162xf32> to vector<16x120xf32>
    %91 = tpu.concatenate %88, %89, %90 in 0 : vector<16x120xf32>, vector<16x120xf32>, vector<16x120xf32> -> vector<48x120xf32>
    %92 = vector.extract_strided_slice %84 {offsets = [0, 0, 0], sizes = [1, 16, 48], strides = [1, 1, 1]} : vector<3x16x48xf32> to vector<1x16x48xf32>
    %93 = vector.shape_cast %92 : vector<1x16x48xf32> to vector<16x48xf32>
    %cst_33 = arith.constant dense<0.000000e+00> : vector<16x120xf32>
    %94 = tpu.matmul %93, %91, %cst_33 {dimension_numbers = #tpu.dot_dimension_numbers<[1], [0], [0], [1], [0, 0, 1, 1], [], []>} : vector<16x48xf32>, vector<48x120xf32>, vector<16x120xf32> -> vector<16x120xf32>
    %95 = arith.addf %87, %94 : vector<16x120xf32>
    %96 = vector.extract_strided_slice %82 {offsets = [0, 20], sizes = [16, 120], strides = [1, 1]} : vector<16x162xf32> to vector<16x120xf32>
    %97 = vector.extract_strided_slice %82 {offsets = [0, 21], sizes = [16, 120], strides = [1, 1]} : vector<16x162xf32> to vector<16x120xf32>
    %98 = vector.extract_strided_slice %82 {offsets = [0, 22], sizes = [16, 120], strides = [1, 1]} : vector<16x162xf32> to vector<16x120xf32>
    %99 = tpu.concatenate %96, %97, %98 in 0 : vector<16x120xf32>, vector<16x120xf32>, vector<16x120xf32> -> vector<48x120xf32>
    %100 = vector.extract_strided_slice %84 {offsets = [1, 0, 0], sizes = [1, 16, 48], strides = [1, 1, 1]} : vector<3x16x48xf32> to vector<1x16x48xf32>
    %101 = vector.shape_cast %100 : vector<1x16x48xf32> to vector<16x48xf32>
    %cst_34 = arith.constant dense<0.000000e+00> : vector<16x120xf32>
    %102 = tpu.matmul %101, %99, %cst_34 {dimension_numbers = #tpu.dot_dimension_numbers<[1], [0], [0], [1], [0, 0, 1, 1], [], []>} : vector<16x48xf32>, vector<48x120xf32>, vector<16x120xf32> -> vector<16x120xf32>
    %103 = arith.addf %95, %102 : vector<16x120xf32>
    %104 = vector.extract_strided_slice %82 {offsets = [0, 40], sizes = [16, 120], strides = [1, 1]} : vector<16x162xf32> to vector<16x120xf32>
    %105 = vector.extract_strided_slice %82 {offsets = [0, 41], sizes = [16, 120], strides = [1, 1]} : vector<16x162xf32> to vector<16x120xf32>
    %106 = vector.extract_strided_slice %82 {offsets = [0, 42], sizes = [16, 120], strides = [1, 1]} : vector<16x162xf32> to vector<16x120xf32>
    %107 = tpu.concatenate %104, %105, %106 in 0 : vector<16x120xf32>, vector<16x120xf32>, vector<16x120xf32> -> vector<48x120xf32>
    %108 = vector.extract_strided_slice %84 {offsets = [2, 0, 0], sizes = [1, 16, 48], strides = [1, 1, 1]} : vector<3x16x48xf32> to vector<1x16x48xf32>
    %109 = vector.shape_cast %108 : vector<1x16x48xf32> to vector<16x48xf32>
    %cst_35 = arith.constant dense<0.000000e+00> : vector<16x120xf32>
    %110 = tpu.matmul %109, %107, %cst_35 {dimension_numbers = #tpu.dot_dimension_numbers<[1], [0], [0], [1], [0, 0, 1, 1], [], []>} : vector<16x48xf32>, vector<48x120xf32>, vector<16x120xf32> -> vector<16x120xf32>
    %111 = arith.addf %103, %110 : vector<16x120xf32>
    %112 = vector.broadcast %86 : vector<16x1xf32> to vector<16x120xf32>
    %113 = arith.addf %111, %112 : vector<16x120xf32>
    %114 = math.tanh %113 : vector<16x120xf32>
    %115 = arith.truncf %114 : vector<16x120xf32> to vector<16x120xbf16>
    %c0_36 = arith.constant 0 : index
    %c0_37 = arith.constant 0 : index
    %116 = vector.load %arg7[%c0_36, %c0_37] : memref<120x162xbf16, #tpu.memory_space<vmem>>, vector<120x162xbf16>
    %cst_38 = arith.constant dense<0.000000e+00> : vector<16x162xf32>
    %117 = tpu.matmul %115, %116, %cst_38 {dimension_numbers = #tpu.dot_dimension_numbers<[1], [0], [0], [1], [0, 0, 1, 1], [], []>} : vector<16x120xbf16>, vector<120x162xbf16>, vector<16x162xf32> -> vector<16x162xf32>
    %c2 = arith.constant 2 : index
    %c0_39 = arith.constant 0 : index
    %c0_40 = arith.constant 0 : index
    %c0_41 = arith.constant 0 : index
    %118 = vector.load %arg3[%c2, %c0_39, %c0_40, %c0_41] : memref<6x3x16x48xf32, #tpu.memory_space<vmem>>, vector<1x3x16x48xf32>
    %119 = vector.shape_cast %118 : vector<1x3x16x48xf32> to vector<3x16x48xf32>
    %c2_42 = arith.constant 2 : index
    %c0_43 = arith.constant 0 : index
    %c0_44 = arith.constant 0 : index
    %120 = vector.load %arg4[%c2_42, %c0_43, %c0_44] : memref<6x16x1xf32, #tpu.memory_space<vmem>>, vector<1x16x1xf32>
    %121 = vector.shape_cast %120 : vector<1x16x1xf32> to vector<16x1xf32>
    %cst_45 = arith.constant 0.000000e+00 : f32
    %122 = vector.broadcast %cst_45 : f32 to vector<16x120xf32>
    %123 = vector.extract_strided_slice %117 {offsets = [0, 0], sizes = [16, 120], strides = [1, 1]} : vector<16x162xf32> to vector<16x120xf32>
    %124 = vector.extract_strided_slice %117 {offsets = [0, 1], sizes = [16, 120], strides = [1, 1]} : vector<16x162xf32> to vector<16x120xf32>
    %125 = vector.extract_strided_slice %117 {offsets = [0, 2], sizes = [16, 120], strides = [1, 1]} : vector<16x162xf32> to vector<16x120xf32>
    %126 = tpu.concatenate %123, %124, %125 in 0 : vector<16x120xf32>, vector<16x120xf32>, vector<16x120xf32> -> vector<48x120xf32>
    %127 = vector.extract_strided_slice %119 {offsets = [0, 0, 0], sizes = [1, 16, 48], strides = [1, 1, 1]} : vector<3x16x48xf32> to vector<1x16x48xf32>
    %128 = vector.shape_cast %127 : vector<1x16x48xf32> to vector<16x48xf32>
    %cst_46 = arith.constant dense<0.000000e+00> : vector<16x120xf32>
    %129 = tpu.matmul %128, %126, %cst_46 {dimension_numbers = #tpu.dot_dimension_numbers<[1], [0], [0], [1], [0, 0, 1, 1], [], []>} : vector<16x48xf32>, vector<48x120xf32>, vector<16x120xf32> -> vector<16x120xf32>
    %130 = arith.addf %122, %129 : vector<16x120xf32>
    %131 = vector.extract_strided_slice %117 {offsets = [0, 20], sizes = [16, 120], strides = [1, 1]} : vector<16x162xf32> to vector<16x120xf32>
    %132 = vector.extract_strided_slice %117 {offsets = [0, 21], sizes = [16, 120], strides = [1, 1]} : vector<16x162xf32> to vector<16x120xf32>
    %133 = vector.extract_strided_slice %117 {offsets = [0, 22], sizes = [16, 120], strides = [1, 1]} : vector<16x162xf32> to vector<16x120xf32>
    %134 = tpu.concatenate %131, %132, %133 in 0 : vector<16x120xf32>, vector<16x120xf32>, vector<16x120xf32> -> vector<48x120xf32>
    %135 = vector.extract_strided_slice %119 {offsets = [1, 0, 0], sizes = [1, 16, 48], strides = [1, 1, 1]} : vector<3x16x48xf32> to vector<1x16x48xf32>
    %136 = vector.shape_cast %135 : vector<1x16x48xf32> to vector<16x48xf32>
    %cst_47 = arith.constant dense<0.000000e+00> : vector<16x120xf32>
    %137 = tpu.matmul %136, %134, %cst_47 {dimension_numbers = #tpu.dot_dimension_numbers<[1], [0], [0], [1], [0, 0, 1, 1], [], []>} : vector<16x48xf32>, vector<48x120xf32>, vector<16x120xf32> -> vector<16x120xf32>
    %138 = arith.addf %130, %137 : vector<16x120xf32>
    %139 = vector.extract_strided_slice %117 {offsets = [0, 40], sizes = [16, 120], strides = [1, 1]} : vector<16x162xf32> to vector<16x120xf32>
    %140 = vector.extract_strided_slice %117 {offsets = [0, 41], sizes = [16, 120], strides = [1, 1]} : vector<16x162xf32> to vector<16x120xf32>
    %141 = vector.extract_strided_slice %117 {offsets = [0, 42], sizes = [16, 120], strides = [1, 1]} : vector<16x162xf32> to vector<16x120xf32>
    %142 = tpu.concatenate %139, %140, %141 in 0 : vector<16x120xf32>, vector<16x120xf32>, vector<16x120xf32> -> vector<48x120xf32>
    %143 = vector.extract_strided_slice %119 {offsets = [2, 0, 0], sizes = [1, 16, 48], strides = [1, 1, 1]} : vector<3x16x48xf32> to vector<1x16x48xf32>
    %144 = vector.shape_cast %143 : vector<1x16x48xf32> to vector<16x48xf32>
    %cst_48 = arith.constant dense<0.000000e+00> : vector<16x120xf32>
    %145 = tpu.matmul %144, %142, %cst_48 {dimension_numbers = #tpu.dot_dimension_numbers<[1], [0], [0], [1], [0, 0, 1, 1], [], []>} : vector<16x48xf32>, vector<48x120xf32>, vector<16x120xf32> -> vector<16x120xf32>
    %146 = arith.addf %138, %145 : vector<16x120xf32>
    %147 = vector.broadcast %121 : vector<16x1xf32> to vector<16x120xf32>
    %148 = arith.addf %146, %147 : vector<16x120xf32>
    %149 = math.tanh %148 : vector<16x120xf32>
    %150 = arith.truncf %149 : vector<16x120xf32> to vector<16x120xbf16>
    %c0_49 = arith.constant 0 : index
    %c0_50 = arith.constant 0 : index
    %151 = vector.load %arg7[%c0_49, %c0_50] : memref<120x162xbf16, #tpu.memory_space<vmem>>, vector<120x162xbf16>
    %cst_51 = arith.constant dense<0.000000e+00> : vector<16x162xf32>
    %152 = tpu.matmul %150, %151, %cst_51 {dimension_numbers = #tpu.dot_dimension_numbers<[1], [0], [0], [1], [0, 0, 1, 1], [], []>} : vector<16x120xbf16>, vector<120x162xbf16>, vector<16x162xf32> -> vector<16x162xf32>
    %153 = arith.addf %152, %82 : vector<16x162xf32>
    %c3 = arith.constant 3 : index
    %c0_52 = arith.constant 0 : index
    %c0_53 = arith.constant 0 : index
    %c0_54 = arith.constant 0 : index
    %154 = vector.load %arg3[%c3, %c0_52, %c0_53, %c0_54] : memref<6x3x16x48xf32, #tpu.memory_space<vmem>>, vector<1x3x16x48xf32>
    %155 = vector.shape_cast %154 : vector<1x3x16x48xf32> to vector<3x16x48xf32>
    %c3_55 = arith.constant 3 : index
    %c0_56 = arith.constant 0 : index
    %c0_57 = arith.constant 0 : index
    %156 = vector.load %arg4[%c3_55, %c0_56, %c0_57] : memref<6x16x1xf32, #tpu.memory_space<vmem>>, vector<1x16x1xf32>
    %157 = vector.shape_cast %156 : vector<1x16x1xf32> to vector<16x1xf32>
    %cst_58 = arith.constant 0.000000e+00 : f32
    %158 = vector.broadcast %cst_58 : f32 to vector<16x120xf32>
    %159 = vector.extract_strided_slice %153 {offsets = [0, 0], sizes = [16, 120], strides = [1, 1]} : vector<16x162xf32> to vector<16x120xf32>
    %160 = vector.extract_strided_slice %153 {offsets = [0, 1], sizes = [16, 120], strides = [1, 1]} : vector<16x162xf32> to vector<16x120xf32>
    %161 = vector.extract_strided_slice %153 {offsets = [0, 2], sizes = [16, 120], strides = [1, 1]} : vector<16x162xf32> to vector<16x120xf32>
    %162 = tpu.concatenate %159, %160, %161 in 0 : vector<16x120xf32>, vector<16x120xf32>, vector<16x120xf32> -> vector<48x120xf32>
    %163 = vector.extract_strided_slice %155 {offsets = [0, 0, 0], sizes = [1, 16, 48], strides = [1, 1, 1]} : vector<3x16x48xf32> to vector<1x16x48xf32>
    %164 = vector.shape_cast %163 : vector<1x16x48xf32> to vector<16x48xf32>
    %cst_59 = arith.constant dense<0.000000e+00> : vector<16x120xf32>
    %165 = tpu.matmul %164, %162, %cst_59 {dimension_numbers = #tpu.dot_dimension_numbers<[1], [0], [0], [1], [0, 0, 1, 1], [], []>} : vector<16x48xf32>, vector<48x120xf32>, vector<16x120xf32> -> vector<16x120xf32>
    %166 = arith.addf %158, %165 : vector<16x120xf32>
    %167 = vector.extract_strided_slice %153 {offsets = [0, 20], sizes = [16, 120], strides = [1, 1]} : vector<16x162xf32> to vector<16x120xf32>
    %168 = vector.extract_strided_slice %153 {offsets = [0, 21], sizes = [16, 120], strides = [1, 1]} : vector<16x162xf32> to vector<16x120xf32>
    %169 = vector.extract_strided_slice %153 {offsets = [0, 22], sizes = [16, 120], strides = [1, 1]} : vector<16x162xf32> to vector<16x120xf32>
    %170 = tpu.concatenate %167, %168, %169 in 0 : vector<16x120xf32>, vector<16x120xf32>, vector<16x120xf32> -> vector<48x120xf32>
    %171 = vector.extract_strided_slice %155 {offsets = [1, 0, 0], sizes = [1, 16, 48], strides = [1, 1, 1]} : vector<3x16x48xf32> to vector<1x16x48xf32>
    %172 = vector.shape_cast %171 : vector<1x16x48xf32> to vector<16x48xf32>
    %cst_60 = arith.constant dense<0.000000e+00> : vector<16x120xf32>
    %173 = tpu.matmul %172, %170, %cst_60 {dimension_numbers = #tpu.dot_dimension_numbers<[1], [0], [0], [1], [0, 0, 1, 1], [], []>} : vector<16x48xf32>, vector<48x120xf32>, vector<16x120xf32> -> vector<16x120xf32>
    %174 = arith.addf %166, %173 : vector<16x120xf32>
    %175 = vector.extract_strided_slice %153 {offsets = [0, 40], sizes = [16, 120], strides = [1, 1]} : vector<16x162xf32> to vector<16x120xf32>
    %176 = vector.extract_strided_slice %153 {offsets = [0, 41], sizes = [16, 120], strides = [1, 1]} : vector<16x162xf32> to vector<16x120xf32>
    %177 = vector.extract_strided_slice %153 {offsets = [0, 42], sizes = [16, 120], strides = [1, 1]} : vector<16x162xf32> to vector<16x120xf32>
    %178 = tpu.concatenate %175, %176, %177 in 0 : vector<16x120xf32>, vector<16x120xf32>, vector<16x120xf32> -> vector<48x120xf32>
    %179 = vector.extract_strided_slice %155 {offsets = [2, 0, 0], sizes = [1, 16, 48], strides = [1, 1, 1]} : vector<3x16x48xf32> to vector<1x16x48xf32>
    %180 = vector.shape_cast %179 : vector<1x16x48xf32> to vector<16x48xf32>
    %cst_61 = arith.constant dense<0.000000e+00> : vector<16x120xf32>
    %181 = tpu.matmul %180, %178, %cst_61 {dimension_numbers = #tpu.dot_dimension_numbers<[1], [0], [0], [1], [0, 0, 1, 1], [], []>} : vector<16x48xf32>, vector<48x120xf32>, vector<16x120xf32> -> vector<16x120xf32>
    %182 = arith.addf %174, %181 : vector<16x120xf32>
    %183 = vector.broadcast %157 : vector<16x1xf32> to vector<16x120xf32>
    %184 = arith.addf %182, %183 : vector<16x120xf32>
    %185 = math.tanh %184 : vector<16x120xf32>
    %186 = vector.extract_strided_slice %185 {offsets = [0, 0], sizes = [16, 99], strides = [1, 1]} : vector<16x120xf32> to vector<16x99xf32>
    %187 = vector.extract_strided_slice %185 {offsets = [0, 1], sizes = [16, 99], strides = [1, 1]} : vector<16x120xf32> to vector<16x99xf32>
    %188 = arith.maximumf %186, %187 : vector<16x99xf32>
    %189 = vector.extract_strided_slice %185 {offsets = [0, 20], sizes = [16, 99], strides = [1, 1]} : vector<16x120xf32> to vector<16x99xf32>
    %190 = vector.extract_strided_slice %185 {offsets = [0, 21], sizes = [16, 99], strides = [1, 1]} : vector<16x120xf32> to vector<16x99xf32>
    %191 = arith.maximumf %189, %190 : vector<16x99xf32>
    %192 = arith.maximumf %188, %191 : vector<16x99xf32>
    %193 = arith.truncf %192 : vector<16x99xf32> to vector<16x99xbf16>
    %c0_62 = arith.constant 0 : index
    %c0_63 = arith.constant 0 : index
    %194 = vector.load %arg8[%c0_62, %c0_63] : memref<99x57xbf16, #tpu.memory_space<vmem>>, vector<99x57xbf16>
    %cst_64 = arith.constant dense<0.000000e+00> : vector<16x57xf32>
    %195 = tpu.matmul %193, %194, %cst_64 {dimension_numbers = #tpu.dot_dimension_numbers<[1], [0], [0], [1], [0, 0, 1, 1], [], []>} : vector<16x99xbf16>, vector<99x57xbf16>, vector<16x57xf32> -> vector<16x57xf32>
    %c4 = arith.constant 4 : index
    %c0_65 = arith.constant 0 : index
    %c0_66 = arith.constant 0 : index
    %c0_67 = arith.constant 0 : index
    %196 = vector.load %arg3[%c4, %c0_65, %c0_66, %c0_67] : memref<6x3x16x48xf32, #tpu.memory_space<vmem>>, vector<1x3x16x48xf32>
    %197 = vector.shape_cast %196 : vector<1x3x16x48xf32> to vector<3x16x48xf32>
    %c4_68 = arith.constant 4 : index
    %c0_69 = arith.constant 0 : index
    %c0_70 = arith.constant 0 : index
    %198 = vector.load %arg4[%c4_68, %c0_69, %c0_70] : memref<6x16x1xf32, #tpu.memory_space<vmem>>, vector<1x16x1xf32>
    %199 = vector.shape_cast %198 : vector<1x16x1xf32> to vector<16x1xf32>
    %cst_71 = arith.constant 0.000000e+00 : f32
    %200 = vector.broadcast %cst_71 : f32 to vector<16x33xf32>
    %201 = vector.extract_strided_slice %195 {offsets = [0, 0], sizes = [16, 33], strides = [1, 1]} : vector<16x57xf32> to vector<16x33xf32>
    %202 = vector.extract_strided_slice %195 {offsets = [0, 1], sizes = [16, 33], strides = [1, 1]} : vector<16x57xf32> to vector<16x33xf32>
    %203 = vector.extract_strided_slice %195 {offsets = [0, 2], sizes = [16, 33], strides = [1, 1]} : vector<16x57xf32> to vector<16x33xf32>
    %204 = tpu.concatenate %201, %202, %203 in 0 : vector<16x33xf32>, vector<16x33xf32>, vector<16x33xf32> -> vector<48x33xf32>
    %205 = vector.extract_strided_slice %197 {offsets = [0, 0, 0], sizes = [1, 16, 48], strides = [1, 1, 1]} : vector<3x16x48xf32> to vector<1x16x48xf32>
    %206 = vector.shape_cast %205 : vector<1x16x48xf32> to vector<16x48xf32>
    %cst_72 = arith.constant dense<0.000000e+00> : vector<16x33xf32>
    %207 = tpu.matmul %206, %204, %cst_72 {dimension_numbers = #tpu.dot_dimension_numbers<[1], [0], [0], [1], [0, 0, 1, 1], [], []>} : vector<16x48xf32>, vector<48x33xf32>, vector<16x33xf32> -> vector<16x33xf32>
    %208 = arith.addf %200, %207 : vector<16x33xf32>
    %209 = vector.extract_strided_slice %195 {offsets = [0, 11], sizes = [16, 33], strides = [1, 1]} : vector<16x57xf32> to vector<16x33xf32>
    %210 = vector.extract_strided_slice %195 {offsets = [0, 12], sizes = [16, 33], strides = [1, 1]} : vector<16x57xf32> to vector<16x33xf32>
    %211 = vector.extract_strided_slice %195 {offsets = [0, 13], sizes = [16, 33], strides = [1, 1]} : vector<16x57xf32> to vector<16x33xf32>
    %212 = tpu.concatenate %209, %210, %211 in 0 : vector<16x33xf32>, vector<16x33xf32>, vector<16x33xf32> -> vector<48x33xf32>
    %213 = vector.extract_strided_slice %197 {offsets = [1, 0, 0], sizes = [1, 16, 48], strides = [1, 1, 1]} : vector<3x16x48xf32> to vector<1x16x48xf32>
    %214 = vector.shape_cast %213 : vector<1x16x48xf32> to vector<16x48xf32>
    %cst_73 = arith.constant dense<0.000000e+00> : vector<16x33xf32>
    %215 = tpu.matmul %214, %212, %cst_73 {dimension_numbers = #tpu.dot_dimension_numbers<[1], [0], [0], [1], [0, 0, 1, 1], [], []>} : vector<16x48xf32>, vector<48x33xf32>, vector<16x33xf32> -> vector<16x33xf32>
    %216 = arith.addf %208, %215 : vector<16x33xf32>
    %217 = vector.extract_strided_slice %195 {offsets = [0, 22], sizes = [16, 33], strides = [1, 1]} : vector<16x57xf32> to vector<16x33xf32>
    %218 = vector.extract_strided_slice %195 {offsets = [0, 23], sizes = [16, 33], strides = [1, 1]} : vector<16x57xf32> to vector<16x33xf32>
    %219 = vector.extract_strided_slice %195 {offsets = [0, 24], sizes = [16, 33], strides = [1, 1]} : vector<16x57xf32> to vector<16x33xf32>
    %220 = tpu.concatenate %217, %218, %219 in 0 : vector<16x33xf32>, vector<16x33xf32>, vector<16x33xf32> -> vector<48x33xf32>
    %221 = vector.extract_strided_slice %197 {offsets = [2, 0, 0], sizes = [1, 16, 48], strides = [1, 1, 1]} : vector<3x16x48xf32> to vector<1x16x48xf32>
    %222 = vector.shape_cast %221 : vector<1x16x48xf32> to vector<16x48xf32>
    %cst_74 = arith.constant dense<0.000000e+00> : vector<16x33xf32>
    %223 = tpu.matmul %222, %220, %cst_74 {dimension_numbers = #tpu.dot_dimension_numbers<[1], [0], [0], [1], [0, 0, 1, 1], [], []>} : vector<16x48xf32>, vector<48x33xf32>, vector<16x33xf32> -> vector<16x33xf32>
    %224 = arith.addf %216, %223 : vector<16x33xf32>
    %225 = vector.broadcast %199 : vector<16x1xf32> to vector<16x33xf32>
    %226 = arith.addf %224, %225 : vector<16x33xf32>
    %227 = math.tanh %226 : vector<16x33xf32>
    %228 = arith.truncf %227 : vector<16x33xf32> to vector<16x33xbf16>
    %c0_75 = arith.constant 0 : index
    %c0_76 = arith.constant 0 : index
    %229 = vector.load %arg9[%c0_75, %c0_76] : memref<33x57xbf16, #tpu.memory_space<vmem>>, vector<33x57xbf16>
    %cst_77 = arith.constant dense<0.000000e+00> : vector<16x57xf32>
    %230 = tpu.matmul %228, %229, %cst_77 {dimension_numbers = #tpu.dot_dimension_numbers<[1], [0], [0], [1], [0, 0, 1, 1], [], []>} : vector<16x33xbf16>, vector<33x57xbf16>, vector<16x57xf32> -> vector<16x57xf32>
    %c5 = arith.constant 5 : index
    %c0_78 = arith.constant 0 : index
    %c0_79 = arith.constant 0 : index
    %c0_80 = arith.constant 0 : index
    %231 = vector.load %arg3[%c5, %c0_78, %c0_79, %c0_80] : memref<6x3x16x48xf32, #tpu.memory_space<vmem>>, vector<1x3x16x48xf32>
    %232 = vector.shape_cast %231 : vector<1x3x16x48xf32> to vector<3x16x48xf32>
    %c5_81 = arith.constant 5 : index
    %c0_82 = arith.constant 0 : index
    %c0_83 = arith.constant 0 : index
    %233 = vector.load %arg4[%c5_81, %c0_82, %c0_83] : memref<6x16x1xf32, #tpu.memory_space<vmem>>, vector<1x16x1xf32>
    %234 = vector.shape_cast %233 : vector<1x16x1xf32> to vector<16x1xf32>
    %cst_84 = arith.constant 0.000000e+00 : f32
    %235 = vector.broadcast %cst_84 : f32 to vector<16x33xf32>
    %236 = vector.extract_strided_slice %230 {offsets = [0, 0], sizes = [16, 33], strides = [1, 1]} : vector<16x57xf32> to vector<16x33xf32>
    %237 = vector.extract_strided_slice %230 {offsets = [0, 1], sizes = [16, 33], strides = [1, 1]} : vector<16x57xf32> to vector<16x33xf32>
    %238 = vector.extract_strided_slice %230 {offsets = [0, 2], sizes = [16, 33], strides = [1, 1]} : vector<16x57xf32> to vector<16x33xf32>
    %239 = tpu.concatenate %236, %237, %238 in 0 : vector<16x33xf32>, vector<16x33xf32>, vector<16x33xf32> -> vector<48x33xf32>
    %240 = vector.extract_strided_slice %232 {offsets = [0, 0, 0], sizes = [1, 16, 48], strides = [1, 1, 1]} : vector<3x16x48xf32> to vector<1x16x48xf32>
    %241 = vector.shape_cast %240 : vector<1x16x48xf32> to vector<16x48xf32>
    %cst_85 = arith.constant dense<0.000000e+00> : vector<16x33xf32>
    %242 = tpu.matmul %241, %239, %cst_85 {dimension_numbers = #tpu.dot_dimension_numbers<[1], [0], [0], [1], [0, 0, 1, 1], [], []>} : vector<16x48xf32>, vector<48x33xf32>, vector<16x33xf32> -> vector<16x33xf32>
    %243 = arith.addf %235, %242 : vector<16x33xf32>
    %244 = vector.extract_strided_slice %230 {offsets = [0, 11], sizes = [16, 33], strides = [1, 1]} : vector<16x57xf32> to vector<16x33xf32>
    %245 = vector.extract_strided_slice %230 {offsets = [0, 12], sizes = [16, 33], strides = [1, 1]} : vector<16x57xf32> to vector<16x33xf32>
    %246 = vector.extract_strided_slice %230 {offsets = [0, 13], sizes = [16, 33], strides = [1, 1]} : vector<16x57xf32> to vector<16x33xf32>
    %247 = tpu.concatenate %244, %245, %246 in 0 : vector<16x33xf32>, vector<16x33xf32>, vector<16x33xf32> -> vector<48x33xf32>
    %248 = vector.extract_strided_slice %232 {offsets = [1, 0, 0], sizes = [1, 16, 48], strides = [1, 1, 1]} : vector<3x16x48xf32> to vector<1x16x48xf32>
    %249 = vector.shape_cast %248 : vector<1x16x48xf32> to vector<16x48xf32>
    %cst_86 = arith.constant dense<0.000000e+00> : vector<16x33xf32>
    %250 = tpu.matmul %249, %247, %cst_86 {dimension_numbers = #tpu.dot_dimension_numbers<[1], [0], [0], [1], [0, 0, 1, 1], [], []>} : vector<16x48xf32>, vector<48x33xf32>, vector<16x33xf32> -> vector<16x33xf32>
    %251 = arith.addf %243, %250 : vector<16x33xf32>
    %252 = vector.extract_strided_slice %230 {offsets = [0, 22], sizes = [16, 33], strides = [1, 1]} : vector<16x57xf32> to vector<16x33xf32>
    %253 = vector.extract_strided_slice %230 {offsets = [0, 23], sizes = [16, 33], strides = [1, 1]} : vector<16x57xf32> to vector<16x33xf32>
    %254 = vector.extract_strided_slice %230 {offsets = [0, 24], sizes = [16, 33], strides = [1, 1]} : vector<16x57xf32> to vector<16x33xf32>
    %255 = tpu.concatenate %252, %253, %254 in 0 : vector<16x33xf32>, vector<16x33xf32>, vector<16x33xf32> -> vector<48x33xf32>
    %256 = vector.extract_strided_slice %232 {offsets = [2, 0, 0], sizes = [1, 16, 48], strides = [1, 1, 1]} : vector<3x16x48xf32> to vector<1x16x48xf32>
    %257 = vector.shape_cast %256 : vector<1x16x48xf32> to vector<16x48xf32>
    %cst_87 = arith.constant dense<0.000000e+00> : vector<16x33xf32>
    %258 = tpu.matmul %257, %255, %cst_87 {dimension_numbers = #tpu.dot_dimension_numbers<[1], [0], [0], [1], [0, 0, 1, 1], [], []>} : vector<16x48xf32>, vector<48x33xf32>, vector<16x33xf32> -> vector<16x33xf32>
    %259 = arith.addf %251, %258 : vector<16x33xf32>
    %260 = vector.broadcast %234 : vector<16x1xf32> to vector<16x33xf32>
    %261 = arith.addf %259, %260 : vector<16x33xf32>
    %262 = math.tanh %261 : vector<16x33xf32>
    %263 = arith.truncf %262 : vector<16x33xf32> to vector<16x33xbf16>
    %c0_88 = arith.constant 0 : index
    %c0_89 = arith.constant 0 : index
    %264 = vector.load %arg9[%c0_88, %c0_89] : memref<33x57xbf16, #tpu.memory_space<vmem>>, vector<33x57xbf16>
    %cst_90 = arith.constant dense<0.000000e+00> : vector<16x57xf32>
    %265 = tpu.matmul %263, %264, %cst_90 {dimension_numbers = #tpu.dot_dimension_numbers<[1], [0], [0], [1], [0, 0, 1, 1], [], []>} : vector<16x33xbf16>, vector<33x57xbf16>, vector<16x57xf32> -> vector<16x57xf32>
    %266 = arith.addf %265, %195 : vector<16x57xf32>
    %c0_91 = arith.constant 0 : index
    %c0_92 = arith.constant 0 : index
    %267 = vector.load %arg10[%c0_91, %c0_92] : memref<8x57xf32, #tpu.memory_space<vmem>>, vector<8x57xf32>
    %268 = vector.extract_strided_slice %266 {offsets = [0, 0], sizes = [8, 57], strides = [1, 1]} : vector<16x57xf32> to vector<8x57xf32>
    %269 = arith.mulf %268, %267 : vector<8x57xf32>
    %cst_93 = arith.constant dense<0.000000e+00> : vector<8xf32>
    %270 = vector.multi_reduction <add>, %269, %cst_93 [1] : vector<8x57xf32> to vector<8xf32>
    %271 = vector.shape_cast %270 : vector<8xf32> to vector<8x1xf32>
    %cst_94 = arith.constant dense<0.000000e+00> : vector<1xf32>
    %272 = vector.multi_reduction <add>, %271, %cst_94 [0] : vector<8x1xf32> to vector<1xf32>
    %273 = vector.shape_cast %272 : vector<1xf32> to vector<1x1xf32>
    %274 = vector.extract_strided_slice %266 {offsets = [8, 0], sizes = [8, 57], strides = [1, 1]} : vector<16x57xf32> to vector<8x57xf32>
    %275 = arith.mulf %274, %267 : vector<8x57xf32>
    %cst_95 = arith.constant dense<0.000000e+00> : vector<8xf32>
    %276 = vector.multi_reduction <add>, %275, %cst_95 [1] : vector<8x57xf32> to vector<8xf32>
    %277 = vector.shape_cast %276 : vector<8xf32> to vector<8x1xf32>
    %cst_96 = arith.constant dense<0.000000e+00> : vector<1xf32>
    %278 = vector.multi_reduction <add>, %277, %cst_96 [0] : vector<8x1xf32> to vector<1xf32>
    %279 = vector.shape_cast %278 : vector<1xf32> to vector<1x1xf32>
    %280 = tpu.concatenate %273, %279 in 1 : vector<1x1xf32>, vector<1x1xf32> -> vector<1x2xf32>
    %c0_97 = arith.constant 0 : index
    %c0_98 = arith.constant 0 : index
    %281 = vector.load %arg11[%c0_97, %c0_98] : memref<1x1xf32, #tpu.memory_space<vmem>>, vector<1x1xf32>
    %282 = vector.broadcast %281 : vector<1x1xf32> to vector<1x2xf32>
    %283 = arith.addf %280, %282 : vector<1x2xf32>
    %c0_99 = arith.constant 0 : index
    %c0_100 = arith.constant 0 : index
    %284 = vector.load %arg12[%c0_99, %c0_100] : memref<1x2xf32, #tpu.memory_space<vmem>>, vector<1x2xf32>
    tpu.vector_store %arg12[%c0_99, %c0_100], %283 {strides = array<i32>} : memref<1x2xf32, #tpu.memory_space<vmem>>, vector<1x2xf32>,
    return
  }
}

</mosaic_0001>

<bundles_post_ra>
// kernel: res_cnn_forward.1
= control target key start
LH: loop header
LB: loop body
LE: loop exit
PB: predicated region body
PF: predicated region fallthrough
CT: control target
= control target key end

     0   :  { %s20733_s0 = inlined_call_operand.vmem [shape: f32[16,1926], index: 0, kind: input, shape index: {}]   ;;  %s20734_s1 = inlined_call_operand.vmem [shape: f32[3,16,48], index: 1, kind: input, shape index: {}]   ;;  %s20735_s2 = inlined_call_operand.vmem [shape: f32[16,1], index: 2, kind: input, shape index: {}]   ;;  %s20736_s3 = inlined_call_operand.vmem [shape: f32[6,3,16,48], index: 3, kind: input, shape index: {}]   ;;  %s20737_s4 = inlined_call_operand.vmem [shape: f32[6,16,1], index: 4, kind: input, shape index: {}]   ;;  %s20738_s5 = inlined_call_operand.vmem [shape: bf16[1701,534], index: 5, kind: input, shape index: {}]   ;;  %s20739_s6 = inlined_call_operand.vmem [shape: bf16[417,162], index: 6, kind: input, shape index: {}]   ;;  %s20740_s7 = inlined_call_operand.vmem [shape: bf16[120,162], index: 7, kind: input, shape index: {}]   ;;  %s20741_s8 = inlined_call_operand.vmem [shape: bf16[99,57], index: 8, kind: input, shape index: {}]   ;;  %s20742_s9 = inlined_call_operand.vmem [shape: bf16[33,57], index: 9, kind: input, shape index: {}]   ;;  %s20743_s10 = inlined_call_operand.vmem [shape: f32[8,57], index: 10, kind: input, shape index: {}]   ;;  %s20744_s11 = inlined_call_operand.<no memory space> [shape: f32[1,1], index: 11, kind: input, shape index: {}]   ;;  %s20745_s12 = inlined_call_operand.hbm [shape: f32[1,2], index: 12, kind: output, shape index: {}]  }
   0x1   :  { %v17_v0 = vstv %s20744_s11 }
   0x2   :  { %18 = vst [vmem:[#allocation2] sm:$0x1] %v17_v0 }
   0x3   :  { %v15360_v1 = vld [vmem:[%s20733_s0 + $0x90] sm:$0xff]  ;;  %v15365_v2 = vld [vmem:[%s20733_s0 + $0x98] sm:$0xff]  ;;  %v46_v3 = vld [vmem:[%s20733_s0 + $0x8] sm:$0xff]  ;;  %s15275_s20 = smov 127   ;;  %s15276_s25 = smov 126   ;;  %vm169_vm0 = vcmask 1039360  }
   0x4   :  { %v12952_v4 = vpack.i.bf16 %v15365_v2, %v15360_v1  ;;  %v47_v5 = vld [vmem:[%s20733_s0 + $0x10] sm:$0xff]  ;;  %v15378_v6 = vld [vmem:[%s20733_s0 + $0x18] sm:$0xff]  ;;  %v15383_v7 = vld [vmem:[%s20733_s0 + $0x88] sm:$0xff]  ;;  %s15277_s13 = smov 54   ;;  %vm280_vm1 = vcmask 1031168   ;;  %vm529_vm2 = vcmask 441344  }
   0x5   :  { %v15385_v8 = vpack.i.bf16 %v47_v5, %v46_v3  ;;  %v45_v9 = vld [vmem:[%s20733_s0] sm:$0xff]  ;;  %v12947_v12 = vpack.i.bf16 %v15383_v7, %v15378_v6  ;;  %v52_v13 = vld [vmem:[%s20733_s0 + $0x38] sm:$0xff]  ;;  %v15409_v14 = vld [vmem:[%s20733_s0 + $0xa8] sm:$0xff]  ;;  %v13097_v46 = vpack.i.bf16 %v15360_v1, %v15383_v7  ;;  %s15280_s23 = smov 108   ;;  %vm698_vm3 = vcmask 392192  }
   0x6   :  { %v61_v10 = vld [vmem:[%s20733_s0 + $0x80] sm:$0xff]  ;;  %12953 = vrot.lane.b32.xlu1 %v12952_v4, %s15275_s20  ;;  %v50_v15 = vld [vmem:[%s20733_s0 + $0x28] sm:$0xff]  ;;  %v51_v16 = vld [vmem:[%s20733_s0 + $0x30] sm:$0xff]  ;;  %v12987_v19 = vpack.i.bf16 %v15409_v14, %v52_v13 }
   0x7   :  { %v15394_v11 = vpack.i.bf16 %v61_v10, %v45_v9  ;;  %12943 = vrot.lane.b32.xlu0 %v15385_v8, %s15275_s20  ;;  %v49_v17 = vld [vmem:[%s20733_s0 + $0x20] sm:$0xff]  ;;  %v67_v20 = vld [vmem:[%s20733_s0 + $0xb0] sm:$0xff]  ;;  %v68_v21 = vld [vmem:[%s20733_s0 + $0xb8] sm:$0xff]  ;;  %v12982_v22 = vpack.i.bf16 %v51_v16, %v50_v15 }
   0x8   :  { %v65_v18 = vld [vmem:[%s20733_s0 + $0xa0] sm:$0xff]  ;;  %v12992_v24 = vpack.i.bf16 %v68_v21, %v67_v20  ;;  %v56_v25 = vld [vmem:[%s20733_s0 + $0x58] sm:$0xff]  ;;  %v70_v26 = vld [vmem:[%s20733_s0 + $0xc8] sm:$0xff]  ;;  %v13112_v47 = vpack.i.bf16 %v67_v20, %v15409_v14 }
   0x9   :  { %v12997_v23 = vpack.i.bf16 %v65_v18, %v49_v17  ;;  %v54_v27 = vld [vmem:[%s20733_s0 + $0x48] sm:$0xff]  ;;  %v55_v28 = vld [vmem:[%s20733_s0 + $0x50] sm:$0xff]  ;;  %v53_v29 = vld [vmem:[%s20733_s0 + $0x40] sm:$0xff]  ;;  %v13027_v31 = vpack.i.bf16 %v70_v26, %v56_v25 }
   0xa   :  { %12958 = vrot.lane.b32.xlu1 %v15394_v11, %s15275_s20  ;;  %v69_v30 = vld [vmem:[%s20733_s0 + $0xc0] sm:$0xff]  ;;  %v71_v32 = vld [vmem:[%s20733_s0 + $0xd0] sm:$0xff]  ;;  %v72_v33 = vld [vmem:[%s20733_s0 + $0xd8] sm:$0xff]  ;;  %v13022_v34 = vpack.i.bf16 %v55_v28, %v54_v27  ;;  %v13127_v48 = vpack.i.bf16 %v15365_v2, %v55_v28  ;;  %v13122_v49 = vpack.i.bf16 %v54_v27, %v15378_v6 }
   0xb   :  { %12948 = vrot.lane.b32.xlu0 %v12947_v12, %s15275_s20  ;;  %v13037_v35 = vpack.i.bf16 %v69_v30, %v53_v29  ;;  %v13032_v36 = vpack.i.bf16 %v72_v33, %v71_v32  ;;  %v59_v37 = vld [vmem:[%s20733_s0 + $0x70] sm:$0xff]  ;;  %v58_v39 = vld [vmem:[%s20733_s0 + $0x68] sm:$0xff]  ;;  %v57_v42 = vld [vmem:[%s20733_s0 + $0x60] sm:$0xff]  ;;  %v13132_v50 = vpack.i.bf16 %v71_v32, %v70_v26 }
   0xc   :  { %v75_v38 = vld [vmem:[%s20733_s0 + $0xf0] sm:$0xff]  ;;  %v74_v40 = vld [vmem:[%s20733_s0 + $0xe8] sm:$0xff]  ;;  %v73_v43 = vld [vmem:[%s20733_s0 + $0xe0] sm:$0xff] }
   0xd   :  { %v13067_v41 = vpack.i.bf16 %v75_v38, %v59_v37  ;;  %v13062_v44 = vpack.i.bf16 %v74_v40, %v58_v39  ;;  %v13072_v45 = vpack.i.bf16 %v73_v43, %v57_v42 }
   0xe   :  { %12968 = vrot.lane.b32.xlu1 %v12947_v12, %s15276_s25 }
   0xf   :  { %12963 = vrot.lane.b32.xlu0 %v15385_v8, %s15276_s25 }
  0x12   :  { %12978 = vrot.lane.b32.xlu1 %v15394_v11, %s15276_s25 }
  0x13   :  { %12973 = vrot.lane.b32.xlu0 %v12952_v4, %s15276_s25 }
  0x16   :  { %12988 = vrot.lane.b32.xlu1 %v12987_v19, %s15275_s20 }
  0x17   :  { %12983 = vrot.lane.b32.xlu0 %v12982_v22, %s15275_s20 }
  0x1a   :  { %12998 = vrot.lane.b32.xlu1 %v12997_v23, %s15275_s20 }
  0x1b   :  { %12993 = vrot.lane.b32.xlu0 %v12992_v24, %s15275_s20 }
  0x1e   :  { %13008 = vrot.lane.b32.xlu1 %v12987_v19, %s15276_s25 }
  0x1f   :  { %13003 = vrot.lane.b32.xlu0 %v12982_v22, %s15276_s25 }
  0x22   :  { %13018 = vrot.lane.b32.xlu1 %v12997_v23, %s15276_s25 }
  0x23   :  { %13013 = vrot.lane.b32.xlu0 %v12992_v24, %s15276_s25 }
  0x26   :  { %13028 = vrot.lane.b32.xlu1 %v13027_v31, %s15275_s20 }
  0x27   :  { %13023 = vrot.lane.b32.xlu0 %v13022_v34, %s15275_s20 }
  0x2a   :  { %13038 = vrot.lane.b32.xlu1 %v13037_v35, %s15275_s20 }
  0x2b   :  { %13033 = vrot.lane.b32.xlu0 %v13032_v36, %s15275_s20 }
  0x2e   :  { %13048 = vrot.lane.b32.xlu1 %v13027_v31, %s15276_s25 }
  0x2f   :  { %13043 = vrot.lane.b32.xlu0 %v13022_v34, %s15276_s25 }
  0x32   :  { %13058 = vrot.lane.b32.xlu1 %v13037_v35, %s15276_s25 }
  0x33   :  { %13053 = vrot.lane.b32.xlu0 %v13032_v36, %s15276_s25 }
  0x36   :  { %13068 = vrot.lane.b32.xlu1 %v13067_v41, %s15275_s20 }
  0x37   :  { %13063 = vrot.lane.b32.xlu0 %v13062_v44, %s15275_s20 }
  0x3a   :  { %13078 = vrot.lane.b32.xlu1 %v13062_v44, %s15276_s25 }
  0x3b   :  { %13073 = vrot.lane.b32.xlu0 %v13072_v45, %s15275_s20 }
  0x3e   :  { %13088 = vrot.lane.b32.xlu1 %v13072_v45, %s15276_s25  ;;  %v20748_v45 = vmov 0.0  }
  0x3f   :  { %13083 = vrot.lane.b32.xlu0 %v13067_v41, %s15276_s25  ;;  %769 = vmatprep.mubr.f32.mxu0 %v20748_v45 }
  0x40   :  { %846 = vmatprep.mubr.f32.mxu1 %v20748_v45 }
  0x42   :  { %13098 = vrot.lane.b32.xlu1 %v13097_v46, %s15277_s13 }
  0x43   :  { %13093 = vrot.lane.b32.xlu0 %v15385_v8, %s15277_s13 }
  0x46   :  { %13108 = vrot.lane.b32.xlu1 %v12982_v22, %s15277_s13 }
  0x47   :  { %13103 = vrot.lane.b32.xlu0 %v15394_v11, %s15277_s13 }
  0x4a   :  { %13118 = vrot.lane.b32.xlu1 %v12997_v23, %s15277_s13 }
  0x4b   :  { %13113 = vrot.lane.b32.xlu0 %v13112_v47, %s15277_s13 }
  0x4e   :  { %13128 = vrot.lane.b32.xlu1 %v13127_v48, %s15277_s13 }
  0x4f   :  { %13123 = vrot.lane.b32.xlu0 %v13122_v49, %s15277_s13 }
  0x52   :  { %13138 = vrot.lane.b32.xlu1 %v13037_v35, %s15277_s13 }
  0x53   :  { %13133 = vrot.lane.b32.xlu0 %v13132_v50, %s15277_s13 }
  0x78   :  { %v15517_v51 = vpop.permute.xlu1 %12953 }
  0x79   :  { %v12944_v52 = vpop.permute.xlu0 %12943  ;;  %v12956_v53 = vunpack.i.h.bf16 %v15517_v51  ;;  %v12955_v54 = vunpack.i.l.bf16 %v15517_v51 }
  0x7a   :  { %v12946_v55 = vunpack.i.h.bf16 %v12944_v52  ;;  %v12945_v56 = vunpack.i.l.bf16 %v12944_v52 }
  0x7b   :  { %v15528_v63 = vsel %vm169_vm0, %v12955_v54, %v12956_v53 }
  0x7c   :  { %v12959_v57 = vpop.permute.xlu1 %12958  ;;  %20830 = vst [vmem:[#allocation6_spill] sm:$0xff] %v15528_v63  ;;  %v15539_v3 = vsel %vm169_vm0, %v12945_v56, %v12946_v55 }
  0x7d   :  { %v15521_v58 = vpop.permute.xlu0 %12948  ;;  %v12961_v59 = vunpack.i.h.bf16 %v12959_v57  ;;  %v12960_v60 = vunpack.i.l.bf16 %v12959_v57 }
  0x7e   :  { %v12951_v61 = vunpack.i.h.bf16 %v15521_v58  ;;  %v12950_v62 = vunpack.i.l.bf16 %v15521_v58 }
  0x7f   :  { %v15531_v0 = vsel %vm169_vm0, %v12960_v60, %v12945_v56 }
  0x80   :  { %20831 = vst [vmem:[#allocation7_spill] sm:$0xff] %v15531_v0  ;;  %v15533_v1 = vpop.permute.xlu1 %12968  ;;  %v15536_v2 = vsel %vm169_vm0, %v12951_v61, %v12955_v54  ;;  %v15544_v4 = vsel %vm169_vm0, %v12946_v55, %v12950_v62  ;;  %v15547_v5 = vsel %vm169_vm0, %v12961_v59, %v12951_v61 }
  0x81   :  { %20832 = vst [vmem:[#allocation8_spill] sm:$0xff] %v15544_v4  ;;  %20833 = vst [vmem:[#allocation9_spill] sm:$0xff] %v15547_v5  ;;  %v12964_v6 = vpop.permute.xlu0 %12963  ;;  %v12970_v7 = vunpack.i.l.bf16 %v15533_v1  ;;  %v13147_v8 = vpack.i.bf16 %v15528_v63, %v15536_v2  ;;  %v13142_v9 = vpack.i.bf16 %v15544_v4, %v15539_v3  ;;  %v12971_v13 = vunpack.i.h.bf16 %v15533_v1 }
  0x82   :  { %v12966_v10 = vunpack.i.h.bf16 %v12964_v6  ;;  %v12965_v11 = vunpack.i.l.bf16 %v12964_v6  ;;  %v13152_v24 = vpack.i.bf16 %v15547_v5, %v15531_v0 }
  0x83   :  { %13148 = vrot.lane.b32.xlu0 %v13147_v8, %s15277_s13  ;;  %13143 = vrot.lane.b32.xlu1 %v13142_v9, %s15277_s13 }
  0x84   :  { %v12979_v15 = vpop.permute.xlu1 %12978  ;;  %v15562_v16 = vsel %vm280_vm1, %v12965_v11, %v12966_v10  ;;  %v15567_v17 = vsel %vm280_vm1, %v12966_v10, %v12970_v7  ;;  %v15204_v10 = vld [vmem:[%s20733_s0 + $0x70] sm:$0xff] }
  0x85   :  { %20834 = vst [vmem:[#allocation10_spill] sm:$0xff] %v15567_v17  ;;  %v15573_v20 = vpop.permute.xlu0 %12973  ;;  %v12981_v21 = vunpack.i.h.bf16 %v12979_v15  ;;  %v12980_v22 = vunpack.i.l.bf16 %v12979_v15  ;;  %v13157_v23 = vpack.i.bf16 %v15567_v17, %v15562_v16  ;;  %v15871_v15 = vld [vmem:[%s20733_s0 + $0xb8] sm:$0xff] }
  0x86   :  { %v12976_v25 = vunpack.i.h.bf16 %v15573_v20  ;;  %v12975_v26 = vunpack.i.l.bf16 %v15573_v20 }
  0x87   :  { %13158 = vrot.lane.b32.xlu0 %v13157_v23, %s15277_s13  ;;  %13153 = vrot.lane.b32.xlu1 %v13152_v24, %s15277_s13  ;;  %v15584_v27 = vsel %vm280_vm1, %v12980_v22, %v12965_v11  ;;  %v15587_v28 = vsel %vm280_vm1, %v12981_v21, %v12971_v13  ;;  %v20746_v24 = vmov 0  }
  0x88   :  { %20835 = vst [vmem:[#allocation11_spill] sm:$0xff] %v15584_v27  ;;  %20836 = vst [vmem:[#allocation12_spill] sm:$0xff] %v15587_v28  ;;  %v15589_v29 = vpop.permute.xlu1 %12988  ;;  %v13167_v30 = vpack.i.bf16 %v15587_v28, %v15584_v27  ;;  %v15596_v32 = vsel %vm280_vm1, %v12971_v13, %v12975_v26  ;;  %v15601_v33 = vsel %vm280_vm1, %v12975_v26, %v12976_v25  ;;  %13483 = vset.pattern.permute.xlu1 %v20746_v24 }
  0x89   :  { %20837 = vst [vmem:[#allocation13_spill] sm:$0xff] %v15601_v33  ;;  %v12984_v34 = vpop.permute.xlu0 %12983  ;;  %v12990_v35 = vunpack.i.l.bf16 %v15589_v29  ;;  %v13162_v36 = vpack.i.bf16 %v15601_v33, %v15596_v32  ;;  %v12991_v46 = vunpack.i.h.bf16 %v15589_v29  ;;  %13482 = vset.pattern.permute.xlu0 %v20746_v24 }
  0x8a   :  { %v12986_v38 = vunpack.i.h.bf16 %v12984_v34  ;;  %v12985_v39 = vunpack.i.l.bf16 %v12984_v34 }
  0x8b   :  { %13168 = vrot.lane.b32.xlu0 %v13167_v30, %s15277_s13  ;;  %13163 = vrot.lane.b32.xlu1 %v13162_v36, %s15277_s13 }
  0x8c   :  { %v12999_v42 = vpop.permute.xlu1 %12998  ;;  %v15615_v43 = vsel %vm169_vm0, %v12985_v39, %v12986_v38  ;;  %v15620_v44 = vsel %vm169_vm0, %v12986_v38, %v12990_v35 }
  0x8d   :  { %20838 = vst [vmem:[#allocation14_spill] sm:$0xff] %v15620_v44  ;;  %v15625_v47 = vpop.permute.xlu0 %12993  ;;  %v13001_v48 = vunpack.i.h.bf16 %v12999_v42  ;;  %v13000_v49 = vunpack.i.l.bf16 %v12999_v42  ;;  %v13172_v50 = vpack.i.bf16 %v15620_v44, %v15615_v43 }
  0x8e   :  { %v12996_v52 = vunpack.i.h.bf16 %v15625_v47  ;;  %v12995_v54 = vunpack.i.l.bf16 %v15625_v47 }
  0x8f   :  { %13173 = vrot.lane.b32.xlu0 %v13172_v50, %s15277_s13  ;;  %v15633_v55 = vsel %vm169_vm0, %v13000_v49, %v12985_v39  ;;  %v15636_v56 = vsel %vm169_vm0, %v13001_v48, %v12991_v46  ;;  %v15641_v57 = vsel %vm169_vm0, %v12950_v62, %v13000_v49  ;;  %v15658_v58 = vsel %vm169_vm0, %v12956_v53, %v13001_v48 }
  0x90   :  { %v15643_v59 = vpop.permute.xlu1 %13008  ;;  %v13182_v60 = vpack.i.bf16 %v15636_v56, %v15633_v55  ;;  %v15648_v61 = vsel %vm169_vm0, %v12991_v46, %v12995_v54  ;;  %v15653_v6 = vsel %vm169_vm0, %v12995_v54, %v12996_v52 }
  0x91   :  { %20839 = vst [vmem:[#allocation15_spill] sm:$0xff] %v15653_v6  ;;  %v13004_v62 = vpop.permute.xlu0 %13003  ;;  %v13010_v8 = vunpack.i.l.bf16 %v15643_v59  ;;  %v13177_v9 = vpack.i.bf16 %v15653_v6, %v15648_v61  ;;  %v13011_v53 = vunpack.i.h.bf16 %v15643_v59 }
  0x92   :  { %v13006_v11 = vunpack.i.h.bf16 %v13004_v62  ;;  %v13005_v13 = vunpack.i.l.bf16 %v13004_v62 }
  0x93   :  { %13183 = vrot.lane.b32.xlu0 %v13182_v60, %s15277_s13  ;;  %13178 = vrot.lane.b32.xlu1 %v13177_v9, %s15277_s13 }
  0x94   :  { %v13019_v21 = vpop.permute.xlu1 %13018  ;;  %v15673_v22 = vsel %vm280_vm1, %v13005_v13, %v13006_v11  ;;  %v15678_v23 = vsel %vm280_vm1, %v13006_v11, %v13010_v8 }
  0x95   :  { %20840 = vst [vmem:[#allocation16_spill] sm:$0xff] %v15678_v23  ;;  %v15684_v30 = vpop.permute.xlu0 %13013  ;;  %v13021_v34 = vunpack.i.h.bf16 %v13019_v21  ;;  %v13020_v36 = vunpack.i.l.bf16 %v13019_v21  ;;  %v13187_v38 = vpack.i.bf16 %v15678_v23, %v15673_v22 }
  0x96   :  { %v13016_v42 = vunpack.i.h.bf16 %v15684_v30  ;;  %v13015_v46 = vunpack.i.l.bf16 %v15684_v30  ;;  %v15202_v30 = vld [vmem:[%s20733_s0 + $0x68] sm:$0xff] }
  0x97   :  { %13188 = vrot.lane.b32.xlu1 %v13187_v38, %s15277_s13  ;;  %v15696_v49 = vsel %vm280_vm1, %v13020_v36, %v13005_v13  ;;  %v15699_v50 = vsel %vm280_vm1, %v13021_v34, %v13011_v53  ;;  %v15704_v54 = vsel %vm280_vm1, %v12970_v7, %v13020_v36  ;;  %v15721_v1 = vsel %vm280_vm1, %v12976_v25, %v13021_v34 }
  0x98   :  { %20841 = vst [vmem:[#allocation17_spill] sm:$0xff] %v15696_v49  ;;  %20842 = vst [vmem:[#allocation18_spill] sm:$0xff] %v15699_v50  ;;  %v15706_v60 = vpop.permute.xlu1 %13028  ;;  %v15709_v62 = vsel %vm280_vm1, %v13011_v53, %v13015_v46  ;;  %v15714_v9 = vsel %vm280_vm1, %v13015_v46, %v13016_v42  ;;  %v13197_v11 = vpack.i.bf16 %v15699_v50, %v15696_v49 }
  0x99   :  { %20843 = vst [vmem:[#allocation19_spill] sm:$0xff] %v15704_v54  ;;  %20844 = vst [vmem:[#allocation20_spill] sm:$0xff] %v15714_v9  ;;  %v13024_v7 = vpop.permute.xlu0 %13023  ;;  %v20753_v13 = vunpack.i.l.bf16 %v15706_v60  ;;  %v13192_v53 = vpack.i.bf16 %v15714_v9, %v15709_v62  ;;  %v13031_v24 = vunpack.i.h.bf16 %v15706_v60 }
  0x9a   :  { %20845 = vst [vmem:[#allocation21_spill] sm:$0xff] %v15721_v1  ;;  %v13026_v36 = vunpack.i.h.bf16 %v13024_v7  ;;  %v13025_v38 = vunpack.i.l.bf16 %v13024_v7 }
  0x9b   :  { %13193 = vrot.lane.b32.xlu0 %v13192_v53, %s15277_s13  ;;  %13198 = vrot.lane.b32.xlu1 %v13197_v11, %s15277_s13 }
  0x9c   :  { %v13039_v25 = vpop.permute.xlu1 %13038  ;;  %v15736_v34 = vsel %vm169_vm0, %v13025_v38, %v13026_v36  ;;  %v15741_v7 = vsel %vm169_vm0, %v13026_v36, %v20753_v13  ;;  %v15910_v13 = vld [vmem:[%s20733_s0 + $0xe8] sm:$0xff] }
  0x9d   :  { %20846 = vst [vmem:[#allocation22_spill] sm:$0xff] %v15736_v34  ;;  %20847 = vst [vmem:[#allocation23_spill] sm:$0xff] %v15741_v7  ;;  %v15747_v41 = vpop.permute.xlu0 %13033  ;;  %v13041_v11 = vunpack.i.h.bf16 %v13039_v25  ;;  %v13040_v19 = vunpack.i.l.bf16 %v13039_v25  ;;  %v13202_v20 = vpack.i.bf16 %v15736_v34, %v15641_v57  ;;  %v13207_v39 = vpack.i.bf16 %v15658_v58, %v15741_v7 }
  0x9e   :  { %v20752_v51 = vunpack.i.h.bf16 %v15747_v41  ;;  %v13035_v36 = vunpack.i.l.bf16 %v15747_v41  ;;  %20869 = vst [vmem:[#allocation45_spill] sm:$0xff] %v15910_v13 }
  0x9f   :  { %13203 = vrot.lane.b32.xlu0 %v13202_v20, %s15277_s13  ;;  %13208 = vrot.lane.b32.xlu1 %v13207_v39, %s15277_s13  ;;  %v15760_v53 = vsel %vm169_vm0, %v13040_v19, %v13025_v38  ;;  %v15763_v25 = vsel %vm169_vm0, %v13041_v11, %v13031_v24  ;;  %v15768_v26 = vsel %vm169_vm0, %v12990_v35, %v13040_v19 }
  0xa0   :  { %20848 = vst [vmem:[#allocation24_spill] sm:$0xff] %v15760_v53  ;;  %20849 = vst [vmem:[#allocation25_spill] sm:$0xff] %v15763_v25  ;;  %v15770_v31 = vpop.permute.xlu1 %13048  ;;  %v15773_v40 = vsel %vm169_vm0, %v13031_v24, %v13035_v36  ;;  %v15778_v39 = vsel %vm169_vm0, %v13035_v36, %v20752_v51  ;;  %v13217_v38 = vpack.i.bf16 %v15763_v25, %v15760_v53  ;;  %v20877_v51 = vunpack.i.l.bf16 %v15706_v60 }
  0xa1   :  { %20850 = vst [vmem:[#allocation26_spill] sm:$0xff] %v15768_v26  ;;  %20851 = vst [vmem:[#allocation27_spill] sm:$0xff] %v15773_v40  ;;  %v15785_v29 = vsel %vm169_vm0, %v12996_v52, %v13041_v11  ;;  %v13044_v19 = vpop.permute.xlu0 %13043  ;;  %v20751_v35 = vunpack.i.l.bf16 %v15770_v31  ;;  %v13212_v24 = vpack.i.bf16 %v15778_v39, %v15773_v40  ;;  %v13051_v12 = vunpack.i.h.bf16 %v15770_v31 }
  0xa2   :  { %20852 = vst [vmem:[#allocation28_spill] sm:$0xff] %v15778_v39  ;;  %20853 = vst [vmem:[#allocation29_spill] sm:$0xff] %v15785_v29  ;;  %v13046_v20 = vunpack.i.h.bf16 %v13044_v19  ;;  %v13045_v48 = vunpack.i.l.bf16 %v13044_v19  ;;  %v20881_v60 = vunpack.i.l.bf16 %v15770_v31 }
  0xa3   :  { %13213 = vrot.lane.b32.xlu0 %v13212_v24, %s15277_s13  ;;  %13218 = vrot.lane.b32.xlu1 %v13217_v38, %s15277_s13 }
  0xa4   :  { %v13059_v18 = vpop.permute.xlu1 %13058  ;;  %v15802_v19 = vsel %vm280_vm1, %v13045_v48, %v13046_v20  ;;  %v15807_v45 = vsel %vm280_vm1, %v13046_v20, %v20751_v35 }
  0xa5   :  { %20854 = vst [vmem:[#allocation30_spill] sm:$0xff] %v15802_v19  ;;  %20855 = vst [vmem:[#allocation31_spill] sm:$0xff] %v15807_v45  ;;  %v15813_v47 = vpop.permute.xlu0 %13053  ;;  %v13061_v52 = vunpack.i.h.bf16 %v13059_v18  ;;  %v13060_v36 = vunpack.i.l.bf16 %v13059_v18  ;;  %v13222_v11 = vpack.i.bf16 %v15802_v19, %v15704_v54  ;;  %v13227_v37 = vpack.i.bf16 %v15721_v1, %v15807_v45 }
  0xa6   :  { %v20750_v46 = vunpack.i.h.bf16 %v15813_v47  ;;  %v13055_v20 = vunpack.i.l.bf16 %v15813_v47 }
  0xa7   :  { %13223 = vrot.lane.b32.xlu0 %v13222_v11, %s15277_s13  ;;  %13228 = vrot.lane.b32.xlu1 %v13227_v37, %s15277_s13  ;;  %v15824_v24 = vsel %vm280_vm1, %v13060_v36, %v13045_v48  ;;  %v15827_v38 = vsel %vm280_vm1, %v13061_v52, %v13051_v12  ;;  %v15832_v18 = vsel %vm280_vm1, %v13010_v8, %v13060_v36 }
  0xa8   :  { %20856 = vst [vmem:[#allocation32_spill] sm:$0xff] %v15824_v24  ;;  %20857 = vst [vmem:[#allocation33_spill] sm:$0xff] %v15827_v38  ;;  %v13069_v21 = vpop.permute.xlu1 %13068  ;;  %v15835_v14 = vsel %vm280_vm1, %v13051_v12, %v13055_v20  ;;  %v15840_v11 = vsel %vm280_vm1, %v13055_v20, %v20750_v46  ;;  %v13242_v37 = vpack.i.bf16 %v15827_v38, %v15824_v24  ;;  %v15858_v20 = vld [vmem:[%s20733_s0 + $0x38] sm:$0xff] }
  0xa9   :  { %20858 = vst [vmem:[#allocation34_spill] sm:$0xff] %v15832_v18  ;;  %20859 = vst [vmem:[#allocation35_spill] sm:$0xff] %v15835_v14  ;;  %v15847_v48 = vsel %vm280_vm1, %v13016_v42, %v13061_v52  ;;  %v13064_v59 = vpop.permute.xlu0 %13063  ;;  %v15849_v8 = vunpack.i.h.bf16 %v13069_v21  ;;  %v13232_v12 = vpack.i.bf16 %v15840_v11, %v15835_v14  ;;  %v13237_v42 = vpack.i.bf16 %v15202_v30, %v15858_v20  ;;  %v15916_v30 = vld [vmem:[%s20733_s0 + $0x60] sm:$0xff] }
  0xaa   :  { %20860 = vst [vmem:[#allocation36_spill] sm:$0xff] %v15840_v11  ;;  %20861 = vst [vmem:[#allocation37_spill] sm:$0xff] %v15847_v48  ;;  %v15853_v36 = vunpack.i.h.bf16 %v13064_v59  ;;  %v13247_v46 = vpack.i.bf16 %v15871_v15, %v15204_v10 }
  0xab   :  { %20862 = vst [vmem:[#allocation38_spill] sm:$0xff] %v15849_v8  ;;  %13233 = vrot.lane.b32.xlu0 %v13232_v12, %s15277_s13  ;;  %13243 = vrot.lane.b32.xlu1 %v13242_v37, %s15277_s13  ;;  %v15881_v12 = vunpack.i.l.bf16 %v13064_v59  ;;  %v15883_v37 = vunpack.i.l.bf16 %v13069_v21  ;;  %20870 = vst [vmem:[#allocation46_spill] sm:$0xff] %v15916_v30 }
  0xac   :  { %20863 = vst [vmem:[#allocation39_spill] sm:$0xff] %v15853_v36  ;;  %v13079_v35 = vpop.permute.xlu1 %13078  ;;  %v15896_v52 = vsel %vm169_vm0, %v15853_v36, %v15849_v8 }
  0xad   :  { %20864 = vst [vmem:[#allocation40_spill] sm:$0xff] %v15881_v12  ;;  %20865 = vst [vmem:[#allocation41_spill] sm:$0xff] %v15883_v37  ;;  %v13074_v27 = vpop.permute.xlu0 %13073  ;;  %v15889_v28 = vunpack.i.h.bf16 %v13079_v35  ;;  %v15891_v10 = vunpack.i.l.bf16 %v13079_v35  ;;  %v15205_v35 = vld [vmem:[%s20733_s0 + $0xf0] sm:$0xff] }
  0xae   :  { %20868 = vst [vmem:[#allocation44_spill] sm:$0xff] %v15896_v52  ;;  %v13076_v59 = vunpack.i.h.bf16 %v13074_v27  ;;  %v13075_v21 = vunpack.i.l.bf16 %v13074_v27  ;;  %v13252_v27 = vpack.i.bf16 %v15205_v35, %v15910_v13  ;;  %v15938_v13 = vsel %vm169_vm0, %v15881_v12, %v15883_v37 }
  0xaf   :  { %20866 = vst [vmem:[#allocation42_spill] sm:$0xff] %v15889_v28  ;;  %20867 = vst [vmem:[#allocation43_spill] sm:$0xff] %v15891_v10  ;;  %13238 = vrot.lane.b32.xlu0 %v13237_v42, %s15277_s13  ;;  %13248 = vrot.lane.b32.xlu1 %v13247_v46, %s15277_s13  ;;  %v15921_v46 = vld [vmem:[%s20733_s0 + $0xe0] sm:$0xff] }
  0xb0   :  { %20871 = vst [vmem:[#allocation47_spill] sm:$0xff] %v15921_v46  ;;  %v13257_v42 = vpack.i.bf16 %v15921_v46, %v15916_v30  ;;  %v15929_v0 = vsel %vm169_vm0, %v13075_v21, %v15881_v12  ;;  %v15933_v35 = vsel %vm169_vm0, %v13076_v59, %v15853_v36  ;;  %v13089_v5 = vpop.permute.xlu1 %13088  ;;  %20872 = vst [vmem:[#allocation48_spill] sm:$0xff] %v15938_v13 }
  0xb1   :  { %v13084_v38 = vpop.permute.xlu0 %13083  ;;  %v13091_v14 = vunpack.i.h.bf16 %v13089_v5  ;;  %v13090_v30 = vunpack.i.l.bf16 %v13089_v5  ;;  %v13267_v5 = vpack.i.bf16 %v15785_v29, %v15883_v37 }
  0xb2   :  { %v15944_v24 = vunpack.i.h.bf16 %v13084_v38  ;;  %v15946_v19 = vunpack.i.l.bf16 %v13084_v38 }
  0xb3   :  { %v15950_v36 = vsel %vm280_vm1, %v13090_v30, %v15891_v10  ;;  %v15954_v12 = vsel %vm280_vm1, %v13091_v14, %v15889_v28  ;;  %13253 = vrot.lane.b32.xlu0 %v13252_v27, %s15277_s13  ;;  %13258 = vrot.lane.b32.xlu1 %v13257_v42, %s15277_s13  ;;  %v15973_v27 = vsel %vm169_vm0, %v20877_v51, %v13075_v21  ;;  %v20879_v42 = vunpack.i.h.bf16 %v15747_v41 }
  0xb4   :  { %20873 = vst [vmem:[#allocation49_spill] sm:$0xff] %v15944_v24  ;;  %20874 = vst [vmem:[#allocation50_spill] sm:$0xff] %v15946_v19  ;;  %v15963_v38 = vsel %vm280_vm1, %v15891_v10, %v15946_v19  ;;  %v15968_v46 = vsel %vm280_vm1, %v15889_v28, %v15944_v24  ;;  %v15980_v25 = vpop.permute.xlu1 %13098  ;;  %v13262_v10 = vpack.i.bf16 %v15938_v13, %v15768_v26 }
  0xb5   :  { %20875 = vst [vmem:[#allocation51_spill] sm:$0xff] %v15950_v36  ;;  %20876 = vst [vmem:[#allocation52_spill] sm:$0xff] %v15963_v38  ;;  %v15978_v37 = vsel %vm169_vm0, %v20879_v42, %v13076_v59  ;;  %v15991_v51 = vsel %vm280_vm1, %v20881_v60, %v13090_v30  ;;  %v13094_v41 = vpop.permute.xlu0 %13093  ;;  %v20883_v59 = vunpack.i.h.bf16 %v15813_v47  ;;  %v13101_v13 = vunpack.i.h.bf16 %v15980_v25 }
  0xb6   :  { %20878 = vst [vmem:[#allocation53_spill] sm:$0xff] %v15973_v27  ;;  %20880 = vst [vmem:[#allocation54_spill] sm:$0xff] %v15978_v37  ;;  %v13096_v42 = vunpack.i.h.bf16 %v13094_v41  ;;  %v13095_v53 = vunpack.i.l.bf16 %v13094_v41  ;;  %v13100_v40 = vunpack.i.l.bf16 %v15980_v25  ;;  %v13272_v25 = vpack.i.bf16 %v15849_v8, %v15896_v52 }
  0xb7   :  { %20882 = vst [vmem:[#allocation55_spill] sm:$0xff] %v15991_v51  ;;  %v15996_v21 = vsel %vm280_vm1, %v20883_v59, %v13091_v14  ;;  %13263 = vrot.lane.b32.xlu0 %v13262_v10, %s15277_s13  ;;  %13268 = vrot.lane.b32.xlu1 %v13267_v5, %s15277_s13  ;;  %v13277_v41 = vpack.i.bf16 %v15933_v35, %v15929_v0 }
  0xb8   :  { %20884 = vst [vmem:[#allocation56_spill] sm:$0xff] %v15996_v21  ;;  %v16006_v47 = vpop.permute.xlu1 %13108  ;;  %v531_v14 = vsel %vm529_vm2, %v13095_v53, %v13096_v42  ;;  %v545_v28 = vsel %vm529_vm2, %v13100_v40, %v13101_v13 }
  0xb9   :  { %v13104_v59 = vpop.permute.xlu0 %13103  ;;  %v12280_v45 = vpack.c.bf16 %v545_v28, %v531_v14  ;;  %v13282_v28 = vpack.i.bf16 %v15963_v38, %v15832_v18  ;;  %v13287_v14 = vpack.i.bf16 %v15847_v48, %v15946_v19  ;;  %v15211_v38 = vld [vmem:[%s20733_s0 + $0x10] sm:$0xff] }
  0xba   :  { %v13106_v31 = vunpack.i.h.bf16 %v13104_v59  ;;  %v13105_v60 = vunpack.i.l.bf16 %v13104_v59 }
  0xbb   :  { %13273 = vrot.lane.b32.xlu0 %v13272_v25, %s15277_s13  ;;  %13278 = vrot.lane.b32.xlu1 %v13277_v41, %s15277_s13 }
  0xbc   :  { %v13119_v52 = vpop.permute.xlu1 %13118  ;;  %12281 = vmatprep.subr.bf16.mxu0 %v12280_v45  ;;  %v530_v11 = vsel %vm529_vm2, %v13105_v60, %v13095_v53  ;;  %v544_v30 = vsel %vm529_vm2, %v13106_v31, %v13100_v40  ;;  %v20885_v45 = vunpack.i.l.bf16 %v16006_v47 }
  0xbd   :  { %v16035_v25 = vpop.permute.xlu0 %13113  ;;  %v13120_v41 = vunpack.i.l.bf16 %v13119_v52  ;;  %v12282_v59 = vpack.c.bf16 %v544_v30, %v530_v11  ;;  %v13121_v5 = vunpack.i.h.bf16 %v13119_v52  ;;  %v13292_v11 = vpack.i.bf16 %v15944_v24, %v15968_v46 }
  0xbe   :  { %v20787_v10 = vunpack.i.l.bf16 %v16035_v25  ;;  %v13297_v52 = vpack.i.bf16 %v15954_v12, %v15950_v36  ;;  %v13307_v24 = vpack.i.bf16 %v15978_v37, %v15973_v27 }
  0xbf   :  { %13283 = vrot.lane.b32.xlu0 %v13282_v28, %s15277_s13  ;;  %13288 = vrot.lane.b32.xlu1 %v13287_v14, %s15277_s13  ;;  %v16043_v40 = vsel %vm529_vm2, %v13120_v41, %v20885_v45  ;;  %v16072_v45 = vld [vmem:[%s20733_s0 + $0xd8] sm:$0xff] }
  0xc0   :  { %v16048_v53 = vsel %vm529_vm2, %v13121_v5, %v20787_v10  ;;  %v16050_v31 = vpop.permute.xlu1 %13128  ;;  %12283 = vmatpush1.bf16.msra.mxu0 %v12282_v59  ;;  %v16067_v59 = vld [vmem:[%s20733_s0 + $0x58] sm:$0xff] }
  0xc1   :  { %v16056_v30 = vpop.permute.xlu0 %13123  ;;  %v13131_v60 = vunpack.i.h.bf16 %v16050_v31  ;;  %v13302_v8 = vpack.i.bf16 %v16072_v45, %v16067_v59 }
  0xc2   :  { %v13125_v14 = vunpack.i.l.bf16 %v16056_v30 }
  0xc3   :  { %13293 = vrot.lane.b32.xlu0 %v13292_v11, %s15277_s13  ;;  %13298 = vrot.lane.b32.xlu1 %v13297_v52, %s15277_s13  ;;  %v547_v28 = vsel %vm529_vm2, %v13131_v60, %v13121_v5  ;;  %v546_v10 = vsel %vm529_vm2, %v13101_v13, %v13131_v60  ;;  %v15212_v13 = vld [vmem:[%s20733_s0 + $0x18] sm:$0xff]  ;;  %v15218_v60 = vld [vmem:[%s20733_s0 + $0xa0] sm:$0xff] }
  0xc4   :  { %v533_v11 = vsel %vm529_vm2, %v13125_v14, %v13120_v41  ;;  %v532_v52 = vsel %vm529_vm2, %v13096_v42, %v13125_v14  ;;  %v13317_v5 = vpack.i.bf16 %v15212_v13, %v15211_v38  ;;  %v13312_v42 = vpack.i.bf16 %v15996_v21, %v15991_v51  ;;  %v15217_v41 = vld [vmem:[%s20733_s0 + $0xa8] sm:$0xff] }
  0xc5   :  { %v12292_v19 = vpack.c.bf16 %v547_v28, %v533_v11  ;;  %v12294_v36 = vpack.c.bf16 %v546_v10, %v532_v52  ;;  %v13332_v28 = vpack.i.bf16 %v15217_v41, %v15218_v60  ;;  %v16117_v14 = vld [vmem:[%s20733_s0 + $0x8] sm:$0xff]  ;;  %v13342_v13 = vpack.i.bf16 %v15641_v57, %v15544_v4  ;;  %v16167_v60 = vld [vmem:[%s20733_s0 + $0x30] sm:$0xff] }
  0xc6   :  { %v16122_v11 = vld [vmem:[%s20733_s0 + $0x88] sm:$0xff]  ;;  %v20891_v41 = vpack.i.bf16 %v15596_v32, %v15562_v16  ;;  %20892 = vst [vmem:[#allocation57_spill] sm:$0xff] %v16167_v60 }
  0xc7   :  { %13303 = vrot.lane.b32.xlu0 %v13302_v8, %s15277_s13  ;;  %13308 = vrot.lane.b32.xlu1 %v13307_v24, %s15277_s13  ;;  %v15213_v24 = vld [vmem:[%s20733_s0 + $0x28] sm:$0xff]  ;;  %v15214_v8 = vld [vmem:[%s20733_s0 + $0x20] sm:$0xff]  ;;  %v13337_v52 = vpack.i.bf16 %v16122_v11, %v16117_v14 }
  0xc8   :  { %12293 = vmatprep.subr.bf16.mxu1 %v12292_v19  ;;  %v13322_v10 = vpack.i.bf16 %v15213_v24, %v15214_v8  ;;  %v15215_v19 = vld [vmem:[%s20733_s0 + $0x90] sm:$0xff]  ;;  %v20887_v24 = vpack.i.bf16 %v15648_v61, %v15636_v56  ;;  %v13367_v8 = vpack.i.bf16 %v15704_v54, %v15567_v17 }
  0xc9   :  { %12295 = vmatpush1.bf16.msra.mxu1 %v12294_v36  ;;  %v15216_v36 = vld [vmem:[%s20733_s0 + $0x98] sm:$0xff]  ;;  %v20898_v17 = vld [vmem:[#allocation27_spill] sm:$0xff] }
  0xca   :  { %v13327_v38 = vpack.i.bf16 %v15216_v36, %v15215_v19  ;;  %v13377_v19 = vpack.i.bf16 %v15721_v1, %v15601_v33  ;;  %v20889_v36 = vpack.i.bf16 %v15673_v22, %v15696_v49  ;;  %v20899_v33 = vld [vmem:[#allocation25_spill] sm:$0xff] }
  0xcb   :  { %13313 = vrot.lane.b32.xlu0 %v13312_v42, %s15277_s13  ;;  %13318 = vrot.lane.b32.xlu1 %v13317_v5, %s15280_s23  ;;  %v20886_v5 = vpack.i.bf16 %v15615_v43, %v15633_v55  ;;  %v13352_v42 = vpack.i.bf16 %v15658_v58, %v15528_v63 }
  0xcf   :  { %13323 = vrot.lane.b32.xlu0 %v13322_v10, %s15280_s23  ;;  %13328 = vrot.lane.b32.xlu1 %v13327_v38, %s15280_s23  ;;  %v20888_v10 = vpack.i.bf16 %v15536_v2, %v15539_v3  ;;  %v20890_v38 = vpack.i.bf16 %v15709_v62, %v15699_v50 }
  0xd3   :  { %13333 = vrot.lane.b32.xlu0 %v13332_v28, %s15280_s23  ;;  %13338 = vrot.lane.b32.xlu1 %v13337_v52, %s15280_s23  ;;  %v13392_v28 = vpack.i.bf16 %v15858_v20, %v16167_v60  ;;  %v16174_v52 = vld [vmem:[%s20733_s0 + $0xb0] sm:$0xff]  ;;  %v16186_v20 = vpop.permute.xlu0 %13133 }
  0xd4   :  { %20893 = vst [vmem:[#allocation58_spill] sm:$0xff] %v16174_v52 }
  0xd7   :  { %13343 = vrot.lane.b32.xlu0 %v13342_v13, %s15280_s23  ;;  %13348 = vrot.lane.b32.xlu1 %v20886_v5, %s15280_s23  ;;  %v13397_v13 = vpack.i.bf16 %v15871_v15, %v16174_v52  ;;  %v13402_v5 = vpack.i.bf16 %v15768_v26, %v15620_v44  ;;  %v13412_v15 = vpack.i.bf16 %v15832_v18, %v15678_v23 }
  0xdb   :  { %13353 = vrot.lane.b32.xlu0 %v13352_v42, %s15280_s23  ;;  %13358 = vrot.lane.b32.xlu1 %v20887_v24, %s15280_s23  ;;  %v13407_v42 = vpack.i.bf16 %v15785_v29, %v15653_v6  ;;  %v16188_v24 = vpop.permute.xlu1 %13138 }
  0xdf   :  { %13363 = vrot.lane.b32.xlu0 %v20888_v10, %s15280_s23  ;;  %13368 = vrot.lane.b32.xlu1 %v13367_v8, %s15280_s23  ;;  %v13417_v8 = vpack.i.bf16 %v15847_v48, %v15714_v9  ;;  %v16199_v10 = vld [vmem:[%s20733_s0 + $0x48] sm:$0xff] }
  0xe3   :  { %13373 = vrot.lane.b32.xlu0 %v20889_v36, %s15280_s23  ;;  %13378 = vrot.lane.b32.xlu1 %v13377_v19, %s15280_s23  ;;  %v16204_v19 = vld [vmem:[%s20733_s0 + $0x40] sm:$0xff] }
  0xe4   :  { %20894 = vst [vmem:[#allocation59_spill] sm:$0xff] %v16204_v19  ;;  %v13422_v36 = vpack.i.bf16 %v16199_v10, %v16204_v19 }
  0xe7   :  { %13383 = vrot.lane.b32.xlu0 %v20890_v38, %s15280_s23  ;;  %13388 = vrot.lane.b32.xlu1 %v20891_v41, %s15280_s23  ;;  %v16211_v38 = vld [vmem:[%s20733_s0 + $0xc8] sm:$0xff]  ;;  %v16216_v41 = vld [vmem:[%s20733_s0 + $0xc0] sm:$0xff] }
  0xe8   :  { %20895 = vst [vmem:[#allocation60_spill] sm:$0xff] %v16216_v41 }
  0xeb   :  { %13393 = vrot.lane.b32.xlu0 %v13392_v28, %s15280_s23  ;;  %13398 = vrot.lane.b32.xlu1 %v13397_v13, %s15280_s23  ;;  %v13427_v28 = vpack.i.bf16 %v16211_v38, %v16216_v41 }
  0xef   :  { %13403 = vrot.lane.b32.xlu0 %v13402_v5, %s15280_s23  ;;  %13408 = vrot.lane.b32.xlu1 %v13407_v42, %s15280_s23 }
  0xf3   :  { %13413 = vrot.lane.b32.xlu0 %v13412_v15, %s15280_s23  ;;  %13418 = vrot.lane.b32.xlu1 %v13417_v8, %s15280_s23 }
  0xf5   :  { %v16220_v13 = vpop.permute.xlu0 %13148  ;;  %v16222_v5 = vpop.permute.xlu1 %13143 }
  0xf6   :  { %v20804_v42 = vunpack.i.h.bf16 %v16220_v13  ;;  %v13150_v15 = vunpack.i.l.bf16 %v16220_v13  ;;  %v20803_v8 = vunpack.i.h.bf16 %v16222_v5  ;;  %v13145_v23 = vunpack.i.l.bf16 %v16222_v5 }
  0xf7   :  { %13423 = vrot.lane.b32.xlu0 %v13422_v36, %s15280_s23  ;;  %13428 = vrot.lane.b32.xlu1 %v13427_v28, %s15280_s23  ;;  %v20896_v28 = vld [vmem:[#allocation24_spill] sm:$0xff] }
  0xf8   :  { %v559_v9 = vsel %vm529_vm2, %v13145_v23, %v20803_v8  ;;  %v573_v18 = vsel %vm529_vm2, %v13150_v15, %v20804_v42  ;;  %v20897_v60 = vpack.i.bf16 %v15736_v34, %v20896_v28 }
  0xf9   :  { %v16236_v48 = vpop.permute.xlu0 %13158  ;;  %v13154_v44 = vpop.permute.xlu1 %13153  ;;  %v12284_v6 = vpack.c.bf16 %v573_v18, %v559_v9  ;;  %v20900_v9 = vpack.i.bf16 %v20898_v17, %v20899_v33 }
  0xfa   :  { %v13156_v26 = vunpack.i.h.bf16 %v13154_v44  ;;  %v13155_v29 = vunpack.i.l.bf16 %v13154_v44  ;;  %v13160_v42 = vunpack.i.l.bf16 %v16236_v48  ;;  %v20913_v17 = vunpack.i.h.bf16 %v16236_v48 }
  0xfb   :  { %12285 = vmatprep.subr.bf16.mxu0 %v12284_v6  ;;  %13433 = vrot.lane.b32.xlu0 %v20897_v60, %s15280_s23  ;;  %v16257_v60 = vld [vmem:[%s20733_s0 + $0x50] sm:$0xff] }
  0xfc   :  { %13438 = vrot.lane.b32.xlu1 %v20900_v9, %s15280_s23  ;;  %v558_v44 = vsel %vm529_vm2, %v13155_v29, %v13145_v23  ;;  %v572_v18 = vsel %vm529_vm2, %v13156_v26, %v13150_v15  ;;  %20901 = vst [vmem:[#allocation61_spill] sm:$0xff] %v16257_v60  ;;  %v13452_v8 = vpack.i.bf16 %v16067_v59, %v16257_v60  ;;  %v20902_v26 = vld [vmem:[#allocation30_spill] sm:$0xff]  ;;  %v20903_v29 = vld [vmem:[#allocation32_spill] sm:$0xff]  ;;  %v20908_v60 = vunpack.i.h.bf16 %v16035_v25 }
  0xfd   :  { %v13169_v36 = vpop.permute.xlu0 %13168  ;;  %v16252_v6 = vpop.permute.xlu1 %13163  ;;  %v12286_v52 = vpack.c.bf16 %v572_v18, %v558_v44  ;;  %v20904_v15 = vpack.i.bf16 %v20902_v26, %v20903_v29  ;;  %v16270_v44 = vld [vmem:[%s20733_s0 + $0xd0] sm:$0xff]  ;;  %v20907_v18 = vunpack.i.l.bf16 %v16006_v47  ;;  %v20909_v29 = vunpack.i.l.bf16 %v16035_v25  ;;  %v20911_v26 = vld [vmem:[#allocation33_spill] sm:$0xff] }
  0xfe   :  { %v13171_v28 = vunpack.i.h.bf16 %v13169_v36  ;;  %v13170_v34 = vunpack.i.l.bf16 %v13169_v36  ;;  %v13165_v23 = vunpack.i.l.bf16 %v16252_v6  ;;  %20905 = vst [vmem:[#allocation62_spill] sm:$0xff] %v16270_v44  ;;  %v13457_v59 = vpack.i.bf16 %v16072_v45, %v16270_v44 }
  0xff   :  { %13443 = vrot.lane.b32.xlu0 %v20904_v15, %s15280_s23  ;;  %12287 = vmatpush1.bf16.msra.mxu0 %v12286_v52  ;;  %v20906_v36 = vunpack.i.h.bf16 %v16006_v47  ;;  %v549_v52 = vsel %vm529_vm2, %v20909_v29, %v20908_v60  ;;  %v20910_v15 = vld [vmem:[#allocation35_spill] sm:$0xff]  ;;  %v587_v45 = vsel %vm529_vm2, %v13160_v42, %v20913_v17  ;;  %v20914_v44 = vunpack.i.h.bf16 %v16252_v6 }
 0x100   :  { %v20912_v33 = vpack.i.bf16 %v20910_v15, %v20911_v26 }
 0x101   :  { %v535_v9 = vsel %vm529_vm2, %v20907_v18, %v20906_v36  ;;  %v601_v41 = vsel %vm529_vm2, %v13165_v23, %v20914_v44  ;;  %v586_v36 = vsel %vm529_vm2, %v13170_v34, %v13160_v42  ;;  %v600_v18 = vsel %vm529_vm2, %v13171_v28, %v13165_v23  ;;  %v16296_v19 = vpop.permute.xlu0 %13173 }
 0x102   :  { %13448 = vrot.lane.b32.xlu1 %v20912_v33, %s15280_s23  ;;  %v12288_v60 = vpack.c.bf16 %v601_v41, %v587_v45  ;;  %v12290_v29 = vpack.c.bf16 %v600_v18, %v586_v36  ;;  %v16301_v33 = vld [vmem:[%s20734_s1 + $0x10] sm:$0xff]  ;;  %v20812_v26 = vunpack.i.h.bf16 %v16296_v19  ;;  %v13175_v17 = vunpack.i.l.bf16 %v16296_v19 }
 0x103   :  { %13453 = vrot.lane.b32.xlu0 %v13452_v8, %s15280_s23  ;;  %v12304_v44 = vpack.c.bf16 %v549_v52, %v535_v9  ;;  %v20915_v8 = vpack.i.bf16 %v15973_v27, %v15741_v7  ;;  %v20916_v36 = vpack.i.bf16 %v15978_v37, %v15778_v39  ;;  %v20917_v18 = vpack.c.bf16 %v16048_v53, %v16043_v40 }
 0x104   :  { %12289 = vmatprep.subr.bf16.mxu0 %v12288_v60  ;;  %v563_v9 = vsel %vm529_vm2, %v13175_v17, %v20812_v26  ;;  %v16346_v26 = vld [vmem:[%s20734_s1 + $0x18] sm:$0xff] }
 0x105   :  { %12291 = vmatpush1.bf16.msra.mxu0 %v12290_v29  ;;  %v16307_v34 = vpop.permute.xlu0 %13183  ;;  %v16309_v41 = vpop.permute.xlu1 %13178 }
 0x106   :  { %13458 = vrot.lane.b32.xlu1 %v13457_v59, %s15280_s23  ;;  %12305 = vmatprep.subr.bf16.mxu0 %v12304_v44  ;;  %v20814_v42 = vunpack.i.h.bf16 %v16307_v34  ;;  %v20815_v28 = vunpack.i.l.bf16 %v16307_v34  ;;  %v20813_v23 = vunpack.i.h.bf16 %v16309_v41  ;;  %v13180_v45 = vunpack.i.l.bf16 %v16309_v41 }
 0x107   :  { %13463 = vrot.lane.b32.xlu0 %v20915_v8, %s15280_s23  ;;  %v20918_v8 = vmov 0.0  }
 0x108   :  { %10999 = vmatmul.mubr.msk.f32.vlgmr.msra.gmra.mrb[0].mxu0 %vm698_vm3, %v16301_v33  ;;  %v562_v59 = vsel %vm529_vm2, %v20815_v28, %v13175_v17  ;;  %v576_v52 = vsel %vm529_vm2, %v20814_v42, %v13180_v45  ;;  %v577_v60 = vsel %vm529_vm2, %v13180_v45, %v20813_v23 }
 0x109   :  { %12307 = vmatpush1.bf16.msra.mxu0 %v20917_v18  ;;  %v16340_v29 = vpop.permute.xlu1 %13188  ;;  %v12308_v17 = vpack.c.bf16 %v577_v60, %v563_v9  ;;  %v12310_v44 = vpack.c.bf16 %v576_v52, %v562_v59  ;;  %775 = vmatprep.mubr.f32.mxu0 %v20918_v8 }
 0x10a   :  { %13468 = vrot.lane.b32.xlu1 %v20916_v36, %s15280_s23 }
 0x10b   :  { %19 = vsyncpa [#allocation4], 0  ;;  %v13126_v36 = vunpack.i.h.bf16 %v16056_v30  ;;  %v13135_v45 = vunpack.i.l.bf16 %v16186_v20  ;;  %v20919_v9 = vld [vmem:[#allocation31_spill] sm:$0xff]  ;;  %12309 = vmatprep.subr.bf16.mxu0 %v12308_v17  ;;  %v13190_v18 = vunpack.i.l.bf16 %v16340_v29  ;;  %v20921_v60 = vld [vmem:[#allocation36_spill] sm:$0xff]  ;;  %v20928_v42 = vunpack.i.h.bf16 %v16186_v20  ;;  %s15283_s26 = smov 52   ;;  %s15284_s14 = smov 88  }
 0x10c   :  { %v20920_v59 = vpack.i.bf16 %v15991_v51, %v20919_v9  ;;  %v20922_v30 = vpack.i.bf16 %v15996_v21, %v20921_v60  ;;  %v83_v23 = vld [vmem:[%s20735_s2] sm:$0xff]  ;;  %v84_v17 = vld [vmem:[%s20735_s2 + $0x8] sm:$0xff]  ;;  %11000 = vmatmul.mubr.msk.f32.gmra.mrb[2].mxu0 %vm698_vm3, %v16346_v26  ;;  %v76_v60 = vld [vmem:[%s20733_s0 + $0xf8] sm:$0xff]  ;;  %v20931_v27 = vunpack.i.h.bf16 %v16340_v29  ;;  %v20934_v63 = vunpack.i.h.bf16 %v16188_v24  ;;  %s15287_s19 = smov 106  }
 0x10d   :  { %12311 = vmatpush1.bf16.msra.mxu0 %v12310_v44  ;;  %v16366_v28 = vpop.permute.xlu0 %13193  ;;  %v20923_v52 = vld [vmem:[#allocation47_spill] sm:$0xff]  ;;  %v20924_v53 = vld [vmem:[#allocation45_spill] sm:$0xff]  ;;  %923 = vmatprep.mubr.f32.mxu0 %v20918_v8  ;;  %v20927_v44 = vunpack.i.l.bf16 %v16050_v31  ;;  %v553_v9 = vsel %vm529_vm2, %v13135_v45, %v20928_v42  ;;  %vm1983_vm4 = vcmask 883712   ;;  %vm6545_vm5 = vcmask 302080  }
 0x10e   :  { %13473 = vrot.lane.b32.xlu0 %v20920_v59, %s15280_s23  ;;  %13478 = vrot.lane.b32.xlu1 %v20922_v30, %s15280_s23  ;;  %v16368_v59 = vpop.permute.xlu1 %13198  ;;  %v13489_v40 = vpack.i.bf16 %v20924_v53, %v20923_v52  ;;  %v13195_v30 = vunpack.i.l.bf16 %v16366_v28  ;;  %v16386_v53 = vld [vmem:[%s20733_s0 + $0x68] sm:$0xff]  ;;  %v591_v42 = vsel %vm529_vm2, %v13190_v18, %v20931_v27  ;;  %v20932_v37 = vunpack.i.h.bf16 %v16366_v28 }
 0x10f   :  { %20925 = vst [vmem:[#allocation47_spill] sm:$0xff] %v16386_v53  ;;  %v20926_v52 = vld [vmem:[#allocation46_spill] sm:$0xff]  ;;  %v539_v21 = vsel %vm529_vm2, %v13126_v36, %v20927_v44  ;;  %v20929_v7 = vunpack.i.h.bf16 %v16368_v59  ;;  %v20930_v39 = vunpack.i.l.bf16 %v16368_v59  ;;  %v552_v27 = vsel %vm529_vm2, %v20934_v63, %v13135_v45 }
 0x110   :  { %v13484_v51 = vpack.i.bf16 %v16386_v53, %v20926_v52  ;;  %v605_v53 = vsel %vm529_vm2, %v13195_v30, %v20932_v37  ;;  %v20937_v63 = vunpack.i.h.bf16 %v16222_v5  ;;  %vm6549_vm6 = vcmask 1041408  }
 0x111   :  { %v604_v52 = vsel %vm529_vm2, %v20929_v7, %v13195_v30  ;;  %v590_v44 = vsel %vm529_vm2, %v20930_v39, %v13190_v18  ;;  %v13204_v15 = vpop.permute.xlu0 %13203  ;;  %v12312_v50 = vpack.c.bf16 %v605_v53, %v591_v42  ;;  %v20933_v7 = vunpack.i.l.bf16 %v16188_v24 }
 0x112   :  { %2727 = vperm.xlu0 %13482, %v83_v23   ;;  %v60_v23 = vld [vmem:[%s20733_s0 + $0x78] sm:$0xff]  ;;  %2732 = vperm.xlu1 %13483, %v84_v17   ;;  %v16414_v49 = vpop.permute.xlu1 %13208  ;;  %v12314_v54 = vpack.c.bf16 %v604_v52, %v590_v44  ;;  %v13205_v4 = vunpack.i.l.bf16 %v13204_v15  ;;  %v13206_v18 = vunpack.i.h.bf16 %v13204_v15  ;;  %v12328_v30 = vpack.c.bf16 %v553_v9, %v539_v21 }
 0x113   :  { %v538_v1 = vsel %vm529_vm2, %v20933_v7, %v13126_v36  ;;  %v13211_v39 = vunpack.i.h.bf16 %v16414_v49  ;;  %v13494_v17 = vpack.i.bf16 %v76_v60, %v60_v23  ;;  %v13210_v37 = vunpack.i.l.bf16 %v16414_v49  ;;  %12313 = vmatprep.subr.bf16.mxu0 %v12312_v50 }
 0x114   :  { %12315 = vmatpush1.bf16.msra.mxu0 %v12314_v54  ;;  %v20935_v36 = vunpack.i.l.bf16 %v16307_v34  ;;  %v20936_v60 = vunpack.i.h.bf16 %v16307_v34  ;;  %v560_v15 = vsel %vm529_vm2, %v20937_v63, %v13205_v4  ;;  %v20938_v54 = vunpack.i.h.bf16 %v16220_v13 }
 0x115   :  { %v16435_v45 = vpop.permute.xlu0 %13213  ;;  %12329 = vmatprep.subr.bf16.mxu0 %v12328_v30  ;;  %v12330_v42 = vpack.c.bf16 %v552_v27, %v538_v1  ;;  %v567_v13 = vsel %vm529_vm2, %v13206_v18, %v13210_v37  ;;  %vm6550_vm7 = vcmask 1042432   ;;  %vm7581_vm8 = vcmask 736256  }
 0x116   :  { %13490 = vrot.lane.b32.xlu0 %v13489_v40, %s15280_s23  ;;  %13485 = vrot.lane.b32.xlu1 %v13484_v51, %s15280_s23  ;;  %v561_v53 = vsel %vm529_vm2, %v13205_v4, %v20935_v36  ;;  %v575_v23 = vsel %vm529_vm2, %v13211_v39, %v20936_v60  ;;  %v16437_v40 = vpop.permute.xlu1 %13218  ;;  %v574_v51 = vsel %vm529_vm2, %v20938_v54, %v13211_v39  ;;  %v13216_v21 = vunpack.i.h.bf16 %v16435_v45  ;;  %v20939_v4 = vld [vmem:[#allocation48_spill] sm:$0xff] }
 0x117   :  { %v12296_v50 = vpack.c.bf16 %v575_v23, %v561_v53  ;;  %v13215_v34 = vunpack.i.l.bf16 %v16435_v45  ;;  %v13221_v9 = vunpack.i.h.bf16 %v16437_v40  ;;  %v13220_v5 = vunpack.i.l.bf16 %v16437_v40  ;;  %11003 = vmatmul.mubr.msk.f32.vlgmr.msra.gmra.mrb[4].mxu0 %vm698_vm3, %v16301_v33 }
 0x118   :  { %v20940_v52 = vpack.i.bf16 %v20939_v4, %v15929_v0  ;;  %v12298_v44 = vpack.c.bf16 %v574_v51, %v560_v15  ;;  %12331 = vmatpush1.bf16.msra.mxu0 %v12330_v42  ;;  %929 = vmatprep.mubr.f32.mxu0 %v20918_v8  ;;  %v20941_v15 = vld [vmem:[#allocation44_spill] sm:$0xff]  ;;  %v20943_v54 = vunpack.i.l.bf16 %v16368_v59  ;;  %vm8018_vm9 = vcmask 424960  }
 0x119   :  { %12297 = vmatprep.subr.bf16.mxu1 %v12296_v50  ;;  %v580_v7 = vsel %vm529_vm2, %v13221_v9, %v13215_v34  ;;  %v566_v39 = vsel %vm529_vm2, %v13220_v5, %v13206_v18  ;;  %v581_v1 = vsel %vm529_vm2, %v13215_v34, %v13216_v21  ;;  %v13224_v27 = vpop.permute.xlu0 %13223  ;;  %v20942_v50 = vpack.i.bf16 %v20941_v15, %v15933_v35  ;;  %v20948_v15 = vld [vmem:[#allocation52_spill] sm:$0xff] }
 0x11a   :  { %13500 = vrot.lane.b32.xlu0 %v20940_v52, %s15280_s23  ;;  %13495 = vrot.lane.b32.xlu1 %v13494_v17, %s15275_s20  ;;  %v16465_v30 = vpop.permute.xlu1 %13228  ;;  %v12332_v36 = vpack.c.bf16 %v581_v1, %v567_v13  ;;  %v12334_v53 = vpack.c.bf16 %v580_v7, %v566_v39  ;;  %v13225_v60 = vunpack.i.l.bf16 %v13224_v27  ;;  %v13226_v18 = vunpack.i.h.bf16 %v13224_v27 }
 0x11b   :  { %12299 = vmatpush1.bf16.msra.mxu1 %v12298_v44  ;;  %v13231_v23 = vunpack.i.h.bf16 %v16465_v30  ;;  %v13230_v63 = vunpack.i.l.bf16 %v16465_v30  ;;  %v20944_v34 = vunpack.i.h.bf16 %v16368_v59  ;;  %v20945_v52 = vunpack.i.h.bf16 %v16236_v48  ;;  %11004 = vmatmul.mubr.msk.f32.gmra.mrb[6].mxu0 %vm698_vm3, %v16346_v26  ;;  %v15234_v30 = vld [vmem:[%s20733_s0 + $0x98] sm:$0xff] }
 0x11c   :  { %12333 = vmatprep.subr.bf16.mxu0 %v12332_v36  ;;  %v589_v51 = vsel %vm529_vm2, %v13225_v60, %v20943_v54  ;;  %1077 = vmatprep.mubr.f32.mxu0 %v20918_v8  ;;  %vm8675_vm10 = vcmask 269312   ;;  %vm8679_vm11 = vcmask 1040384   ;;  %vm9034_vm12 = vcmask 719872  }
 0x11d   :  { %v603_v4 = vsel %vm529_vm2, %v13231_v23, %v20944_v34  ;;  %v588_v44 = vsel %vm529_vm2, %v20945_v52, %v13225_v60  ;;  %12335 = vmatpush1.bf16.msra.mxu0 %v12334_v53  ;;  %v16487_v13 = vpop.permute.xlu0 %13233  ;;  %v595_v53 = vsel %vm529_vm2, %v13226_v18, %v13230_v63  ;;  %vm9239_vm13 = vcmask 1043456  }
 0x11e   :  { %13510 = vrot.lane.b32.xlu0 %v13494_v17, %s15276_s25  ;;  %13505 = vrot.lane.b32.xlu1 %v20942_v50, %s15280_s23  ;;  %v20946_v17 = vunpack.i.h.bf16 %v16252_v6  ;;  %v16489_v7 = vpop.permute.xlu1 %13243  ;;  %v12300_v39 = vpack.c.bf16 %v603_v4, %v589_v51  ;;  %v13236_v27 = vunpack.i.h.bf16 %v16487_v13  ;;  %v13235_v59 = vunpack.i.l.bf16 %v16487_v13  ;;  %v20949_v50 = vld [vmem:[#allocation51_spill] sm:$0xff] }
 0x11f   :  { %v13246_v36 = vunpack.i.h.bf16 %v16489_v7  ;;  %v13245_v48 = vunpack.i.l.bf16 %v16489_v7  ;;  %v20947_v6 = vpack.i.bf16 %v15968_v46, %v15954_v12  ;;  %v20950_v54 = vpack.i.bf16 %v20948_v15, %v20949_v50 }
 0x120   :  { %v602_v42 = vsel %vm529_vm2, %v20946_v17, %v13231_v23  ;;  %12301 = vmatprep.subr.bf16.mxu1 %v12300_v39  ;;  %v609_v46 = vsel %vm529_vm2, %v13235_v59, %v13236_v27  ;;  %v20951_v39 = vunpack.i.h.bf16 %v16006_v47  ;;  %vm9235_vm14 = vcmask 982016  }
 0x121   :  { %v12302_v1 = vpack.c.bf16 %v602_v42, %v588_v44  ;;  %v608_v60 = vsel %vm529_vm2, %v13246_v36, %v13235_v59  ;;  %v594_v23 = vsel %vm529_vm2, %v13245_v48, %v13226_v18  ;;  %v13239_v51 = vpop.permute.xlu0 %13238  ;;  %v12336_v4 = vpack.c.bf16 %v609_v46, %v595_v53 }
 0x122   :  { %13520 = vrot.lane.b32.xlu0 %v20947_v6, %s15280_s23  ;;  %13515 = vrot.lane.b32.xlu1 %v20950_v54, %s15280_s23  ;;  %v13249_v34 = vpop.permute.xlu1 %13248  ;;  %v12338_v52 = vpack.c.bf16 %v608_v60, %v594_v23  ;;  %v13240_v44 = vunpack.i.l.bf16 %v13239_v51  ;;  %v13241_v42 = vunpack.i.h.bf16 %v13239_v51  ;;  %v20952_v59 = vunpack.i.h.bf16 %v16035_v25 }
 0x123   :  { %12303 = vmatpush1.bf16.msra.mxu1 %v12302_v1  ;;  %v13251_v17 = vunpack.i.h.bf16 %v13249_v34  ;;  %v13250_v18 = vunpack.i.l.bf16 %v13249_v34  ;;  %12337 = vmatprep.subr.bf16.mxu0 %v12336_v4  ;;  %v20953_v53 = vunpack.i.l.bf16 %v16188_v24  ;;  %v20954_v23 = vunpack.i.h.bf16 %v16188_v24 }
 0x124   :  { %v536_v1 = vsel %vm529_vm2, %v20951_v39, %v13240_v44  ;;  %12339 = vmatpush1.bf16.msra.mxu0 %v12338_v52  ;;  %vm15285_vm15 = vmmov 0  }
 0x125   :  { %v550_v6 = vsel %vm529_vm2, %v20952_v59, %v13251_v17  ;;  %v537_v60 = vsel %vm529_vm2, %v13240_v44, %v20953_v53  ;;  %v551_v15 = vsel %vm529_vm2, %v13251_v17, %v20954_v23  ;;  %v13254_v54 = vpop.permute.xlu0 %13253  ;;  %v543_v44 = vsel %vm529_vm2, %v13241_v42, %v13250_v18 }
 0x126   :  { %11001 = vmatmul.mubr.msk.f32.vlgmr.msra.gmra.mrb[0].mxu1 %vm698_vm3, %v16301_v33  ;;  %v16532_v46 = vpop.permute.xlu1 %13258  ;;  %v12316_v51 = vpack.c.bf16 %v551_v15, %v537_v60  ;;  %v12318_v47 = vpack.c.bf16 %v550_v6, %v536_v1  ;;  %v13256_v34 = vunpack.i.h.bf16 %v13254_v54  ;;  %v13255_v25 = vunpack.i.l.bf16 %v13254_v54 }
 0x127   :  { %852 = vmatprep.mubr.f32.mxu1 %v20918_v8  ;;  %v13261_v4 = vunpack.i.h.bf16 %v16532_v46  ;;  %v13260_v52 = vunpack.i.l.bf16 %v16532_v46  ;;  %11007 = vmatmul.mubr.msk.f32.vlgmr.msra.gmra.mrb[8].mxu0 %vm698_vm3, %v16301_v33 }
 0x128   :  { %12317 = vmatprep.subr.bf16.mxu1 %v12316_v51  ;;  %v557_v39 = vsel %vm529_vm2, %v13255_v25, %v13256_v34  ;;  %1083 = vmatprep.mubr.f32.mxu0 %v20918_v8  ;;  %v20956_v51 = vunpack.i.h.bf16 %v16309_v41 }
 0x129   :  { %v556_v24 = vsel %vm529_vm2, %v13261_v4, %v13255_v25  ;;  %v542_v17 = vsel %vm529_vm2, %v13260_v52, %v13241_v42  ;;  %12319 = vmatpush1.bf16.msra.mxu1 %v12318_v47  ;;  %v13264_v1 = vpop.permute.xlu0 %13263  ;;  %v12352_v6 = vpack.c.bf16 %v557_v39, %v543_v44  ;;  %v20955_v42 = vunpack.i.h.bf16 %v16296_v19 }
 0x12a   :  { %v13269_v59 = vpop.permute.xlu1 %13268  ;;  %v12354_v18 = vpack.c.bf16 %v556_v24, %v542_v17  ;;  %11002 = vmatmul.mubr.msk.f32.gmra.mrb[2].mxu1 %vm698_vm3, %v16346_v26  ;;  %v13265_v53 = vunpack.i.l.bf16 %v13264_v1  ;;  %v13266_v23 = vunpack.i.h.bf16 %v13264_v1 }
 0x12b   :  { %v13271_v60 = vunpack.i.h.bf16 %v13269_v59  ;;  %1000 = vmatprep.mubr.f32.mxu1 %v20918_v8  ;;  %v13270_v15 = vunpack.i.l.bf16 %v13269_v59  ;;  %12353 = vmatprep.subr.bf16.mxu0 %v12352_v6 }
 0x12c   :  { %11008 = vmatmul.mubr.msk.f32.gmra.mrb[10].mxu0 %vm698_vm3, %v16346_v26  ;;  %v564_v54 = vsel %vm529_vm2, %v20955_v42, %v13265_v53  ;;  %v565_v34 = vsel %vm529_vm2, %v13265_v53, %v13220_v5 }
 0x12d   :  { %v578_v47 = vsel %vm529_vm2, %v20956_v51, %v13271_v60  ;;  %12355 = vmatpush1.bf16.msra.mxu0 %v12354_v18  ;;  %v579_v25 = vsel %vm529_vm2, %v13271_v60, %v13221_v9  ;;  %v13274_v44 = vpop.permute.xlu0 %13273  ;;  %1231 = vmatprep.mubr.f32.mxu0 %v20918_v8  ;;  %v571_v5 = vsel %vm529_vm2, %v13266_v23, %v13270_v15 }
 0x12e   :  { %v16565_v24 = vpop.permute.xlu1 %13278  ;;  %v12320_v17 = vpack.c.bf16 %v579_v25, %v565_v34  ;;  %v12322_v19 = vpack.c.bf16 %v578_v47, %v564_v54  ;;  %v13276_v39 = vunpack.i.h.bf16 %v13274_v44  ;;  %v13275_v41 = vunpack.i.l.bf16 %v13274_v44 }
 0x12f   :  { %v13281_v1 = vunpack.i.h.bf16 %v16565_v24  ;;  %v13280_v59 = vunpack.i.l.bf16 %v16565_v24  ;;  %v20957_v25 = vunpack.i.h.bf16 %v16340_v29 }
 0x130   :  { %12321 = vmatprep.subr.bf16.mxu1 %v12320_v17  ;;  %v585_v6 = vsel %vm529_vm2, %v13275_v41, %v13276_v39  ;;  %v20958_v17 = vunpack.i.h.bf16 %v16366_v28 }
 0x131   :  { %v584_v40 = vsel %vm529_vm2, %v13281_v1, %v13275_v41  ;;  %v570_v9 = vsel %vm529_vm2, %v13280_v59, %v13266_v23  ;;  %12323 = vmatpush1.bf16.msra.mxu1 %v12322_v19  ;;  %v13284_v18 = vpop.permute.xlu0 %13283  ;;  %v12356_v60 = vpack.c.bf16 %v585_v6, %v571_v5 }
 0x132   :  { %v13289_v53 = vpop.permute.xlu1 %13288  ;;  %v12358_v42 = vpack.c.bf16 %v584_v40, %v570_v9  ;;  %v13285_v54 = vunpack.i.l.bf16 %v13284_v18  ;;  %v13286_v47 = vunpack.i.h.bf16 %v13284_v18 }
 0x133   :  { %v13291_v51 = vunpack.i.h.bf16 %v13289_v53  ;;  %v13290_v34 = vunpack.i.l.bf16 %v13289_v53  ;;  %12357 = vmatprep.subr.bf16.mxu0 %v12356_v60 }
 0x134   :  { %v592_v44 = vsel %vm529_vm2, %v20957_v25, %v13285_v54  ;;  %12359 = vmatpush1.bf16.msra.mxu0 %v12358_v42  ;;  %v593_v23 = vsel %vm529_vm2, %v13285_v54, %v13245_v48 }
 0x135   :  { %v606_v19 = vsel %vm529_vm2, %v20958_v17, %v13291_v51  ;;  %v607_v15 = vsel %vm529_vm2, %v13291_v51, %v13246_v36  ;;  %v13294_v39 = vpop.permute.xlu0 %13293  ;;  %v599_v48 = vsel %vm529_vm2, %v13286_v47, %v13290_v34  ;;  %v12364_v51 = vpack.c.bf16 %v16122_v11, %v16117_v14  ;;  %v15230_v14 = vld [vmem:[%s20733_s0] sm:$0xff] }
 0x136   :  { %v13299_v41 = vpop.permute.xlu1 %13298  ;;  %v12324_v40 = vpack.c.bf16 %v607_v15, %v593_v23  ;;  %v12326_v9 = vpack.c.bf16 %v606_v19, %v592_v44  ;;  %v13296_v29 = vunpack.i.h.bf16 %v13294_v39  ;;  %v13295_v5 = vunpack.i.l.bf16 %v13294_v39  ;;  %v15231_v11 = vld [vmem:[%s20733_s0 + $0x80] sm:$0xff] }
 0x137   :  { %v13301_v6 = vunpack.i.h.bf16 %v13299_v41  ;;  %v13300_v18 = vunpack.i.l.bf16 %v13299_v41  ;;  %v20959_v23 = vunpack.i.h.bf16 %v16186_v20  ;;  %v20960_v34 = vunpack.i.l.bf16 %v16050_v31 }
 0x138   :  { %12325 = vmatprep.subr.bf16.mxu1 %v12324_v40  ;;  %v613_v7 = vsel %vm529_vm2, %v13295_v5, %v13296_v29  ;;  %v12366_v39 = vpack.c.bf16 %v15231_v11, %v15230_v14  ;;  %v15238_v14 = vld [vmem:[%s20733_s0 + $0x90] sm:$0xff] }
 0x139   :  { %v612_v28 = vsel %vm529_vm2, %v13301_v6, %v13295_v5  ;;  %v598_v53 = vsel %vm529_vm2, %v13300_v18, %v13286_v47  ;;  %12327 = vmatpush1.bf16.msra.mxu1 %v12326_v9  ;;  %v13304_v60 = vpop.permute.xlu0 %13303  ;;  %v12360_v42 = vpack.c.bf16 %v613_v7, %v599_v48  ;;  %v15239_v11 = vld [vmem:[%s20733_s0 + $0x10] sm:$0xff] }
 0x13a   :  { %v13309_v36 = vpop.permute.xlu1 %13308  ;;  %v12362_v54 = vpack.c.bf16 %v612_v28, %v598_v53  ;;  %v13306_v25 = vunpack.i.h.bf16 %v13304_v60  ;;  %v13305_v44 = vunpack.i.l.bf16 %v13304_v60 }
 0x13b   :  { %v13310_v17 = vunpack.i.l.bf16 %v13309_v36  ;;  %v13311_v19 = vunpack.i.h.bf16 %v13309_v36  ;;  %12361 = vmatprep.subr.bf16.mxu0 %v12360_v42 }
 0x13c   :  { %11005 = vmatmul.mubr.msk.f32.vlgmr.msra.gmra.mrb[4].mxu1 %vm698_vm3, %v16301_v33  ;;  %v554_v47 = vsel %vm529_vm2, %v20959_v23, %v13306_v25  ;;  %v540_v15 = vsel %vm529_vm2, %v20960_v34, %v13305_v44  ;;  %12363 = vmatpush1.bf16.msra.mxu0 %v12362_v54  ;;  %v541_v20 = vsel %vm529_vm2, %v13305_v44, %v13260_v52  ;;  %v20966_v44 = vld [vmem:[#allocation12_spill] sm:$0xff]  ;;  %v15237_v23 = vld [vmem:[%s20733_s0 + $0xa0] sm:$0xff] }
 0x13d   :  { %v13314_v41 = vpop.permute.xlu0 %13313  ;;  %v555_v31 = vsel %vm529_vm2, %v13306_v25, %v13261_v4  ;;  %12365 = vmatprep.subr.bf16.mxu0 %v12364_v51  ;;  %v12342_v5 = vpack.c.bf16 %v554_v47, %v540_v15  ;;  %v569_v28 = vsel %vm529_vm2, %v13310_v17, %v13280_v59  ;;  %1006 = vmatprep.mubr.f32.mxu1 %v20918_v8 }
 0x13e   :  { %v16608_v40 = vpop.permute.xlu1 %13318  ;;  %v13316_v9 = vunpack.i.h.bf16 %v13314_v41  ;;  %v13315_v29 = vunpack.i.l.bf16 %v13314_v41  ;;  %v12340_v53 = vpack.c.bf16 %v555_v31, %v541_v20  ;;  %v583_v52 = vsel %vm529_vm2, %v13311_v19, %v13281_v1  ;;  %v16703_v41 = vld [vmem:[%s20734_s1 + $0x8] sm:$0xff] }
 0x13f   :  { %11011 = vmatmul.mubr.msk.f32.vlgmr.msra.gmra.mrb[12].mxu0 %vm698_vm3, %v16301_v33  ;;  %v582_v46 = vsel %vm529_vm2, %v13216_v21, %v13311_v19  ;;  %v568_v4 = vsel %vm529_vm2, %v13210_v37, %v13310_v17  ;;  %v12344_v24 = vpack.c.bf16 %v583_v52, %v569_v28  ;;  %v20961_v1 = vpack.c.bf16 %v15536_v2, %v15539_v3  ;;  %v20962_v37 = vld [vmem:[#allocation9_spill] sm:$0xff]  ;;  %v20963_v21 = vld [vmem:[#allocation7_spill] sm:$0xff]  ;;  %v20974_v28 = vld [vmem:[#allocation8_spill] sm:$0xff] }
 0x140   :  { %11006 = vmatmul.mubr.msk.f32.gmra.mrb[6].mxu1 %vm698_vm3, %v16346_v26  ;;  %12367 = vmatpush1.bf16.msra.mxu0 %v12366_v39  ;;  %v597_v7 = vsel %vm529_vm2, %v13315_v29, %v13300_v18  ;;  %v611_v45 = vsel %vm529_vm2, %v13316_v9, %v13301_v6  ;;  %v12346_v49 = vpack.c.bf16 %v582_v46, %v568_v4  ;;  %v15232_v2 = vld [vmem:[%s20733_s0 + $0xa8] sm:$0xff] }
 0x141   :  { %12341 = vmatprep.subr.bf16.mxu1 %v12340_v53  ;;  %v16631_v59 = vpop.permute.xlu0 %13323  ;;  %12369 = vmatprep.subr.bf16.mxu0 %v20961_v1  ;;  %v20964_v60 = vpack.c.bf16 %v20962_v37, %v20963_v21  ;;  %v15233_v3 = vld [vmem:[%s20733_s0 + $0x28] sm:$0xff]  ;;  %v596_v18 = vsel %vm529_vm2, %v13230_v63, %v13315_v29  ;;  %v610_v36 = vsel %vm529_vm2, %v13236_v27, %v13316_v9  ;;  %v15235_v63 = vld [vmem:[%s20733_s0 + $0x18] sm:$0xff] }
 0x142   :  { %v16633_v48 = vpop.permute.xlu1 %13328  ;;  %12343 = vmatpush1.bf16.msra.mxu1 %v12342_v5  ;;  %1237 = vmatprep.mubr.f32.mxu0 %v20918_v8  ;;  %v12388_v6 = vpack.c.bf16 %v15232_v2, %v15233_v3  ;;  %v12348_v51 = vpack.c.bf16 %v611_v45, %v597_v7  ;;  %v20965_v25 = vpack.c.bf16 %v15596_v32, %v15562_v16  ;;  %v20967_v17 = vld [vmem:[#allocation11_spill] sm:$0xff]  ;;  %v16679_v16 = vld [vmem:[%s20734_s1] sm:$0xff] }
 0x143   :  { %12345 = vmatprep.subr.bf16.mxu1 %v12344_v24  ;;  %11012 = vmatmul.mubr.msk.f32.gmra.mrb[14].mxu0 %vm698_vm3, %v16346_v26  ;;  %v12376_v13 = vpack.c.bf16 %v15234_v30, %v15235_v63  ;;  %v12350_v27 = vpack.c.bf16 %v610_v36, %v596_v18  ;;  %v20968_v19 = vpack.c.bf16 %v20966_v44, %v20967_v17  ;;  %v15236_v32 = vld [vmem:[%s20733_s0 + $0x20] sm:$0xff]  ;;  %v20977_v53 = vld [vmem:[#allocation19_spill] sm:$0xff]  ;;  %v20983_v24 = vld [vmem:[#allocation60_spill] sm:$0xff]  ;;  %v13320_v63 = vunpack.i.l.bf16 %v16608_v40 }
 0x144   :  { %12371 = vmatpush1.bf16.msra.mxu0 %v20964_v60  ;;  %1154 = vmatprep.mubr.f32.mxu1 %v20918_v8  ;;  %v12390_v47 = vpack.c.bf16 %v15237_v23, %v15236_v32  ;;  %v12378_v39 = vpack.c.bf16 %v15238_v14, %v15239_v11  ;;  %v20969_v9 = vpack.c.bf16 %v15648_v61, %v15615_v43  ;;  %v20982_v4 = vld [vmem:[#allocation59_spill] sm:$0xff]  ;;  %v20985_v37 = vld [vmem:[#allocation10_spill] sm:$0xff]  ;;  %v20987_v60 = vld [vmem:[#allocation57_spill] sm:$0xff]  ;;  %v13330_v44 = vunpack.i.l.bf16 %v16633_v48 }
 0x145   :  { %v16659_v42 = vpop.permute.xlu0 %13333  ;;  %12373 = vmatprep.subr.bf16.mxu0 %v20965_v25  ;;  %1314 = vmatprep.mubr.f32.mxu0 %v20918_v8  ;;  %v20970_v29 = vpack.c.bf16 %v15658_v58, %v15641_v57  ;;  %v20972_v61 = vpack.c.bf16 %v15709_v62, %v15673_v22  ;;  %v12412_v57 = vpack.c.bf16 %v16211_v38, %v16199_v10  ;;  %v20973_v58 = vld [vmem:[#allocation6_spill] sm:$0xff]  ;;  %v15240_v22 = vld [vmem:[%s20733_s0 + $0x38] sm:$0xff]  ;;  %v13326_v17 = vunpack.i.h.bf16 %v16631_v59 }
 0x146   :  { %v16661_v54 = vpop.permute.xlu1 %13338  ;;  %12347 = vmatpush1.bf16.msra.mxu1 %v12346_v49  ;;  %v15241_v62 = vld [vmem:[%s20733_s0 + $0xb8] sm:$0xff]  ;;  %v20979_v10 = vld [vmem:[#allocation18_spill] sm:$0xff]  ;;  %v12414_v1 = vpack.c.bf16 %v20983_v24, %v20982_v4 }
 0x147   :  { %12349 = vmatprep.subr.bf16.mxu1 %v12348_v51  ;;  %v20980_v38 = vld [vmem:[#allocation17_spill] sm:$0xff]  ;;  %v20988_v2 = vld [vmem:[#allocation58_spill] sm:$0xff]  ;;  %v20989_v51 = vld [vmem:[#allocation27_spill] sm:$0xff]  ;;  %v13341_v32 = vunpack.i.h.bf16 %v16661_v54  ;;  %v13340_v23 = vunpack.i.l.bf16 %v16661_v54 }
 0x148   :  { %12375 = vmatpush1.bf16.msra.mxu0 %v20968_v19  ;;  %v20981_v46 = vpack.c.bf16 %v20979_v10, %v20980_v38  ;;  %v20984_v49 = vld [vmem:[#allocation13_spill] sm:$0xff]  ;;  %v12402_v3 = vpack.c.bf16 %v20988_v2, %v20987_v60  ;;  %v20990_v25 = vld [vmem:[#allocation22_spill] sm:$0xff]  ;;  %v13335_v19 = vunpack.i.l.bf16 %v16659_v42  ;;  %v20998_v54 = vld [vmem:[#allocation35_spill] sm:$0xff] }
 0x149   :  { %v16687_v34 = vpop.permute.xlu0 %13343  ;;  %12389 = vmatprep.subr.bf16.mxu0 %v12388_v6  ;;  %v20986_v21 = vpack.c.bf16 %v20984_v49, %v20985_v37  ;;  %v13321_v6 = vunpack.i.h.bf16 %v16608_v40  ;;  %v20991_v30 = vpack.c.bf16 %v20989_v51, %v20990_v25  ;;  %v20993_v14 = vld [vmem:[#allocation26_spill] sm:$0xff]  ;;  %v20995_v11 = vld [vmem:[#allocation25_spill] sm:$0xff]  ;;  %v21002_v38 = vld [vmem:[#allocation15_spill] sm:$0xff]  ;;  %v16836_v37 = vsel %vm1983_vm4, %v13340_v23, %v13320_v63 }
 0x14a   :  { %v16689_v15 = vpop.permute.xlu1 %13348  ;;  %12351 = vmatpush1.bf16.msra.mxu1 %v12350_v27  ;;  %v13331_v27 = vunpack.i.h.bf16 %v16633_v48  ;;  %v13336_v48 = vunpack.i.h.bf16 %v16659_v42  ;;  %v21005_v60 = vld [vmem:[#allocation37_spill] sm:$0xff]  ;;  %v21006_v2 = vld [vmem:[#allocation34_spill] sm:$0xff]  ;;  %v13346_v51 = vunpack.i.h.bf16 %v16687_v34  ;;  %v13345_v25 = vunpack.i.l.bf16 %v16687_v34 }
 0x14b   :  { %12377 = vmatprep.subr.bf16.mxu1 %v12376_v13  ;;  %11013 = vmatmul.mubr.msk.f32.vlgmr.msra.gmra.mrb[0].mxu0 %vm698_vm3, %v16679_v16  ;;  %v13325_v13 = vunpack.i.l.bf16 %v16631_v59  ;;  %v16827_v24 = vsel %vm1983_vm4, %v13320_v63, %v13321_v6  ;;  %v21008_v63 = vld [vmem:[#allocation33_spill] sm:$0xff] }
 0x14c   :  { %12391 = vmatpush1.bf16.msra.mxu0 %v12390_v47  ;;  %1320 = vmatprep.mubr.f32.mxu0 %v20918_v8  ;;  %v20992_v47 = vld [vmem:[#allocation29_spill] sm:$0xff]  ;;  %v16833_v49 = vsel %vm1983_vm4, %v13331_v27, %v13335_v19 }
 0x14d   :  { %11009 = vmatmul.mubr.msk.f32.vlgmr.msra.gmra.mrb[8].mxu1 %vm698_vm3, %v16301_v33  ;;  %v16707_v20 = vpop.permute.xlu0 %13353  ;;  %12393 = vmatprep.subr.bf16.mxu0 %v20969_v9  ;;  %v20971_v33 = vpack.c.bf16 %v15636_v56, %v15633_v55  ;;  %v20975_v55 = vpack.c.bf16 %v20973_v58, %v20974_v28  ;;  %v20976_v56 = vld [vmem:[#allocation21_spill] sm:$0xff]  ;;  %v20994_v40 = vpack.c.bf16 %v20992_v47, %v20993_v14 }
 0x14e   :  { %v16709_v31 = vpop.permute.xlu1 %13358  ;;  %12379 = vmatpush1.bf16.msra.mxu1 %v12378_v39  ;;  %1160 = vmatprep.mubr.f32.mxu1 %v20918_v8  ;;  %v20978_v52 = vpack.c.bf16 %v20976_v56, %v20977_v53  ;;  %v20996_v39 = vld [vmem:[#allocation24_spill] sm:$0xff]  ;;  %v15244_v56 = vld [vmem:[%s20733_s0 + $0xe8] sm:$0xff]  ;;  %v16820_v10 = vsel %vm1983_vm4, %v13321_v6, %v13325_v13  ;;  %v16847_v6 = vsel %vm1983_vm4, %v13325_v13, %v13326_v17  ;;  %v13355_v13 = vunpack.i.l.bf16 %v16707_v20 }
 0x14f   :  { %12381 = vmatprep.subr.bf16.mxu1 %v20970_v29  ;;  %11014 = vmatmul.mubr.msk.f32.gmra.mrb[2].mxu0 %vm698_vm3, %v16703_v41  ;;  %v20997_v9 = vpack.c.bf16 %v20995_v11, %v20996_v39  ;;  %v15242_v58 = vld [vmem:[%s20733_s0 + $0x58] sm:$0xff]  ;;  %v21001_v53 = vld [vmem:[#allocation47_spill] sm:$0xff]  ;;  %v13361_v47 = vunpack.i.h.bf16 %v16709_v31  ;;  %v13360_v14 = vunpack.i.l.bf16 %v16709_v31 }
 0x150   :  { %12395 = vmatpush1.bf16.msra.mxu0 %v20971_v33  ;;  %1468 = vmatprep.mubr.f32.mxu0 %v20918_v8  ;;  %v15243_v28 = vld [vmem:[%s20733_s0 + $0xd8] sm:$0xff] }
 0x151   :  { %v16724_v5 = vpop.permute.xlu0 %13363  ;;  %12397 = vmatprep.subr.bf16.mxu0 %v20972_v61  ;;  %11010 = vmatmul.mubr.msk.f32.gmra.mrb[10].mxu1 %vm698_vm3, %v16346_v26  ;;  %v12400_v26 = vpack.c.bf16 %v15241_v62, %v15240_v22  ;;  %v20999_v61 = vld [vmem:[#allocation30_spill] sm:$0xff]  ;;  %v21011_v11 = vld [vmem:[#allocation20_spill] sm:$0xff] }
 0x152   :  { %v16726_v43 = vpop.permute.xlu1 %13368  ;;  %12383 = vmatpush1.bf16.msra.mxu1 %v20975_v55  ;;  %1391 = vmatprep.mubr.f32.mxu1 %v20918_v8  ;;  %v12424_v55 = vpack.c.bf16 %v15243_v28, %v15242_v58  ;;  %v15245_v22 = vld [vmem:[%s20733_s0 + $0x60] sm:$0xff]  ;;  %v21012_v39 = vld [vmem:[#allocation16_spill] sm:$0xff] }
 0x153   :  { %12385 = vmatprep.subr.bf16.mxu1 %v20978_v52  ;;  %v12436_v52 = vpack.c.bf16 %v15244_v56, %v21001_v53  ;;  %v15246_v62 = vld [vmem:[%s20733_s0 + $0xe0] sm:$0xff]  ;;  %v16889_v53 = vsel %vm1983_vm4, %v13345_v25, %v13346_v51 }
 0x154   :  { %12399 = vmatpush1.bf16.msra.mxu0 %v20981_v46  ;;  %v21003_v46 = vld [vmem:[#allocation14_spill] sm:$0xff] }
 0x155   :  { %v16753_v7 = vpop.permute.xlu0 %13373  ;;  %12413 = vmatprep.subr.bf16.mxu0 %v12412_v57  ;;  %v21000_v57 = vpack.c.bf16 %v20998_v54, %v20999_v61  ;;  %v21004_v4 = vpack.c.bf16 %v21002_v38, %v21003_v46  ;;  %v21014_v54 = vld [vmem:[#allocation61_spill] sm:$0xff]  ;;  %v21017_v46 = vld [vmem:[#allocation40_spill] sm:$0xff] }
 0x156   :  { %v16755_v45 = vpop.permute.xlu1 %13378  ;;  %12387 = vmatpush1.bf16.msra.mxu1 %v20986_v21  ;;  %v16839_v21 = vsel %vm1983_vm4, %v13341_v32, %v13330_v44  ;;  %v13356_v32 = vunpack.i.h.bf16 %v16707_v20 }
 0x157   :  { %12401 = vmatprep.subr.bf16.mxu1 %v12400_v26  ;;  %11017 = vmatmul.mubr.msk.f32.vlgmr.msra.gmra.mrb[4].mxu0 %vm698_vm3, %v16679_v16  ;;  %v12438_v26 = vpack.c.bf16 %v15246_v62, %v15245_v22  ;;  %v12450_v28 = vpack.c.bf16 %v16839_v21, %v16836_v37  ;;  %v13365_v22 = vunpack.i.l.bf16 %v16724_v5 }
 0x158   :  { %12415 = vmatpush1.bf16.msra.mxu0 %v12414_v1  ;;  %1474 = vmatprep.mubr.f32.mxu0 %v20918_v8  ;;  %v16830_v1 = vsel %vm1983_vm4, %v13330_v44, %v13331_v27  ;;  %v21009_v27 = vld [vmem:[#allocation32_spill] sm:$0xff]  ;;  %v16858_v44 = vsel %vm1983_vm4, %v13335_v19, %v13336_v48  ;;  %v21015_v19 = vld [vmem:[#allocation62_spill] sm:$0xff] }
 0x159   :  { %11015 = vmatmul.mubr.msk.f32.vlgmr.msra.gmra.mrb[0].mxu1 %vm698_vm3, %v16679_v16  ;;  %v16768_v18 = vpop.permute.xlu0 %13383  ;;  %12417 = vmatprep.subr.bf16.mxu0 %v20991_v30  ;;  %v13350_v30 = vunpack.i.l.bf16 %v16689_v15  ;;  %v21010_v23 = vpack.c.bf16 %v21008_v63, %v21009_v27  ;;  %v12426_v61 = vpack.c.bf16 %v21015_v19, %v21014_v54  ;;  %v12448_v20 = vpack.c.bf16 %v16830_v1, %v16827_v24 }
 0x15a   :  { %v16770_v36 = vpop.permute.xlu1 %13388  ;;  %12403 = vmatpush1.bf16.msra.mxu1 %v12402_v3  ;;  %1397 = vmatprep.mubr.f32.mxu1 %v20918_v8  ;;  %v21007_v3 = vpack.c.bf16 %v21005_v60, %v21006_v2  ;;  %v12460_v58 = vpack.c.bf16 %v16858_v44, %v16847_v6  ;;  %v16905_v24 = vsel %vm1983_vm4, %v13355_v13, %v13356_v32  ;;  %v13366_v60 = vunpack.i.h.bf16 %v16724_v5 }
 0x15b   :  { %12405 = vmatprep.subr.bf16.mxu1 %v20994_v40  ;;  %11018 = vmatmul.mubr.msk.f32.gmra.mrb[6].mxu0 %vm698_vm3, %v16703_v41  ;;  %v16883_v56 = vsel %vm1983_vm4, %v13346_v51, %v13350_v30  ;;  %v16910_v1 = vsel %vm1983_vm4, %v13360_v14, %v13361_v47  ;;  %v13381_v2 = vunpack.i.h.bf16 %v16755_v45  ;;  %v13385_v51 = vunpack.i.l.bf16 %v16768_v18 }
 0x15c   :  { %12419 = vmatpush1.bf16.msra.mxu0 %v20997_v9  ;;  %1622 = vmatprep.mubr.f32.mxu0 %v20918_v8  ;;  %v21013_v9 = vpack.c.bf16 %v21011_v11, %v21012_v39  ;;  %v13386_v63 = vunpack.i.h.bf16 %v16768_v18  ;;  %v13391_v27 = vunpack.i.h.bf16 %v16770_v36  ;;  %v13370_v39 = vunpack.i.l.bf16 %v16726_v43 }
 0x15d   :  { %v16794_v29 = vpop.permute.xlu0 %13393  ;;  %12421 = vmatprep.subr.bf16.mxu0 %v21000_v57  ;;  %11016 = vmatmul.mubr.msk.f32.gmra.mrb[2].mxu1 %vm698_vm3, %v16703_v41  ;;  %v13351_v57 = vunpack.i.h.bf16 %v16689_v15  ;;  %v16941_v19 = vsel %vm1983_vm4, %v13365_v22, %v13345_v25  ;;  %v2026_v25 = vsel %vm1983_vm4, %v13366_v60, %v13355_v13  ;;  %v16958_v22 = vsel %vm1983_vm4, %v13381_v2, %v13385_v51  ;;  %v21029_v13 = vld [vmem:[#allocation56_spill] sm:$0xff]  ;;  %v21030_v60 = vld [vmem:[#allocation55_spill] sm:$0xff] }
 0x15e   :  { %v16796_v33 = vpop.permute.xlu1 %13398  ;;  %12407 = vmatpush1.bf16.msra.mxu1 %v21004_v4  ;;  %1545 = vmatprep.mubr.f32.mxu1 %v20918_v8 }
 0x15f   :  { %12409 = vmatprep.subr.bf16.mxu1 %v21007_v3  ;;  %v13380_v3 = vunpack.i.l.bf16 %v16755_v45  ;;  %v16928_v5 = vsel %vm1983_vm4, %v13350_v30, %v13351_v57  ;;  %v13371_v45 = vunpack.i.h.bf16 %v16726_v43  ;;  %v13376_v30 = vunpack.i.h.bf16 %v16753_v7 }
 0x160   :  { %12423 = vmatpush1.bf16.msra.mxu0 %v21010_v23  ;;  %v13390_v23 = vunpack.i.l.bf16 %v16770_v36  ;;  %v12452_v36 = vpack.c.bf16 %v16905_v24, %v16889_v53  ;;  %v12464_v54 = vpack.c.bf16 %v16910_v1, %v16928_v5  ;;  %v21027_v24 = vld [vmem:[#allocation23_spill] sm:$0xff] }
 0x161   :  { %v16864_v34 = vpop.permute.xlu0 %13403  ;;  %12437 = vmatprep.subr.bf16.mxu0 %v12436_v52  ;;  %v16892_v52 = vsel %vm1983_vm4, %v13356_v32, %v13360_v14  ;;  %v21019_v32 = vld [vmem:[#allocation54_spill] sm:$0xff]  ;;  %v21020_v14 = vld [vmem:[#allocation53_spill] sm:$0xff] }
 0x162   :  { %v16866_v40 = vpop.permute.xlu1 %13408  ;;  %12411 = vmatpush1.bf16.msra.mxu1 %v21013_v9  ;;  %v21021_v11 = vpack.c.bf16 %v21019_v32, %v21020_v14  ;;  %v21022_v9 = vpack.c.bf16 %v15933_v35, %v15929_v0  ;;  %v21023_v0 = vld [vmem:[#allocation42_spill] sm:$0xff]  ;;  %v21024_v35 = vld [vmem:[#allocation43_spill] sm:$0xff]  ;;  %v12466_v53 = vpack.c.bf16 %v16892_v52, %v16883_v56  ;;  %v2055_v14 = vsel %vm1983_vm4, %v13380_v3, %v13381_v2 }
 0x163   :  { %12425 = vmatprep.subr.bf16.mxu1 %v12424_v55  ;;  %11021 = vmatmul.mubr.msk.f32.vlgmr.msra.gmra.mrb[8].mxu0 %vm698_vm3, %v16679_v16  ;;  %v12462_v55 = vpack.c.bf16 %v16833_v49, %v16820_v10  ;;  %v13401_v2 = vunpack.i.h.bf16 %v16796_v33  ;;  %v13406_v6 = vunpack.i.h.bf16 %v16864_v34  ;;  %v13405_v44 = vunpack.i.l.bf16 %v16864_v34 }
 0x164   :  { %12439 = vmatpush1.bf16.msra.mxu0 %v12438_v26  ;;  %1628 = vmatprep.mubr.f32.mxu0 %v20918_v8  ;;  %v21016_v26 = vld [vmem:[#allocation39_spill] sm:$0xff]  ;;  %v13410_v42 = vunpack.i.l.bf16 %v16866_v40 }
 0x165   :  { %11019 = vmatmul.mubr.msk.f32.vlgmr.msra.gmra.mrb[4].mxu1 %vm698_vm3, %v16679_v16  ;;  %v16897_v62 = vpop.permute.xlu0 %13413  ;;  %v21018_v4 = vpack.c.bf16 %v21016_v26, %v21017_v46  ;;  %v21025_v46 = vpack.c.bf16 %v21023_v0, %v21024_v35  ;;  %v13395_v0 = vunpack.i.l.bf16 %v16794_v29  ;;  %v21031_v35 = vpack.c.bf16 %v21029_v13, %v21030_v60  ;;  %v21033_v60 = vld [vmem:[#allocation36_spill] sm:$0xff] }
 0x166   :  { %v16899_v38 = vpop.permute.xlu1 %13418  ;;  %12427 = vmatpush1.bf16.msra.mxu1 %v12426_v61  ;;  %1551 = vmatprep.mubr.f32.mxu1 %v20918_v8  ;;  %v13375_v61 = vunpack.i.l.bf16 %v16753_v7  ;;  %v13416_v37 = vunpack.i.h.bf16 %v16897_v62  ;;  %v13415_v21 = vunpack.i.l.bf16 %v16897_v62  ;;  %v17074_v5 = vsel %vm1983_vm4, %v13351_v57, %v13405_v44  ;;  %v17142_v7 = vld [vmem:[%s20734_s1 + $0x28] sm:$0xff] }
 0x167   :  { %12441 = vmatprep.subr.bf16.mxu0 %v21018_v4  ;;  %12429 = vmatprep.subr.bf16.mxu1 %v21021_v11  ;;  %v21026_v4 = vld [vmem:[#allocation28_spill] sm:$0xff]  ;;  %v16966_v11 = vsel %vm1983_vm4, %v13390_v23, %v13370_v39  ;;  %v13400_v23 = vunpack.i.l.bf16 %v16796_v33  ;;  %v2017_v57 = vsel %vm1983_vm4, %v13405_v44, %v13406_v6 }
 0x168   :  { %11022 = vmatmul.mubr.msk.f32.gmra.mrb[10].mxu0 %vm698_vm3, %v16703_v41  ;;  %v21028_v32 = vpack.c.bf16 %v21026_v4, %v21027_v24  ;;  %v13396_v4 = vunpack.i.h.bf16 %v16794_v29  ;;  %v16988_v24 = vsel %vm1983_vm4, %v13371_v45, %v13375_v61  ;;  %v2043_v29 = vsel %vm1983_vm4, %v13375_v61, %v13376_v30 }
 0x169   :  { %12443 = vmatpush1.bf16.msra.mxu0 %v21022_v9  ;;  %1776 = vmatprep.mubr.f32.mxu0 %v20918_v8  ;;  %v16945_v43 = vpop.permute.xlu0 %13423  ;;  %v16969_v9 = vsel %vm1983_vm4, %v13391_v27, %v13380_v3  ;;  %v21032_v3 = vpack.c.bf16 %v15954_v12, %v20949_v50  ;;  %v2041_v27 = vsel %vm1983_vm4, %v13370_v39, %v13371_v45  ;;  %v21034_v12 = vld [vmem:[#allocation31_spill] sm:$0xff] }
 0x16a   :  { %v16947_v26 = vpop.permute.xlu1 %13428  ;;  %12445 = vmatprep.subr.bf16.mxu0 %v21025_v46  ;;  %11020 = vmatmul.mubr.msk.f32.gmra.mrb[6].mxu1 %vm698_vm3, %v16703_v41  ;;  %v16978_v46 = vsel %vm1983_vm4, %v13385_v51, %v13386_v63  ;;  %v12454_v51 = vpack.c.bf16 %v2026_v25, %v16941_v19  ;;  %v12456_v13 = vpack.c.bf16 %v2055_v14, %v2041_v27  ;;  %v13425_v33 = vunpack.i.l.bf16 %v16945_v43 }
 0x16b   :  { %12431 = vmatpush1.bf16.msra.mxu1 %v21028_v32  ;;  %1699 = vmatprep.mubr.f32.mxu1 %v20918_v8  ;;  %v21035_v50 = vpack.c.bf16 %v21033_v60, %v21034_v12  ;;  %v12468_v45 = vpack.c.bf16 %v16978_v46, %v2043_v29  ;;  %v12470_v19 = vpack.c.bf16 %v16958_v22, %v16988_v24  ;;  %v13426_v25 = vunpack.i.h.bf16 %v16945_v43 }
 0x16c   :  { %12433 = vmatprep.subr.bf16.mxu1 %v21031_v35  ;;  %v17010_v61 = vsel %vm1983_vm4, %v13326_v17, %v13395_v0  ;;  %v13431_v14 = vunpack.i.h.bf16 %v16947_v26  ;;  %v13430_v35 = vunpack.i.l.bf16 %v16947_v26  ;;  %v17023_v59 = vsel %vm1983_vm4, %v13336_v48, %v13400_v23 }
 0x16d   :  { %12447 = vmatpush1.bf16.msra.mxu0 %v21032_v3  ;;  %v16990_v32 = vpop.permute.xlu0 %13433  ;;  %v1989_v17 = vsel %vm1983_vm4, %v13395_v0, %v13396_v4  ;;  %v1991_v10 = vsel %vm1983_vm4, %v13425_v33, %v13426_v25  ;;  %v2045_v31 = vsel %vm1983_vm4, %v13415_v21, %v13416_v37 }
 0x16e   :  { %12449 = vmatprep.subr.bf16.mxu0 %v12448_v20  ;;  %v17000_v39 = vpop.permute.xlu1 %13438  ;;  %v12458_v20 = vpack.c.bf16 %v16969_v9, %v16966_v11  ;;  %v2003_v11 = vsel %vm1983_vm4, %v13400_v23, %v13401_v2  ;;  %v17043_v9 = vsel %vm1983_vm4, %v13396_v4, %v13425_v33  ;;  %v2005_v49 = vsel %vm1983_vm4, %v13430_v35, %v13431_v14 }
 0x16f   :  { %12435 = vmatpush1.bf16.msra.mxu1 %v21035_v50  ;;  %v13441_v0 = vunpack.i.h.bf16 %v17000_v39  ;;  %v13440_v1 = vunpack.i.l.bf16 %v17000_v39  ;;  %v12472_v46 = vpack.c.bf16 %v2003_v11, %v1989_v17  ;;  %v12474_v4 = vpack.c.bf16 %v17023_v59, %v17010_v61 }
 0x170   :  { %12461 = vmatprep.subr.bf16.mxu1 %v12460_v58  ;;  %11025 = vmatmul.mubr.msk.f32.vlgmr.msra.gmra.mrb[12].mxu0 %vm698_vm3, %v16679_v16  ;;  %v13411_v58 = vunpack.i.h.bf16 %v16866_v40  ;;  %v17053_v40 = vsel %vm1983_vm4, %v13401_v2, %v13430_v35  ;;  %v2030_v2 = vsel %vm1983_vm4, %v13361_v47, %v13410_v42  ;;  %v12484_v23 = vpack.c.bf16 %v2005_v49, %v1991_v10 }
 0x171   :  { %12451 = vmatpush1.bf16.msra.mxu0 %v12450_v28  ;;  %1782 = vmatprep.mubr.f32.mxu0 %v20918_v8  ;;  %v17037_v48 = vpop.permute.xlu0 %13443  ;;  %v13421_v28 = vunpack.i.h.bf16 %v16899_v38  ;;  %v12486_v3 = vpack.c.bf16 %v17053_v40, %v17043_v9  ;;  %v2044_v61 = vsel %vm1983_vm4, %v13376_v30, %v13415_v21  ;;  %v12478_v11 = vpack.c.bf16 %v2030_v2, %v17074_v5 }
 0x172   :  { %11023 = vmatmul.mubr.msk.f32.vlgmr.msra.gmra.mrb[8].mxu1 %vm698_vm3, %v16679_v16  ;;  %12453 = vmatprep.subr.bf16.mxu0 %v12452_v36  ;;  %v13420_v16 = vunpack.i.l.bf16 %v16899_v38  ;;  %v13435_v36 = vunpack.i.l.bf16 %v16990_v32  ;;  %v2032_v52 = vsel %vm1983_vm4, %v13411_v58, %v13440_v1  ;;  %v13445_v29 = vunpack.i.l.bf16 %v17037_v48 }
 0x173   :  { %12463 = vmatpush1.bf16.msra.mxu1 %v12462_v55  ;;  %1705 = vmatprep.mubr.f32.mxu1 %v20918_v8  ;;  %v13436_v55 = vunpack.i.h.bf16 %v16990_v32 }
 0x174   :  { %v17048_v34 = vpop.permute.xlu1 %13448  ;;  %12465 = vmatprep.subr.bf16.mxu1 %v12464_v54  ;;  %11026 = vmatmul.mubr.msk.f32.gmra.mrb[14].mxu0 %vm698_vm3, %v16703_v41  ;;  %v2059_v47 = vsel %vm1983_vm4, %v13420_v16, %v13421_v28  ;;  %v2018_v56 = vsel %vm1983_vm4, %v13406_v6, %v13435_v36  ;;  %v2058_v22 = vsel %vm1983_vm4, %v13386_v63, %v13420_v16 }
 0x175   :  { %12455 = vmatpush1.bf16.msra.mxu0 %v12454_v51  ;;  %2222 = vmatprep.mubr.f32.mxu0 %v20918_v8  ;;  %v17076_v54 = vpop.permute.xlu0 %13453  ;;  %v2019_v27 = vsel %vm1983_vm4, %v13435_v36, %v13436_v55  ;;  %v2033_v51 = vsel %vm1983_vm4, %v13440_v1, %v13441_v0  ;;  %v13451_v33 = vunpack.i.h.bf16 %v17048_v34  ;;  %v13450_v60 = vunpack.i.l.bf16 %v17048_v34 }
 0x176   :  { %12457 = vmatprep.subr.bf16.mxu0 %v12456_v13  ;;  %11024 = vmatmul.mubr.msk.f32.gmra.mrb[10].mxu1 %vm698_vm3, %v16703_v41  ;;  %v2031_v41 = vsel %vm1983_vm4, %v13410_v42, %v13411_v58  ;;  %v13446_v13 = vunpack.i.h.bf16 %v17037_v48  ;;  %v13456_v12 = vunpack.i.h.bf16 %v17076_v54  ;;  %v13455_v50 = vunpack.i.l.bf16 %v17076_v54 }
 0x177   :  { %12467 = vmatpush1.bf16.msra.mxu1 %v12466_v53  ;;  %2299 = vmatprep.mubr.f32.mxu1 %v20918_v8  ;;  %v17106_v53 = vld [vmem:[%s20734_s1 + $0x20] sm:$0xff]  ;;  %v12476_v17 = vpack.c.bf16 %v2031_v41, %v2017_v57  ;;  %v12488_v24 = vpack.c.bf16 %v2033_v51, %v2019_v27  ;;  %v12480_v30 = vpack.c.bf16 %v2059_v47, %v2045_v31 }
 0x178   :  { %v17088_v15 = vpop.permute.xlu1 %13458  ;;  %12469 = vmatprep.subr.bf16.mxu1 %v12468_v45  ;;  %v12490_v18 = vpack.c.bf16 %v2032_v52, %v2018_v56  ;;  %v2047_v63 = vsel %vm1983_vm4, %v13445_v29, %v13446_v13  ;;  %v2061_v6 = vsel %vm1983_vm4, %v13450_v60, %v13451_v33  ;;  %v1993_v62 = vsel %vm1983_vm4, %v13455_v50, %v13456_v12 }
 0x179   :  { %12459 = vmatpush1.bf16.msra.mxu0 %v12458_v20  ;;  %v13461_v45 = vunpack.i.h.bf16 %v17088_v15  ;;  %v13460_v20 = vunpack.i.l.bf16 %v17088_v15  ;;  %v17128_v35 = vpop.permute.xlu0 %13463  ;;  %v2060_v9 = vsel %vm1983_vm4, %v13421_v28, %v13450_v60  ;;  %v1992_v16 = vsel %vm1983_vm4, %v13426_v25, %v13455_v50 }
 0x17a   :  { %12473 = vmatprep.subr.bf16.mxu0 %v12472_v46  ;;  %v13466_v58 = vunpack.i.h.bf16 %v17128_v35  ;;  %v13465_v42 = vunpack.i.l.bf16 %v17128_v35  ;;  %v12492_v38 = vpack.c.bf16 %v2061_v6, %v2047_v63  ;;  %v12482_v43 = vpack.c.bf16 %v2058_v22, %v2044_v61 }
 0x17b   :  { %12471 = vmatpush1.bf16.msra.mxu1 %v12470_v19  ;;  %v2046_v19 = vsel %vm1983_vm4, %v13416_v37, %v13445_v29  ;;  %v2007_v44 = vsel %vm1983_vm4, %v13460_v20, %v13461_v45  ;;  %v2006_v40 = vsel %vm1983_vm4, %v13431_v14, %v13460_v20 }
 0x17c   :  { %v17130_v59 = vpop.permute.xlu1 %13468  ;;  %11027 = vmatmul.mubr.msk.f32.vlgmr.msra.gmra.mrb[0].mxu0 %vm698_vm3, %v17106_v53  ;;  %12485 = vmatprep.subr.bf16.mxu1 %v12484_v23  ;;  %v12496_v28 = vpack.c.bf16 %v2007_v44, %v1993_v62  ;;  %v12494_v26 = vpack.c.bf16 %v2060_v9, %v2046_v19  ;;  %v12498_v25 = vpack.c.bf16 %v2006_v40, %v1992_v16 }
 0x17d   :  { %12475 = vmatpush1.bf16.msra.mxu0 %v12474_v4  ;;  %2228 = vmatprep.mubr.f32.mxu0 %v20918_v8  ;;  %v13471_v37 = vunpack.i.h.bf16 %v17130_v59  ;;  %v13470_v21 = vunpack.i.l.bf16 %v17130_v59  ;;  %v2021_v14 = vsel %vm1983_vm4, %v13465_v42, %v13466_v58  ;;  %v2020_v2 = vsel %vm1983_vm4, %v13436_v55, %v13465_v42 }
 0x17e   :  { %11029 = vmatmul.mubr.msk.f32.vlgmr.msra.gmra.mrb[0].mxu1 %vm698_vm3, %v17106_v53  ;;  %12477 = vmatprep.subr.bf16.mxu0 %v12476_v17 }
 0x17f   :  { %12487 = vmatpush1.bf16.msra.mxu1 %v12486_v3  ;;  %2305 = vmatprep.mubr.f32.mxu1 %v20918_v8  ;;  %v2035_v36 = vsel %vm1983_vm4, %v13470_v21, %v13471_v37  ;;  %v2034_v57 = vsel %vm1983_vm4, %v13441_v0, %v13470_v21 }
 0x180   :  { %12489 = vmatprep.subr.bf16.mxu1 %v12488_v24  ;;  %11028 = vmatmul.mubr.msk.f32.gmra.mrb[2].mxu0 %vm698_vm3, %v17142_v7  ;;  %v17178_v10 = vpop.permute.xlu0 %13473  ;;  %v17180_v49 = vpop.permute.xlu1 %13478  ;;  %v12500_v41 = vpack.c.bf16 %v2035_v36, %v2021_v14  ;;  %v12502_v39 = vpack.c.bf16 %v2034_v57, %v2020_v2 }
 0x181   :  { %12479 = vmatpush1.bf16.msra.mxu0 %v12478_v11  ;;  %2376 = vmatprep.mubr.f32.mxu0 %v20918_v8  ;;  %v13476_v1 = vunpack.i.h.bf16 %v17178_v10  ;;  %v13475_v5 = vunpack.i.l.bf16 %v17178_v10  ;;  %v13481_v46 = vunpack.i.h.bf16 %v17180_v49  ;;  %v13480_v4 = vunpack.i.l.bf16 %v17180_v49 }
 0x182   :  { %11030 = vmatmul.mubr.msk.f32.gmra.mrb[2].mxu1 %vm698_vm3, %v17142_v7  ;;  %12481 = vmatprep.subr.bf16.mxu0 %v12480_v30 }
 0x183   :  { %12491 = vmatpush1.bf16.msra.mxu1 %v12490_v18  ;;  %2453 = vmatprep.mubr.f32.mxu1 %v20918_v8  ;;  %v2049_v23 = vsel %vm1983_vm4, %v13475_v5, %v13476_v1  ;;  %v2063_v32 = vsel %vm1983_vm4, %v13480_v4, %v13481_v46  ;;  %v2048_v55 = vsel %vm1983_vm4, %v13446_v13, %v13475_v5 }
 0x184   :  { %12493 = vmatprep.subr.bf16.mxu1 %v12492_v38  ;;  %v2062_v0 = vsel %vm1983_vm4, %v13451_v33, %v13480_v4  ;;  %v12504_v3 = vpack.c.bf16 %v2063_v32, %v2049_v23 }
 0x185   :  { %12483 = vmatpush1.bf16.msra.mxu0 %v12482_v43  ;;  %v12506_v48 = vpack.c.bf16 %v2062_v0, %v2048_v55 }
 0x186   :  { %12497 = vmatprep.subr.bf16.mxu0 %v12496_v28 }
 0x187   :  { %12495 = vmatpush1.bf16.msra.mxu1 %v12494_v26 }
 0x188   :  { %11031 = vmatmul.mubr.msk.f32.vlgmr.msra.gmra.mrb[4].mxu0 %vm698_vm3, %v17106_v53 }
 0x189   :  { %12499 = vmatpush1.bf16.msra.mxu0 %v12498_v25  ;;  %2382 = vmatprep.mubr.f32.mxu0 %v20918_v8 }
 0x18a   :  { %11033 = vmatmul.mubr.msk.f32.vlgmr.msra.gmra.mrb[4].mxu1 %vm698_vm3, %v17106_v53  ;;  %12501 = vmatprep.subr.bf16.mxu0 %v12500_v41 }
 0x18b   :  { %2459 = vmatprep.mubr.f32.mxu1 %v20918_v8 }
 0x18c   :  { %11032 = vmatmul.mubr.msk.f32.gmra.mrb[6].mxu0 %vm698_vm3, %v17142_v7 }
 0x18d   :  { %12503 = vmatpush1.bf16.msra.mxu0 %v12502_v39  ;;  %2530 = vmatprep.mubr.f32.mxu0 %v20918_v8 }
 0x18e   :  { %11034 = vmatmul.mubr.msk.f32.gmra.mrb[6].mxu1 %vm698_vm3, %v17142_v7  ;;  %12505 = vmatprep.subr.bf16.mxu0 %v12504_v3 }
 0x18f   :  { %2607 = vmatprep.mubr.f32.mxu1 %v20918_v8 }
 0x191   :  { %v17224_v31 = vpop.permute.xlu0 %2727  ;;  %v17227_v47 = vpop.permute.xlu1 %2732  ;;  %12507 = vmatpush1.bf16.msra.mxu0 %v12506_v48 }
 0x194   :  { %11035 = vmatmul.mubr.msk.f32.vlgmr.msra.gmra.mrb[8].mxu0 %vm698_vm3, %v17106_v53 }
 0x195   :  { %v17229_v34 = vpop.permute.xlu0 %13490  ;;  %v17233_v27 = vpop.permute.xlu1 %13485  ;;  %2536 = vmatprep.mubr.f32.mxu0 %v20918_v8 }
 0x196   :  { %v13493_v56 = vunpack.i.h.bf16 %v17229_v34  ;;  %v13492_v52 = vunpack.i.l.bf16 %v17229_v34  ;;  %v13488_v51 = vunpack.i.h.bf16 %v17233_v27  ;;  %v13487_v13 = vunpack.i.l.bf16 %v17233_v27 }
 0x198   :  { %v2008_v29 = vsel %vm1983_vm4, %v13461_v45, %v13492_v52  ;;  %v2009_v33 = vsel %vm1983_vm4, %v13492_v52, %v13493_v56  ;;  %v1994_v60 = vsel %vm1983_vm4, %v13456_v12, %v13487_v13  ;;  %v1995_v20 = vsel %vm1983_vm4, %v13487_v13, %v13488_v51  ;;  %11036 = vmatmul.mubr.msk.f32.gmra.mrb[10].mxu0 %vm698_vm3, %v17142_v7 }
 0x199   :  { %v17249_v50 = vpop.permute.xlu0 %13500  ;;  %v17254_v61 = vpop.permute.xlu1 %13495  ;;  %v12508_v15 = vpack.c.bf16 %v2009_v33, %v1995_v20  ;;  %v12510_v45 = vpack.c.bf16 %v2008_v29, %v1994_v60  ;;  %2684 = vmatprep.mubr.f32.mxu0 %v20918_v8 }
 0x19a   :  { %v13503_v54 = vunpack.i.h.bf16 %v17249_v50  ;;  %v13502_v12 = vunpack.i.l.bf16 %v17249_v50 }
 0x19b   :  { %12509 = vmatprep.subr.bf16.mxu1 %v12508_v15 }
 0x19c   :  { %12511 = vmatpush1.bf16.msra.mxu1 %v12510_v45  ;;  %v2022_v30 = vsel %vm1983_vm4, %v13466_v58, %v13502_v12  ;;  %v2023_v63 = vsel %vm1983_vm4, %v13502_v12, %v13503_v54 }
 0x19d   :  { %v17261_v17 = vpop.permute.xlu0 %13510  ;;  %v17263_v11 = vpop.permute.xlu1 %13505 }
 0x19e   :  { %v13508_v22 = vunpack.i.h.bf16 %v17263_v11  ;;  %v13507_v24 = vunpack.i.l.bf16 %v17263_v11 }
 0x1a0   :  { %v2036_v19 = vsel %vm1983_vm4, %v13471_v37, %v13507_v24  ;;  %v2037_v6 = vsel %vm1983_vm4, %v13507_v24, %v13508_v22 }
 0x1a1   :  { %v17273_v18 = vpop.permute.xlu0 %13520  ;;  %v17283_v44 = vpop.permute.xlu1 %13515  ;;  %v12512_v58 = vpack.c.bf16 %v2037_v6, %v2023_v63  ;;  %v12514_v59 = vpack.c.bf16 %v2036_v19, %v2022_v30 }
 0x1a2   :  { %v13523_v62 = vunpack.i.h.bf16 %v17273_v18  ;;  %v13522_v35 = vunpack.i.l.bf16 %v17273_v18  ;;  %v13518_v42 = vunpack.i.h.bf16 %v17283_v44  ;;  %v13517_v37 = vunpack.i.l.bf16 %v17283_v44  ;;  %v14252_v44 = vld [vmem:[%s20738_s5 + $0x8] ss:$20 sps:$4 sm:$0xff]  }
 0x1a3   :  { %12513 = vmatprep.subr.bf16.mxu1 %v12512_v58  ;;  %v15247_v58 = vld [vmem:[%s20733_s0 + $0x70] sm:$0xff] }
 0x1a4   :  { %v2064_v21 = vsel %vm1983_vm4, %v13481_v46, %v13522_v35  ;;  %v2065_v9 = vsel %vm1983_vm4, %v13522_v35, %v13523_v62  ;;  %v2050_v16 = vsel %vm1983_vm4, %v13476_v1, %v13517_v37  ;;  %12515 = vmatpush1.bf16.msra.mxu1 %v12514_v59  ;;  %v2051_v40 = vsel %vm1983_vm4, %v13517_v37, %v13518_v42  ;;  %v15248_v59 = vld [vmem:[%s20733_s0 + $0x78] sm:$0xff]  ;;  %v14260_v18 = vld [vmem:[%s20738_s5 + $0x34] ss:$20 sps:$4 sm:$0xff]  }
 0x1a5   :  { %v12516_v38 = vpack.c.bf16 %v2065_v9, %v2051_v40  ;;  %v12518_v28 = vpack.c.bf16 %v2064_v21, %v2050_v16  ;;  %v13497_v35 = vunpack.i.l.bf16 %v17254_v61  ;;  %v13544_v37 = vpack.i.bf16 %v15248_v59, %v15247_v58  ;;  %v14261_v58 = vld [vmem:[%s20738_s5 + $0x50] ss:$20 sps:$4 sm:$0xff]  }
 0x1a6   :  { %v13498_v9 = vunpack.i.h.bf16 %v17254_v61  ;;  %v13512_v61 = vunpack.i.l.bf16 %v17261_v17  ;;  %v14269_v59 = vld [vmem:[%s20738_s5 + $0x7c] ss:$20 sps:$4 sm:$0xff]  }
 0x1a7   :  { %12517 = vmatprep.subr.bf16.mxu1 %v12516_v38  ;;  %v15249_v38 = vld [vmem:[%s20733_s0 + $0xf0] sm:$0xff] }
 0x1a8   :  { %12519 = vmatpush1.bf16.msra.mxu1 %v12518_v28  ;;  %v15250_v28 = vld [vmem:[%s20733_s0 + $0xf8] sm:$0xff] }
 0x1ab   :  { %11037 = vmatmul.mubr.msk.f32.vlgmr.msra.gmra.mrb[8].mxu1 %vm698_vm3, %v17106_v53 }
 0x1ac   :  { %2613 = vmatprep.mubr.f32.mxu1 %v20918_v8 }
 0x1af   :  { %11038 = vmatmul.mubr.msk.f32.gmra.mrb[10].mxu1 %vm698_vm3, %v17142_v7 }
 0x24f   :  { %v2224_v10 = vpop.f32.mrb[0].mxu0 }
 0x250   :  { %v2226_v49 = vpop.f32.mrb[1].mxu0  ;;  %v2735_v23 = vadd.f32 %v17224_v31, %v2224_v10  ;;  %v13549_v10 = vpack.i.bf16 %v15250_v28, %v15249_v38  ;;  %v14275_v38 = vld [vmem:[%s20738_s5 + $0xa4] ss:$20 sps:$4 sm:$0xff]  }
 0x251   :  { %v2301_v43 = vpop.f32.mrb[0].mxu1  ;;  %v2736_v26 = vadd.f32 %v17224_v31, %v2226_v49  ;;  %v21036_v49 = vld [vmem:[#allocation41_spill] sm:$0xff] }
 0x252   :  { %v2737_v25 = vadd.f32 %v17224_v31, %v2301_v43  ;;  %v2303_v14 = vpop.f32.mrb[1].mxu1  ;;  %v1795_v43 = vsel %vm169_vm0, %v21036_v49, %v13497_v35  ;;  %v14273_v49 = vld [vmem:[%s20738_s5 + $0xa0] ss:$20 sps:$4 sm:$0xff]  }
 0x253   :  { %15109 = vtanh.f32 %v2736_v26  ;;  %v2738_v36 = vadd.f32 %v17224_v31, %v2303_v14  ;;  %v2230_v1 = vpop.f32.mrb[2].mxu0  ;;  %v21037_v26 = vld [vmem:[#allocation38_spill] sm:$0xff]  ;;  %v13513_v14 = vunpack.i.h.bf16 %v17261_v17 }
 0x254   :  { %15111 = vtanh.f32 %v2737_v25  ;;  %v2749_v5 = vadd.f32 %v17227_v47, %v2230_v1  ;;  %v2232_v46 = vpop.f32.mrb[3].mxu0  ;;  %v1796_v25 = vsel %vm169_vm0, %v21037_v26, %v13498_v9  ;;  %v13554_v1 = vpack.i.bf16 %v13497_v35, %v1795_v43  ;;  %v14263_v35 = vld [vmem:[%s20738_s5 + $0x54] ss:$20 sps:$4 sm:$0xff]   ;;  %v14281_v43 = vld [vmem:[%s20738_s5 + $0xcc] ss:$20 sps:$4 sm:$0xff]  }
 0x255   :  { %15113 = vtanh.f32 %v2738_v36  ;;  %v2307_v4 = vpop.f32.mrb[2].mxu1  ;;  %v2750_v2 = vadd.f32 %v17227_v47, %v2232_v46  ;;  %v21038_v46 = vld [vmem:[#allocation50_spill] sm:$0xff] }
 0x256   :  { %15115 = vtanh.f32 %v2749_v5  ;;  %v2751_v57 = vadd.f32 %v17227_v47, %v2307_v4  ;;  %v2309_v41 = vpop.f32.mrb[3].mxu1  ;;  %v1801_v4 = vsel %vm280_vm1, %v21038_v46, %v13512_v61  ;;  %v14287_v26 = vld [vmem:[%s20738_s5 + $0xf4] ss:$20 sps:$4 sm:$0xff]   ;;  %v14299_v46 = vld [vmem:[%s20738_s5 + $0x144] ss:$20 sps:$4 sm:$0xff]  }
 0x257   :  { %15117 = vtanh.f32 %v2750_v2  ;;  %v2752_v32 = vadd.f32 %v17227_v47, %v2309_v41  ;;  %v13559_v2 = vpack.i.bf16 %v13498_v9, %v1796_v25  ;;  %v14267_v9 = vld [vmem:[%s20738_s5 + $0x78] ss:$20 sps:$4 sm:$0xff]   ;;  %v14285_v25 = vld [vmem:[%s20738_s5 + $0xf0] ss:$20 sps:$4 sm:$0xff]  }
 0x258   :  { %15119 = vtanh.f32 %v2751_v57  ;;  %v21039_v57 = vld [vmem:[#allocation49_spill] sm:$0xff] }
 0x259   :  { %15121 = vtanh.f32 %v2752_v32  ;;  %v1802_v41 = vsel %vm280_vm1, %v21039_v57, %v13513_v14  ;;  %v14249_v32 = vld [vmem:[%s20738_s5] ss:$20 sps:$4 sm:$0xff]   ;;  %v14303_v57 = vld [vmem:[%s20738_s5 + $0x168] ss:$20 sps:$4 sm:$0xff]  }
 0x25a   :  { %15123 = vtanh.f32 %v2735_v23  ;;  %v13564_v23 = vpack.i.bf16 %v13512_v61, %v1801_v4  ;;  %v13569_v17 = vpack.i.bf16 %v13513_v14, %v1802_v41  ;;  %v14279_v61 = vld [vmem:[%s20738_s5 + $0xc8] ss:$20 sps:$4 sm:$0xff]   ;;  %v14297_v4 = vld [vmem:[%s20738_s5 + $0x140] ss:$20 sps:$4 sm:$0xff]  }
 0x25b   :  { %v17312_v39 = vpop.f32.mrb[4].mxu0  ;;  %v14293_v14 = vld [vmem:[%s20738_s5 + $0x11c] ss:$20 sps:$4 sm:$0xff]   ;;  %v14311_v41 = vld [vmem:[%s20738_s5 + $0x194] ss:$20 sps:$4 sm:$0xff]  }
 0x25c   :  { %v17314_v55 = vpop.f32.mrb[5].mxu0 }
 0x25d   :  { %v17316_v0 = vpop.eup %15109  ;;  %v17318_v3 = vpop.f32.mrb[4].mxu1 }
 0x25e   :  { %v17320_v48 = vpop.eup %15111  ;;  %v17322_v52 = vpop.f32.mrb[5].mxu1 }
 0x25f   :  { %v17324_v13 = vpop.eup %15113  ;;  %v17326_v29 = vpop.f32.mrb[6].mxu0  ;;  %v13524_v33 = vpack.i.bf16 %v17320_v48, %v17316_v0 }
 0x260   :  { %v17330_v60 = vpop.eup %15115  ;;  %v17332_v20 = vpop.f32.mrb[7].mxu0 }
 0x261   :  { %v17334_v15 = vpop.eup %15117  ;;  %v17336_v45 = vpop.f32.mrb[6].mxu1  ;;  %13525 = vrot.lane.b32.xlu1 %v13524_v33, %s15275_s20  ;;  %v14251_v33 = vld [vmem:[%s20738_s5 + $0x4] ss:$20 sps:$4 sm:$0xff]  }
 0x262   :  { %v17339_v12 = vpop.eup %15119  ;;  %v17341_v24 = vpop.f32.mrb[7].mxu1  ;;  %v13534_v30 = vpack.i.bf16 %v17334_v15, %v17324_v13  ;;  %6568 = vmatprep.subr.bf16.mxu1 %v14251_v33  ;;  %v14323_v33 = vld [vmem:[%s20738_s5 + $0x1e4] ss:$20 sps:$4 sm:$0xff]  }
 0x263   :  { %v17345_v19 = vpop.eup %15121  ;;  %6569 = vmatpush1.bf16.msra.mxu1 %v14249_v32  ;;  %v14315_v32 = vld [vmem:[%s20738_s5 + $0x1b8] ss:$20 sps:$4 sm:$0xff]  }
 0x264   :  { %v13529_v63 = vpack.i.bf16 %v17345_v19, %v17339_v12  ;;  %13535 = vrot.lane.b32.xlu0 %v13534_v30, %s15275_s20  ;;  %v17350_v6 = vpop.eup %15123  ;;  %v14257_v30 = vld [vmem:[%s20738_s5 + $0x2c] ss:$20 sps:$4 sm:$0xff]  }
 0x265   :  { %v13539_v21 = vpack.i.bf16 %v17330_v60, %v17350_v6  ;;  %6570 = vmatprep.subr.bf16.mxu1 %v14257_v30  ;;  %v14321_v30 = vld [vmem:[%s20738_s5 + $0x1e0] ss:$20 sps:$4 sm:$0xff]  }
 0x266   :  { %13530 = vrot.lane.b32.xlu1 %v13529_v63, %s15275_s20  ;;  %v14255_v63 = vld [vmem:[%s20738_s5 + $0x28] ss:$20 sps:$4 sm:$0xff]  }
 0x267   :  { %v17363_v16 = vpop.f32.mrb[8].mxu0  ;;  %6571 = vmatpush1.bf16.msra.mxu1 %v14255_v63  ;;  %v14329_v63 = vld [vmem:[%s20738_s5 + $0x20c] ss:$20 sps:$4 sm:$0xff]  }
 0x268   :  { %13540 = vrot.lane.b32.xlu0 %v13539_v21, %s15275_s20  ;;  %v17366_v40 = vpop.f32.mrb[9].mxu0  ;;  %6572 = vmatprep.subr.bf16.mxu1 %v14263_v35  ;;  %v14327_v35 = vld [vmem:[%s20738_s5 + $0x208] ss:$20 sps:$4 sm:$0xff]  }
 0x26a   :  { %13545 = vrot.lane.b32.xlu1 %v13544_v37, %s15280_s23 }
 0x26b   :  { %v17381_v36 = vpop.f32.mrb[10].mxu0  ;;  %6573 = vmatpush1.bf16.msra.mxu1 %v14261_v58  ;;  %v2739_v58 = vadd.f32 %v17224_v31, %v17312_v39 }
 0x26c   :  { %13550 = vrot.lane.b32.xlu0 %v13549_v10, %s15280_s23  ;;  %v17384_v5 = vpop.f32.mrb[11].mxu0  ;;  %6574 = vmatprep.subr.bf16.mxu1 %v14269_v59  ;;  %v2740_v59 = vadd.f32 %v17224_v31, %v17314_v55 }
 0x26d   :  { %15125 = vtanh.f32 %v2739_v58 }
 0x26e   :  { %13555 = vrot.lane.b32.xlu1 %v13554_v1, %s15280_s23  ;;  %v14291_v1 = vld [vmem:[%s20738_s5 + $0x118] ss:$20 sps:$4 sm:$0xff]   ;;  %15127 = vtanh.f32 %v2740_v59 }
 0x26f   :  { %6575 = vmatpush1.bf16.msra.mxu1 %v14267_v9  ;;  %v2753_v9 = vadd.f32 %v17227_v47, %v17326_v29 }
 0x270   :  { %13560 = vrot.lane.b32.xlu0 %v13559_v2, %s15280_s23  ;;  %6576 = vmatprep.subr.bf16.mxu1 %v14275_v38  ;;  %v14305_v2 = vld [vmem:[%s20738_s5 + $0x16c] ss:$20 sps:$4 sm:$0xff]   ;;  %v2754_v38 = vadd.f32 %v17227_v47, %v17332_v20 }
 0x271   :  { %15129 = vtanh.f32 %v2753_v9 }
 0x272   :  { %13565 = vrot.lane.b32.xlu1 %v13564_v23, %s15280_s23  ;;  %v14309_v23 = vld [vmem:[%s20738_s5 + $0x190] ss:$20 sps:$4 sm:$0xff]   ;;  %15131 = vtanh.f32 %v2754_v38 }
 0x273   :  { %6577 = vmatpush1.bf16.msra.mxu1 %v14273_v49 }
 0x274   :  { %13570 = vrot.lane.b32.xlu0 %v13569_v17, %s15280_s23  ;;  %6578 = vmatprep.subr.bf16.mxu1 %v14281_v43  ;;  %v14317_v17 = vld [vmem:[%s20738_s5 + $0x1bc] ss:$20 sps:$4 sm:$0xff]  }
 0x275   :  { %v14333_v43 = vld [vmem:[%s20738_s5 + $0x230] ss:$20 sps:$4 sm:$0xff]  }
 0x277   :  { %6579 = vmatpush1.bf16.msra.mxu1 %v14279_v61  ;;  %v14335_v61 = vld [vmem:[%s20738_s5 + $0x234] ss:$20 sps:$4 sm:$0xff]  }
 0x278   :  { %6580 = vmatprep.subr.bf16.mxu1 %v14287_v26 }
 0x27b   :  { %6581 = vmatpush1.bf16.msra.mxu1 %v14285_v25 }
 0x27c   :  { %6582 = vmatprep.subr.bf16.mxu1 %v14293_v14 }
 0x27e   :  { %v17415_v37 = vpop.f32.mrb[8].mxu1 }
 0x27f   :  { %v17417_v21 = vpop.f32.mrb[9].mxu1  ;;  %6583 = vmatpush1.bf16.msra.mxu1 %v14291_v1 }
 0x280   :  { %6584 = vmatprep.subr.bf16.mxu1 %v14299_v46 }
 0x282   :  { %v17425_v28 = vpop.f32.mrb[10].mxu1 }
 0x283   :  { %v17427_v10 = vpop.f32.mrb[11].mxu1  ;;  %6585 = vmatpush1.bf16.msra.mxu1 %v14297_v4 }
 0x284   :  { %6586 = vmatprep.subr.bf16.mxu1 %v14305_v2 }
 0x287   :  { %6587 = vmatpush1.bf16.msra.mxu1 %v14303_v57 }
 0x288   :  { %6588 = vmatprep.subr.bf16.mxu1 %v14311_v41 }
 0x28b   :  { %6589 = vmatpush1.bf16.msra.mxu1 %v14309_v23  ;;  %v14339_v23 = vld [vmem:[%s20738_s5 + $0x258] ss:$20 sps:$4 sm:$0xff]  }
 0x28c   :  { %6590 = vmatprep.subr.bf16.mxu1 %v14317_v17  ;;  %v14341_v17 = vld [vmem:[%s20738_s5 + $0x25c] ss:$20 sps:$4 sm:$0xff]  }
 0x28f   :  { %6591 = vmatpush1.bf16.msra.mxu1 %v14315_v32 }
 0x290   :  { %6592 = vmatprep.subr.bf16.mxu1 %v14323_v33 }
 0x293   :  { %6593 = vmatpush1.bf16.msra.mxu1 %v14321_v30 }
 0x294   :  { %6594 = vmatprep.subr.bf16.mxu1 %v14329_v63 }
 0x297   :  { %6595 = vmatpush1.bf16.msra.mxu1 %v14327_v35 }
 0x298   :  { %6596 = vmatprep.subr.bf16.mxu1 %v14335_v61 }
 0x29b   :  { %6597 = vmatpush1.bf16.msra.mxu1 %v14333_v43  ;;  %v17538_v43 = vpop.eup %15125 }
 0x29c   :  { %6598 = vmatprep.subr.bf16.mxu1 %v14341_v17 }
 0x29f   :  { %6599 = vmatpush1.bf16.msra.mxu1 %v14339_v23 }
 0x2d3   :  { %v13526_v49 = vpop.permute.xlu1 %13525 }
 0x2d4   :  { %v13528_v39 = vunpack.i.h.bf16 %v13526_v49  ;;  %v13527_v26 = vunpack.i.l.bf16 %v13526_v49 }
 0x2d6   :  { %v17500_v55 = vpop.permute.xlu0 %13535  ;;  %v2876_v29 = vsel %vm169_vm0, %v13527_v26, %v13528_v39 }
 0x2d7   :  { %v13538_v20 = vunpack.i.h.bf16 %v17500_v55  ;;  %v13537_v25 = vunpack.i.l.bf16 %v17500_v55  ;;  %v17513_v2 = vmax.f32 %v17316_v0, %v2876_v29  ;;  %v17549_v29 = vpop.eup %15127 }
 0x2d8   :  { %v17505_v14 = vpop.permute.xlu1 %13530  ;;  %v13584_v27 = vpack.i.bf16 %v17549_v29, %v17538_v43 }
 0x2d9   :  { %v13533_v1 = vunpack.i.h.bf16 %v17505_v14  ;;  %v13532_v46 = vunpack.i.l.bf16 %v17505_v14  ;;  %v2877_v4 = vsel %vm169_vm0, %v13528_v39, %v13537_v25 }
 0x2da   :  { %v17516_v57 = vmax.f32 %v17320_v48, %v2877_v4  ;;  %v13541_v41 = vpop.permute.xlu0 %13540  ;;  %v17552_v4 = vpop.eup %15129 }
 0x2db   :  { %v2890_v32 = vsel %vm169_vm0, %v13532_v46, %v13533_v1  ;;  %v2889_v33 = vsel %vm169_vm0, %v13538_v20, %v13532_v46  ;;  %v13543_v0 = vunpack.i.h.bf16 %v13541_v41  ;;  %v13542_v30 = vunpack.i.l.bf16 %v13541_v41  ;;  %v17560_v23 = vpop.eup %15131 }
 0x2dc   :  { %v17529_v48 = vmax.f32 %v17339_v12, %v2890_v32  ;;  %v17532_v63 = vmax.f32 %v17334_v15, %v2889_v33  ;;  %v13546_v35 = vpop.permute.xlu1 %13545  ;;  %v13574_v58 = vpack.i.bf16 %v17516_v57, %v17513_v2  ;;  %v13594_v34 = vpack.i.bf16 %v17560_v23, %v17552_v4 }
 0x2dd   :  { %v13548_v59 = vunpack.i.h.bf16 %v13546_v35  ;;  %v13547_v9 = vunpack.i.l.bf16 %v13546_v35  ;;  %v2875_v38 = vsel %vm169_vm0, %v13542_v30, %v13527_v26  ;;  %v2888_v49 = vsel %vm169_vm0, %v13543_v0, %v13538_v20 }
 0x2de   :  { %v17541_v12 = vmax.f32 %v17350_v6, %v2875_v38  ;;  %v17544_v15 = vmax.f32 %v17330_v60, %v2888_v49  ;;  %v13551_v61 = vpop.permute.xlu0 %13550  ;;  %v13579_v39 = vpack.i.bf16 %v17529_v48, %v17532_v63  ;;  %13575 = vrot.lane.b32.xlu1 %v13574_v58, %s15277_s13  ;;  %v14347_v49 = vld [vmem:[%s20738_s5 + $0x284] ss:$20 sps:$4 sm:$0xff]  }
 0x2df   :  { %v13553_v26 = vunpack.i.h.bf16 %v13551_v61  ;;  %v13552_v46 = vunpack.i.l.bf16 %v13551_v61  ;;  %v1997_v20 = vsel %vm1983_vm4, %v13547_v9, %v13548_v59  ;;  %v1996_v6 = vsel %vm1983_vm4, %v13488_v51, %v13547_v9  ;;  %6611 = vmatprep.subr.bf16.mxu1 %v14347_v49  ;;  %v14300_v49 = vld [vmem:[%s20738_s5 + $0x148] ss:$20 sps:$4 sm:$0xff]  }
 0x2e0   :  { %v13556_v60 = vpop.permute.xlu1 %13555  ;;  %13580 = vrot.lane.b32.xlu0 %v13579_v39, %s15277_s13  ;;  %v13589_v41 = vpack.i.bf16 %v17544_v15, %v17541_v12 }
 0x2e1   :  { %v13558_v17 = vunpack.i.h.bf16 %v13556_v60  ;;  %v13557_v32 = vunpack.i.l.bf16 %v13556_v60  ;;  %v2010_v33 = vsel %vm1983_vm4, %v13493_v56, %v13552_v46  ;;  %v2011_v0 = vsel %vm1983_vm4, %v13552_v46, %v13553_v26 }
 0x2e2   :  { %v13561_v30 = vpop.permute.xlu0 %13560  ;;  %13590 = vrot.lane.b32.xlu1 %v13589_v41, %s15277_s13  ;;  %v12520_v51 = vpack.c.bf16 %v2011_v0, %v1997_v20  ;;  %v12522_v35 = vpack.c.bf16 %v2010_v33, %v1996_v6  ;;  %v14254_v0 = vld [vmem:[%s20738_s5 + $0xc] ss:$20 sps:$4 sm:$0xff]  }
 0x2e3   :  { %v13563_v58 = vunpack.i.h.bf16 %v13561_v30  ;;  %v13562_v59 = vunpack.i.l.bf16 %v13561_v30  ;;  %v2024_v9 = vsel %vm1983_vm4, %v13503_v54, %v13557_v32  ;;  %v2025_v56 = vsel %vm1983_vm4, %v13557_v32, %v13558_v17  ;;  %v14272_v30 = vld [vmem:[%s20738_s5 + $0x84] ss:$20 sps:$4 sm:$0xff]  }
 0x2e4   :  { %v13566_v38 = vpop.permute.xlu1 %13565  ;;  %13585 = vrot.lane.b32.xlu0 %v13584_v27, %s15275_s20  ;;  %12521 = vmatprep.subr.bf16.mxu0 %v12520_v51  ;;  %v14270_v27 = vld [vmem:[%s20738_s5 + $0x80] ss:$20 sps:$4 sm:$0xff]   ;;  %v14276_v51 = vld [vmem:[%s20738_s5 + $0xa8] ss:$20 sps:$4 sm:$0xff]  }
 0x2e5   :  { %v13568_v61 = vunpack.i.h.bf16 %v13566_v38  ;;  %v13567_v39 = vunpack.i.l.bf16 %v13566_v38  ;;  %v2038_v50 = vsel %vm1983_vm4, %v13508_v22, %v13562_v59  ;;  %12523 = vmatpush1.bf16.msra.mxu0 %v12522_v35  ;;  %v2039_v54 = vsel %vm1983_vm4, %v13562_v59, %v13563_v58  ;;  %v14284_v35 = vld [vmem:[%s20738_s5 + $0xd4] ss:$20 sps:$4 sm:$0xff]   ;;  %v14282_v58 = vld [vmem:[%s20738_s5 + $0xd0] ss:$20 sps:$4 sm:$0xff]  }
 0x2e6   :  { %v13571_v26 = vpop.permute.xlu0 %13570  ;;  %13595 = vrot.lane.b32.xlu1 %v13594_v34, %s15275_s20  ;;  %v12524_v46 = vpack.c.bf16 %v2039_v54, %v2025_v56  ;;  %v12526_v20 = vpack.c.bf16 %v2038_v50, %v2024_v9  ;;  %v14290_v59 = vld [vmem:[%s20738_s5 + $0xfc] ss:$20 sps:$4 sm:$0xff]   ;;  %v14288_v9 = vld [vmem:[%s20738_s5 + $0xf8] ss:$20 sps:$4 sm:$0xff]   ;;  %v14294_v34 = vld [vmem:[%s20738_s5 + $0x120] ss:$20 sps:$4 sm:$0xff]  }
 0x2e7   :  { %v13573_v6 = vunpack.i.h.bf16 %v13571_v26  ;;  %v13572_v60 = vunpack.i.l.bf16 %v13571_v26  ;;  %v2052_v41 = vsel %vm1983_vm4, %v13518_v42, %v13567_v39  ;;  %v2053_v22 = vsel %vm1983_vm4, %v13567_v39, %v13568_v61  ;;  %v14266_v42 = vld [vmem:[%s20738_s5 + $0x5c] ss:$20 sps:$4 sm:$0xff]   ;;  %v14296_v38 = vld [vmem:[%s20738_s5 + $0x124] ss:$20 sps:$4 sm:$0xff]   ;;  %v14302_v56 = vld [vmem:[%s20738_s5 + $0x14c] ss:$20 sps:$4 sm:$0xff]  }
 0x2e8   :  { %12525 = vmatprep.subr.bf16.mxu0 %v12524_v46  ;;  %v14308_v61 = vld [vmem:[%s20738_s5 + $0x174] ss:$20 sps:$4 sm:$0xff]   ;;  %v14306_v39 = vld [vmem:[%s20738_s5 + $0x170] ss:$20 sps:$4 sm:$0xff]   ;;  %v14312_v54 = vld [vmem:[%s20738_s5 + $0x198] ss:$20 sps:$4 sm:$0xff]  }
 0x2e9   :  { %v2066_v11 = vsel %vm1983_vm4, %v13523_v62, %v13572_v60  ;;  %12527 = vmatpush1.bf16.msra.mxu0 %v12526_v20  ;;  %v2067_v17 = vsel %vm1983_vm4, %v13572_v60, %v13573_v6  ;;  %v14258_v62 = vld [vmem:[%s20738_s5 + $0x30] ss:$20 sps:$4 sm:$0xff]   ;;  %v14318_v46 = vld [vmem:[%s20738_s5 + $0x1c0] ss:$20 sps:$4 sm:$0xff]   ;;  %v14324_v6 = vld [vmem:[%s20738_s5 + $0x1e8] ss:$20 sps:$4 sm:$0xff]  }
 0x2ea   :  { %v12528_v32 = vpack.c.bf16 %v2067_v17, %v2053_v22  ;;  %v12530_v33 = vpack.c.bf16 %v2066_v11, %v2052_v41  ;;  %v14314_v50 = vld [vmem:[%s20738_s5 + $0x19c] ss:$20 sps:$4 sm:$0xff]   ;;  %v14320_v26 = vld [vmem:[%s20738_s5 + $0x1c4] ss:$20 sps:$4 sm:$0xff]   ;;  %v14326_v20 = vld [vmem:[%s20738_s5 + $0x1ec] ss:$20 sps:$4 sm:$0xff]  }
 0x2eb   :  { %v14332_v60 = vld [vmem:[%s20738_s5 + $0x214] ss:$20 sps:$4 sm:$0xff]   ;;  %v14330_v41 = vld [vmem:[%s20738_s5 + $0x210] ss:$20 sps:$4 sm:$0xff]   ;;  %v14336_v22 = vld [vmem:[%s20738_s5 + $0x238] ss:$20 sps:$4 sm:$0xff]  }
 0x2ec   :  { %12529 = vmatprep.subr.bf16.mxu0 %v12528_v32  ;;  %v14338_v11 = vld [vmem:[%s20738_s5 + $0x23c] ss:$20 sps:$4 sm:$0xff]   ;;  %v14344_v17 = vld [vmem:[%s20738_s5 + $0x264] ss:$20 sps:$4 sm:$0xff]   ;;  %v14342_v32 = vld [vmem:[%s20738_s5 + $0x260] ss:$20 sps:$4 sm:$0xff]  }
 0x2ed   :  { %12531 = vmatpush1.bf16.msra.mxu0 %v12530_v33  ;;  %v14350_v33 = vld [vmem:[%s20738_s5 + $0x28c] ss:$20 sps:$4 sm:$0xff]  }
 0x2ee   :  { %6869 = vmatprep.subr.bf16.mxu0 %v14254_v0  ;;  %v2741_v0 = vadd.f32 %v17224_v31, %v17318_v3 }
 0x2f0   :  { %11039 = vmatmul.mubr.msk.f32.vlgmr.msra.gmra.mrb[12].mxu0 %vm698_vm3, %v17106_v53  ;;  %v14264_v53 = vld [vmem:[%s20738_s5 + $0x58] ss:$20 sps:$4 sm:$0xff]   ;;  %15133 = vtanh.f32 %v2741_v0 }
 0x2f1   :  { %2690 = vmatprep.mubr.f32.mxu0 %v20918_v8  ;;  %6870 = vmatpush1.bf16.msra.mxu0 %v14252_v44  ;;  %v2742_v44 = vadd.f32 %v17224_v31, %v17322_v52 }
 0x2f2   :  { %6871 = vmatprep.subr.bf16.mxu0 %v14260_v18  ;;  %v2755_v18 = vadd.f32 %v17227_v47, %v17336_v45 }
 0x2f3   :  { %15135 = vtanh.f32 %v2742_v44  ;;  %v14362_v44 = vld [vmem:[%s20738_s5 + $0x2dc] ss:$20 sps:$4 sm:$0xff]  }
 0x2f4   :  { %11040 = vmatmul.mubr.msk.f32.gmra.mrb[14].mxu0 %vm698_vm3, %v17142_v7  ;;  %v14278_v7 = vld [vmem:[%s20738_s5 + $0xac] ss:$20 sps:$4 sm:$0xff]   ;;  %15137 = vtanh.f32 %v2755_v18 }
 0x2f5   :  { %6872 = vmatpush1.bf16.msra.mxu0 %v14258_v62 }
 0x2f6   :  { %6873 = vmatprep.subr.bf16.mxu0 %v14266_v42  ;;  %v2756_v42 = vadd.f32 %v17227_v47, %v17341_v24 }
 0x2f8   :  { %15139 = vtanh.f32 %v2756_v42  ;;  %v14357_v42 = vld [vmem:[%s20738_s5 + $0x2d0] ss:$20 sps:$4 sm:$0xff]  }
 0x2f9   :  { %6874 = vmatpush1.bf16.msra.mxu0 %v14264_v53 }
 0x2fa   :  { %6875 = vmatprep.subr.bf16.mxu0 %v14272_v30 }
 0x2fd   :  { %6876 = vmatpush1.bf16.msra.mxu0 %v14270_v27 }
 0x2fe   :  { %6877 = vmatprep.subr.bf16.mxu0 %v14278_v7 }
 0x301   :  { %6878 = vmatpush1.bf16.msra.mxu0 %v14276_v51 }
 0x302   :  { %6879 = vmatprep.subr.bf16.mxu0 %v14284_v35 }
 0x305   :  { %6880 = vmatpush1.bf16.msra.mxu0 %v14282_v58 }
 0x306   :  { %6881 = vmatprep.subr.bf16.mxu0 %v14290_v59 }
 0x309   :  { %6882 = vmatpush1.bf16.msra.mxu0 %v14288_v9 }
 0x30a   :  { %6883 = vmatprep.subr.bf16.mxu0 %v14296_v38 }
 0x30d   :  { %6884 = vmatpush1.bf16.msra.mxu0 %v14294_v34 }
 0x30e   :  { %6885 = vmatprep.subr.bf16.mxu0 %v14302_v56 }
 0x311   :  { %6886 = vmatpush1.bf16.msra.mxu0 %v14300_v49 }
 0x312   :  { %6887 = vmatprep.subr.bf16.mxu0 %v14308_v61 }
 0x315   :  { %6888 = vmatpush1.bf16.msra.mxu0 %v14306_v39 }
 0x316   :  { %6889 = vmatprep.subr.bf16.mxu0 %v14314_v50 }
 0x319   :  { %6890 = vmatpush1.bf16.msra.mxu0 %v14312_v54 }
 0x31a   :  { %6891 = vmatprep.subr.bf16.mxu0 %v14320_v26 }
 0x31d   :  { %6892 = vmatpush1.bf16.msra.mxu0 %v14318_v46 }
 0x31e   :  { %6893 = vmatprep.subr.bf16.mxu0 %v14326_v20 }
 0x321   :  { %6894 = vmatpush1.bf16.msra.mxu0 %v14324_v6  ;;  %v14353_v6 = vld [vmem:[%s20738_s5 + $0x2ac] ss:$20 sps:$4 sm:$0xff]  }
 0x322   :  { %6895 = vmatprep.subr.bf16.mxu0 %v14332_v60 }
 0x325   :  { %6896 = vmatpush1.bf16.msra.mxu0 %v14330_v41  ;;  %v17768_v41 = vpop.eup %15133 }
 0x326   :  { %6897 = vmatprep.subr.bf16.mxu0 %v14338_v11 }
 0x329   :  { %6898 = vmatpush1.bf16.msra.mxu0 %v14336_v22 }
 0x32a   :  { %6899 = vmatprep.subr.bf16.mxu0 %v14344_v17  ;;  %v14351_v17 = vld [vmem:[%s20738_s5 + $0x2a8] ss:$20 sps:$4 sm:$0xff]  }
 0x32d   :  { %6900 = vmatpush1.bf16.msra.mxu0 %v14342_v32 }
 0x32e   :  { %6912 = vmatprep.subr.bf16.mxu0 %v14350_v33  ;;  %v14359_v33 = vld [vmem:[%s20738_s5 + $0x2d4] ss:$20 sps:$4 sm:$0xff]  }
 0x350   :  { %v17702_v62 = vpop.permute.xlu1 %13575 }
 0x351   :  { %v13578_v53 = vunpack.i.h.bf16 %v17702_v62  ;;  %v13577_v30 = vunpack.i.l.bf16 %v17702_v62 }
 0x352   :  { %v17708_v27 = vpop.permute.xlu0 %13580 }
 0x353   :  { %v13583_v3 = vunpack.i.h.bf16 %v17708_v27  ;;  %v13582_v52 = vunpack.i.l.bf16 %v17708_v27  ;;  %v3042_v45 = vsel %vm529_vm2, %v13577_v30, %v13578_v53 }
 0x354   :  { %v13591_v7 = vpop.permute.xlu1 %13590  ;;  %v3096_v24 = vmax.f32 %v17513_v2, %v3042_v45  ;;  %v14365_v45 = vld [vmem:[%s20738_s5 + $0x2fc] ss:$20 sps:$4 sm:$0xff]  }
 0x355   :  { %v13593_v51 = vunpack.i.h.bf16 %v13591_v7  ;;  %v13592_v35 = vunpack.i.l.bf16 %v13591_v7  ;;  %v3055_v58 = vsel %vm529_vm2, %v13582_v52, %v13583_v3  ;;  %v14368_v7 = vld [vmem:[%s20738_s5 + $0x304] ss:$20 sps:$4 sm:$0xff]  }
 0x356   :  { %v17719_v59 = vpop.permute.xlu0 %13585  ;;  %v3110_v9 = vmax.f32 %v17532_v63, %v3055_v58  ;;  %v14374_v58 = vld [vmem:[%s20738_s5 + $0x32c] ss:$20 sps:$4 sm:$0xff]  }
 0x357   :  { %v3054_v38 = vsel %vm529_vm2, %v13593_v51, %v13582_v52  ;;  %v3041_v34 = vsel %vm529_vm2, %v13592_v35, %v13577_v30  ;;  %v13588_v56 = vunpack.i.h.bf16 %v17719_v59  ;;  %v13587_v49 = vunpack.i.l.bf16 %v17719_v59  ;;  %v14360_v30 = vld [vmem:[%s20738_s5 + $0x2d8] ss:$20 sps:$4 sm:$0xff]   ;;  %v14366_v51 = vld [vmem:[%s20738_s5 + $0x300] ss:$20 sps:$4 sm:$0xff]  }
 0x358   :  { %v3109_v2 = vmax.f32 %v17544_v15, %v3054_v38  ;;  %v3095_v61 = vmax.f32 %v17541_v12, %v3041_v34  ;;  %v17728_v39 = vpack.c.bf16 %v3110_v9, %v3096_v24  ;;  %v17730_v50 = vpop.permute.xlu1 %13595  ;;  %v14345_v12 = vld [vmem:[%s20738_s5 + $0x280] ss:$20 sps:$4 sm:$0xff]   ;;  %v14348_v15 = vld [vmem:[%s20738_s5 + $0x288] ss:$20 sps:$4 sm:$0xff]   ;;  %v14363_v24 = vld [vmem:[%s20738_s5 + $0x2f8] ss:$20 sps:$4 sm:$0xff]  }
 0x359   :  { %v2878_v63 = vsel %vm169_vm0, %v13537_v25, %v13587_v49  ;;  %v2879_v54 = vsel %vm169_vm0, %v13587_v49, %v13588_v56  ;;  %v13598_v26 = vunpack.i.h.bf16 %v17730_v50  ;;  %v13597_v46 = vunpack.i.l.bf16 %v17730_v50  ;;  %v14371_v35 = vld [vmem:[%s20738_s5 + $0x324] ss:$20 sps:$4 sm:$0xff]   ;;  %v14369_v9 = vld [vmem:[%s20738_s5 + $0x320] ss:$20 sps:$4 sm:$0xff]   ;;  %v14372_v38 = vld [vmem:[%s20738_s5 + $0x328] ss:$20 sps:$4 sm:$0xff]  }
 0x35a   :  { %v17746_v20 = vpack.c.bf16 %v3109_v2, %v3095_v61  ;;  %v17749_v55 = vmax.f32 %v17324_v13, %v2878_v63  ;;  %v17752_v25 = vmax.f32 %v17538_v43, %v2879_v54  ;;  %6600 = vmatprep.mubr.bf16.mxu1 %v17728_v39  ;;  %6901 = vmatprep.mubr.bf16.mxu0 %v17728_v39  ;;  %v14356_v43 = vld [vmem:[%s20738_s5 + $0x2b4] ss:$20 sps:$4 sm:$0xff]   ;;  %v14377_v34 = vld [vmem:[%s20738_s5 + $0x34c] ss:$20 sps:$4 sm:$0xff]   ;;  %v14378_v61 = vld [vmem:[%s20738_s5 + $0x350] ss:$20 sps:$4 sm:$0xff]  }
 0x35b   :  { %v2891_v60 = vsel %vm169_vm0, %v13533_v1, %v13597_v46  ;;  %v2892_v13 = vsel %vm169_vm0, %v13597_v46, %v13598_v26  ;;  %v17780_v1 = vpop.eup %15135  ;;  %v14380_v49 = vld [vmem:[%s20738_s5 + $0x354] ss:$20 sps:$4 sm:$0xff]   ;;  %v14386_v54 = vld [vmem:[%s20738_s5 + $0x37c] ss:$20 sps:$4 sm:$0xff]  }
 0x35c   :  { %v17771_v11 = vmax.f32 %v17345_v19, %v2891_v60  ;;  %v17774_v22 = vmax.f32 %v17552_v4, %v2892_v13  ;;  %6601 = vmatmul.mubr.bf16.vlgmr.msra.gmra.mrb[12].mxu1 %v17746_v20  ;;  %6902 = vmatmul.mubr.bf16.vlgmr.msra.gmra.mrb[16].mxu0 %v17746_v20  ;;  %v13599_v14 = vpack.i.bf16 %v17752_v25, %v17749_v55  ;;  %v14354_v19 = vld [vmem:[%s20738_s5 + $0x2b0] ss:$20 sps:$4 sm:$0xff]   ;;  %v17788_v4 = vpop.eup %15137  ;;  %v14375_v2 = vld [vmem:[%s20738_s5 + $0x348] ss:$20 sps:$4 sm:$0xff]   ;;  %v14387_v60 = vld [vmem:[%s20738_s5 + $0x398] ss:$20 sps:$4 sm:$0xff]  }
 0x35d   :  { %6612 = vmatpush1.bf16.msra.mxu1 %v14345_v12  ;;  %6913 = vmatpush1.bf16.msra.mxu0 %v14348_v15  ;;  %v17796_v0 = vpop.eup %15139  ;;  %v13604_v18 = vpack.i.bf16 %v17780_v1, %v17768_v41  ;;  %v14383_v63 = vld [vmem:[%s20738_s5 + $0x374] ss:$20 sps:$4 sm:$0xff]   ;;  %v14381_v46 = vld [vmem:[%s20738_s5 + $0x370] ss:$20 sps:$4 sm:$0xff]   ;;  %v14384_v12 = vld [vmem:[%s20738_s5 + $0x378] ss:$20 sps:$4 sm:$0xff]  }
 0x35e   :  { %13600 = vrot.lane.b32.xlu0 %v13599_v14, %s15277_s13  ;;  %v13609_v32 = vpack.i.bf16 %v17774_v22, %v17771_v11  ;;  %6613 = vmatprep.subr.bf16.mxu1 %v14353_v6  ;;  %v13614_v52 = vpack.i.bf16 %v17796_v0, %v17788_v4  ;;  %v14389_v15 = vld [vmem:[%s20738_s5 + $0x39c] ss:$20 sps:$4 sm:$0xff]   ;;  %v14392_v6 = vld [vmem:[%s20738_s5 + $0x3a4] ss:$20 sps:$4 sm:$0xff]   ;;  %v14390_v13 = vld [vmem:[%s20738_s5 + $0x3a0] ss:$20 sps:$4 sm:$0xff]  }
 0x35f   :  { %6914 = vmatprep.subr.bf16.mxu0 %v14356_v43  ;;  %v14395_v43 = vld [vmem:[%s20738_s5 + $0x3c4] ss:$20 sps:$4 sm:$0xff]   ;;  %v14398_v14 = vld [vmem:[%s20738_s5 + $0x3cc] ss:$20 sps:$4 sm:$0xff]  }
 0x360   :  { %13610 = vrot.lane.b32.xlu1 %v13609_v32, %s15277_s13  ;;  %v14401_v32 = vld [vmem:[%s20738_s5 + $0x3ec] ss:$20 sps:$4 sm:$0xff]  }
 0x361   :  { %6614 = vmatpush1.bf16.msra.mxu1 %v14351_v17  ;;  %6915 = vmatpush1.bf16.msra.mxu0 %v14354_v19  ;;  %v14393_v17 = vld [vmem:[%s20738_s5 + $0x3c0] ss:$20 sps:$4 sm:$0xff]   ;;  %v14396_v19 = vld [vmem:[%s20738_s5 + $0x3c8] ss:$20 sps:$4 sm:$0xff]  }
 0x362   :  { %13605 = vrot.lane.b32.xlu0 %v13604_v18, %s15275_s20  ;;  %6615 = vmatprep.subr.bf16.mxu1 %v14359_v33  ;;  %v14404_v33 = vld [vmem:[%s20738_s5 + $0x3f4] ss:$20 sps:$4 sm:$0xff]   ;;  %v14402_v18 = vld [vmem:[%s20738_s5 + $0x3f0] ss:$20 sps:$4 sm:$0xff]  }
 0x363   :  { %6916 = vmatprep.subr.bf16.mxu0 %v14362_v44  ;;  %v14399_v44 = vld [vmem:[%s20738_s5 + $0x3e8] ss:$20 sps:$4 sm:$0xff]   ;;  %v14441_v59 = vld [vmem:[%s20738_s5 + $0x500] ss:$20 sps:$4 sm:$0xff]  }
 0x364   :  { %13615 = vrot.lane.b32.xlu1 %v13614_v52, %s15275_s20  ;;  %v14405_v52 = vld [vmem:[%s20738_s5 + $0x410] ss:$20 sps:$4 sm:$0xff]  }
 0x365   :  { %6616 = vmatpush1.bf16.msra.mxu1 %v14357_v42  ;;  %6917 = vmatpush1.bf16.msra.mxu0 %v14360_v30  ;;  %v14407_v42 = vld [vmem:[%s20738_s5 + $0x414] ss:$20 sps:$4 sm:$0xff]   ;;  %v14410_v30 = vld [vmem:[%s20738_s5 + $0x41c] ss:$20 sps:$4 sm:$0xff]  }
 0x366   :  { %6617 = vmatprep.subr.bf16.mxu1 %v14365_v45  ;;  %6918 = vmatprep.subr.bf16.mxu0 %v14368_v7  ;;  %v14408_v45 = vld [vmem:[%s20738_s5 + $0x418] ss:$20 sps:$4 sm:$0xff]   ;;  %v14413_v7 = vld [vmem:[%s20738_s5 + $0x43c] ss:$20 sps:$4 sm:$0xff]  }
 0x369   :  { %6618 = vmatpush1.bf16.msra.mxu1 %v14363_v24  ;;  %6919 = vmatpush1.bf16.msra.mxu0 %v14366_v51  ;;  %v14416_v24 = vld [vmem:[%s20738_s5 + $0x444] ss:$20 sps:$4 sm:$0xff]  }
 0x36a   :  { %6619 = vmatprep.subr.bf16.mxu1 %v14371_v35  ;;  %6920 = vmatprep.subr.bf16.mxu0 %v14374_v58  ;;  %v14411_v51 = vld [vmem:[%s20738_s5 + $0x438] ss:$20 sps:$4 sm:$0xff]   ;;  %v14414_v35 = vld [vmem:[%s20738_s5 + $0x440] ss:$20 sps:$4 sm:$0xff]  }
 0x36b   :  { %v14419_v58 = vld [vmem:[%s20738_s5 + $0x464] ss:$20 sps:$4 sm:$0xff]  }
 0x36d   :  { %6620 = vmatpush1.bf16.msra.mxu1 %v14369_v9  ;;  %6921 = vmatpush1.bf16.msra.mxu0 %v14372_v38  ;;  %v14422_v9 = vld [vmem:[%s20738_s5 + $0x46c] ss:$20 sps:$4 sm:$0xff]  }
 0x36e   :  { %6621 = vmatprep.subr.bf16.mxu1 %v14377_v34  ;;  %6922 = vmatprep.subr.bf16.mxu0 %v14380_v49  ;;  %v14417_v38 = vld [vmem:[%s20738_s5 + $0x460] ss:$20 sps:$4 sm:$0xff]   ;;  %v14420_v34 = vld [vmem:[%s20738_s5 + $0x468] ss:$20 sps:$4 sm:$0xff]  }
 0x36f   :  { %v14425_v49 = vld [vmem:[%s20738_s5 + $0x48c] ss:$20 sps:$4 sm:$0xff]  }
 0x371   :  { %6622 = vmatpush1.bf16.msra.mxu1 %v14375_v2  ;;  %6923 = vmatpush1.bf16.msra.mxu0 %v14378_v61  ;;  %v14428_v2 = vld [vmem:[%s20738_s5 + $0x494] ss:$20 sps:$4 sm:$0xff]  }
 0x372   :  { %6623 = vmatprep.subr.bf16.mxu1 %v14383_v63  ;;  %6924 = vmatprep.subr.bf16.mxu0 %v14386_v54  ;;  %v14423_v61 = vld [vmem:[%s20738_s5 + $0x488] ss:$20 sps:$4 sm:$0xff]   ;;  %v14426_v63 = vld [vmem:[%s20738_s5 + $0x490] ss:$20 sps:$4 sm:$0xff]  }
 0x373   :  { %v14431_v54 = vld [vmem:[%s20738_s5 + $0x4b4] ss:$20 sps:$4 sm:$0xff]  }
 0x375   :  { %6624 = vmatpush1.bf16.msra.mxu1 %v14381_v46  ;;  %6925 = vmatpush1.bf16.msra.mxu0 %v14384_v12  ;;  %v14434_v46 = vld [vmem:[%s20738_s5 + $0x4bc] ss:$20 sps:$4 sm:$0xff]  }
 0x376   :  { %6625 = vmatprep.subr.bf16.mxu1 %v14389_v15  ;;  %6926 = vmatprep.subr.bf16.mxu0 %v14392_v6  ;;  %v14429_v12 = vld [vmem:[%s20738_s5 + $0x4b0] ss:$20 sps:$4 sm:$0xff]   ;;  %v14432_v15 = vld [vmem:[%s20738_s5 + $0x4b8] ss:$20 sps:$4 sm:$0xff]  }
 0x377   :  { %v14437_v6 = vld [vmem:[%s20738_s5 + $0x4dc] ss:$20 sps:$4 sm:$0xff]  }
 0x379   :  { %6626 = vmatpush1.bf16.msra.mxu1 %v14387_v60  ;;  %6927 = vmatpush1.bf16.msra.mxu0 %v14390_v13  ;;  %v14440_v60 = vld [vmem:[%s20738_s5 + $0x4e4] ss:$20 sps:$4 sm:$0xff]  }
 0x37a   :  { %6627 = vmatprep.subr.bf16.mxu1 %v14395_v43  ;;  %6928 = vmatprep.subr.bf16.mxu0 %v14398_v14  ;;  %v14435_v13 = vld [vmem:[%s20738_s5 + $0x4d8] ss:$20 sps:$4 sm:$0xff]   ;;  %v14438_v43 = vld [vmem:[%s20738_s5 + $0x4e0] ss:$20 sps:$4 sm:$0xff]  }
 0x37b   :  { %v14443_v14 = vld [vmem:[%s20738_s5 + $0x504] ss:$20 sps:$4 sm:$0xff]  }
 0x37d   :  { %6628 = vmatpush1.bf16.msra.mxu1 %v14393_v17  ;;  %6929 = vmatpush1.bf16.msra.mxu0 %v14396_v19  ;;  %v14446_v17 = vld [vmem:[%s20738_s5 + $0x50c] ss:$20 sps:$4 sm:$0xff]  }
 0x37e   :  { %6629 = vmatprep.subr.bf16.mxu1 %v14401_v32  ;;  %6930 = vmatprep.subr.bf16.mxu0 %v14404_v33 }
 0x381   :  { %6630 = vmatpush1.bf16.msra.mxu1 %v14399_v44  ;;  %6931 = vmatpush1.bf16.msra.mxu0 %v14402_v18  ;;  %v2743_v18 = vadd.f32 %v17224_v31, %v17363_v16 }
 0x382   :  { %6631 = vmatprep.subr.bf16.mxu1 %v14407_v42  ;;  %6932 = vmatprep.subr.bf16.mxu0 %v14410_v30  ;;  %v2744_v42 = vadd.f32 %v17224_v31, %v17366_v40  ;;  %v2757_v30 = vadd.f32 %v17227_v47, %v17381_v36 }
 0x383   :  { %15141 = vtanh.f32 %v2743_v18 }
 0x384   :  { %15143 = vtanh.f32 %v2744_v42  ;;  %v14458_v42 = vld [vmem:[%s20738_s5 + $0x55c] ss:$20 sps:$4 sm:$0xff]  }
 0x385   :  { %6632 = vmatpush1.bf16.msra.mxu1 %v14405_v52  ;;  %6933 = vmatpush1.bf16.msra.mxu0 %v14408_v45  ;;  %v2758_v52 = vadd.f32 %v17227_v47, %v17384_v5  ;;  %15145 = vtanh.f32 %v2757_v30 }
 0x386   :  { %6633 = vmatprep.subr.bf16.mxu1 %v14413_v7  ;;  %6934 = vmatprep.subr.bf16.mxu0 %v14416_v24 }
 0x387   :  { %15147 = vtanh.f32 %v2758_v52  ;;  %v14453_v52 = vld [vmem:[%s20738_s5 + $0x550] ss:$20 sps:$4 sm:$0xff]  }
 0x389   :  { %6634 = vmatpush1.bf16.msra.mxu1 %v14411_v51  ;;  %6935 = vmatpush1.bf16.msra.mxu0 %v14414_v35 }
 0x38a   :  { %6635 = vmatprep.subr.bf16.mxu1 %v14419_v58  ;;  %6936 = vmatprep.subr.bf16.mxu0 %v14422_v9 }
 0x38d   :  { %6636 = vmatpush1.bf16.msra.mxu1 %v14417_v38  ;;  %6937 = vmatpush1.bf16.msra.mxu0 %v14420_v34 }
 0x38e   :  { %6637 = vmatprep.subr.bf16.mxu1 %v14425_v49  ;;  %6938 = vmatprep.subr.bf16.mxu0 %v14428_v2 }
 0x391   :  { %6638 = vmatpush1.bf16.msra.mxu1 %v14423_v61  ;;  %6939 = vmatpush1.bf16.msra.mxu0 %v14426_v63 }
 0x392   :  { %6639 = vmatprep.subr.bf16.mxu1 %v14431_v54  ;;  %6940 = vmatprep.subr.bf16.mxu0 %v14434_v46 }
 0x395   :  { %6640 = vmatpush1.bf16.msra.mxu1 %v14429_v12  ;;  %6941 = vmatpush1.bf16.msra.mxu0 %v14432_v15  ;;  %v14449_v12 = vld [vmem:[%s20738_s5 + $0x52c] ss:$20 sps:$4 sm:$0xff]  }
 0x396   :  { %6641 = vmatprep.subr.bf16.mxu1 %v14437_v6  ;;  %6942 = vmatprep.subr.bf16.mxu0 %v14440_v60  ;;  %v14452_v60 = vld [vmem:[%s20738_s5 + $0x534] ss:$20 sps:$4 sm:$0xff]  }
 0x399   :  { %6642 = vmatpush1.bf16.msra.mxu1 %v14435_v13  ;;  %6943 = vmatpush1.bf16.msra.mxu0 %v14438_v43  ;;  %v14447_v43 = vld [vmem:[%s20738_s5 + $0x528] ss:$20 sps:$4 sm:$0xff]  }
 0x39a   :  { %6654 = vmatprep.subr.bf16.mxu1 %v14443_v14  ;;  %6955 = vmatprep.subr.bf16.mxu0 %v14446_v17  ;;  %v14450_v14 = vld [vmem:[%s20738_s5 + $0x530] ss:$20 sps:$4 sm:$0xff]   ;;  %v14455_v17 = vld [vmem:[%s20738_s5 + $0x554] ss:$20 sps:$4 sm:$0xff]  }
 0x3c3   :  { %v17976_v19 = vpop.f32.mrb[12].mxu0 }
 0x3c4   :  { %v17978_v32 = vpop.f32.mrb[13].mxu0 }
 0x3c7   :  { %v17980_v33 = vpop.f32.mrb[14].mxu0 }
 0x3c8   :  { %v17982_v44 = vpop.f32.mrb[15].mxu0 }
 0x3d0   :  { %v17992_v45 = vpop.permute.xlu0 %13600 }
 0x3d1   :  { %v13603_v7 = vunpack.i.h.bf16 %v17992_v45  ;;  %v13602_v24 = vunpack.i.l.bf16 %v17992_v45 }
 0x3d2   :  { %v17996_v16 = vpop.permute.xlu1 %13610 }
 0x3d3   :  { %v3043_v40 = vsel %vm529_vm2, %v13578_v53, %v13602_v24  ;;  %v13613_v36 = vunpack.i.h.bf16 %v17996_v16  ;;  %v13612_v5 = vunpack.i.l.bf16 %v17996_v16  ;;  %v3044_v51 = vsel %vm529_vm2, %v13602_v24, %v13603_v7  ;;  %v14456_v24 = vld [vmem:[%s20738_s5 + $0x558] ss:$20 sps:$4 sm:$0xff]  }
 0x3d4   :  { %v18006_v35 = vpop.permute.xlu0 %13605  ;;  %v3097_v38 = vmax.f32 %v17516_v57, %v3043_v40  ;;  %v3098_v2 = vmax.f32 %v17749_v55, %v3044_v51  ;;  %v14461_v40 = vld [vmem:[%s20738_s5 + $0x57c] ss:$20 sps:$4 sm:$0xff]   ;;  %v14459_v51 = vld [vmem:[%s20738_s5 + $0x578] ss:$20 sps:$4 sm:$0xff]  }
 0x3d5   :  { %v13608_v58 = vunpack.i.h.bf16 %v18006_v35  ;;  %v13607_v9 = vunpack.i.l.bf16 %v18006_v35  ;;  %v3056_v62 = vsel %vm529_vm2, %v13583_v3, %v13612_v5  ;;  %v3057_v53 = vsel %vm529_vm2, %v13612_v5, %v13613_v36  ;;  %v14464_v5 = vld [vmem:[%s20738_s5 + $0x584] ss:$20 sps:$4 sm:$0xff]   ;;  %v14537_v35 = vld [vmem:[%s20738_s5 + $0x780] ss:$20 sps:$4 sm:$0xff]  }
 0x3d6   :  { %v3111_v34 = vmax.f32 %v17529_v48, %v3056_v62  ;;  %v18018_v49 = vpop.permute.xlu1 %13615  ;;  %v3112_v61 = vmax.f32 %v17771_v11, %v3057_v53  ;;  %v14467_v62 = vld [vmem:[%s20738_s5 + $0x5a4] ss:$20 sps:$4 sm:$0xff]   ;;  %v14470_v53 = vld [vmem:[%s20738_s5 + $0x5ac] ss:$20 sps:$4 sm:$0xff]  }
 0x3d7   :  { %v2880_v27 = vsel %vm169_vm0, %v13588_v56, %v13607_v9  ;;  %v2881_v3 = vsel %vm169_vm0, %v13607_v9, %v13608_v58  ;;  %v13618_v63 = vunpack.i.h.bf16 %v18018_v49  ;;  %v13617_v57 = vunpack.i.l.bf16 %v18018_v49  ;;  %v18043_v56 = vpop.eup %15141  ;;  %v14462_v9 = vld [vmem:[%s20738_s5 + $0x580] ss:$20 sps:$4 sm:$0xff]  }
 0x3d8   :  { %v18031_v48 = vmax.f32 %v17549_v29, %v2880_v27  ;;  %v18034_v54 = vmax.f32 %v17768_v41, %v2881_v3  ;;  %v18036_v55 = vpack.c.bf16 %v3112_v61, %v3098_v2  ;;  %v18038_v11 = vpack.c.bf16 %v3111_v34, %v3097_v38  ;;  %v14444_v41 = vld [vmem:[%s20738_s5 + $0x508] ss:$20 sps:$4 sm:$0xff]   ;;  %v18057_v15 = vpop.eup %15143  ;;  %v14465_v38 = vld [vmem:[%s20738_s5 + $0x5a0] ss:$20 sps:$4 sm:$0xff]   ;;  %v14474_v3 = vld [vmem:[%s20738_s5 + $0x5d0] ss:$20 sps:$4 sm:$0xff]  }
 0x3d9   :  { %v2893_v46 = vsel %vm169_vm0, %v13598_v26, %v13617_v57  ;;  %v2894_v29 = vsel %vm169_vm0, %v13617_v57, %v13618_v63  ;;  %v18072_v13 = vpop.eup %15145  ;;  %v13624_v18 = vpack.i.bf16 %v18057_v15, %v18043_v56  ;;  %v14468_v34 = vld [vmem:[%s20738_s5 + $0x5a8] ss:$20 sps:$4 sm:$0xff]   ;;  %v14473_v2 = vld [vmem:[%s20738_s5 + $0x5cc] ss:$20 sps:$4 sm:$0xff]  }
 0x3da   :  { %v18060_v6 = vmax.f32 %v17560_v23, %v2893_v46  ;;  %v18063_v50 = vmax.f32 %v17788_v4, %v2894_v29  ;;  %v13619_v26 = vpack.i.bf16 %v18034_v54, %v18031_v48  ;;  %6643 = vmatprep.mubr.bf16.mxu1 %v18036_v55  ;;  %6944 = vmatprep.mubr.bf16.mxu0 %v18036_v55  ;;  %v18076_v23 = vpop.eup %15147  ;;  %v14476_v61 = vld [vmem:[%s20738_s5 + $0x5d4] ss:$20 sps:$4 sm:$0xff]   ;;  %v14477_v46 = vld [vmem:[%s20738_s5 + $0x5f0] ss:$20 sps:$4 sm:$0xff]   ;;  %v14480_v29 = vld [vmem:[%s20738_s5 + $0x5f8] ss:$20 sps:$4 sm:$0xff]  }
 0x3db   :  { %6644 = vmatmul.mubr.bf16.vlgmr.msra.gmra.mrb[12].mxu1 %v18038_v11  ;;  %6945 = vmatmul.mubr.bf16.vlgmr.msra.gmra.mrb[16].mxu0 %v18038_v11  ;;  %v13634_v30 = vpack.i.bf16 %v18076_v23, %v18072_v13  ;;  %v14471_v27 = vld [vmem:[%s20738_s5 + $0x5c8] ss:$20 sps:$4 sm:$0xff]  }
 0x3dc   :  { %13620 = vrot.lane.b32.xlu0 %v13619_v26, %s15277_s13  ;;  %v13629_v4 = vpack.i.bf16 %v18063_v50, %v18060_v6  ;;  %6655 = vmatpush1.bf16.msra.mxu1 %v14441_v59  ;;  %v14479_v57 = vld [vmem:[%s20738_s5 + $0x5f4] ss:$20 sps:$4 sm:$0xff]   ;;  %v14482_v59 = vld [vmem:[%s20738_s5 + $0x5fc] ss:$20 sps:$4 sm:$0xff]   ;;  %v14483_v26 = vld [vmem:[%s20738_s5 + $0x618] ss:$20 sps:$4 sm:$0xff]  }
 0x3dd   :  { %6956 = vmatpush1.bf16.msra.mxu0 %v14444_v41  ;;  %6656 = vmatprep.subr.bf16.mxu1 %v14449_v12  ;;  %v14485_v41 = vld [vmem:[%s20738_s5 + $0x61c] ss:$20 sps:$4 sm:$0xff]   ;;  %v14488_v12 = vld [vmem:[%s20738_s5 + $0x624] ss:$20 sps:$4 sm:$0xff]  }
 0x3de   :  { %13630 = vrot.lane.b32.xlu1 %v13629_v4, %s15277_s13  ;;  %6957 = vmatprep.subr.bf16.mxu0 %v14452_v60  ;;  %v14486_v60 = vld [vmem:[%s20738_s5 + $0x620] ss:$20 sps:$4 sm:$0xff]   ;;  %v14491_v4 = vld [vmem:[%s20738_s5 + $0x644] ss:$20 sps:$4 sm:$0xff]  }
 0x3e0   :  { %13625 = vrot.lane.b32.xlu0 %v13624_v18, %s15275_s20  ;;  %6657 = vmatpush1.bf16.msra.mxu1 %v14447_v43  ;;  %v14494_v43 = vld [vmem:[%s20738_s5 + $0x64c] ss:$20 sps:$4 sm:$0xff]  }
 0x3e1   :  { %6958 = vmatpush1.bf16.msra.mxu0 %v14450_v14  ;;  %6658 = vmatprep.subr.bf16.mxu1 %v14455_v17  ;;  %v14489_v14 = vld [vmem:[%s20738_s5 + $0x640] ss:$20 sps:$4 sm:$0xff]   ;;  %v14492_v17 = vld [vmem:[%s20738_s5 + $0x648] ss:$20 sps:$4 sm:$0xff]  }
 0x3e2   :  { %13635 = vrot.lane.b32.xlu1 %v13634_v30, %s15275_s20  ;;  %6959 = vmatprep.subr.bf16.mxu0 %v14458_v42  ;;  %v14497_v18 = vld [vmem:[%s20738_s5 + $0x66c] ss:$20 sps:$4 sm:$0xff]   ;;  %v14500_v42 = vld [vmem:[%s20738_s5 + $0x674] ss:$20 sps:$4 sm:$0xff]  }
 0x3e3   :  { %v14495_v30 = vld [vmem:[%s20738_s5 + $0x668] ss:$20 sps:$4 sm:$0xff]  }
 0x3e4   :  { %6659 = vmatpush1.bf16.msra.mxu1 %v14453_v52  ;;  %v14498_v52 = vld [vmem:[%s20738_s5 + $0x670] ss:$20 sps:$4 sm:$0xff]  }
 0x3e5   :  { %6960 = vmatpush1.bf16.msra.mxu0 %v14456_v24  ;;  %6660 = vmatprep.subr.bf16.mxu1 %v14461_v40  ;;  %v14503_v24 = vld [vmem:[%s20738_s5 + $0x694] ss:$20 sps:$4 sm:$0xff]   ;;  %v14506_v40 = vld [vmem:[%s20738_s5 + $0x69c] ss:$20 sps:$4 sm:$0xff]  }
 0x3e6   :  { %6961 = vmatprep.subr.bf16.mxu0 %v14464_v5  ;;  %v14501_v5 = vld [vmem:[%s20738_s5 + $0x690] ss:$20 sps:$4 sm:$0xff]  }
 0x3e8   :  { %6661 = vmatpush1.bf16.msra.mxu1 %v14459_v51  ;;  %v14504_v51 = vld [vmem:[%s20738_s5 + $0x698] ss:$20 sps:$4 sm:$0xff]  }
 0x3e9   :  { %6962 = vmatpush1.bf16.msra.mxu0 %v14462_v9  ;;  %6662 = vmatprep.subr.bf16.mxu1 %v14467_v62  ;;  %v14509_v9 = vld [vmem:[%s20738_s5 + $0x6bc] ss:$20 sps:$4 sm:$0xff]   ;;  %v14512_v62 = vld [vmem:[%s20738_s5 + $0x6c4] ss:$20 sps:$4 sm:$0xff]  }
 0x3ea   :  { %6963 = vmatprep.subr.bf16.mxu0 %v14470_v53  ;;  %v14507_v53 = vld [vmem:[%s20738_s5 + $0x6b8] ss:$20 sps:$4 sm:$0xff]  }
 0x3ec   :  { %6663 = vmatpush1.bf16.msra.mxu1 %v14465_v38  ;;  %v14510_v38 = vld [vmem:[%s20738_s5 + $0x6c0] ss:$20 sps:$4 sm:$0xff]  }
 0x3ed   :  { %6964 = vmatpush1.bf16.msra.mxu0 %v14468_v34  ;;  %6664 = vmatprep.subr.bf16.mxu1 %v14473_v2  ;;  %v14515_v34 = vld [vmem:[%s20738_s5 + $0x6e4] ss:$20 sps:$4 sm:$0xff]   ;;  %v14518_v2 = vld [vmem:[%s20738_s5 + $0x6ec] ss:$20 sps:$4 sm:$0xff]  }
 0x3ee   :  { %6965 = vmatprep.subr.bf16.mxu0 %v14476_v61  ;;  %v14513_v61 = vld [vmem:[%s20738_s5 + $0x6e0] ss:$20 sps:$4 sm:$0xff]  }
 0x3f0   :  { %6665 = vmatpush1.bf16.msra.mxu1 %v14471_v27  ;;  %v14516_v27 = vld [vmem:[%s20738_s5 + $0x6e8] ss:$20 sps:$4 sm:$0xff]  }
 0x3f1   :  { %6966 = vmatpush1.bf16.msra.mxu0 %v14474_v3  ;;  %6666 = vmatprep.subr.bf16.mxu1 %v14479_v57  ;;  %v14521_v3 = vld [vmem:[%s20738_s5 + $0x70c] ss:$20 sps:$4 sm:$0xff]   ;;  %v14524_v57 = vld [vmem:[%s20738_s5 + $0x714] ss:$20 sps:$4 sm:$0xff]  }
 0x3f2   :  { %6967 = vmatprep.subr.bf16.mxu0 %v14482_v59  ;;  %v14519_v59 = vld [vmem:[%s20738_s5 + $0x708] ss:$20 sps:$4 sm:$0xff]  }
 0x3f4   :  { %6667 = vmatpush1.bf16.msra.mxu1 %v14477_v46  ;;  %v14522_v46 = vld [vmem:[%s20738_s5 + $0x710] ss:$20 sps:$4 sm:$0xff]  }
 0x3f5   :  { %6968 = vmatpush1.bf16.msra.mxu0 %v14480_v29  ;;  %6668 = vmatprep.subr.bf16.mxu1 %v14485_v41  ;;  %v14527_v29 = vld [vmem:[%s20738_s5 + $0x734] ss:$20 sps:$4 sm:$0xff]   ;;  %v14530_v41 = vld [vmem:[%s20738_s5 + $0x73c] ss:$20 sps:$4 sm:$0xff]  }
 0x3f6   :  { %6969 = vmatprep.subr.bf16.mxu0 %v14488_v12  ;;  %v14525_v12 = vld [vmem:[%s20738_s5 + $0x730] ss:$20 sps:$4 sm:$0xff]  }
 0x3f8   :  { %6669 = vmatpush1.bf16.msra.mxu1 %v14483_v26  ;;  %v14528_v26 = vld [vmem:[%s20738_s5 + $0x738] ss:$20 sps:$4 sm:$0xff]  }
 0x3f9   :  { %6970 = vmatpush1.bf16.msra.mxu0 %v14486_v60  ;;  %6670 = vmatprep.subr.bf16.mxu1 %v14491_v4  ;;  %v14533_v60 = vld [vmem:[%s20738_s5 + $0x75c] ss:$20 sps:$4 sm:$0xff]   ;;  %v14536_v4 = vld [vmem:[%s20738_s5 + $0x764] ss:$20 sps:$4 sm:$0xff]  }
 0x3fa   :  { %6971 = vmatprep.subr.bf16.mxu0 %v14494_v43  ;;  %v14531_v43 = vld [vmem:[%s20738_s5 + $0x758] ss:$20 sps:$4 sm:$0xff]  }
 0x3fc   :  { %6671 = vmatpush1.bf16.msra.mxu1 %v14489_v14  ;;  %v14534_v14 = vld [vmem:[%s20738_s5 + $0x760] ss:$20 sps:$4 sm:$0xff]  }
 0x3fd   :  { %6972 = vmatpush1.bf16.msra.mxu0 %v14492_v17  ;;  %6672 = vmatprep.subr.bf16.mxu1 %v14497_v18  ;;  %v14539_v17 = vld [vmem:[%s20738_s5 + $0x784] ss:$20 sps:$4 sm:$0xff]   ;;  %v14542_v18 = vld [vmem:[%s20738_s5 + $0x78c] ss:$20 sps:$4 sm:$0xff]  }
 0x3fe   :  { %6973 = vmatprep.subr.bf16.mxu0 %v14500_v42  ;;  %v2745_v42 = vadd.f32 %v17224_v31, %v17415_v37 }
 0x400   :  { %6673 = vmatpush1.bf16.msra.mxu1 %v14495_v30  ;;  %v2746_v30 = vadd.f32 %v17224_v31, %v17417_v21  ;;  %15149 = vtanh.f32 %v2745_v42 }
 0x401   :  { %6974 = vmatpush1.bf16.msra.mxu0 %v14498_v52  ;;  %6674 = vmatprep.subr.bf16.mxu1 %v14503_v24  ;;  %v2759_v52 = vadd.f32 %v17227_v47, %v17425_v28  ;;  %v2760_v24 = vadd.f32 %v17227_v47, %v17427_v10 }
 0x402   :  { %6975 = vmatprep.subr.bf16.mxu0 %v14506_v40  ;;  %15151 = vtanh.f32 %v2746_v30  ;;  %v14549_v30 = vld [vmem:[%s20738_s5 + $0x7d0] ss:$20 sps:$4 sm:$0xff]  }
 0x403   :  { %15153 = vtanh.f32 %v2759_v52  ;;  %v14552_v52 = vld [vmem:[%s20738_s5 + $0x7d8] ss:$20 sps:$4 sm:$0xff]  }
 0x404   :  { %6675 = vmatpush1.bf16.msra.mxu1 %v14501_v5  ;;  %15155 = vtanh.f32 %v2760_v24  ;;  %v14557_v24 = vld [vmem:[%s20738_s5 + $0x7fc] ss:$20 sps:$4 sm:$0xff]  }
 0x405   :  { %6976 = vmatpush1.bf16.msra.mxu0 %v14504_v51  ;;  %6676 = vmatprep.subr.bf16.mxu1 %v14509_v9 }
 0x406   :  { %6977 = vmatprep.subr.bf16.mxu0 %v14512_v62 }
 0x408   :  { %6677 = vmatpush1.bf16.msra.mxu1 %v14507_v53 }
 0x409   :  { %6978 = vmatpush1.bf16.msra.mxu0 %v14510_v38  ;;  %6678 = vmatprep.subr.bf16.mxu1 %v14515_v34 }
 0x40a   :  { %6979 = vmatprep.subr.bf16.mxu0 %v14518_v2 }
 0x40c   :  { %6679 = vmatpush1.bf16.msra.mxu1 %v14513_v61 }
 0x40d   :  { %6980 = vmatpush1.bf16.msra.mxu0 %v14516_v27  ;;  %6680 = vmatprep.subr.bf16.mxu1 %v14521_v3 }
 0x40e   :  { %6981 = vmatprep.subr.bf16.mxu0 %v14524_v57 }
 0x410   :  { %6681 = vmatpush1.bf16.msra.mxu1 %v14519_v59 }
 0x411   :  { %6982 = vmatpush1.bf16.msra.mxu0 %v14522_v46  ;;  %6682 = vmatprep.subr.bf16.mxu1 %v14527_v29  ;;  %v14545_v29 = vld [vmem:[%s20738_s5 + $0x7ac] ss:$20 sps:$4 sm:$0xff]  }
 0x412   :  { %6983 = vmatprep.subr.bf16.mxu0 %v14530_v41 }
 0x414   :  { %6683 = vmatpush1.bf16.msra.mxu1 %v14525_v12 }
 0x415   :  { %6984 = vmatpush1.bf16.msra.mxu0 %v14528_v26  ;;  %6684 = vmatprep.subr.bf16.mxu1 %v14533_v60  ;;  %v14548_v26 = vld [vmem:[%s20738_s5 + $0x7b4] ss:$20 sps:$4 sm:$0xff]  }
 0x416   :  { %6985 = vmatprep.subr.bf16.mxu0 %v14536_v4  ;;  %v14543_v4 = vld [vmem:[%s20738_s5 + $0x7a8] ss:$20 sps:$4 sm:$0xff]  }
 0x418   :  { %6685 = vmatpush1.bf16.msra.mxu1 %v14531_v43  ;;  %v14546_v43 = vld [vmem:[%s20738_s5 + $0x7b0] ss:$20 sps:$4 sm:$0xff]  }
 0x419   :  { %6986 = vmatpush1.bf16.msra.mxu0 %v14534_v14  ;;  %6697 = vmatprep.subr.bf16.mxu1 %v14539_v17  ;;  %v14551_v14 = vld [vmem:[%s20738_s5 + $0x7d4] ss:$20 sps:$4 sm:$0xff]  }
 0x41a   :  { %6998 = vmatprep.subr.bf16.mxu0 %v14542_v18  ;;  %v14554_v18 = vld [vmem:[%s20738_s5 + $0x7dc] ss:$20 sps:$4 sm:$0xff]  }
 0x44e   :  { %v18276_v40 = vpop.permute.xlu0 %13620 }
 0x44f   :  { %v13623_v5 = vunpack.i.h.bf16 %v18276_v40  ;;  %v13622_v51 = vunpack.i.l.bf16 %v18276_v40 }
 0x450   :  { %v18280_v37 = vpop.permute.xlu1 %13630 }
 0x451   :  { %v3045_v21 = vsel %vm529_vm2, %v13603_v7, %v13622_v51  ;;  %v13633_v28 = vunpack.i.h.bf16 %v18280_v37  ;;  %v13632_v10 = vunpack.i.l.bf16 %v18280_v37  ;;  %v3046_v9 = vsel %vm529_vm2, %v13622_v51, %v13623_v5  ;;  %v14560_v51 = vld [vmem:[%s20738_s5 + $0x804] ss:$20 sps:$4 sm:$0xff]  }
 0x452   :  { %v18290_v62 = vpop.permute.xlu0 %13625  ;;  %v3099_v34 = vmax.f32 %v17752_v25, %v3045_v21  ;;  %v3100_v27 = vmax.f32 %v18031_v48, %v3046_v9  ;;  %v14555_v21 = vld [vmem:[%s20738_s5 + $0x7f8] ss:$20 sps:$4 sm:$0xff]  }
 0x453   :  { %v3058_v53 = vsel %vm529_vm2, %v13613_v36, %v13632_v10  ;;  %v13628_v38 = vunpack.i.h.bf16 %v18290_v62  ;;  %v13627_v45 = vunpack.i.l.bf16 %v18290_v62  ;;  %v3059_v7 = vsel %vm529_vm2, %v13632_v10, %v13633_v28  ;;  %v14558_v10 = vld [vmem:[%s20738_s5 + $0x800] ss:$20 sps:$4 sm:$0xff]   ;;  %v14563_v9 = vld [vmem:[%s20738_s5 + $0x824] ss:$20 sps:$4 sm:$0xff]  }
 0x454   :  { %v3113_v2 = vmax.f32 %v17774_v22, %v3058_v53  ;;  %v18302_v61 = vpop.permute.xlu1 %13635  ;;  %v3114_v16 = vmax.f32 %v18060_v6, %v3059_v7  ;;  %v14566_v53 = vld [vmem:[%s20738_s5 + $0x82c] ss:$20 sps:$4 sm:$0xff]   ;;  %v14564_v7 = vld [vmem:[%s20738_s5 + $0x828] ss:$20 sps:$4 sm:$0xff]  }
 0x455   :  { %v2882_v36 = vsel %vm169_vm0, %v13608_v58, %v13627_v45  ;;  %v2883_v3 = vsel %vm169_vm0, %v13627_v45, %v13628_v38  ;;  %v13638_v57 = vunpack.i.h.bf16 %v18302_v61  ;;  %v13637_v25 = vunpack.i.l.bf16 %v18302_v61  ;;  %v18327_v58 = vpop.eup %15149  ;;  %v14561_v45 = vld [vmem:[%s20738_s5 + $0x820] ss:$20 sps:$4 sm:$0xff]  }
 0x456   :  { %v18315_v22 = vmax.f32 %v17780_v1, %v2882_v36  ;;  %v18318_v59 = vmax.f32 %v18043_v56, %v2883_v3  ;;  %v18320_v48 = vpack.c.bf16 %v3114_v16, %v3100_v27  ;;  %v18322_v6 = vpack.c.bf16 %v3113_v2, %v3099_v34  ;;  %v14540_v56 = vld [vmem:[%s20738_s5 + $0x788] ss:$20 sps:$4 sm:$0xff]   ;;  %v18341_v41 = vpop.eup %15151  ;;  %v14569_v34 = vld [vmem:[%s20738_s5 + $0x84c] ss:$20 sps:$4 sm:$0xff]   ;;  %v14570_v16 = vld [vmem:[%s20738_s5 + $0x850] ss:$20 sps:$4 sm:$0xff]  }
 0x457   :  { %v2895_v46 = vsel %vm169_vm0, %v13618_v63, %v13637_v25  ;;  %v2896_v1 = vsel %vm169_vm0, %v13637_v25, %v13638_v57  ;;  %v18356_v60 = vpop.eup %15153  ;;  %v13644_v17 = vpack.i.bf16 %v18341_v41, %v18327_v58  ;;  %v14572_v2 = vld [vmem:[%s20738_s5 + $0x854] ss:$20 sps:$4 sm:$0xff]   ;;  %v14578_v3 = vld [vmem:[%s20738_s5 + $0x87c] ss:$20 sps:$4 sm:$0xff]  }
 0x458   :  { %v18344_v12 = vmax.f32 %v17796_v0, %v2895_v46  ;;  %v18347_v49 = vmax.f32 %v18072_v13, %v2896_v1  ;;  %6686 = vmatprep.mubr.bf16.mxu1 %v18320_v48  ;;  %6987 = vmatprep.mubr.bf16.mxu0 %v18320_v48  ;;  %v13639_v63 = vpack.i.bf16 %v18318_v59, %v18315_v22  ;;  %v18360_v0 = vpop.eup %15155  ;;  %v14567_v27 = vld [vmem:[%s20738_s5 + $0x848] ss:$20 sps:$4 sm:$0xff]   ;;  %v14573_v25 = vld [vmem:[%s20738_s5 + $0x870] ss:$20 sps:$4 sm:$0xff]   ;;  %v14633_v62 = vld [vmem:[%s20738_s5 + $0xa00] ss:$20 sps:$4 sm:$0xff]  }
 0x459   :  { %6687 = vmatmul.mubr.bf16.vlgmr.msra.gmra.mrb[12].mxu1 %v18322_v6  ;;  %6988 = vmatmul.mubr.bf16.vlgmr.msra.gmra.mrb[16].mxu0 %v18322_v6  ;;  %v13654_v42 = vpack.i.bf16 %v18360_v0, %v18356_v60  ;;  %v14575_v36 = vld [vmem:[%s20738_s5 + $0x874] ss:$20 sps:$4 sm:$0xff]   ;;  %v14581_v46 = vld [vmem:[%s20738_s5 + $0x89c] ss:$20 sps:$4 sm:$0xff]   ;;  %v14584_v1 = vld [vmem:[%s20738_s5 + $0x8a4] ss:$20 sps:$4 sm:$0xff]  }
 0x45a   :  { %13640 = vrot.lane.b32.xlu0 %v13639_v63, %s15277_s13  ;;  %v13649_v13 = vpack.i.bf16 %v18347_v49, %v18344_v12  ;;  %6698 = vmatpush1.bf16.msra.mxu1 %v14537_v35  ;;  %v14576_v35 = vld [vmem:[%s20738_s5 + $0x878] ss:$20 sps:$4 sm:$0xff]  }
 0x45b   :  { %6999 = vmatpush1.bf16.msra.mxu0 %v14540_v56  ;;  %6699 = vmatprep.subr.bf16.mxu1 %v14545_v29  ;;  %v14579_v56 = vld [vmem:[%s20738_s5 + $0x898] ss:$20 sps:$4 sm:$0xff]   ;;  %v14582_v29 = vld [vmem:[%s20738_s5 + $0x8a0] ss:$20 sps:$4 sm:$0xff]  }
 0x45c   :  { %13650 = vrot.lane.b32.xlu1 %v13649_v13, %s15277_s13  ;;  %7000 = vmatprep.subr.bf16.mxu0 %v14548_v26  ;;  %v14587_v63 = vld [vmem:[%s20738_s5 + $0x8c4] ss:$20 sps:$4 sm:$0xff]   ;;  %v14590_v26 = vld [vmem:[%s20738_s5 + $0x8cc] ss:$20 sps:$4 sm:$0xff]  }
 0x45d   :  { %v14585_v13 = vld [vmem:[%s20738_s5 + $0x8c0] ss:$20 sps:$4 sm:$0xff]  }
 0x45e   :  { %13645 = vrot.lane.b32.xlu0 %v13644_v17, %s15275_s20  ;;  %6700 = vmatpush1.bf16.msra.mxu1 %v14543_v4  ;;  %v14588_v4 = vld [vmem:[%s20738_s5 + $0x8c8] ss:$20 sps:$4 sm:$0xff]  }
 0x45f   :  { %7001 = vmatpush1.bf16.msra.mxu0 %v14546_v43  ;;  %6701 = vmatprep.subr.bf16.mxu1 %v14551_v14  ;;  %v14593_v43 = vld [vmem:[%s20738_s5 + $0x8ec] ss:$20 sps:$4 sm:$0xff]   ;;  %v14596_v14 = vld [vmem:[%s20738_s5 + $0x8f4] ss:$20 sps:$4 sm:$0xff]  }
 0x460   :  { %13655 = vrot.lane.b32.xlu1 %v13654_v42, %s15275_s20  ;;  %7002 = vmatprep.subr.bf16.mxu0 %v14554_v18  ;;  %v14591_v17 = vld [vmem:[%s20738_s5 + $0x8e8] ss:$20 sps:$4 sm:$0xff]   ;;  %v14594_v18 = vld [vmem:[%s20738_s5 + $0x8f0] ss:$20 sps:$4 sm:$0xff]  }
 0x461   :  { %v14599_v42 = vld [vmem:[%s20738_s5 + $0x914] ss:$20 sps:$4 sm:$0xff]  }
 0x462   :  { %6702 = vmatpush1.bf16.msra.mxu1 %v14549_v30  ;;  %v14602_v30 = vld [vmem:[%s20738_s5 + $0x91c] ss:$20 sps:$4 sm:$0xff]  }
 0x463   :  { %7003 = vmatpush1.bf16.msra.mxu0 %v14552_v52  ;;  %6703 = vmatprep.subr.bf16.mxu1 %v14557_v24  ;;  %v14597_v52 = vld [vmem:[%s20738_s5 + $0x910] ss:$20 sps:$4 sm:$0xff]   ;;  %v14600_v24 = vld [vmem:[%s20738_s5 + $0x918] ss:$20 sps:$4 sm:$0xff]  }
 0x464   :  { %7004 = vmatprep.subr.bf16.mxu0 %v14560_v51  ;;  %v14605_v51 = vld [vmem:[%s20738_s5 + $0x93c] ss:$20 sps:$4 sm:$0xff]  }
 0x466   :  { %6704 = vmatpush1.bf16.msra.mxu1 %v14555_v21  ;;  %v14608_v21 = vld [vmem:[%s20738_s5 + $0x944] ss:$20 sps:$4 sm:$0xff]  }
 0x467   :  { %7005 = vmatpush1.bf16.msra.mxu0 %v14558_v10  ;;  %6705 = vmatprep.subr.bf16.mxu1 %v14563_v9  ;;  %v14603_v10 = vld [vmem:[%s20738_s5 + $0x938] ss:$20 sps:$4 sm:$0xff]   ;;  %v14606_v9 = vld [vmem:[%s20738_s5 + $0x940] ss:$20 sps:$4 sm:$0xff]  }
 0x468   :  { %7006 = vmatprep.subr.bf16.mxu0 %v14566_v53  ;;  %v14611_v53 = vld [vmem:[%s20738_s5 + $0x964] ss:$20 sps:$4 sm:$0xff]  }
 0x46a   :  { %6706 = vmatpush1.bf16.msra.mxu1 %v14561_v45  ;;  %v14614_v45 = vld [vmem:[%s20738_s5 + $0x96c] ss:$20 sps:$4 sm:$0xff]  }
 0x46b   :  { %7007 = vmatpush1.bf16.msra.mxu0 %v14564_v7  ;;  %6707 = vmatprep.subr.bf16.mxu1 %v14569_v34  ;;  %v14609_v7 = vld [vmem:[%s20738_s5 + $0x960] ss:$20 sps:$4 sm:$0xff]   ;;  %v14612_v34 = vld [vmem:[%s20738_s5 + $0x968] ss:$20 sps:$4 sm:$0xff]  }
 0x46c   :  { %7008 = vmatprep.subr.bf16.mxu0 %v14572_v2  ;;  %v14617_v2 = vld [vmem:[%s20738_s5 + $0x98c] ss:$20 sps:$4 sm:$0xff]  }
 0x46e   :  { %6708 = vmatpush1.bf16.msra.mxu1 %v14567_v27  ;;  %v14620_v27 = vld [vmem:[%s20738_s5 + $0x994] ss:$20 sps:$4 sm:$0xff]  }
 0x46f   :  { %7009 = vmatpush1.bf16.msra.mxu0 %v14570_v16  ;;  %6709 = vmatprep.subr.bf16.mxu1 %v14575_v36  ;;  %v14615_v16 = vld [vmem:[%s20738_s5 + $0x988] ss:$20 sps:$4 sm:$0xff]   ;;  %v14618_v36 = vld [vmem:[%s20738_s5 + $0x990] ss:$20 sps:$4 sm:$0xff]  }
 0x470   :  { %7010 = vmatprep.subr.bf16.mxu0 %v14578_v3  ;;  %v14623_v3 = vld [vmem:[%s20738_s5 + $0x9b4] ss:$20 sps:$4 sm:$0xff]  }
 0x472   :  { %6710 = vmatpush1.bf16.msra.mxu1 %v14573_v25  ;;  %v14626_v25 = vld [vmem:[%s20738_s5 + $0x9bc] ss:$20 sps:$4 sm:$0xff]  }
 0x473   :  { %7011 = vmatpush1.bf16.msra.mxu0 %v14576_v35  ;;  %6711 = vmatprep.subr.bf16.mxu1 %v14581_v46  ;;  %v14621_v35 = vld [vmem:[%s20738_s5 + $0x9b0] ss:$20 sps:$4 sm:$0xff]   ;;  %v14624_v46 = vld [vmem:[%s20738_s5 + $0x9b8] ss:$20 sps:$4 sm:$0xff]  }
 0x474   :  { %7012 = vmatprep.subr.bf16.mxu0 %v14584_v1  ;;  %v14629_v1 = vld [vmem:[%s20738_s5 + $0x9dc] ss:$20 sps:$4 sm:$0xff]  }
 0x476   :  { %6712 = vmatpush1.bf16.msra.mxu1 %v14579_v56  ;;  %v14632_v56 = vld [vmem:[%s20738_s5 + $0x9e4] ss:$20 sps:$4 sm:$0xff]  }
 0x477   :  { %7013 = vmatpush1.bf16.msra.mxu0 %v14582_v29  ;;  %6713 = vmatprep.subr.bf16.mxu1 %v14587_v63  ;;  %v14627_v29 = vld [vmem:[%s20738_s5 + $0x9d8] ss:$20 sps:$4 sm:$0xff]   ;;  %v14630_v63 = vld [vmem:[%s20738_s5 + $0x9e0] ss:$20 sps:$4 sm:$0xff]  }
 0x478   :  { %7014 = vmatprep.subr.bf16.mxu0 %v14590_v26  ;;  %v14635_v26 = vld [vmem:[%s20738_s5 + $0xa04] ss:$20 sps:$4 sm:$0xff]  }
 0x47a   :  { %6714 = vmatpush1.bf16.msra.mxu1 %v14585_v13  ;;  %v14638_v13 = vld [vmem:[%s20738_s5 + $0xa0c] ss:$20 sps:$4 sm:$0xff]  }
 0x47b   :  { %7015 = vmatpush1.bf16.msra.mxu0 %v14588_v4  ;;  %6715 = vmatprep.subr.bf16.mxu1 %v14593_v43  ;;  %v2747_v4 = vadd.f32 %v17224_v31, %v17976_v19  ;;  %v2748_v43 = vadd.f32 %v17224_v31, %v17978_v32 }
 0x47c   :  { %7016 = vmatprep.subr.bf16.mxu0 %v14596_v14  ;;  %v2761_v14 = vadd.f32 %v17227_v47, %v17980_v33 }
 0x47d   :  { %15157 = vtanh.f32 %v2747_v4  ;;  %v14656_v4 = vld [vmem:[%s20738_s5 + $0xa84] ss:$20 sps:$4 sm:$0xff]  }
 0x47e   :  { %6716 = vmatpush1.bf16.msra.mxu1 %v14591_v17  ;;  %v2762_v17 = vadd.f32 %v17227_v47, %v17982_v44  ;;  %15159 = vtanh.f32 %v2748_v43  ;;  %v14651_v43 = vld [vmem:[%s20738_s5 + $0xa78] ss:$20 sps:$4 sm:$0xff]  }
 0x47f   :  { %7017 = vmatpush1.bf16.msra.mxu0 %v14594_v18  ;;  %6717 = vmatprep.subr.bf16.mxu1 %v14599_v42  ;;  %15161 = vtanh.f32 %v2761_v14  ;;  %v14654_v14 = vld [vmem:[%s20738_s5 + $0xa80] ss:$20 sps:$4 sm:$0xff]  }
 0x480   :  { %7018 = vmatprep.subr.bf16.mxu0 %v14602_v30  ;;  %15163 = vtanh.f32 %v2762_v17  ;;  %v14659_v17 = vld [vmem:[%s20738_s5 + $0xaa4] ss:$20 sps:$4 sm:$0xff]  }
 0x482   :  { %6718 = vmatpush1.bf16.msra.mxu1 %v14597_v52 }
 0x483   :  { %7019 = vmatpush1.bf16.msra.mxu0 %v14600_v24  ;;  %6719 = vmatprep.subr.bf16.mxu1 %v14605_v51 }
 0x484   :  { %7020 = vmatprep.subr.bf16.mxu0 %v14608_v21 }
 0x486   :  { %6720 = vmatpush1.bf16.msra.mxu1 %v14603_v10 }
 0x487   :  { %7021 = vmatpush1.bf16.msra.mxu0 %v14606_v9  ;;  %6721 = vmatprep.subr.bf16.mxu1 %v14611_v53 }
 0x488   :  { %7022 = vmatprep.subr.bf16.mxu0 %v14614_v45 }
 0x48a   :  { %6722 = vmatpush1.bf16.msra.mxu1 %v14609_v7 }
 0x48b   :  { %7023 = vmatpush1.bf16.msra.mxu0 %v14612_v34  ;;  %6723 = vmatprep.subr.bf16.mxu1 %v14617_v2  ;;  %v14641_v2 = vld [vmem:[%s20738_s5 + $0xa2c] ss:$20 sps:$4 sm:$0xff]  }
 0x48c   :  { %7024 = vmatprep.subr.bf16.mxu0 %v14620_v27 }
 0x48e   :  { %6724 = vmatpush1.bf16.msra.mxu1 %v14615_v16 }
 0x48f   :  { %7025 = vmatpush1.bf16.msra.mxu0 %v14618_v36  ;;  %6725 = vmatprep.subr.bf16.mxu1 %v14623_v3  ;;  %v14644_v36 = vld [vmem:[%s20738_s5 + $0xa34] ss:$20 sps:$4 sm:$0xff]  }
 0x490   :  { %7026 = vmatprep.subr.bf16.mxu0 %v14626_v25  ;;  %v14639_v25 = vld [vmem:[%s20738_s5 + $0xa28] ss:$20 sps:$4 sm:$0xff]  }
 0x492   :  { %6726 = vmatpush1.bf16.msra.mxu1 %v14621_v35  ;;  %v14642_v35 = vld [vmem:[%s20738_s5 + $0xa30] ss:$20 sps:$4 sm:$0xff]  }
 0x493   :  { %7027 = vmatpush1.bf16.msra.mxu0 %v14624_v46  ;;  %6727 = vmatprep.subr.bf16.mxu1 %v14629_v1  ;;  %v14647_v46 = vld [vmem:[%s20738_s5 + $0xa54] ss:$20 sps:$4 sm:$0xff]  }
 0x494   :  { %7028 = vmatprep.subr.bf16.mxu0 %v14632_v56  ;;  %v14650_v56 = vld [vmem:[%s20738_s5 + $0xa5c] ss:$20 sps:$4 sm:$0xff]  }
 0x496   :  { %6728 = vmatpush1.bf16.msra.mxu1 %v14627_v29 }
 0x497   :  { %7029 = vmatpush1.bf16.msra.mxu0 %v14630_v63  ;;  %6740 = vmatprep.subr.bf16.mxu1 %v14635_v26  ;;  %v14645_v63 = vld [vmem:[%s20738_s5 + $0xa50] ss:$20 sps:$4 sm:$0xff]   ;;  %v14648_v26 = vld [vmem:[%s20738_s5 + $0xa58] ss:$20 sps:$4 sm:$0xff]  }
 0x498   :  { %7041 = vmatprep.subr.bf16.mxu0 %v14638_v13  ;;  %v14653_v13 = vld [vmem:[%s20738_s5 + $0xa7c] ss:$20 sps:$4 sm:$0xff]  }
 0x4cc   :  { %v18560_v18 = vpop.permute.xlu0 %13640 }
 0x4cd   :  { %v13643_v42 = vunpack.i.h.bf16 %v18560_v18  ;;  %v13642_v30 = vunpack.i.l.bf16 %v18560_v18 }
 0x4ce   :  { %v18564_v19 = vpop.permute.xlu1 %13650 }
 0x4cf   :  { %v3047_v31 = vsel %vm529_vm2, %v13623_v5, %v13642_v30  ;;  %v13653_v32 = vunpack.i.h.bf16 %v18564_v19  ;;  %v13652_v47 = vunpack.i.l.bf16 %v18564_v19  ;;  %v3048_v33 = vsel %vm529_vm2, %v13642_v30, %v13643_v42  ;;  %v14662_v30 = vld [vmem:[%s20738_s5 + $0xaac] ss:$20 sps:$4 sm:$0xff]  }
 0x4d0   :  { %v18574_v44 = vpop.permute.xlu0 %13645  ;;  %v3101_v51 = vmax.f32 %v18034_v54, %v3047_v31  ;;  %v3102_v9 = vmax.f32 %v18315_v22, %v3048_v33  ;;  %v14657_v31 = vld [vmem:[%s20738_s5 + $0xaa0] ss:$20 sps:$4 sm:$0xff]  }
 0x4d1   :  { %v13648_v52 = vunpack.i.h.bf16 %v18574_v44  ;;  %v13647_v24 = vunpack.i.l.bf16 %v18574_v44  ;;  %v3060_v40 = vsel %vm529_vm2, %v13633_v28, %v13652_v47  ;;  %v3061_v5 = vsel %vm529_vm2, %v13652_v47, %v13653_v32  ;;  %v14660_v47 = vld [vmem:[%s20738_s5 + $0xaa8] ss:$20 sps:$4 sm:$0xff]   ;;  %v14665_v33 = vld [vmem:[%s20738_s5 + $0xacc] ss:$20 sps:$4 sm:$0xff]  }
 0x4d2   :  { %v3115_v21 = vmax.f32 %v18063_v50, %v3060_v40  ;;  %v18586_v10 = vpop.permute.xlu1 %13655  ;;  %v3116_v53 = vmax.f32 %v18344_v12, %v3061_v5  ;;  %v14663_v40 = vld [vmem:[%s20738_s5 + $0xac8] ss:$20 sps:$4 sm:$0xff]   ;;  %v14666_v5 = vld [vmem:[%s20738_s5 + $0xad0] ss:$20 sps:$4 sm:$0xff]  }
 0x4d3   :  { %v2884_v37 = vsel %vm169_vm0, %v13628_v38, %v13647_v24  ;;  %v2885_v28 = vsel %vm169_vm0, %v13647_v24, %v13648_v52  ;;  %v13658_v45 = vunpack.i.h.bf16 %v18586_v10  ;;  %v13657_v54 = vunpack.i.l.bf16 %v18586_v10  ;;  %v18611_v38 = vpop.eup %15157  ;;  %v14668_v24 = vld [vmem:[%s20738_s5 + $0xad4] ss:$20 sps:$4 sm:$0xff]  }
 0x4d4   :  { %v18599_v50 = vmax.f32 %v18057_v15, %v2884_v37  ;;  %v18602_v7 = vmax.f32 %v18327_v58, %v2885_v28  ;;  %v18604_v22 = vpack.c.bf16 %v3116_v53, %v3102_v9  ;;  %v18606_v12 = vpack.c.bf16 %v3115_v21, %v3101_v51  ;;  %v14636_v58 = vld [vmem:[%s20738_s5 + $0xa08] ss:$20 sps:$4 sm:$0xff]   ;;  %v18625_v27 = vpop.eup %15159  ;;  %v14669_v9 = vld [vmem:[%s20738_s5 + $0xaf0] ss:$20 sps:$4 sm:$0xff]   ;;  %v14672_v53 = vld [vmem:[%s20738_s5 + $0xaf8] ss:$20 sps:$4 sm:$0xff]  }
 0x4d5   :  { %v2897_v34 = vsel %vm169_vm0, %v13638_v57, %v13657_v54  ;;  %v2898_v15 = vsel %vm169_vm0, %v13657_v54, %v13658_v45  ;;  %v18640_v3 = vpop.eup %15161  ;;  %v13664_v1 = vpack.i.bf16 %v18625_v27, %v18611_v38  ;;  %v14671_v51 = vld [vmem:[%s20738_s5 + $0xaf4] ss:$20 sps:$4 sm:$0xff]   ;;  %v14674_v21 = vld [vmem:[%s20738_s5 + $0xafc] ss:$20 sps:$4 sm:$0xff]   ;;  %v14680_v28 = vld [vmem:[%s20738_s5 + $0xb24] ss:$20 sps:$4 sm:$0xff]  }
 0x4d6   :  { %v18628_v16 = vmax.f32 %v18076_v23, %v2897_v34  ;;  %v18631_v61 = vmax.f32 %v18356_v60, %v2898_v15  ;;  %v13659_v57 = vpack.i.bf16 %v18602_v7, %v18599_v50  ;;  %6729 = vmatprep.mubr.bf16.mxu1 %v18604_v22  ;;  %7030 = vmatprep.mubr.bf16.mxu0 %v18604_v22  ;;  %v18644_v23 = vpop.eup %15163  ;;  %v14677_v37 = vld [vmem:[%s20738_s5 + $0xb1c] ss:$20 sps:$4 sm:$0xff]   ;;  %v14675_v54 = vld [vmem:[%s20738_s5 + $0xb18] ss:$20 sps:$4 sm:$0xff]  }
 0x4d7   :  { %6730 = vmatmul.mubr.bf16.vlgmr.msra.gmra.mrb[12].mxu1 %v18606_v12  ;;  %7031 = vmatmul.mubr.bf16.vlgmr.msra.gmra.mrb[16].mxu0 %v18606_v12  ;;  %v13674_v29 = vpack.i.bf16 %v18644_v23, %v18640_v3  ;;  %v14683_v34 = vld [vmem:[%s20738_s5 + $0xb44] ss:$20 sps:$4 sm:$0xff]   ;;  %v14686_v15 = vld [vmem:[%s20738_s5 + $0xb4c] ss:$20 sps:$4 sm:$0xff]  }
 0x4d8   :  { %13660 = vrot.lane.b32.xlu0 %v13659_v57, %s15277_s13  ;;  %v13669_v60 = vpack.i.bf16 %v18631_v61, %v18628_v16  ;;  %6741 = vmatpush1.bf16.msra.mxu1 %v14633_v62  ;;  %v14678_v62 = vld [vmem:[%s20738_s5 + $0xb20] ss:$20 sps:$4 sm:$0xff]  }
 0x4d9   :  { %7042 = vmatpush1.bf16.msra.mxu0 %v14636_v58  ;;  %6742 = vmatprep.subr.bf16.mxu1 %v14641_v2  ;;  %v14681_v58 = vld [vmem:[%s20738_s5 + $0xb40] ss:$20 sps:$4 sm:$0xff]   ;;  %v14684_v2 = vld [vmem:[%s20738_s5 + $0xb48] ss:$20 sps:$4 sm:$0xff]  }
 0x4da   :  { %13670 = vrot.lane.b32.xlu1 %v13669_v60, %s15277_s13  ;;  %7043 = vmatprep.subr.bf16.mxu0 %v14644_v36  ;;  %v14689_v57 = vld [vmem:[%s20738_s5 + $0xb6c] ss:$20 sps:$4 sm:$0xff]   ;;  %v14692_v36 = vld [vmem:[%s20738_s5 + $0xb74] ss:$20 sps:$4 sm:$0xff]  }
 0x4db   :  { %v14687_v60 = vld [vmem:[%s20738_s5 + $0xb68] ss:$20 sps:$4 sm:$0xff]  }
 0x4dc   :  { %13665 = vrot.lane.b32.xlu0 %v13664_v1, %s15275_s20  ;;  %6743 = vmatpush1.bf16.msra.mxu1 %v14639_v25  ;;  %v14690_v25 = vld [vmem:[%s20738_s5 + $0xb70] ss:$20 sps:$4 sm:$0xff]  }
 0x4dd   :  { %7044 = vmatpush1.bf16.msra.mxu0 %v14642_v35  ;;  %6744 = vmatprep.subr.bf16.mxu1 %v14647_v46  ;;  %v14695_v35 = vld [vmem:[%s20738_s5 + $0xb94] ss:$20 sps:$4 sm:$0xff]   ;;  %v14698_v46 = vld [vmem:[%s20738_s5 + $0xb9c] ss:$20 sps:$4 sm:$0xff]  }
 0x4de   :  { %13675 = vrot.lane.b32.xlu1 %v13674_v29, %s15275_s20  ;;  %7045 = vmatprep.subr.bf16.mxu0 %v14650_v56  ;;  %v14693_v1 = vld [vmem:[%s20738_s5 + $0xb90] ss:$20 sps:$4 sm:$0xff]   ;;  %v14696_v56 = vld [vmem:[%s20738_s5 + $0xb98] ss:$20 sps:$4 sm:$0xff]  }
 0x4df   :  { %v14701_v29 = vld [vmem:[%s20738_s5 + $0xbbc] ss:$20 sps:$4 sm:$0xff]  }
 0x4e0   :  { %6745 = vmatpush1.bf16.msra.mxu1 %v14645_v63  ;;  %v14704_v63 = vld [vmem:[%s20738_s5 + $0xbc4] ss:$20 sps:$4 sm:$0xff]  }
 0x4e1   :  { %7046 = vmatpush1.bf16.msra.mxu0 %v14648_v26  ;;  %6746 = vmatprep.subr.bf16.mxu1 %v14653_v13  ;;  %v14699_v26 = vld [vmem:[%s20738_s5 + $0xbb8] ss:$20 sps:$4 sm:$0xff]   ;;  %v14702_v13 = vld [vmem:[%s20738_s5 + $0xbc0] ss:$20 sps:$4 sm:$0xff]  }
 0x4e2   :  { %7047 = vmatprep.subr.bf16.mxu0 %v14656_v4  ;;  %v14707_v4 = vld [vmem:[%s20738_s5 + $0xbe4] ss:$20 sps:$4 sm:$0xff]  }
 0x4e4   :  { %6747 = vmatpush1.bf16.msra.mxu1 %v14651_v43  ;;  %v14710_v43 = vld [vmem:[%s20738_s5 + $0xbec] ss:$20 sps:$4 sm:$0xff]  }
 0x4e5   :  { %7048 = vmatpush1.bf16.msra.mxu0 %v14654_v14  ;;  %6748 = vmatprep.subr.bf16.mxu1 %v14659_v17  ;;  %v14705_v14 = vld [vmem:[%s20738_s5 + $0xbe0] ss:$20 sps:$4 sm:$0xff]   ;;  %v14708_v17 = vld [vmem:[%s20738_s5 + $0xbe8] ss:$20 sps:$4 sm:$0xff]  }
 0x4e6   :  { %7049 = vmatprep.subr.bf16.mxu0 %v14662_v30  ;;  %v14713_v30 = vld [vmem:[%s20738_s5 + $0xc0c] ss:$20 sps:$4 sm:$0xff]  }
 0x4e8   :  { %6749 = vmatpush1.bf16.msra.mxu1 %v14657_v31  ;;  %v14716_v31 = vld [vmem:[%s20738_s5 + $0xc14] ss:$20 sps:$4 sm:$0xff]  }
 0x4e9   :  { %7050 = vmatpush1.bf16.msra.mxu0 %v14660_v47  ;;  %6750 = vmatprep.subr.bf16.mxu1 %v14665_v33  ;;  %v14711_v47 = vld [vmem:[%s20738_s5 + $0xc08] ss:$20 sps:$4 sm:$0xff]   ;;  %v14714_v33 = vld [vmem:[%s20738_s5 + $0xc10] ss:$20 sps:$4 sm:$0xff]  }
 0x4ea   :  { %7051 = vmatprep.subr.bf16.mxu0 %v14668_v24  ;;  %v14719_v24 = vld [vmem:[%s20738_s5 + $0xc34] ss:$20 sps:$4 sm:$0xff]  }
 0x4ec   :  { %6751 = vmatpush1.bf16.msra.mxu1 %v14663_v40  ;;  %v14722_v40 = vld [vmem:[%s20738_s5 + $0xc3c] ss:$20 sps:$4 sm:$0xff]  }
 0x4ed   :  { %7052 = vmatpush1.bf16.msra.mxu0 %v14666_v5  ;;  %6752 = vmatprep.subr.bf16.mxu1 %v14671_v51  ;;  %v14717_v5 = vld [vmem:[%s20738_s5 + $0xc30] ss:$20 sps:$4 sm:$0xff]   ;;  %v14720_v51 = vld [vmem:[%s20738_s5 + $0xc38] ss:$20 sps:$4 sm:$0xff]  }
 0x4ee   :  { %7053 = vmatprep.subr.bf16.mxu0 %v14674_v21  ;;  %v14725_v21 = vld [vmem:[%s20738_s5 + $0xc5c] ss:$20 sps:$4 sm:$0xff]  }
 0x4f0   :  { %6753 = vmatpush1.bf16.msra.mxu1 %v14669_v9  ;;  %v14728_v9 = vld [vmem:[%s20738_s5 + $0xc64] ss:$20 sps:$4 sm:$0xff]  }
 0x4f1   :  { %7054 = vmatpush1.bf16.msra.mxu0 %v14672_v53  ;;  %6754 = vmatprep.subr.bf16.mxu1 %v14677_v37  ;;  %v14723_v53 = vld [vmem:[%s20738_s5 + $0xc58] ss:$20 sps:$4 sm:$0xff]   ;;  %v14726_v37 = vld [vmem:[%s20738_s5 + $0xc60] ss:$20 sps:$4 sm:$0xff]  }
 0x4f2   :  { %7055 = vmatprep.subr.bf16.mxu0 %v14680_v28  ;;  %v14731_v28 = vld [vmem:[%s20738_s5 + $0xc84] ss:$20 sps:$4 sm:$0xff]  }
 0x4f4   :  { %6755 = vmatpush1.bf16.msra.mxu1 %v14675_v54  ;;  %v14734_v54 = vld [vmem:[%s20738_s5 + $0xc8c] ss:$20 sps:$4 sm:$0xff]  }
 0x4f5   :  { %7056 = vmatpush1.bf16.msra.mxu0 %v14678_v62  ;;  %6756 = vmatprep.subr.bf16.mxu1 %v14683_v34 }
 0x4f6   :  { %7057 = vmatprep.subr.bf16.mxu0 %v14686_v15 }
 0x4f8   :  { %6757 = vmatpush1.bf16.msra.mxu1 %v14681_v58 }
 0x4f9   :  { %7058 = vmatpush1.bf16.msra.mxu0 %v14684_v2  ;;  %6758 = vmatprep.subr.bf16.mxu1 %v14689_v57 }
 0x4fa   :  { %7059 = vmatprep.subr.bf16.mxu0 %v14692_v36 }
 0x4fc   :  { %6759 = vmatpush1.bf16.msra.mxu1 %v14687_v60 }
 0x4fd   :  { %7060 = vmatpush1.bf16.msra.mxu0 %v14690_v25  ;;  %6760 = vmatprep.subr.bf16.mxu1 %v14695_v35 }
 0x4fe   :  { %7061 = vmatprep.subr.bf16.mxu0 %v14698_v46 }
 0x500   :  { %6761 = vmatpush1.bf16.msra.mxu1 %v14693_v1 }
 0x501   :  { %7062 = vmatpush1.bf16.msra.mxu0 %v14696_v56  ;;  %6762 = vmatprep.subr.bf16.mxu1 %v14701_v29 }
 0x502   :  { %7063 = vmatprep.subr.bf16.mxu0 %v14704_v63 }
 0x504   :  { %6763 = vmatpush1.bf16.msra.mxu1 %v14699_v26 }
 0x505   :  { %7064 = vmatpush1.bf16.msra.mxu0 %v14702_v13  ;;  %6764 = vmatprep.subr.bf16.mxu1 %v14707_v4 }
 0x506   :  { %7065 = vmatprep.subr.bf16.mxu0 %v14710_v43 }
 0x508   :  { %6765 = vmatpush1.bf16.msra.mxu1 %v14705_v14 }
 0x509   :  { %7066 = vmatpush1.bf16.msra.mxu0 %v14708_v17  ;;  %6766 = vmatprep.subr.bf16.mxu1 %v14713_v30  ;;  %v14740_v17 = vld [vmem:[%s20738_s5 + $0xcb4] ss:$20 sps:$4 sm:$0xff]  }
 0x50a   :  { %7067 = vmatprep.subr.bf16.mxu0 %v14716_v31  ;;  %v14735_v31 = vld [vmem:[%s20738_s5 + $0xca8] ss:$20 sps:$4 sm:$0xff]  }
 0x50c   :  { %6767 = vmatpush1.bf16.msra.mxu1 %v14711_v47  ;;  %v14743_v47 = vld [vmem:[%s20738_s5 + $0xcd4] ss:$20 sps:$4 sm:$0xff]  }
 0x50d   :  { %7068 = vmatpush1.bf16.msra.mxu0 %v14714_v33  ;;  %6768 = vmatprep.subr.bf16.mxu1 %v14719_v24  ;;  %v14746_v33 = vld [vmem:[%s20738_s5 + $0xcdc] ss:$20 sps:$4 sm:$0xff]  }
 0x50e   :  { %7069 = vmatprep.subr.bf16.mxu0 %v14722_v40  ;;  %v14741_v24 = vld [vmem:[%s20738_s5 + $0xcd0] ss:$20 sps:$4 sm:$0xff]   ;;  %v14744_v40 = vld [vmem:[%s20738_s5 + $0xcd8] ss:$20 sps:$4 sm:$0xff]  }
 0x510   :  { %6769 = vmatpush1.bf16.msra.mxu1 %v14717_v5  ;;  %v14749_v5 = vld [vmem:[%s20738_s5 + $0xcfc] ss:$20 sps:$4 sm:$0xff]  }
 0x511   :  { %7070 = vmatpush1.bf16.msra.mxu0 %v14720_v51  ;;  %6770 = vmatprep.subr.bf16.mxu1 %v14725_v21  ;;  %v14752_v51 = vld [vmem:[%s20738_s5 + $0xd04] ss:$20 sps:$4 sm:$0xff]  }
 0x512   :  { %7071 = vmatprep.subr.bf16.mxu0 %v14728_v9  ;;  %v14747_v21 = vld [vmem:[%s20738_s5 + $0xcf8] ss:$20 sps:$4 sm:$0xff]   ;;  %v14750_v9 = vld [vmem:[%s20738_s5 + $0xd00] ss:$20 sps:$4 sm:$0xff]  }
 0x514   :  { %6771 = vmatpush1.bf16.msra.mxu1 %v14723_v53  ;;  %v14755_v53 = vld [vmem:[%s20738_s5 + $0xd24] ss:$20 sps:$4 sm:$0xff]  }
 0x515   :  { %7072 = vmatpush1.bf16.msra.mxu0 %v14726_v37  ;;  %6783 = vmatprep.subr.bf16.mxu1 %v14731_v28  ;;  %v14758_v37 = vld [vmem:[%s20738_s5 + $0xd2c] ss:$20 sps:$4 sm:$0xff]  }
 0x516   :  { %7084 = vmatprep.subr.bf16.mxu0 %v14734_v54  ;;  %v14753_v28 = vld [vmem:[%s20738_s5 + $0xd20] ss:$20 sps:$4 sm:$0xff]   ;;  %v14756_v54 = vld [vmem:[%s20738_s5 + $0xd28] ss:$20 sps:$4 sm:$0xff]  }
 0x54a   :  { %v18836_v62 = vpop.permute.xlu0 %13660 }
 0x54b   :  { %v13663_v34 = vunpack.i.h.bf16 %v18836_v62  ;;  %v13662_v15 = vunpack.i.l.bf16 %v18836_v62 }
 0x54c   :  { %v18840_v58 = vpop.permute.xlu1 %13670 }
 0x54d   :  { %v13673_v2 = vunpack.i.h.bf16 %v18840_v58  ;;  %v13672_v57 = vunpack.i.l.bf16 %v18840_v58  ;;  %v3050_v36 = vsel %vm529_vm2, %v13662_v15, %v13663_v34  ;;  %v3049_v60 = vsel %vm529_vm2, %v13643_v42, %v13662_v15  ;;  %v14761_v15 = vld [vmem:[%s20738_s5 + $0xd4c] ss:$20 sps:$4 sm:$0xff]  }
 0x54e   :  { %v13666_v25 = vpop.permute.xlu0 %13665  ;;  %v3104_v26 = vmax.f32 %v18599_v50, %v3050_v36  ;;  %v3103_v42 = vmax.f32 %v18318_v59, %v3049_v60  ;;  %v14729_v59 = vld [vmem:[%s20738_s5 + $0xc80] ss:$20 sps:$4 sm:$0xff]   ;;  %v14759_v36 = vld [vmem:[%s20738_s5 + $0xd48] ss:$20 sps:$4 sm:$0xff]   ;;  %v14762_v60 = vld [vmem:[%s20738_s5 + $0xd50] ss:$20 sps:$4 sm:$0xff]  }
 0x54f   :  { %v3062_v35 = vsel %vm529_vm2, %v13653_v32, %v13672_v57  ;;  %v13668_v46 = vunpack.i.h.bf16 %v13666_v25  ;;  %v13667_v1 = vunpack.i.l.bf16 %v13666_v25  ;;  %v3063_v56 = vsel %vm529_vm2, %v13672_v57, %v13673_v2  ;;  %v14764_v57 = vld [vmem:[%s20738_s5 + $0xd54] ss:$20 sps:$4 sm:$0xff]  }
 0x550   :  { %v3117_v29 = vmax.f32 %v18347_v49, %v3062_v35  ;;  %v13676_v63 = vpop.permute.xlu1 %13675  ;;  %v3118_v18 = vmax.f32 %v18628_v16, %v3063_v56  ;;  %v14767_v25 = vld [vmem:[%s20738_s5 + $0xd74] ss:$20 sps:$4 sm:$0xff]   ;;  %v14770_v35 = vld [vmem:[%s20738_s5 + $0xd7c] ss:$20 sps:$4 sm:$0xff]  }
 0x551   :  { %v2886_v19 = vsel %vm169_vm0, %v13648_v52, %v13667_v1  ;;  %v2887_v32 = vsel %vm169_vm0, %v13667_v1, %v13668_v46  ;;  %v13678_v13 = vunpack.i.h.bf16 %v13676_v63  ;;  %v13677_v49 = vunpack.i.l.bf16 %v13676_v63  ;;  %v14768_v1 = vld [vmem:[%s20738_s5 + $0xd78] ss:$20 sps:$4 sm:$0xff]   ;;  %v14773_v56 = vld [vmem:[%s20738_s5 + $0xd9c] ss:$20 sps:$4 sm:$0xff]  }
 0x552   :  { %v18865_v4 = vmax.f32 %v18341_v41, %v2886_v19  ;;  %v18868_v43 = vmax.f32 %v18611_v38, %v2887_v32  ;;  %v18870_v14 = vpack.c.bf16 %v3118_v18, %v3104_v26  ;;  %v18876_v44 = vmax.f32 %v18625_v27, %v13668_v46  ;;  %v14732_v41 = vld [vmem:[%s20738_s5 + $0xc88] ss:$20 sps:$4 sm:$0xff]   ;;  %v14737_v38 = vld [vmem:[%s20738_s5 + $0xcac] ss:$20 sps:$4 sm:$0xff]   ;;  %v14765_v46 = vld [vmem:[%s20738_s5 + $0xd70] ss:$20 sps:$4 sm:$0xff]  }
 0x553   :  { %v18879_v52 = vmax.f32 %v18644_v23, %v13678_v13  ;;  %v18881_v50 = vpack.c.bf16 %v3117_v29, %v3103_v42  ;;  %v2899_v16 = vsel %vm169_vm0, %v13658_v45, %v13677_v49  ;;  %v2900_v27 = vsel %vm169_vm0, %v13677_v49, %v13678_v13  ;;  %v14776_v29 = vld [vmem:[%s20738_s5 + $0xda4] ss:$20 sps:$4 sm:$0xff]   ;;  %v14774_v26 = vld [vmem:[%s20738_s5 + $0xda0] ss:$20 sps:$4 sm:$0xff]   ;;  %v14780_v32 = vld [vmem:[%s20738_s5 + $0xdc8] ss:$20 sps:$4 sm:$0xff]  }
 0x554   :  { %6772 = vmatprep.mubr.bf16.mxu1 %v18870_v14  ;;  %7073 = vmatprep.mubr.bf16.mxu0 %v18870_v14  ;;  %v13679_v23 = vpack.i.bf16 %v18868_v43, %v18865_v4  ;;  %v18901_v30 = vmax.f32 %v18360_v0, %v2899_v16  ;;  %v18904_v10 = vmax.f32 %v18640_v3, %v2900_v27  ;;  %v14738_v3 = vld [vmem:[%s20738_s5 + $0xcb0] ss:$20 sps:$4 sm:$0xff]   ;;  %v14771_v63 = vld [vmem:[%s20738_s5 + $0xd98] ss:$20 sps:$4 sm:$0xff]   ;;  %v14777_v19 = vld [vmem:[%s20738_s5 + $0xdc0] ss:$20 sps:$4 sm:$0xff]  }
 0x555   :  { %6773 = vmatmul.mubr.bf16.vlgmr.msra.gmra.mrb[12].mxu1 %v18881_v50  ;;  %7074 = vmatmul.mubr.bf16.vlgmr.msra.gmra.mrb[16].mxu0 %v18881_v50  ;;  %v13689_v45 = vpack.i.bf16 %v18879_v52, %v18876_v44  ;;  %v14779_v18 = vld [vmem:[%s20738_s5 + $0xdc4] ss:$20 sps:$4 sm:$0xff]   ;;  %v14782_v42 = vld [vmem:[%s20738_s5 + $0xdcc] ss:$20 sps:$4 sm:$0xff]   ;;  %v14788_v49 = vld [vmem:[%s20738_s5 + $0xdf4] ss:$20 sps:$4 sm:$0xff]  }
 0x556   :  { %13680 = vrot.lane.b32.xlu0 %v13679_v23, %s15277_s13  ;;  %6784 = vmatpush1.bf16.msra.mxu1 %v14729_v59  ;;  %v13684_v0 = vpack.i.bf16 %v18904_v10, %v18901_v30  ;;  %v14785_v13 = vld [vmem:[%s20738_s5 + $0xdec] ss:$20 sps:$4 sm:$0xff]   ;;  %v14783_v59 = vld [vmem:[%s20738_s5 + $0xde8] ss:$20 sps:$4 sm:$0xff]   ;;  %v14789_v27 = vld [vmem:[%s20738_s5 + $0xe10] ss:$20 sps:$4 sm:$0xff]  }
 0x557   :  { %7085 = vmatpush1.bf16.msra.mxu0 %v14732_v41  ;;  %6785 = vmatprep.subr.bf16.mxu1 %v14737_v38  ;;  %v14786_v41 = vld [vmem:[%s20738_s5 + $0xdf0] ss:$20 sps:$4 sm:$0xff]   ;;  %v14791_v38 = vld [vmem:[%s20738_s5 + $0xe14] ss:$20 sps:$4 sm:$0xff]   ;;  %v14792_v23 = vld [vmem:[%s20738_s5 + $0xe18] ss:$20 sps:$4 sm:$0xff]  }
 0x558   :  { %7086 = vmatprep.subr.bf16.mxu0 %v14740_v17  ;;  %13685 = vrot.lane.b32.xlu1 %v13684_v0, %s15277_s13  ;;  %v14794_v16 = vld [vmem:[%s20738_s5 + $0xe1c] ss:$20 sps:$4 sm:$0xff]   ;;  %v14798_v0 = vld [vmem:[%s20738_s5 + $0xe40] ss:$20 sps:$4 sm:$0xff]  }
 0x559   :  { %v14797_v17 = vld [vmem:[%s20738_s5 + $0xe3c] ss:$20 sps:$4 sm:$0xff]  }
 0x55a   :  { %13690 = vrot.lane.b32.xlu0 %v13689_v45, %s15277_s13  ;;  %6786 = vmatpush1.bf16.msra.mxu1 %v14735_v31  ;;  %v14800_v45 = vld [vmem:[%s20738_s5 + $0xe44] ss:$20 sps:$4 sm:$0xff]  }
 0x55b   :  { %7087 = vmatpush1.bf16.msra.mxu0 %v14738_v3  ;;  %6787 = vmatprep.subr.bf16.mxu1 %v14743_v47  ;;  %v14795_v31 = vld [vmem:[%s20738_s5 + $0xe38] ss:$20 sps:$4 sm:$0xff]  }
 0x55c   :  { %7088 = vmatprep.subr.bf16.mxu0 %v14746_v33  ;;  %v14803_v3 = vld [vmem:[%s20738_s5 + $0xe64] ss:$20 sps:$4 sm:$0xff]   ;;  %v14806_v47 = vld [vmem:[%s20738_s5 + $0xe6c] ss:$20 sps:$4 sm:$0xff]  }
 0x55d   :  { %v14801_v33 = vld [vmem:[%s20738_s5 + $0xe60] ss:$20 sps:$4 sm:$0xff]  }
 0x55e   :  { %6788 = vmatpush1.bf16.msra.mxu1 %v14741_v24  ;;  %v14804_v24 = vld [vmem:[%s20738_s5 + $0xe68] ss:$20 sps:$4 sm:$0xff]  }
 0x55f   :  { %7089 = vmatpush1.bf16.msra.mxu0 %v14744_v40  ;;  %6789 = vmatprep.subr.bf16.mxu1 %v14749_v5  ;;  %v14809_v40 = vld [vmem:[%s20738_s5 + $0xe8c] ss:$20 sps:$4 sm:$0xff]   ;;  %v14812_v5 = vld [vmem:[%s20738_s5 + $0xe94] ss:$20 sps:$4 sm:$0xff]  }
 0x560   :  { %7090 = vmatprep.subr.bf16.mxu0 %v14752_v51  ;;  %v14807_v51 = vld [vmem:[%s20738_s5 + $0xe88] ss:$20 sps:$4 sm:$0xff]  }
 0x562   :  { %6790 = vmatpush1.bf16.msra.mxu1 %v14747_v21  ;;  %v14810_v21 = vld [vmem:[%s20738_s5 + $0xe90] ss:$20 sps:$4 sm:$0xff]  }
 0x563   :  { %7091 = vmatpush1.bf16.msra.mxu0 %v14750_v9  ;;  %6791 = vmatprep.subr.bf16.mxu1 %v14755_v53  ;;  %v14815_v9 = vld [vmem:[%s20738_s5 + $0xeb4] ss:$20 sps:$4 sm:$0xff]   ;;  %v14818_v53 = vld [vmem:[%s20738_s5 + $0xebc] ss:$20 sps:$4 sm:$0xff]  }
 0x564   :  { %7092 = vmatprep.subr.bf16.mxu0 %v14758_v37  ;;  %v14813_v37 = vld [vmem:[%s20738_s5 + $0xeb0] ss:$20 sps:$4 sm:$0xff]  }
 0x566   :  { %6792 = vmatpush1.bf16.msra.mxu1 %v14753_v28  ;;  %v14816_v28 = vld [vmem:[%s20738_s5 + $0xeb8] ss:$20 sps:$4 sm:$0xff]  }
 0x567   :  { %7093 = vmatpush1.bf16.msra.mxu0 %v14756_v54  ;;  %6793 = vmatprep.subr.bf16.mxu1 %v14761_v15  ;;  %v14821_v54 = vld [vmem:[%s20738_s5 + $0xedc] ss:$20 sps:$4 sm:$0xff]   ;;  %v14824_v15 = vld [vmem:[%s20738_s5 + $0xee4] ss:$20 sps:$4 sm:$0xff]  }
 0x568   :  { %7094 = vmatprep.subr.bf16.mxu0 %v14764_v57  ;;  %v14819_v57 = vld [vmem:[%s20738_s5 + $0xed8] ss:$20 sps:$4 sm:$0xff]  }
 0x56a   :  { %6794 = vmatpush1.bf16.msra.mxu1 %v14759_v36  ;;  %v14822_v36 = vld [vmem:[%s20738_s5 + $0xee0] ss:$20 sps:$4 sm:$0xff]  }
 0x56b   :  { %7095 = vmatpush1.bf16.msra.mxu0 %v14762_v60  ;;  %6795 = vmatprep.subr.bf16.mxu1 %v14767_v25  ;;  %v14827_v60 = vld [vmem:[%s20738_s5 + $0xf04] ss:$20 sps:$4 sm:$0xff]   ;;  %v14830_v25 = vld [vmem:[%s20738_s5 + $0xf0c] ss:$20 sps:$4 sm:$0xff]  }
 0x56c   :  { %7096 = vmatprep.subr.bf16.mxu0 %v14770_v35 }
 0x56e   :  { %6796 = vmatpush1.bf16.msra.mxu1 %v14765_v46 }
 0x56f   :  { %7097 = vmatpush1.bf16.msra.mxu0 %v14768_v1  ;;  %6797 = vmatprep.subr.bf16.mxu1 %v14773_v56 }
 0x570   :  { %7098 = vmatprep.subr.bf16.mxu0 %v14776_v29 }
 0x572   :  { %6798 = vmatpush1.bf16.msra.mxu1 %v14771_v63 }
 0x573   :  { %7099 = vmatpush1.bf16.msra.mxu0 %v14774_v26  ;;  %6799 = vmatprep.subr.bf16.mxu1 %v14779_v18 }
 0x574   :  { %7100 = vmatprep.subr.bf16.mxu0 %v14782_v42 }
 0x576   :  { %6800 = vmatpush1.bf16.msra.mxu1 %v14777_v19 }
 0x577   :  { %7101 = vmatpush1.bf16.msra.mxu0 %v14780_v32  ;;  %6801 = vmatprep.subr.bf16.mxu1 %v14785_v13 }
 0x578   :  { %7102 = vmatprep.subr.bf16.mxu0 %v14788_v49 }
 0x57a   :  { %6802 = vmatpush1.bf16.msra.mxu1 %v14783_v59 }
 0x57b   :  { %7103 = vmatpush1.bf16.msra.mxu0 %v14786_v41  ;;  %6803 = vmatprep.subr.bf16.mxu1 %v14791_v38 }
 0x57c   :  { %7104 = vmatprep.subr.bf16.mxu0 %v14794_v16  ;;  %v14831_v16 = vld [vmem:[%s20738_s5 + $0xf28] ss:$20 sps:$4 sm:$0xff]  }
 0x57e   :  { %6804 = vmatpush1.bf16.msra.mxu1 %v14789_v27  ;;  %v14834_v27 = vld [vmem:[%s20738_s5 + $0xf30] ss:$20 sps:$4 sm:$0xff]  }
 0x57f   :  { %7105 = vmatpush1.bf16.msra.mxu0 %v14792_v23  ;;  %6805 = vmatprep.subr.bf16.mxu1 %v14797_v17  ;;  %v14839_v23 = vld [vmem:[%s20738_s5 + $0xf54] ss:$20 sps:$4 sm:$0xff]   ;;  %v14842_v17 = vld [vmem:[%s20738_s5 + $0xf5c] ss:$20 sps:$4 sm:$0xff]  }
 0x580   :  { %7106 = vmatprep.subr.bf16.mxu0 %v14800_v45  ;;  %v14837_v45 = vld [vmem:[%s20738_s5 + $0xf50] ss:$20 sps:$4 sm:$0xff]  }
 0x582   :  { %6806 = vmatpush1.bf16.msra.mxu1 %v14795_v31  ;;  %v14840_v31 = vld [vmem:[%s20738_s5 + $0xf58] ss:$20 sps:$4 sm:$0xff]  }
 0x583   :  { %7107 = vmatpush1.bf16.msra.mxu0 %v14798_v0  ;;  %6807 = vmatprep.subr.bf16.mxu1 %v14803_v3  ;;  %v14845_v0 = vld [vmem:[%s20738_s5 + $0xf7c] ss:$20 sps:$4 sm:$0xff]   ;;  %v14848_v3 = vld [vmem:[%s20738_s5 + $0xf84] ss:$20 sps:$4 sm:$0xff]  }
 0x584   :  { %7108 = vmatprep.subr.bf16.mxu0 %v14806_v47  ;;  %v14843_v47 = vld [vmem:[%s20738_s5 + $0xf78] ss:$20 sps:$4 sm:$0xff]  }
 0x586   :  { %6808 = vmatpush1.bf16.msra.mxu1 %v14801_v33  ;;  %v14846_v33 = vld [vmem:[%s20738_s5 + $0xf80] ss:$20 sps:$4 sm:$0xff]  }
 0x587   :  { %7109 = vmatpush1.bf16.msra.mxu0 %v14804_v24  ;;  %6809 = vmatprep.subr.bf16.mxu1 %v14809_v40  ;;  %v14851_v24 = vld [vmem:[%s20738_s5 + $0xfa4] ss:$20 sps:$4 sm:$0xff]   ;;  %v14854_v40 = vld [vmem:[%s20738_s5 + $0xfac] ss:$20 sps:$4 sm:$0xff]  }
 0x588   :  { %7110 = vmatprep.subr.bf16.mxu0 %v14812_v5  ;;  %v14849_v5 = vld [vmem:[%s20738_s5 + $0xfa0] ss:$20 sps:$4 sm:$0xff]  }
 0x58a   :  { %6810 = vmatpush1.bf16.msra.mxu1 %v14807_v51  ;;  %v14852_v51 = vld [vmem:[%s20738_s5 + $0xfa8] ss:$20 sps:$4 sm:$0xff]  }
 0x58b   :  { %7111 = vmatpush1.bf16.msra.mxu0 %v14810_v21  ;;  %6811 = vmatprep.subr.bf16.mxu1 %v14815_v9  ;;  %v14857_v21 = vld [vmem:[%s20738_s5 + $0xfcc] ss:$20 sps:$4 sm:$0xff]   ;;  %v14860_v9 = vld [vmem:[%s20738_s5 + $0xfd4] ss:$20 sps:$4 sm:$0xff]  }
 0x58c   :  { %7112 = vmatprep.subr.bf16.mxu0 %v14818_v53  ;;  %v14855_v53 = vld [vmem:[%s20738_s5 + $0xfc8] ss:$20 sps:$4 sm:$0xff]  }
 0x58e   :  { %6812 = vmatpush1.bf16.msra.mxu1 %v14813_v37  ;;  %v14858_v37 = vld [vmem:[%s20738_s5 + $0xfd0] ss:$20 sps:$4 sm:$0xff]  }
 0x58f   :  { %7113 = vmatpush1.bf16.msra.mxu0 %v14816_v28  ;;  %6813 = vmatprep.subr.bf16.mxu1 %v14821_v54  ;;  %v14863_v28 = vld [vmem:[%s20738_s5 + $0xff4] ss:$20 sps:$4 sm:$0xff]   ;;  %v14866_v54 = vld [vmem:[%s20738_s5 + $0xffc] ss:$20 sps:$4 sm:$0xff]  }
 0x590   :  { %7114 = vmatprep.subr.bf16.mxu0 %v14824_v15  ;;  %v14861_v15 = vld [vmem:[%s20738_s5 + $0xff0] ss:$20 sps:$4 sm:$0xff]  }
 0x592   :  { %6814 = vmatpush1.bf16.msra.mxu1 %v14819_v57  ;;  %v14864_v57 = vld [vmem:[%s20738_s5 + $0xff8] ss:$20 sps:$4 sm:$0xff]  }
 0x593   :  { %7115 = vmatpush1.bf16.msra.mxu0 %v14822_v36  ;;  %6826 = vmatprep.subr.bf16.mxu1 %v14827_v60  ;;  %v14869_v36 = vld [vmem:[%s20738_s5 + $0x101c] ss:$20 sps:$4 sm:$0xff]   ;;  %v14872_v60 = vld [vmem:[%s20738_s5 + $0x1024] ss:$20 sps:$4 sm:$0xff]  }
 0x594   :  { %7127 = vmatprep.subr.bf16.mxu0 %v14830_v25  ;;  %v14867_v25 = vld [vmem:[%s20738_s5 + $0x1018] ss:$20 sps:$4 sm:$0xff]  }
 0x5c8   :  { %v19095_v35 = vpop.permute.xlu0 %13680 }
 0x5c9   :  { %v13683_v46 = vunpack.i.h.bf16 %v19095_v35  ;;  %v13682_v1 = vunpack.i.l.bf16 %v19095_v35  ;;  %v14889_v35 = vld [vmem:[%s20738_s5 + $0x150] ss:$20 sps:$4 sm:$0xff]  }
 0x5ca   :  { %v19099_v56 = vpop.permute.xlu1 %13685 }
 0x5cb   :  { %v13688_v63 = vunpack.i.h.bf16 %v19099_v56  ;;  %v13687_v26 = vunpack.i.l.bf16 %v19099_v56  ;;  %v3051_v18 = vsel %vm529_vm2, %v13663_v34, %v13682_v1  ;;  %v3052_v32 = vsel %vm529_vm2, %v13682_v1, %v13683_v46  ;;  %v14870_v1 = vld [vmem:[%s20738_s5 + $0x1020] ss:$20 sps:$4 sm:$0xff]   ;;  %v14891_v56 = vld [vmem:[%s20738_s5 + $0x10] ss:$20 sps:$4 sm:$0xff]  }
 0x5cc   :  { %v19101_v29 = vpop.permute.xlu0 %13690  ;;  %v3105_v62 = vmax.f32 %v18602_v7, %v3051_v18  ;;  %v3106_v59 = vmax.f32 %v18865_v4, %v3052_v32  ;;  %v14825_v7 = vld [vmem:[%s20738_s5 + $0xf00] ss:$20 sps:$4 sm:$0xff]  }
 0x5cd   :  { %v13693_v42 = vunpack.i.h.bf16 %v19101_v29  ;;  %v13692_v19 = vunpack.i.l.bf16 %v19101_v29  ;;  %v3064_v13 = vsel %vm529_vm2, %v13673_v2, %v13687_v26  ;;  %v3065_v49 = vsel %vm529_vm2, %v13687_v26, %v13688_v63  ;;  %v14875_v26 = vld [vmem:[%s20738_s5 + $0x1044] ss:$20 sps:$4 sm:$0xff]   ;;  %v14878_v18 = vld [vmem:[%s20738_s5 + $0x104c] ss:$20 sps:$4 sm:$0xff]   ;;  %v3773_v32 = vld [vmem:[%s20738_s5 + $0x1090] sm:$0x77] }
 0x5ce   :  { %v3119_v34 = vmax.f32 %v18631_v61, %v3064_v13  ;;  %v3120_v41 = vmax.f32 %v18901_v30, %v3065_v49  ;;  %v14828_v61 = vld [vmem:[%s20738_s5 + $0xf08] ss:$20 sps:$4 sm:$0xff]   ;;  %v20829_v49 = vmov 65535  }
 0x5cf   :  { %v3122_v38 = vmax.f32 %v18879_v52, %v13693_v42  ;;  %v3108_v58 = vmax.f32 %v18876_v44, %v13692_v19  ;;  %v14833_v44 = vld [vmem:[%s20738_s5 + $0xf2c] ss:$20 sps:$4 sm:$0xff]   ;;  %v14836_v52 = vld [vmem:[%s20738_s5 + $0xf34] ss:$20 sps:$4 sm:$0xff]   ;;  %v3774_v13 = vld [vmem:[%s20738_s5 + $0x1098] sm:$0x77] }
 0x5d0   :  { %v19129_v2 = vpack.c.bf16 %v3120_v41, %v3106_v59  ;;  %v19137_v4 = vpack.c.bf16 %v3119_v34, %v3105_v62  ;;  %v6551_v62 = vsel %vm6549_vm6, 4294967295, %v20829_v49  ;;  %v14873_v34 = vld [vmem:[%s20738_s5 + $0x1040] ss:$20 sps:$4 sm:$0xff]   ;;  %v14876_v59 = vld [vmem:[%s20738_s5 + $0x1048] ss:$20 sps:$4 sm:$0xff]  }
 0x5d1   :  { %v19149_v30 = vpack.c.bf16 %v3122_v38, %v3108_v58  ;;  %v14881_v41 = vld [vmem:[%s20738_s5 + $0x106c] ss:$20 sps:$4 sm:$0xff]   ;;  %v14884_v38 = vld [vmem:[%s20738_s5 + $0x1074] ss:$20 sps:$4 sm:$0xff]   ;;  %v11572_v58 = vcombine.high %v3773_v32, %v3773_v32 }
 0x5d2   :  { %6815 = vmatprep.mubr.bf16.mxu1 %v19129_v2  ;;  %7116 = vmatprep.mubr.bf16.mxu0 %v19129_v2 }
 0x5d3   :  { %6816 = vmatmul.mubr.bf16.vlgmr.msra.gmra.mrb[12].mxu1 %v19137_v4  ;;  %7117 = vmatmul.mubr.bf16.vlgmr.msra.gmra.mrb[16].mxu0 %v19137_v4 }
 0x5d4   :  { %6827 = vmatpush1.bf16.msra.mxu1 %v14825_v7  ;;  %7128 = vmatpush1.bf16.msra.mxu0 %v14828_v61  ;;  %v11574_v7 = vcombine.high %v3774_v13, %v3774_v13  ;;  %v19259_v61 = vsel %vm6550_vm7, %v6551_v62, 0  ;;  %v14919_v62 = vld [vmem:[%s20738_s5 + $0x128] ss:$20 sps:$4 sm:$0xff]  }
 0x5d5   :  { %11576 = vmatprep.mubr.msk.bf16.mxu1 %vm6545_vm5, %v19149_v30  ;;  %11577 = vmatprep.mubr.msk.bf16.mxu0 %vm6545_vm5, %v19149_v30 }
 0x5d6   :  { %6828 = vmatprep.subr.bf16.mxu1 %v14833_v44  ;;  %7129 = vmatprep.subr.bf16.mxu0 %v14836_v52  ;;  %v14879_v44 = vld [vmem:[%s20738_s5 + $0x1068] ss:$20 sps:$4 sm:$0xff]   ;;  %v14882_v52 = vld [vmem:[%s20738_s5 + $0x1070] ss:$20 sps:$4 sm:$0xff]  }
 0x5d8   :  { %6829 = vmatpush1.bf16.msra.mxu1 %v14831_v16  ;;  %7130 = vmatpush1.bf16.msra.mxu0 %v14834_v27  ;;  %v11571_v16 = vcombine.low %v3773_v32, %v3773_v32  ;;  %v11573_v27 = vcombine.low %v3774_v13, %v3774_v13  ;;  %v14917_v32 = vld [vmem:[%s20738_s5 + $0x268] ss:$20 sps:$4 sm:$0xff]  }
 0x5d9   :  { %6830 = vmatprep.subr.bf16.mxu1 %v14839_v23  ;;  %7131 = vmatprep.subr.bf16.mxu0 %v14842_v17  ;;  %v6557_v23 = vand.u32 %v11572_v58, %v19259_v61  ;;  %v6563_v17 = vand.u32 %v11574_v7, %v19259_v61  ;;  %v14918_v13 = vld [vmem:[%s20738_s5 + $0x768] ss:$20 sps:$4 sm:$0xff]   ;;  %v14924_v58 = vld [vmem:[%s20738_s5 + $0xa10] ss:$20 sps:$4 sm:$0xff]   ;;  %v14925_v7 = vld [vmem:[%s20738_s5 + $0x3f8] ss:$20 sps:$4 sm:$0xff]  }
 0x5dc   :  { %6831 = vmatpush1.bf16.msra.mxu1 %v14837_v45  ;;  %7132 = vmatpush1.bf16.msra.mxu0 %v14840_v31  ;;  %v3053_v45 = vsel %vm529_vm2, %v13683_v46, %v13692_v19  ;;  %v3066_v31 = vsel %vm529_vm2, %v13688_v63, %v13693_v42  ;;  %v14890_v46 = vld [vmem:[%s20738_s5 + $0x650] ss:$20 sps:$4 sm:$0xff]   ;;  %v14894_v63 = vld [vmem:[%s20738_s5 + $0x678] ss:$20 sps:$4 sm:$0xff]   ;;  %vm10970_vm2 = vcmask 7168  }
 0x5dd   :  { %6832 = vmatprep.subr.bf16.mxu1 %v14845_v0  ;;  %7133 = vmatprep.subr.bf16.mxu0 %v14848_v3  ;;  %v6554_v0 = vand.u32 %v11571_v16, %v19259_v61  ;;  %v6560_v3 = vand.u32 %v11573_v27, %v19259_v61  ;;  %v14895_v42 = vld [vmem:[%s20738_s5 + $0x38] ss:$20 sps:$4 sm:$0xff]   ;;  %v14932_v27 = vld [vmem:[%s20738_s5 + $0xa60] ss:$20 sps:$4 sm:$0xff]  }
 0x5de   :  { %v14896_v19 = vld [vmem:[%s20738_s5 + $0x538] ss:$20 sps:$4 sm:$0xff]  }
 0x5df   :  { %v14928_v16 = vld [vmem:[%s20738_s5 + $0xa38] ss:$20 sps:$4 sm:$0xff]  }
 0x5e0   :  { %6833 = vmatpush1.bf16.msra.mxu1 %v14843_v47  ;;  %7134 = vmatpush1.bf16.msra.mxu0 %v14846_v33  ;;  %v3107_v47 = vmax.f32 %v18868_v43, %v3053_v45  ;;  %v3121_v33 = vmax.f32 %v18904_v10, %v3066_v31  ;;  %v14892_v43 = vld [vmem:[%s20738_s5 + $0x510] ss:$20 sps:$4 sm:$0xff]   ;;  %v14893_v10 = vld [vmem:[%s20738_s5 + $0x178] ss:$20 sps:$4 sm:$0xff]   ;;  %v14936_v45 = vld [vmem:[%s20738_s5 + $0xa88] ss:$20 sps:$4 sm:$0xff]  }
 0x5e1   :  { %6834 = vmatprep.subr.bf16.mxu1 %v14851_v24  ;;  %7135 = vmatprep.subr.bf16.mxu0 %v14854_v40  ;;  %v14897_v24 = vld [vmem:[%s20738_s5 + $0x1a0] ss:$20 sps:$4 sm:$0xff]   ;;  %v14937_v31 = vld [vmem:[%s20738_s5 + $0x470] ss:$20 sps:$4 sm:$0xff]  }
 0x5e2   :  { %v19292_v29 = vpack.c.bf16 %v3121_v33, %v3107_v47  ;;  %v14899_v40 = vld [vmem:[%s20738_s5 + $0x60] ss:$20 sps:$4 sm:$0xff]   ;;  %v14940_v47 = vld [vmem:[%s20738_s5 + $0xab0] ss:$20 sps:$4 sm:$0xff]   ;;  %v14941_v33 = vld [vmem:[%s20738_s5 + $0x498] ss:$20 sps:$4 sm:$0xff]  }
 0x5e4   :  { %6835 = vmatpush1.bf16.msra.mxu1 %v14849_v5  ;;  %7136 = vmatpush1.bf16.msra.mxu0 %v14852_v51  ;;  %v14901_v5 = vld [vmem:[%s20738_s5 + $0x1c8] ss:$20 sps:$4 sm:$0xff]  }
 0x5e5   :  { %6836 = vmatprep.subr.bf16.mxu1 %v14857_v21  ;;  %7137 = vmatprep.subr.bf16.mxu0 %v14860_v9  ;;  %v14902_v51 = vld [vmem:[%s20738_s5 + $0x6c8] ss:$20 sps:$4 sm:$0xff]  }
 0x5e6   :  { %v14903_v21 = vld [vmem:[%s20738_s5 + $0x88] ss:$20 sps:$4 sm:$0xff]  }
 0x5e7   :  { %v14904_v9 = vld [vmem:[%s20738_s5 + $0x588] ss:$20 sps:$4 sm:$0xff]  }
 0x5e8   :  { %6837 = vmatpush1.bf16.msra.mxu1 %v14855_v53  ;;  %7138 = vmatpush1.bf16.msra.mxu0 %v14858_v37  ;;  %v14905_v53 = vld [vmem:[%s20738_s5 + $0x1f0] ss:$20 sps:$4 sm:$0xff]  }
 0x5e9   :  { %6838 = vmatprep.subr.bf16.mxu1 %v14863_v28  ;;  %7139 = vmatprep.subr.bf16.mxu0 %v14866_v54  ;;  %v14906_v37 = vld [vmem:[%s20738_s5 + $0x6f0] ss:$20 sps:$4 sm:$0xff]  }
 0x5ea   :  { %v14907_v28 = vld [vmem:[%s20738_s5 + $0xb0] ss:$20 sps:$4 sm:$0xff]  }
 0x5eb   :  { %v14908_v54 = vld [vmem:[%s20738_s5 + $0x5b0] ss:$20 sps:$4 sm:$0xff]  }
 0x5ec   :  { %6839 = vmatpush1.bf16.msra.mxu1 %v14861_v15  ;;  %7140 = vmatpush1.bf16.msra.mxu0 %v14864_v57  ;;  %v14909_v15 = vld [vmem:[%s20738_s5 + $0x218] ss:$20 sps:$4 sm:$0xff]  }
 0x5ed   :  { %6840 = vmatprep.subr.bf16.mxu1 %v14869_v36  ;;  %7141 = vmatprep.subr.bf16.mxu0 %v14872_v60  ;;  %v14910_v57 = vld [vmem:[%s20738_s5 + $0x718] ss:$20 sps:$4 sm:$0xff]  }
 0x5ee   :  { %v14911_v36 = vld [vmem:[%s20738_s5 + $0xd8] ss:$20 sps:$4 sm:$0xff]  }
 0x5ef   :  { %v14912_v60 = vld [vmem:[%s20738_s5 + $0x5d8] ss:$20 sps:$4 sm:$0xff]  }
 0x5f0   :  { %6841 = vmatpush1.bf16.msra.mxu1 %v14867_v25  ;;  %7142 = vmatpush1.bf16.msra.mxu0 %v14870_v1  ;;  %v14913_v25 = vld [vmem:[%s20738_s5 + $0x240] ss:$20 sps:$4 sm:$0xff]  }
 0x5f1   :  { %6842 = vmatprep.subr.bf16.mxu1 %v14875_v26  ;;  %7143 = vmatprep.subr.bf16.mxu0 %v14878_v18  ;;  %v14914_v1 = vld [vmem:[%s20738_s5 + $0x740] ss:$20 sps:$4 sm:$0xff]  }
 0x5f2   :  { %v14915_v26 = vld [vmem:[%s20738_s5 + $0x100] ss:$20 sps:$4 sm:$0xff]  }
 0x5f3   :  { %v14916_v18 = vld [vmem:[%s20738_s5 + $0x600] ss:$20 sps:$4 sm:$0xff]  }
 0x5f4   :  { %6843 = vmatpush1.bf16.msra.mxu1 %v14873_v34  ;;  %7144 = vmatpush1.bf16.msra.mxu0 %v14876_v59  ;;  %v14920_v34 = vld [vmem:[%s20738_s5 + $0x628] ss:$20 sps:$4 sm:$0xff]   ;;  %v14921_v59 = vld [vmem:[%s20738_s5 + $0x3d0] ss:$20 sps:$4 sm:$0xff]  }
 0x5f5   :  { %6844 = vmatprep.subr.bf16.mxu1 %v14881_v41  ;;  %7145 = vmatprep.subr.bf16.mxu0 %v14884_v38  ;;  %v14922_v41 = vld [vmem:[%s20738_s5 + $0xb50] ss:$20 sps:$4 sm:$0xff]  }
 0x5f6   :  { %v14923_v38 = vld [vmem:[%s20738_s5 + $0x290] ss:$20 sps:$4 sm:$0xff]  }
 0x5f8   :  { %6845 = vmatpush1.bf16.msra.mxu1 %v14879_v44  ;;  %7146 = vmatpush1.bf16.msra.mxu0 %v14882_v52  ;;  %v14926_v44 = vld [vmem:[%s20738_s5 + $0xb78] ss:$20 sps:$4 sm:$0xff]  }
 0x5f9   :  { %6846 = vmatprep.subr.bf16.mxu1 %v6557_v23  ;;  %7147 = vmatprep.subr.bf16.mxu0 %v6563_v17  ;;  %v14927_v52 = vld [vmem:[%s20738_s5 + $0x2b8] ss:$20 sps:$4 sm:$0xff]   ;;  %v14934_v23 = vld [vmem:[%s20738_s5 + $0xbc8] ss:$20 sps:$4 sm:$0xff]  }
 0x5fa   :  { %v14935_v17 = vld [vmem:[%s20738_s5 + $0x308] ss:$20 sps:$4 sm:$0xff]  }
 0x5fc   :  { %6847 = vmatpush1.bf16.msra.mxu1 %v6554_v0  ;;  %7148 = vmatpush1.bf16.msra.mxu0 %v6560_v3  ;;  %v14938_v0 = vld [vmem:[%s20738_s5 + $0xbf0] ss:$20 sps:$4 sm:$0xff]  }
 0x5fd   :  { %11749 = vmatprep.subr.bf16.mxu1 %v14889_v35  ;;  %11793 = vmatprep.subr.bf16.mxu0 %v14890_v46  ;;  %v14939_v3 = vld [vmem:[%s20738_s5 + $0x330] ss:$20 sps:$4 sm:$0xff]   ;;  %v14942_v35 = vld [vmem:[%s20738_s5 + $0xc18] ss:$20 sps:$4 sm:$0xff]  }
 0x5fe   :  { %v14943_v46 = vld [vmem:[%s20738_s5 + $0x358] ss:$20 sps:$4 sm:$0xff]  }
 0x5ff   :  { %6859 = vmatmul.mubr.bf16.vlgmr.msra.gmra.mrb[12].mxu1 %v19292_v29  ;;  %7160 = vmatmul.mubr.bf16.vlgmr.msra.gmra.mrb[16].mxu0 %v19292_v29 }
 0x600   :  { %11750 = vmatpush3.bf16.msra.mxu1 %v14891_v56  ;;  %7202 = vmatprep.mubr.bf16.mxu1 %v17728_v39  ;;  %v14898_v39 = vld [vmem:[%s20738_s5 + $0x6a0] ss:$20 sps:$4 sm:$0xff]   ;;  %v14944_v56 = vld [vmem:[%s20738_s5 + $0xad8] ss:$20 sps:$4 sm:$0xff]  }
 0x601   :  { %11794 = vmatpush3.bf16.msra.mxu0 %v14892_v43  ;;  %7284 = vmatprep.mubr.bf16.mxu0 %v18320_v48  ;;  %v14900_v48 = vld [vmem:[%s20738_s5 + $0x560] ss:$20 sps:$4 sm:$0xff]  }
 0x602   :  { %11751 = vmatprep.subr.bf16.mxu1 %v14893_v10  ;;  %11795 = vmatprep.subr.bf16.mxu0 %v14894_v63  ;;  %v14945_v43 = vld [vmem:[%s20738_s5 + $0x4c0] ss:$20 sps:$4 sm:$0xff]  }
 0x603   :  { %v14946_v10 = vld [vmem:[%s20738_s5 + $0xc40] ss:$20 sps:$4 sm:$0xff]  }
 0x604   :  { %11752 = vmatpush3.bf16.msra.mxu1 %v14895_v42  ;;  %v14947_v63 = vld [vmem:[%s20738_s5 + $0x380] ss:$20 sps:$4 sm:$0xff]  }
 0x605   :  { %11796 = vmatpush3.bf16.msra.mxu0 %v14896_v19  ;;  %11753 = vmatprep.subr.bf16.mxu1 %v14897_v24  ;;  %v14948_v42 = vld [vmem:[%s20738_s5 + $0xb00] ss:$20 sps:$4 sm:$0xff]   ;;  %v14949_v19 = vld [vmem:[%s20738_s5 + $0x4e8] ss:$20 sps:$4 sm:$0xff]  }
 0x606   :  { %11797 = vmatprep.subr.bf16.mxu0 %v14898_v39  ;;  %v14950_v24 = vld [vmem:[%s20738_s5 + $0xc68] ss:$20 sps:$4 sm:$0xff]  }
 0x607   :  { %v14951_v39 = vld [vmem:[%s20738_s5 + $0x3a8] ss:$20 sps:$4 sm:$0xff]  }
 0x608   :  { %11754 = vmatpush3.bf16.msra.mxu1 %v14899_v40  ;;  %v14952_v40 = vld [vmem:[%s20738_s5 + $0xb28] ss:$20 sps:$4 sm:$0xff]  }
 0x609   :  { %11798 = vmatpush3.bf16.msra.mxu0 %v14900_v48  ;;  %11755 = vmatprep.subr.bf16.mxu1 %v14901_v5  ;;  %v14953_v48 = vld [vmem:[%s20738_s5 + $0x8d0] ss:$20 sps:$4 sm:$0xff]  }
 0x60a   :  { %11799 = vmatprep.subr.bf16.mxu0 %v14902_v51  ;;  %v14954_v5 = vld [vmem:[%s20738_s5 + $0x790] ss:$20 sps:$4 sm:$0xff]  }
 0x60b   :  { %v14955_v51 = vld [vmem:[%s20738_s5 + $0xf10] ss:$20 sps:$4 sm:$0xff]  }
 0x60c   :  { %11756 = vmatpush3.bf16.msra.mxu1 %v14903_v21  ;;  %v21040_v21 = vmov 0  }
 0x60d   :  { %11800 = vmatpush3.bf16.msra.mxu0 %v14904_v9  ;;  %11757 = vmatprep.subr.bf16.mxu1 %v14905_v53  ;;  %v14956_v9 = vld [vmem:[%s20738_s5 + $0x8f8] ss:$20 sps:$4 sm:$0xff]  }
 0x60e   :  { %11801 = vmatprep.subr.bf16.mxu0 %v14906_v37  ;;  %v14957_v53 = vld [vmem:[%s20738_s5 + $0x7b8] ss:$20 sps:$4 sm:$0xff]  }
 0x60f   :  { %v14958_v37 = vld [vmem:[%s20738_s5 + $0xf38] ss:$20 sps:$4 sm:$0xff]  }
 0x610   :  { %11758 = vmatpush3.bf16.msra.mxu1 %v14907_v28  ;;  %v14959_v28 = vld [vmem:[%s20738_s5 + $0x920] ss:$20 sps:$4 sm:$0xff]  }
 0x611   :  { %11802 = vmatpush3.bf16.msra.mxu0 %v14908_v54  ;;  %11759 = vmatprep.subr.bf16.mxu1 %v14909_v15  ;;  %v14964_v54 = vld [vmem:[%s20738_s5 + $0xf88] ss:$20 sps:$4 sm:$0xff]   ;;  %v14965_v15 = vld [vmem:[%s20738_s5 + $0x970] ss:$20 sps:$4 sm:$0xff]  }
 0x612   :  { %11803 = vmatprep.subr.bf16.mxu0 %v14910_v57  ;;  %v14966_v57 = vld [vmem:[%s20738_s5 + $0x830] ss:$20 sps:$4 sm:$0xff]  }
 0x614   :  { %11760 = vmatpush3.bf16.msra.mxu1 %v14911_v36  ;;  %v14967_v36 = vld [vmem:[%s20738_s5 + $0xfb0] ss:$20 sps:$4 sm:$0xff]  }
 0x615   :  { %11804 = vmatpush3.bf16.msra.mxu0 %v14912_v60  ;;  %11761 = vmatprep.subr.bf16.mxu1 %v14913_v25  ;;  %v14968_v60 = vld [vmem:[%s20738_s5 + $0x998] ss:$20 sps:$4 sm:$0xff]  }
 0x616   :  { %11805 = vmatprep.subr.bf16.mxu0 %v14914_v1  ;;  %v14969_v25 = vld [vmem:[%s20738_s5 + $0x858] ss:$20 sps:$4 sm:$0xff]  }
 0x617   :  { %v14970_v1 = vld [vmem:[%s20738_s5 + $0xfd8] ss:$20 sps:$4 sm:$0xff]  }
 0x618   :  { %11762 = vmatpush3.bf16.msra.mxu1 %v14915_v26  ;;  %v14971_v26 = vld [vmem:[%s20738_s5 + $0x9c0] ss:$20 sps:$4 sm:$0xff]  }
 0x619   :  { %11806 = vmatpush3.bf16.msra.mxu0 %v14916_v18  ;;  %11763 = vmatprep.subr.bf16.mxu1 %v14917_v32  ;;  %v14972_v18 = vld [vmem:[%s20738_s5 + $0x880] ss:$20 sps:$4 sm:$0xff]  }
 0x61a   :  { %11807 = vmatprep.subr.bf16.mxu0 %v14918_v13  ;;  %v14973_v32 = vld [vmem:[%s20738_s5 + $0x1000] ss:$20 sps:$4 sm:$0xff]   ;;  %v14974_v13 = vld [vmem:[%s20738_s5 + $0x9e8] ss:$20 sps:$4 sm:$0xff]  }
 0x61c   :  { %11764 = vmatpush3.bf16.msra.mxu1 %v14919_v62  ;;  %v14975_v62 = vld [vmem:[%s20738_s5 + $0x8a8] ss:$20 sps:$4 sm:$0xff]  }
 0x61d   :  { %11808 = vmatpush3.bf16.msra.mxu0 %v14920_v34  ;;  %11771 = vmatprep.subr.bf16.mxu1 %v14921_v59  ;;  %v14976_v34 = vld [vmem:[%s20738_s5 + $0x1028] ss:$20 sps:$4 sm:$0xff]   ;;  %v14977_v59 = vld [vmem:[%s20738_s5 + $0xdd0] ss:$20 sps:$4 sm:$0xff]  }
 0x61e   :  { %11837 = vmatprep.subr.bf16.mxu0 %v14922_v41  ;;  %v14978_v41 = vld [vmem:[%s20738_s5 + $0xc90] ss:$20 sps:$4 sm:$0xff]  }
 0x61f   :  { %7203 = vmatmul.mubr.bf16.vlgmr.msra.gmra.mrb[16].mxu1 %v17746_v20  ;;  %v14929_v20 = vld [vmem:[%s20738_s5 + $0x420] ss:$20 sps:$4 sm:$0xff]  }
 0x620   :  { %7285 = vmatmul.mubr.bf16.vlgmr.msra.gmra.mrb[20].mxu0 %v18322_v6  ;;  %11772 = vmatpush3.bf16.msra.mxu1 %v14923_v38  ;;  %v14930_v6 = vld [vmem:[%s20738_s5 + $0xba0] ss:$20 sps:$4 sm:$0xff]   ;;  %v14979_v38 = vld [vmem:[%s20738_s5 + $0x1050] ss:$20 sps:$4 sm:$0xff]  }
 0x621   :  { %7243 = vmatprep.mubr.bf16.mxu1 %v18036_v55  ;;  %11838 = vmatpush3.bf16.msra.mxu0 %v14924_v58  ;;  %v14931_v55 = vld [vmem:[%s20738_s5 + $0x2e0] ss:$20 sps:$4 sm:$0xff]   ;;  %v14980_v58 = vld [vmem:[%s20738_s5 + $0xdf8] ss:$20 sps:$4 sm:$0xff]  }
 0x622   :  { %7366 = vmatprep.mubr.bf16.mxu0 %v18870_v14  ;;  %11773 = vmatprep.subr.bf16.mxu1 %v14925_v7  ;;  %v14933_v14 = vld [vmem:[%s20738_s5 + $0x448] ss:$20 sps:$4 sm:$0xff]   ;;  %v14981_v7 = vld [vmem:[%s20738_s5 + $0xcb8] ss:$20 sps:$4 sm:$0xff]  }
 0x623   :  { %11839 = vmatprep.subr.bf16.mxu0 %v14926_v44  ;;  %v14982_v44 = vld [vmem:[%s20738_s5 + $0x1078] ss:$20 sps:$4 sm:$0xff]  }
 0x624   :  { %11774 = vmatpush3.bf16.msra.mxu1 %v14927_v52  ;;  %v14983_v52 = vld [vmem:[%s20738_s5 + $0xe20] ss:$20 sps:$4 sm:$0xff]  }
 0x625   :  { %11840 = vmatpush3.bf16.msra.mxu0 %v14928_v16  ;;  %11775 = vmatprep.subr.bf16.mxu1 %v14929_v20  ;;  %v14986_v20 = vld [vmem:[%s20738_s5 + $0xe48] ss:$20 sps:$4 sm:$0xff]  }
 0x626   :  { %11841 = vmatprep.subr.bf16.mxu0 %v14930_v6  ;;  %v14987_v6 = vld [vmem:[%s20738_s5 + $0xd08] ss:$20 sps:$4 sm:$0xff]  }
 0x628   :  { %11776 = vmatpush3.bf16.msra.mxu1 %v14931_v55  ;;  %v14988_v55 = vld [vmem:[%s20738_s5 + $0xe70] ss:$20 sps:$4 sm:$0xff]  }
 0x629   :  { %11842 = vmatpush3.bf16.msra.mxu0 %v14932_v27  ;;  %11777 = vmatprep.subr.bf16.mxu1 %v14933_v14  ;;  %v14990_v27 = vld [vmem:[%s20738_s5 + $0xe98] ss:$20 sps:$4 sm:$0xff]  }
 0x62a   :  { %11843 = vmatprep.subr.bf16.mxu0 %v14934_v23  ;;  %v14991_v14 = vld [vmem:[%s20738_s5 + $0xd58] ss:$20 sps:$4 sm:$0xff]   ;;  %v14993_v23 = vld [vmem:[%s20738_s5 + $0xd80] ss:$20 sps:$4 sm:$0xff]  }
 0x62c   :  { %11778 = vmatpush3.bf16.msra.mxu1 %v14935_v17  ;;  %v14994_v17 = vld [vmem:[%s20738_s5 + $0xee8] ss:$20 sps:$4 sm:$0xff]  }
 0x62d   :  { %11844 = vmatpush3.bf16.msra.mxu0 %v14936_v45  ;;  %11779 = vmatprep.subr.bf16.mxu1 %v14937_v31  ;;  %v14995_v45 = vld [vmem:[%s20738_s5 + $0xda8] ss:$20 sps:$4 sm:$0xff]  }
 0x62e   :  { %11845 = vmatprep.subr.bf16.mxu0 %v14938_v0 }
 0x630   :  { %11780 = vmatpush3.bf16.msra.mxu1 %v14939_v3 }
 0x631   :  { %11846 = vmatpush3.bf16.msra.mxu0 %v14940_v47  ;;  %11781 = vmatprep.subr.bf16.mxu1 %v14941_v33 }
 0x632   :  { %11847 = vmatprep.subr.bf16.mxu0 %v14942_v35 }
 0x634   :  { %11782 = vmatpush3.bf16.msra.mxu1 %v14943_v46 }
 0x635   :  { %11848 = vmatpush3.bf16.msra.mxu0 %v14944_v56  ;;  %11783 = vmatprep.subr.bf16.mxu1 %v14945_v43 }
 0x636   :  { %11849 = vmatprep.subr.bf16.mxu0 %v14946_v10 }
 0x638   :  { %11784 = vmatpush3.bf16.msra.mxu1 %v14947_v63 }
 0x639   :  { %11850 = vmatpush3.bf16.msra.mxu0 %v14948_v42  ;;  %11785 = vmatprep.subr.bf16.mxu1 %v14949_v19 }
 0x63a   :  { %11851 = vmatprep.subr.bf16.mxu0 %v14950_v24 }
 0x63c   :  { %11786 = vmatpush3.bf16.msra.mxu1 %v14951_v39 }
 0x63d   :  { %11852 = vmatpush3.bf16.msra.mxu0 %v14952_v40  ;;  %11815 = vmatprep.subr.bf16.mxu1 %v14953_v48 }
 0x63e   :  { %7416 = vmatprep.subr.bf16.mxu0 %v21040_v21 }
 0x63f   :  { %7244 = vmatmul.mubr.bf16.vlgmr.msra.gmra.mrb[20].mxu1 %v18038_v11  ;;  %v14960_v11 = vld [vmem:[%s20738_s5 + $0x7e0] ss:$20 sps:$4 sm:$0xff]  }
 0x640   :  { %7367 = vmatmul.mubr.bf16.vlgmr.msra.gmra.mrb[24].mxu0 %v18881_v50  ;;  %11816 = vmatpush3.bf16.msra.mxu1 %v14954_v5  ;;  %v14962_v50 = vld [vmem:[%s20738_s5 + $0x948] ss:$20 sps:$4 sm:$0xff]  }
 0x641   :  { %7325 = vmatprep.mubr.bf16.mxu1 %v18604_v22  ;;  %7417 = vmatpush1.bf16.msra.mxu0 %v14955_v51  ;;  %v14961_v22 = vld [vmem:[%s20738_s5 + $0xf60] ss:$20 sps:$4 sm:$0xff]  }
 0x642   :  { %11578 = vmatprep.mubr.msk.bf16.mxu0 %vm6545_vm5, %v19149_v30  ;;  %11817 = vmatprep.subr.bf16.mxu1 %v14956_v9  ;;  %v14963_v30 = vld [vmem:[%s20738_s5 + $0x808] ss:$20 sps:$4 sm:$0xff]  }
 0x643   :  { %7418 = vmatprep.subr.bf16.mxu0 %v21040_v21 }
 0x644   :  { %11818 = vmatpush3.bf16.msra.mxu1 %v14957_v53 }
 0x645   :  { %7419 = vmatpush1.bf16.msra.mxu0 %v14958_v37  ;;  %11819 = vmatprep.subr.bf16.mxu1 %v14959_v28 }
 0x646   :  { %7420 = vmatprep.subr.bf16.mxu0 %v21040_v21 }
 0x648   :  { %11820 = vmatpush3.bf16.msra.mxu1 %v14960_v11 }
 0x649   :  { %7421 = vmatpush1.bf16.msra.mxu0 %v14961_v22  ;;  %11821 = vmatprep.subr.bf16.mxu1 %v14962_v50 }
 0x64a   :  { %7422 = vmatprep.subr.bf16.mxu0 %v21040_v21 }
 0x64c   :  { %11822 = vmatpush3.bf16.msra.mxu1 %v14963_v30 }
 0x64d   :  { %7423 = vmatpush1.bf16.msra.mxu0 %v14964_v54  ;;  %11823 = vmatprep.subr.bf16.mxu1 %v14965_v15 }
 0x64e   :  { %7424 = vmatprep.subr.bf16.mxu0 %v21040_v21 }
 0x650   :  { %11824 = vmatpush3.bf16.msra.mxu1 %v14966_v57 }
 0x651   :  { %7425 = vmatpush1.bf16.msra.mxu0 %v14967_v36  ;;  %11825 = vmatprep.subr.bf16.mxu1 %v14968_v60 }
 0x652   :  { %7426 = vmatprep.subr.bf16.mxu0 %v21040_v21 }
 0x654   :  { %11826 = vmatpush3.bf16.msra.mxu1 %v14969_v25 }
 0x655   :  { %7427 = vmatpush1.bf16.msra.mxu0 %v14970_v1  ;;  %11827 = vmatprep.subr.bf16.mxu1 %v14971_v26 }
 0x656   :  { %7428 = vmatprep.subr.bf16.mxu0 %v21040_v21 }
 0x658   :  { %11828 = vmatpush3.bf16.msra.mxu1 %v14972_v18 }
 0x659   :  { %7429 = vmatpush1.bf16.msra.mxu0 %v14973_v32  ;;  %11829 = vmatprep.subr.bf16.mxu1 %v14974_v13 }
 0x65a   :  { %7430 = vmatprep.subr.bf16.mxu0 %v21040_v21 }
 0x65c   :  { %11830 = vmatpush3.bf16.msra.mxu1 %v14975_v62 }
 0x65d   :  { %7431 = vmatpush1.bf16.msra.mxu0 %v14976_v34  ;;  %11859 = vmatprep.subr.bf16.mxu1 %v14977_v59 }
 0x65e   :  { %7432 = vmatprep.subr.bf16.mxu0 %v21040_v21 }
 0x65f   :  { %7326 = vmatmul.mubr.bf16.vlgmr.msra.gmra.mrb[24].mxu1 %v18606_v12  ;;  %v14985_v12 = vld [vmem:[%s20738_s5 + $0x10a0] ss:$0 sps:$4 sm:$0x77]  }
 0x660   :  { %11860 = vmatpush3.bf16.msra.mxu1 %v14978_v41  ;;  %7407 = vmatprep.mubr.bf16.mxu1 %v19129_v2  ;;  %v14984_v2 = vld [vmem:[%s20738_s5 + $0xce0] ss:$20 sps:$4 sm:$0xff]   ;;  %v6566_v16 = vand.u32 %v14985_v12, %v19259_v61  ;;  %v14989_v61 = vld [vmem:[%s20738_s5 + $0xd30] ss:$20 sps:$4 sm:$0xff]  }
 0x661   :  { %7433 = vmatpush1.bf16.msra.mxu0 %v14979_v38  ;;  %11861 = vmatprep.subr.bf16.mxu1 %v14980_v58 }
 0x662   :  { %7434 = vmatprep.subr.bf16.mxu0 %v21040_v21 }
 0x664   :  { %11862 = vmatpush3.bf16.msra.mxu1 %v14981_v7 }
 0x665   :  { %7435 = vmatpush1.bf16.msra.mxu0 %v14982_v44  ;;  %11863 = vmatprep.subr.bf16.mxu1 %v14983_v52 }
 0x666   :  { %7436 = vmatprep.subr.bf16.mxu0 %v21040_v21 }
 0x668   :  { %11864 = vmatpush3.bf16.msra.mxu1 %v14984_v2 }
 0x669   :  { %7437 = vmatpush1.bf16.msra.mxu0 %v6566_v16  ;;  %11865 = vmatprep.subr.bf16.mxu1 %v14986_v20 }
 0x66c   :  { %7449 = vmatmul.mubr.bf16.vlgmr.msra.gmra.mrb[28].mxu0 %v19292_v29  ;;  %11866 = vmatpush3.bf16.msra.mxu1 %v14987_v6  ;;  %v14992_v29 = vld [vmem:[%s20738_s5 + $0xec0] ss:$20 sps:$4 sm:$0xff]   ;;  %s15282_s5 = smov 90  }
 0x66d   :  { %11867 = vmatprep.subr.bf16.mxu1 %v14988_v55 }
 0x670   :  { %11868 = vmatpush3.bf16.msra.mxu1 %v14989_v61 }
 0x671   :  { %11869 = vmatprep.subr.bf16.mxu1 %v14990_v27 }
 0x674   :  { %11870 = vmatpush3.bf16.msra.mxu1 %v14991_v14 }
 0x675   :  { %11871 = vmatprep.subr.bf16.mxu1 %v14992_v29 }
 0x678   :  { %11872 = vmatpush3.bf16.msra.mxu1 %v14993_v23 }
 0x679   :  { %11873 = vmatprep.subr.bf16.mxu1 %v14994_v17 }
 0x67c   :  { %11874 = vmatpush3.bf16.msra.mxu1 %v14995_v45 }
 0x67f   :  { %7408 = vmatmul.mubr.bf16.vlgmr.msra.gmra.mrb[28].mxu1 %v19137_v4 }
 0x680   :  { %7694 = vmatprep.mubr.f32.mxu1 %v20918_v8 }
 0x6d2   :  { %v19636_v31 = vpop.f32.mrb[12].mxu1  ;;  %v19638_v0 = vpop.f32.mrb[16].mxu0 }
 0x6d3   :  { %v19640_v3 = vpop.f32.mrb[13].mxu1  ;;  %v19642_v47 = vpop.f32.mrb[17].mxu0 }
 0x6d4   :  { %v19644_v33 = vpop.f32.mrb[14].mxu1  ;;  %v19646_v35 = vpop.f32.mrb[18].mxu0  ;;  %v19650_v46 = vpack.i.bf16 %v19638_v0, %v19640_v3 }
 0x6d5   :  { %v19652_v56 = vpop.f32.mrb[15].mxu1  ;;  %v19654_v4 = vpop.f32.mrb[19].mxu0  ;;  %v19658_v43 = vpack.i.bf16 %v19644_v33, %v19636_v31  ;;  %v12558_v39 = vpack.c.bf16 %v19644_v33, %v19636_v31  ;;  %v7457_v31 = vld [vmem:[%s20736_s3] sm:$0xff] }
 0x6d6   :  { %13695 = vrot.lane.b32.xlu1 %v19650_v46, %s15275_s20  ;;  %v13709_v10 = vpack.i.bf16 %v19652_v56, %v19642_v47  ;;  %v13714_v63 = vpack.i.bf16 %v19654_v4, %v19646_v35  ;;  %v19670_v42 = vpack.i.bf16 %v19646_v35, %v19652_v56  ;;  %v13789_v19 = vpack.i.bf16 %v19654_v4, %v19642_v47 }
 0x6d7   :  { %13705 = vrot.lane.b32.xlu0 %v19658_v43, %s15275_s20  ;;  %v12556_v24 = vpack.c.bf16 %v19652_v56, %v19640_v3  ;;  %v12568_v40 = vpack.c.bf16 %v19654_v4, %v19642_v47 }
 0x6da   :  { %13700 = vrot.lane.b32.xlu1 %v19650_v46, %s15276_s25 }
 0x6db   :  { %13710 = vrot.lane.b32.xlu0 %v13709_v10, %s15275_s20 }
 0x6de   :  { %13715 = vrot.lane.b32.xlu1 %v13714_v63, %s15275_s20 }
 0x6df   :  { %13720 = vrot.lane.b32.xlu0 %v13709_v10, %s15276_s25 }
 0x6e2   :  { %13725 = vrot.lane.b32.xlu1 %v13714_v63, %s15276_s25 }
 0x6e3   :  { %13730 = vrot.lane.b32.xlu0 %v19658_v43, %s15276_s25 }
 0x6e6   :  { %13735 = vrot.lane.b32.xlu1 %v19650_v46, %s15282_s5 }
 0x6e7   :  { %13745 = vrot.lane.b32.xlu0 %v19670_v42, %s15282_s5 }
 0x6ea   :  { %13740 = vrot.lane.b32.xlu1 %v19658_v43, %s15282_s5 }
 0x6f2   :  { %v11765_v5 = vpop.f32.mrb[16].mxu1 }
 0x6f3   :  { %v11809_v51 = vpop.f32.mrb[20].mxu0  ;;  %v11766_v9 = vpop.f32.mrb[17].mxu1 }
 0x6f4   :  { %v11767_v53 = vadd.f32 %v11766_v9, %v11765_v5  ;;  %v11810_v37 = vpop.f32.mrb[21].mxu0  ;;  %v11768_v28 = vpop.f32.mrb[18].mxu1 }
 0x6f5   :  { %v11811_v11 = vadd.f32 %v11810_v37, %v11809_v51  ;;  %v11812_v22 = vpop.f32.mrb[22].mxu0  ;;  %v11769_v50 = vpop.f32.mrb[19].mxu1 }
 0x6f6   :  { %v11770_v30 = vadd.f32 %v11769_v50, %v11768_v28  ;;  %v11813_v54 = vpop.f32.mrb[23].mxu0 }
 0x6f7   :  { %v11814_v15 = vadd.f32 %v11813_v54, %v11812_v22 }
 0x712   :  { %v11787_v57 = vpop.f32.mrb[20].mxu1 }
 0x713   :  { %v11853_v36 = vpop.f32.mrb[24].mxu0  ;;  %v11788_v60 = vpop.f32.mrb[21].mxu1 }
 0x714   :  { %v11789_v25 = vadd.f32 %v11788_v60, %v11787_v57  ;;  %v11854_v1 = vpop.f32.mrb[25].mxu0  ;;  %v11790_v26 = vpop.f32.mrb[22].mxu1 }
 0x715   :  { %v11855_v18 = vadd.f32 %v11854_v1, %v11853_v36  ;;  %v11856_v32 = vpop.f32.mrb[26].mxu0  ;;  %v11791_v13 = vpop.f32.mrb[23].mxu1 }
 0x716   :  { %v7246_v62 = vadd.f32 %v11789_v25, %v11767_v53  ;;  %v11792_v34 = vadd.f32 %v11791_v13, %v11790_v26  ;;  %v11857_v59 = vpop.f32.mrb[27].mxu0 }
 0x717   :  { %v11858_v41 = vadd.f32 %v11857_v59, %v11856_v32 }
 0x718   :  { %v7249_v38 = vadd.f32 %v11792_v34, %v11770_v30  ;;  %v7287_v58 = vadd.f32 %v11811_v11, %v7246_v62 }
 0x71a   :  { %v7290_v7 = vadd.f32 %v11814_v15, %v7249_v38 }
 0x732   :  { %v11831_v44 = vpop.f32.mrb[24].mxu1 }
 0x733   :  { %v11832_v52 = vpop.f32.mrb[25].mxu1 }
 0x734   :  { %v11833_v12 = vadd.f32 %v11832_v52, %v11831_v44  ;;  %v11834_v2 = vpop.f32.mrb[26].mxu1 }
 0x735   :  { %v11835_v16 = vpop.f32.mrb[27].mxu1 }
 0x736   :  { %v7328_v20 = vadd.f32 %v11833_v12, %v7287_v58  ;;  %v11836_v6 = vadd.f32 %v11835_v16, %v11834_v2 }
 0x738   :  { %v7331_v55 = vadd.f32 %v11836_v6, %v7290_v7  ;;  %v7369_v61 = vadd.f32 %v11855_v18, %v7328_v20 }
 0x73a   :  { %v7372_v27 = vadd.f32 %v11858_v41, %v7331_v55 }
 0x73f   :  { %v7450_v14 = vpop.f32.mrb[28].mxu0 }
 0x740   :  { %v7452_v29 = vpop.f32.mrb[29].mxu0 }
 0x741   :  { %v7453_v23 = vpop.f32.mrb[30].mxu0 }
 0x742   :  { %v7455_v17 = vpop.f32.mrb[31].mxu0 }
 0x748   :  { %v13696_v45 = vpop.permute.xlu1 %13695 }
 0x749   :  { %v13706_v10 = vpop.permute.xlu0 %13705  ;;  %v13698_v63 = vunpack.i.h.bf16 %v13696_v45  ;;  %v13697_v5 = vunpack.i.l.bf16 %v13696_v45 }
 0x74a   :  { %v13708_v53 = vunpack.i.h.bf16 %v13706_v10  ;;  %v13707_v37 = vunpack.i.l.bf16 %v13706_v10 }
 0x74b   :  { %v19699_v22 = vsel %vm169_vm0, %v13697_v5, %v13698_v63 }
 0x74c   :  { %v13701_v51 = vpop.permute.xlu1 %13700  ;;  %v19715_v26 = vsel %vm169_vm0, %v13707_v37, %v13697_v5 }
 0x74d   :  { %v13711_v9 = vpop.permute.xlu0 %13710  ;;  %v13703_v50 = vunpack.i.h.bf16 %v13701_v51  ;;  %v13702_v30 = vunpack.i.l.bf16 %v13701_v51 }
 0x74e   :  { %v13713_v28 = vunpack.i.h.bf16 %v13711_v9  ;;  %v19696_v11 = vunpack.i.l.bf16 %v13711_v9 }
 0x74f   :  { %v19731_v41 = vsel %vm280_vm1, %v13702_v30, %v13703_v50 }
 0x750   :  { %v19702_v54 = vsel %vm169_vm0, %v13708_v53, %v13713_v28  ;;  %v13716_v15 = vpop.permute.xlu1 %13715  ;;  %v19706_v57 = vsel %vm169_vm0, %v13698_v63, %v19696_v11 }
 0x751   :  { %v19708_v36 = vunpack.i.h.bf16 %v13716_v15  ;;  %v13717_v60 = vunpack.i.l.bf16 %v13716_v15  ;;  %v13721_v25 = vpop.permute.xlu0 %13720  ;;  %v19712_v1 = vpack.i.bf16 %v19706_v57, %v19699_v22  ;;  %v12562_v59 = vpack.c.bf16 %v19702_v54, %v19715_v26 }
 0x752   :  { %v19717_v18 = vunpack.i.l.bf16 %v13721_v25  ;;  %v11875_v32 = vpop.f32.mrb[28].mxu1  ;;  %v13723_v12 = vunpack.i.h.bf16 %v13721_v25 }
 0x753   :  { %v19720_v13 = vsel %vm169_vm0, %v13713_v28, %v13717_v60  ;;  %v19724_v62 = vsel %vm169_vm0, %v13717_v60, %v19708_v36  ;;  %13750 = vrot.lane.b32.xlu0 %v19712_v1, %s15282_s5  ;;  %v11876_v34 = vpop.f32.mrb[29].mxu1  ;;  %v13764_v60 = vpack.i.bf16 %v19702_v54, %v19715_v26  ;;  %v12572_v26 = vpack.c.bf16 %v19708_v36, %v19696_v11 }
 0x754   :  { %v11877_v38 = vadd.f32 %v11876_v34, %v11875_v32  ;;  %v13726_v58 = vpop.permute.xlu1 %13725  ;;  %v11878_v7 = vpop.f32.mrb[30].mxu1  ;;  %v19735_v44 = vpack.i.bf16 %v19724_v62, %v19720_v13  ;;  %v19739_v52 = vsel %vm280_vm1, %v13703_v50, %v19717_v18  ;;  %v12560_v51 = vpack.c.bf16 %v19720_v13, %v19699_v22 }
 0x755   :  { %v19741_v2 = vunpack.i.h.bf16 %v13726_v58  ;;  %v13727_v16 = vunpack.i.l.bf16 %v13726_v58  ;;  %v13731_v20 = vpop.permute.xlu0 %13730  ;;  %v11879_v6 = vpop.f32.mrb[31].mxu1  ;;  %v13754_v55 = vpack.i.bf16 %v19739_v52, %v19731_v41  ;;  %v21041_v13 = vpack.c.bf16 %v19646_v35, %v19638_v0 }
 0x756   :  { %v7410_v29 = vadd.f32 %v11877_v38, %v7369_v61  ;;  %v13732_v17 = vunpack.i.l.bf16 %v13731_v20  ;;  %v11880_v45 = vadd.f32 %v11879_v6, %v11878_v7  ;;  %13760 = vrot.lane.b32.xlu1 %v19735_v44, %s15282_s5  ;;  %v13733_v5 = vunpack.i.h.bf16 %v13731_v20 }
 0x757   :  { %v19748_v10 = vsel %vm280_vm1, %v13723_v12, %v13727_v16  ;;  %v19752_v63 = vsel %vm280_vm1, %v13727_v16, %v19741_v2  ;;  %13755 = vrot.lane.b32.xlu0 %v13754_v55, %s15282_s5 }
 0x758   :  { %v7451_v9 = vadd.f32 %v7450_v14, %v7410_v29  ;;  %v7413_v61 = vadd.f32 %v11880_v45, %v7372_v27  ;;  %v19757_v53 = vpop.permute.xlu1 %13735  ;;  %v13769_v15 = vpack.i.bf16 %v19752_v63, %v19748_v10  ;;  %v19768_v25 = vsel %vm280_vm1, %v13732_v17, %v13702_v30 }
 0x759   :  { %v13738_v37 = vunpack.i.h.bf16 %v19757_v53  ;;  %v13737_v28 = vunpack.i.l.bf16 %v19757_v53  ;;  %v19761_v50 = vpop.permute.xlu0 %13745  ;;  %v19773_v34 = vsel %vm280_vm1, %v13733_v5, %v13723_v12  ;;  %v12564_v29 = vpack.c.bf16 %v19748_v10, %v19731_v41 }
 0x75a   :  { %v7454_v14 = vadd.f32 %v7453_v23, %v7413_v61  ;;  %v13748_v27 = vunpack.i.h.bf16 %v19761_v50  ;;  %v13747_v32 = vunpack.i.l.bf16 %v19761_v50  ;;  %13770 = vrot.lane.b32.xlu1 %v13769_v15, %s15282_s5  ;;  %v13849_v58 = vpack.i.bf16 %v7451_v9, %v19642_v47  ;;  %v7458_v47 = vld [vmem:[%s20736_s3 + $0x8] sm:$0xff] }
 0x75b   :  { %13765 = vrot.lane.b32.xlu0 %v13764_v60, %s15282_s5  ;;  %v7583_v38 = vsel %vm7581_vm8, %v13737_v28, %v13738_v37  ;;  %v13774_v17 = vpack.i.bf16 %v19773_v34, %v19768_v25  ;;  %v12566_v45 = vpack.c.bf16 %v19773_v34, %v19768_v25 }
 0x75c   :  { %v13741_v30 = vpop.permute.xlu1 %13740  ;;  %v13779_v7 = vpack.i.bf16 %v7454_v14, %v7451_v9  ;;  %v7586_v23 = vsel %vm7581_vm8, %v13747_v32, %v13748_v27  ;;  %v13854_v16 = vpack.i.bf16 %v7454_v14, %v19654_v4  ;;  %v12576_v4 = vpack.c.bf16 %v19741_v2, %v19717_v18 }
 0x75d   :  { %v13743_v12 = vunpack.i.h.bf16 %v13741_v30  ;;  %v13742_v20 = vunpack.i.l.bf16 %v13741_v30  ;;  %v12532_v6 = vpack.c.bf16 %v7586_v23, %v7583_v38 }
 0x75e   :  { %13780 = vrot.lane.b32.xlu1 %v13779_v7, %s15275_s20 }
 0x75f   :  { %v7582_v9 = vsel %vm7581_vm8, %v13742_v20, %v13737_v28  ;;  %v7585_v61 = vsel %vm7581_vm8, %v13743_v12, %v13747_v32  ;;  %12533 = vmatprep.subr.bf16.mxu1 %v12532_v6  ;;  %13775 = vrot.lane.b32.xlu0 %v13774_v17, %s15282_s5  ;;  %v13794_v28 = vpack.i.bf16 %v19708_v36, %v19696_v11 }
 0x760   :  { %v12534_v38 = vpack.c.bf16 %v7585_v61, %v7582_v9  ;;  %v13799_v32 = vpack.i.bf16 %v19741_v2, %v19717_v18 }
 0x762   :  { %12535 = vmatpush1.bf16.msra.mxu1 %v12534_v38  ;;  %13785 = vrot.lane.b32.xlu1 %v13779_v7, %s15276_s25 }
 0x763   :  { %13790 = vrot.lane.b32.xlu0 %v13789_v19, %s15282_s5 }
 0x766   :  { %13795 = vrot.lane.b32.xlu1 %v13794_v28, %s15282_s5 }
 0x767   :  { %13800 = vrot.lane.b32.xlu0 %v13799_v32, %s15282_s5 }
 0x76a   :  { %13805 = vrot.lane.b32.xlu1 %v19650_v46, %s15283_s26 }
 0x76b   :  { %13810 = vrot.lane.b32.xlu0 %v19670_v42, %s15283_s26 }
 0x76e   :  { %13815 = vrot.lane.b32.xlu1 %v19658_v43, %s15283_s26 }
 0x76f   :  { %13820 = vrot.lane.b32.xlu0 %v19712_v1, %s15283_s26 }
 0x772   :  { %13825 = vrot.lane.b32.xlu1 %v19735_v44, %s15283_s26 }
 0x773   :  { %13830 = vrot.lane.b32.xlu0 %v13764_v60, %s15283_s26 }
 0x776   :  { %13835 = vrot.lane.b32.xlu1 %v13754_v55, %s15283_s26 }
 0x777   :  { %13840 = vrot.lane.b32.xlu0 %v13769_v15, %s15283_s26 }
 0x77a   :  { %13845 = vrot.lane.b32.xlu1 %v13774_v17, %s15283_s26 }
 0x77b   :  { %13850 = vrot.lane.b32.xlu0 %v13849_v58, %s15283_s26 }
 0x77e   :  { %13855 = vrot.lane.b32.xlu1 %v13854_v16, %s15283_s26 }
 0x7c5   :  { %v19826_v46 = vpop.permute.xlu0 %13750 }
 0x7c6   :  { %v13753_v43 = vunpack.i.h.bf16 %v19826_v46  ;;  %v13752_v42 = vunpack.i.l.bf16 %v19826_v46  ;;  %v7460_v46 = vld [vmem:[%s20736_s3 + $0x18] sm:$0xff] }
 0x7c8   :  { %v19830_v19 = vpop.permute.xlu1 %13760  ;;  %v7589_v15 = vsel %vm7581_vm8, %v13752_v42, %v13753_v43 }
 0x7c9   :  { %v13763_v1 = vunpack.i.h.bf16 %v19830_v19  ;;  %v13762_v44 = vunpack.i.l.bf16 %v19830_v19  ;;  %v19834_v55 = vpop.permute.xlu0 %13755 }
 0x7ca   :  { %v13758_v30 = vunpack.i.h.bf16 %v19834_v55  ;;  %v13757_v7 = vunpack.i.l.bf16 %v19834_v55 }
 0x7cb   :  { %v7592_v60 = vsel %vm7581_vm8, %v13762_v44, %v13763_v1 }
 0x7cc   :  { %v12536_v58 = vpack.c.bf16 %v7592_v60, %v7589_v15  ;;  %v19842_v23 = vpop.permute.xlu1 %13770  ;;  %v7595_v19 = vsel %vm7581_vm8, %v13757_v7, %v13758_v30 }
 0x7cd   :  { %v13766_v16 = vpop.permute.xlu0 %13765  ;;  %v13773_v12 = vunpack.i.h.bf16 %v19842_v23  ;;  %v13772_v20 = vunpack.i.l.bf16 %v19842_v23 }
 0x7ce   :  { %v13768_v6 = vunpack.i.h.bf16 %v13766_v16  ;;  %v13767_v17 = vunpack.i.l.bf16 %v13766_v16  ;;  %12537 = vmatprep.subr.bf16.mxu1 %v12536_v58 }
 0x7cf   :  { %v7598_v38 = vsel %vm7581_vm8, %v13772_v20, %v13773_v12 }
 0x7d0   :  { %v7591_v9 = vsel %vm7581_vm8, %v13768_v6, %v13762_v44  ;;  %v7588_v61 = vsel %vm7581_vm8, %v13767_v17, %v13752_v42  ;;  %v13781_v28 = vpop.permute.xlu1 %13780  ;;  %v12540_v14 = vpack.c.bf16 %v7598_v38, %v7595_v19 }
 0x7d1   :  { %v12538_v32 = vpack.c.bf16 %v7591_v9, %v7588_v61  ;;  %v13783_v15 = vunpack.i.h.bf16 %v13781_v28  ;;  %v13782_v60 = vunpack.i.l.bf16 %v13781_v28  ;;  %v13776_v49 = vpop.permute.xlu0 %13775 }
 0x7d2   :  { %v13778_v16 = vunpack.i.h.bf16 %v13776_v49  ;;  %v13777_v58 = vunpack.i.l.bf16 %v13776_v49 }
 0x7d3   :  { %12539 = vmatpush1.bf16.msra.mxu1 %v12538_v32  ;;  %v7951_v42 = vsel %vm169_vm0, %v19708_v36, %v13783_v15  ;;  %v7950_v44 = vsel %vm169_vm0, %v19696_v11, %v13782_v60 }
 0x7d4   :  { %12541 = vmatprep.subr.bf16.mxu1 %v12540_v14  ;;  %v13869_v6 = vpack.i.bf16 %v13783_v15, %v7951_v42  ;;  %v13859_v17 = vpack.i.bf16 %v13782_v60, %v7950_v44  ;;  %v7597_v9 = vsel %vm7581_vm8, %v13778_v16, %v13772_v20  ;;  %v7594_v61 = vsel %vm7581_vm8, %v13777_v58, %v13757_v7  ;;  %v13786_v5 = vpop.permute.xlu1 %13785  ;;  %v7459_v58 = vld [vmem:[%s20736_s3 + $0x10] sm:$0xff] }
 0x7d5   :  { %v13788_v28 = vunpack.i.h.bf16 %v13786_v5  ;;  %v13787_v48 = vunpack.i.l.bf16 %v13786_v5  ;;  %v13791_v38 = vpop.permute.xlu0 %13790  ;;  %v12542_v19 = vpack.c.bf16 %v7597_v9, %v7594_v61 }
 0x7d6   :  { %v13793_v49 = vunpack.i.h.bf16 %v13791_v38  ;;  %v13792_v32 = vunpack.i.l.bf16 %v13791_v38  ;;  %13870 = vrot.lane.b32.xlu1 %v13869_v6, %s15283_s26  ;;  %13860 = vrot.lane.b32.xlu0 %v13859_v17, %s15283_s26 }
 0x7d7   :  { %v7957_v14 = vsel %vm280_vm1, %v19741_v2, %v13788_v28  ;;  %v7956_v15 = vsel %vm280_vm1, %v19717_v18, %v13787_v48  ;;  %12543 = vmatpush1.bf16.msra.mxu1 %v12542_v19  ;;  %v21042_v18 = vpack.c.bf16 %v19724_v62, %v19706_v57 }
 0x7d8   :  { %v13874_v20 = vpack.i.bf16 %v13788_v28, %v7957_v14  ;;  %v13864_v7 = vpack.i.bf16 %v13787_v48, %v7956_v15  ;;  %v7587_v5 = vsel %vm7581_vm8, %v13748_v27, %v13793_v49  ;;  %v7584_v60 = vsel %vm7581_vm8, %v13738_v37, %v13792_v32  ;;  %v13796_v16 = vpop.permute.xlu1 %13795  ;;  %v7464_v27 = vld [vmem:[%s20737_s4 + $0x8] sm:$0xff]  ;;  %v7463_v28 = vld [vmem:[%s20737_s4] sm:$0xff] }
 0x7d9   :  { %v13798_v42 = vunpack.i.h.bf16 %v13796_v16  ;;  %v13797_v44 = vunpack.i.l.bf16 %v13796_v16  ;;  %v13801_v6 = vpop.permute.xlu0 %13800  ;;  %v12544_v17 = vpack.c.bf16 %v13793_v49, %v13792_v32  ;;  %v12546_v9 = vpack.c.bf16 %v7587_v5, %v7584_v60 }
 0x7da   :  { %v13803_v61 = vunpack.i.h.bf16 %v13801_v6  ;;  %13875 = vrot.lane.b32.xlu1 %v13874_v20, %s15283_s26  ;;  %13865 = vrot.lane.b32.xlu0 %v13864_v7, %s15283_s26  ;;  %v13802_v37 = vunpack.i.l.bf16 %v13801_v6  ;;  %v21043_v7 = vpack.c.bf16 %v19752_v63, %v19739_v52 }
 0x7db   :  { %v7593_v48 = vsel %vm7581_vm8, %v13763_v1, %v13798_v42  ;;  %v7590_v53 = vsel %vm7581_vm8, %v13753_v43, %v13797_v44  ;;  %12545 = vmatprep.subr.bf16.mxu1 %v12544_v17  ;;  %11579 = vmatmul.mubr.msk.f32.vlgmr.msra.gmra.mrb[32].mxu1 %vm698_vm3, %v7459_v58  ;;  %v12548_v50 = vpack.c.bf16 %v13798_v42, %v13797_v44 }
 0x7dc   :  { %12547 = vmatpush1.bf16.msra.mxu1 %v12546_v9  ;;  %v12550_v38 = vpack.c.bf16 %v7593_v48, %v7590_v53  ;;  %7700 = vmatprep.mubr.f32.mxu1 %v20918_v8  ;;  %v7599_v43 = vsel %vm7581_vm8, %v13773_v12, %v13803_v61  ;;  %v7596_v1 = vsel %vm7581_vm8, %v13758_v30, %v13802_v37  ;;  %v19898_v19 = vpop.permute.xlu1 %13805 }
 0x7dd   :  { %12549 = vmatprep.subr.bf16.mxu1 %v12548_v50  ;;  %v12552_v49 = vpack.c.bf16 %v13803_v61, %v13802_v37  ;;  %v12554_v32 = vpack.c.bf16 %v7599_v43, %v7596_v1  ;;  %v19905_v23 = vpop.permute.xlu0 %13810  ;;  %v13808_v56 = vunpack.i.h.bf16 %v19898_v19 }
 0x7de   :  { %8242 = vperm.xlu1 %13483, %v7464_v27   ;;  %8237 = vperm.xlu0 %13482, %v7463_v28   ;;  %v13812_v22 = vunpack.i.l.bf16 %v19905_v23 }
 0x7df   :  { %11580 = vmatmul.mubr.msk.f32.gmra.mrb[34].mxu1 %vm698_vm3, %v7460_v46 }
 0x7e0   :  { %12551 = vmatpush1.bf16.msra.mxu1 %v12550_v38  ;;  %7771 = vmatprep.mubr.f32.mxu1 %v20918_v8  ;;  %v13816_v14 = vpop.permute.xlu1 %13815 }
 0x7e1   :  { %12553 = vmatprep.subr.bf16.mxu1 %v12552_v49  ;;  %v19922_v3 = vpop.permute.xlu0 %13820  ;;  %v13818_v0 = vunpack.i.h.bf16 %v13816_v14  ;;  %v13817_v35 = vunpack.i.l.bf16 %v13816_v14  ;;  %v7461_v14 = vld [vmem:[%s20736_s3 + $0x20] sm:$0xff] }
 0x7e2   :  { %v13823_v10 = vunpack.i.h.bf16 %v19922_v3 }
 0x7e4   :  { %12555 = vmatpush1.bf16.msra.mxu1 %v12554_v32  ;;  %v19915_v55 = vpop.permute.xlu1 %13825 }
 0x7e5   :  { %12557 = vmatprep.subr.bf16.mxu1 %v12556_v24  ;;  %v13807_v24 = vunpack.i.l.bf16 %v19898_v19  ;;  %v13831_v54 = vpop.permute.xlu0 %13830  ;;  %v13828_v36 = vunpack.i.h.bf16 %v19915_v55 }
 0x7e6   :  { %v13832_v25 = vunpack.i.l.bf16 %v13831_v54  ;;  %v13833_v30 = vunpack.i.h.bf16 %v13831_v54 }
 0x7e7   :  { %11581 = vmatmul.mubr.msk.f32.vlgmr.msra.gmra.mrb[36].mxu1 %vm698_vm3, %v7459_v58 }
 0x7e8   :  { %12559 = vmatpush1.bf16.msra.mxu1 %v12558_v39  ;;  %7777 = vmatprep.mubr.f32.mxu1 %v20918_v8  ;;  %v19933_v33 = vpop.permute.xlu1 %13835  ;;  %v13813_v39 = vunpack.i.h.bf16 %v19905_v23  ;;  %v7462_v23 = vld [vmem:[%s20736_s3 + $0x28] sm:$0xff] }
 0x7e9   :  { %12561 = vmatprep.subr.bf16.mxu1 %v12560_v51  ;;  %v19967_v2 = vpop.permute.xlu0 %13840  ;;  %v13822_v51 = vunpack.i.l.bf16 %v19922_v3  ;;  %v13838_v62 = vunpack.i.h.bf16 %v19933_v33  ;;  %v13837_v12 = vunpack.i.l.bf16 %v19933_v33 }
 0x7ea   :  { %v8024_v11 = vsel %vm8018_vm9, %v13812_v22, %v13813_v39  ;;  %v13843_v15 = vunpack.i.h.bf16 %v19967_v2  ;;  %v13842_v20 = vunpack.i.l.bf16 %v19967_v2 }
 0x7eb   :  { %11582 = vmatmul.mubr.msk.f32.gmra.mrb[38].mxu1 %vm698_vm3, %v7460_v46  ;;  %v8027_v60 = vsel %vm8018_vm9, %v13832_v25, %v13822_v51  ;;  %v8028_v58 = vsel %vm8018_vm9, %v13822_v51, %v13823_v10  ;;  %v8036_v63 = vsel %vm8018_vm9, %v13837_v12, %v13838_v62 }
 0x7ec   :  { %12563 = vmatpush1.bf16.msra.mxu1 %v12562_v59  ;;  %7854 = vmatprep.mubr.f32.mxu1 %v20918_v8  ;;  %v13827_v59 = vunpack.i.l.bf16 %v19915_v55  ;;  %v13846_v41 = vpop.permute.xlu1 %13845  ;;  %v8040_v48 = vsel %vm8018_vm9, %v13842_v20, %v13843_v15 }
 0x7ed   :  { %12565 = vmatprep.subr.bf16.mxu1 %v12564_v29  ;;  %v8023_v29 = vsel %vm8018_vm9, %v13818_v0, %v13812_v22  ;;  %v13848_v44 = vunpack.i.h.bf16 %v13846_v41  ;;  %v13847_v6 = vunpack.i.l.bf16 %v13846_v41  ;;  %v13851_v17 = vpop.permute.xlu0 %13850  ;;  %v12588_v38 = vpack.c.bf16 %v8040_v48, %v8036_v63 }
 0x7ee   :  { %v8032_v57 = vsel %vm8018_vm9, %v13827_v59, %v13828_v36  ;;  %v8031_v42 = vsel %vm8018_vm9, %v13833_v30, %v13827_v59  ;;  %v13853_v53 = vunpack.i.h.bf16 %v13851_v17  ;;  %v13852_v37 = vunpack.i.l.bf16 %v13851_v17 }
 0x7ef   :  { %v12584_v9 = vpack.c.bf16 %v8032_v57, %v8028_v58  ;;  %v12586_v50 = vpack.c.bf16 %v8031_v42, %v8027_v60  ;;  %v8039_v27 = vsel %vm8018_vm9, %v13848_v44, %v13842_v20  ;;  %v8035_v28 = vsel %vm8018_vm9, %v13847_v6, %v13837_v12 }
 0x7f0   :  { %12567 = vmatpush1.bf16.msra.mxu1 %v12566_v45  ;;  %v8019_v45 = vsel %vm8018_vm9, %v13817_v35, %v13807_v24  ;;  %v13856_v5 = vpop.permute.xlu1 %13855  ;;  %v12590_v43 = vpack.c.bf16 %v8039_v27, %v8035_v28  ;;  %v8022_v1 = vsel %vm8018_vm9, %v13852_v37, %v13853_v53 }
 0x7f1   :  { %12569 = vmatprep.subr.bf16.mxu1 %v12568_v40  ;;  %v8020_v40 = vsel %vm8018_vm9, %v13807_v24, %v13808_v56  ;;  %v12582_v16 = vpack.c.bf16 %v8023_v29, %v8019_v45  ;;  %v13858_v61 = vunpack.i.h.bf16 %v13856_v5  ;;  %v13857_v52 = vunpack.i.l.bf16 %v13856_v5 }
 0x7f2   :  { %v12580_v34 = vpack.c.bf16 %v8024_v11, %v8020_v40 }
 0x7f3   :  { %11583 = vmatmul.mubr.msk.f32.vlgmr.msra.gmra.mrb[32].mxu1 %vm698_vm3, %v7457_v31  ;;  %v8026_v46 = vsel %vm8018_vm9, %v13857_v52, %v13858_v61  ;;  %v8025_v49 = vsel %vm8018_vm9, %v13813_v39, %v13857_v52 }
 0x7f4   :  { %12571 = vmatpush1.bf16.msra.mxu1 %v21041_v13  ;;  %7860 = vmatprep.mubr.f32.mxu1 %v20918_v8  ;;  %v12592_v32 = vpack.c.bf16 %v8026_v46, %v8022_v1  ;;  %v14998_v1 = vld [vmem:[%s20739_s6 + $0x4] ss:$8 sps:$4 sm:$0xff]  }
 0x7f5   :  { %12573 = vmatprep.subr.bf16.mxu1 %v12572_v26  ;;  %8688 = vmatprep.subr.bf16.mxu0 %v14998_v1 }
 0x7f7   :  { %11584 = vmatmul.mubr.msk.f32.gmra.mrb[34].mxu1 %vm698_vm3, %v7458_v47 }
 0x7f8   :  { %12575 = vmatpush1.bf16.msra.mxu1 %v21042_v18  ;;  %7931 = vmatprep.mubr.f32.mxu1 %v20918_v8 }
 0x7f9   :  { %12577 = vmatprep.subr.bf16.mxu1 %v12576_v4 }
 0x7fc   :  { %12579 = vmatpush1.bf16.msra.mxu1 %v21043_v7 }
 0x7fd   :  { %12581 = vmatprep.subr.bf16.mxu1 %v12580_v34 }
 0x7ff   :  { %11585 = vmatmul.mubr.msk.f32.vlgmr.msra.gmra.mrb[36].mxu1 %vm698_vm3, %v7457_v31  ;;  %v8021_v31 = vsel %vm8018_vm9, %v13808_v56, %v13852_v37 }
 0x800   :  { %12583 = vmatpush1.bf16.msra.mxu1 %v12582_v16  ;;  %7937 = vmatprep.mubr.f32.mxu1 %v20918_v8  ;;  %v12594_v24 = vpack.c.bf16 %v8025_v49, %v8021_v31  ;;  %v15001_v49 = vld [vmem:[%s20739_s6 + $0x14] ss:$8 sps:$4 sm:$0xff]   ;;  %v15002_v31 = vld [vmem:[%s20739_s6 + $0x20] ss:$8 sps:$4 sm:$0xff]  }
 0x801   :  { %12585 = vmatprep.subr.bf16.mxu1 %v12584_v9 }
 0x803   :  { %11586 = vmatmul.mubr.msk.f32.gmra.mrb[38].mxu1 %vm698_vm3, %v7458_v47 }
 0x804   :  { %12587 = vmatpush1.bf16.msra.mxu1 %v12586_v50  ;;  %8137 = vmatprep.mubr.f32.mxu1 %v20918_v8 }
 0x805   :  { %12589 = vmatprep.subr.bf16.mxu1 %v12588_v38 }
 0x808   :  { %12591 = vmatpush1.bf16.msra.mxu1 %v12590_v43  ;;  %v14996_v43 = vld [vmem:[%s20739_s6] ss:$8 sps:$4 sm:$0xff]  }
 0x809   :  { %12593 = vmatprep.subr.bf16.mxu1 %v12592_v32  ;;  %8689 = vmatpush1.bf16.msra.mxu0 %v14996_v43  ;;  %v14999_v32 = vld [vmem:[%s20739_s6 + $0x10] ss:$8 sps:$4 sm:$0xff]   ;;  %v15046_v43 = vld [vmem:[%s20739_s6 + $0x104] ss:$8 sps:$4 sm:$0xff]  }
 0x80a   :  { %8690 = vmatprep.subr.bf16.mxu0 %v15001_v49 }
 0x80b   :  { %11587 = vmatmul.mubr.msk.f32.vlgmr.msra.gmra.mrb[32].mxu1 %vm698_vm3, %v7461_v14 }
 0x80c   :  { %12595 = vmatpush1.bf16.msra.mxu1 %v12594_v24  ;;  %8143 = vmatprep.mubr.f32.mxu1 %v20918_v8  ;;  %v15007_v24 = vld [vmem:[%s20739_s6 + $0x34] ss:$8 sps:$4 sm:$0xff]  }
 0x80d   :  { %8691 = vmatpush1.bf16.msra.mxu0 %v14999_v32 }
 0x80f   :  { %11588 = vmatmul.mubr.msk.f32.gmra.mrb[34].mxu1 %vm698_vm3, %v7462_v23 }
 0x810   :  { %8214 = vmatprep.mubr.f32.mxu1 %v20918_v8 }
 0x848   :  { %v13871_v39 = vpop.permute.xlu1 %13870  ;;  %v13861_v22 = vpop.permute.xlu0 %13860 }
 0x849   :  { %v13873_v19 = vunpack.i.h.bf16 %v13871_v39  ;;  %v13872_v54 = vunpack.i.l.bf16 %v13871_v39  ;;  %v13863_v56 = vunpack.i.h.bf16 %v13861_v22  ;;  %v13862_v26 = vunpack.i.l.bf16 %v13861_v22  ;;  %v15010_v39 = vld [vmem:[%s20739_s6 + $0x44] ss:$8 sps:$4 sm:$0xff]   ;;  %v15008_v22 = vld [vmem:[%s20739_s6 + $0x40] ss:$8 sps:$4 sm:$0xff]  }
 0x84b   :  { %v8033_v13 = vsel %vm8018_vm9, %v13828_v36, %v13872_v54  ;;  %v8029_v47 = vsel %vm8018_vm9, %v13823_v10, %v13862_v26  ;;  %v8030_v4 = vsel %vm8018_vm9, %v13862_v26, %v13863_v56  ;;  %v8034_v40 = vsel %vm8018_vm9, %v13872_v54, %v13873_v19  ;;  %v15013_v19 = vld [vmem:[%s20739_s6 + $0x54] ss:$8 sps:$4 sm:$0xff]   ;;  %v15011_v54 = vld [vmem:[%s20739_s6 + $0x50] ss:$8 sps:$4 sm:$0xff]   ;;  %v15016_v56 = vld [vmem:[%s20739_s6 + $0x64] ss:$8 sps:$4 sm:$0xff]  }
 0x84c   :  { %v12598_v11 = vpack.c.bf16 %v8033_v13, %v8029_v47  ;;  %v13876_v0 = vpop.permute.xlu1 %13875  ;;  %v13866_v35 = vpop.permute.xlu0 %13865  ;;  %v12596_v59 = vpack.c.bf16 %v8034_v40, %v8030_v4  ;;  %v15014_v26 = vld [vmem:[%s20739_s6 + $0x60] ss:$8 sps:$4 sm:$0xff]   ;;  %v15019_v13 = vld [vmem:[%s20739_s6 + $0x74] ss:$8 sps:$4 sm:$0xff]   ;;  %v15017_v47 = vld [vmem:[%s20739_s6 + $0x70] ss:$8 sps:$4 sm:$0xff]  }
 0x84d   :  { %v13878_v41 = vunpack.i.h.bf16 %v13876_v0  ;;  %v13877_v18 = vunpack.i.l.bf16 %v13876_v0  ;;  %v13868_v51 = vunpack.i.h.bf16 %v13866_v35  ;;  %v13867_v25 = vunpack.i.l.bf16 %v13866_v35  ;;  %v15022_v4 = vld [vmem:[%s20739_s6 + $0x84] ss:$8 sps:$4 sm:$0xff]   ;;  %v15020_v40 = vld [vmem:[%s20739_s6 + $0x80] ss:$8 sps:$4 sm:$0xff]   ;;  %v15023_v0 = vld [vmem:[%s20739_s6 + $0x90] ss:$8 sps:$4 sm:$0xff]  }
 0x84e   :  { %12597 = vmatprep.subr.bf16.mxu1 %v12596_v59  ;;  %v15028_v35 = vld [vmem:[%s20739_s6 + $0xa4] ss:$8 sps:$4 sm:$0xff]   ;;  %v15026_v59 = vld [vmem:[%s20739_s6 + $0xa0] ss:$8 sps:$4 sm:$0xff]  }
 0x84f   :  { %v8041_v55 = vsel %vm8018_vm9, %v13843_v15, %v13877_v18  ;;  %v8037_v3 = vsel %vm8018_vm9, %v13838_v62, %v13867_v25  ;;  %12599 = vmatpush1.bf16.msra.mxu1 %v12598_v11  ;;  %v8038_v36 = vsel %vm8018_vm9, %v13867_v25, %v13868_v51  ;;  %v8042_v10 = vsel %vm8018_vm9, %v13877_v18, %v13878_v41  ;;  %v15025_v11 = vld [vmem:[%s20739_s6 + $0x94] ss:$8 sps:$4 sm:$0xff]   ;;  %v15029_v18 = vld [vmem:[%s20739_s6 + $0xb0] ss:$8 sps:$4 sm:$0xff]   ;;  %v15034_v51 = vld [vmem:[%s20739_s6 + $0xc4] ss:$8 sps:$4 sm:$0xff]  }
 0x850   :  { %v12602_v34 = vpack.c.bf16 %v8041_v55, %v8037_v3  ;;  %v12600_v29 = vpack.c.bf16 %v8042_v10, %v8038_v36  ;;  %v15031_v41 = vld [vmem:[%s20739_s6 + $0xb4] ss:$8 sps:$4 sm:$0xff]   ;;  %v15032_v25 = vld [vmem:[%s20739_s6 + $0xc0] ss:$8 sps:$4 sm:$0xff]   ;;  %v15035_v3 = vld [vmem:[%s20739_s6 + $0xd0] ss:$8 sps:$4 sm:$0xff]  }
 0x851   :  { %v15037_v55 = vld [vmem:[%s20739_s6 + $0xd4] ss:$8 sps:$4 sm:$0xff]   ;;  %v15038_v36 = vld [vmem:[%s20739_s6 + $0xe0] ss:$8 sps:$4 sm:$0xff]   ;;  %v15040_v10 = vld [vmem:[%s20739_s6 + $0xe4] ss:$8 sps:$4 sm:$0xff]  }
 0x852   :  { %12601 = vmatprep.subr.bf16.mxu1 %v12600_v29 }
 0x853   :  { %12603 = vmatpush1.bf16.msra.mxu1 %v12602_v34 }
 0x856   :  { %11589 = vmatmul.mubr.msk.f32.vlgmr.msra.gmra.mrb[36].mxu1 %vm698_vm3, %v7461_v14  ;;  %v15004_v14 = vld [vmem:[%s20739_s6 + $0x24] ss:$8 sps:$4 sm:$0xff]  }
 0x857   :  { %8220 = vmatprep.mubr.f32.mxu1 %v20918_v8  ;;  %8692 = vmatprep.subr.bf16.mxu0 %v15004_v14 }
 0x858   :  { %8693 = vmatpush1.bf16.msra.mxu0 %v15002_v31 }
 0x859   :  { %8694 = vmatprep.subr.bf16.mxu0 %v15007_v24 }
 0x85a   :  { %11590 = vmatmul.mubr.msk.f32.gmra.mrb[38].mxu1 %vm698_vm3, %v7462_v23  ;;  %v15005_v23 = vld [vmem:[%s20739_s6 + $0x30] ss:$8 sps:$4 sm:$0xff]  }
 0x85c   :  { %8695 = vmatpush1.bf16.msra.mxu0 %v15005_v23 }
 0x85d   :  { %v8238_v57 = vpop.permute.xlu0 %8237  ;;  %v8243_v62 = vpop.permute.xlu1 %8242  ;;  %8696 = vmatprep.subr.bf16.mxu0 %v15010_v39 }
 0x860   :  { %8697 = vmatpush1.bf16.msra.mxu0 %v15008_v22 }
 0x861   :  { %8698 = vmatprep.subr.bf16.mxu0 %v15013_v19 }
 0x864   :  { %8699 = vmatpush1.bf16.msra.mxu0 %v15011_v54 }
 0x865   :  { %8700 = vmatprep.subr.bf16.mxu0 %v15016_v56 }
 0x868   :  { %8701 = vmatpush1.bf16.msra.mxu0 %v15014_v26 }
 0x869   :  { %8702 = vmatprep.subr.bf16.mxu0 %v15019_v13 }
 0x86c   :  { %8703 = vmatpush1.bf16.msra.mxu0 %v15017_v47 }
 0x86d   :  { %8704 = vmatprep.subr.bf16.mxu0 %v15022_v4 }
 0x870   :  { %8705 = vmatpush1.bf16.msra.mxu0 %v15020_v40 }
 0x871   :  { %8706 = vmatprep.subr.bf16.mxu0 %v15025_v11 }
 0x874   :  { %8707 = vmatpush1.bf16.msra.mxu0 %v15023_v0 }
 0x875   :  { %8708 = vmatprep.subr.bf16.mxu0 %v15028_v35 }
 0x878   :  { %8709 = vmatpush1.bf16.msra.mxu0 %v15026_v59 }
 0x879   :  { %8710 = vmatprep.subr.bf16.mxu0 %v15031_v41  ;;  %v15044_v41 = vld [vmem:[%s20739_s6 + $0x100] ss:$8 sps:$4 sm:$0xff]  }
 0x87c   :  { %8711 = vmatpush1.bf16.msra.mxu0 %v15029_v18 }
 0x87d   :  { %8712 = vmatprep.subr.bf16.mxu0 %v15034_v51 }
 0x880   :  { %8713 = vmatpush1.bf16.msra.mxu0 %v15032_v25 }
 0x881   :  { %8714 = vmatprep.subr.bf16.mxu0 %v15037_v55  ;;  %v15049_v55 = vld [vmem:[%s20739_s6 + $0x114] ss:$8 sps:$4 sm:$0xff]  }
 0x884   :  { %8715 = vmatpush1.bf16.msra.mxu0 %v15035_v3 }
 0x885   :  { %8716 = vmatprep.subr.bf16.mxu0 %v15040_v10  ;;  %v15052_v10 = vld [vmem:[%s20739_s6 + $0x124] ss:$8 sps:$4 sm:$0xff]  }
 0x888   :  { %8717 = vmatpush1.bf16.msra.mxu0 %v15038_v36  ;;  %v15047_v36 = vld [vmem:[%s20739_s6 + $0x110] ss:$8 sps:$4 sm:$0xff]  }
 0x8de   :  { %v8139_v2 = vpop.f32.mrb[32].mxu1 }
 0x8df   :  { %v8141_v45 = vpop.f32.mrb[33].mxu1  ;;  %v8245_v7 = vadd.f32 %v8238_v57, %v8139_v2 }
 0x8e0   :  { %v8246_v12 = vadd.f32 %v8238_v57, %v8141_v45 }
 0x8e2   :  { %v8145_v33 = vpop.f32.mrb[34].mxu1  ;;  %15165 = vtanh.f32 %v8246_v12  ;;  %v15041_v12 = vld [vmem:[%s20739_s6 + $0xf0] ss:$8 sps:$4 sm:$0xff]  }
 0x8e3   :  { %v8147_v30 = vpop.f32.mrb[35].mxu1  ;;  %v8249_v16 = vadd.f32 %v8243_v62, %v8145_v33 }
 0x8e4   :  { %v8250_v15 = vadd.f32 %v8243_v62, %v8147_v30 }
 0x8e6   :  { %15167 = vtanh.f32 %v8250_v15  ;;  %v15043_v15 = vld [vmem:[%s20739_s6 + $0xf4] ss:$8 sps:$4 sm:$0xff]  }
 0x8e7   :  { %8718 = vmatprep.subr.bf16.mxu0 %v15043_v15  ;;  %v15067_v15 = vld [vmem:[%s20739_s6 + $0x174] ss:$8 sps:$4 sm:$0xff]  }
 0x8e8   :  { %8719 = vmatpush1.bf16.msra.mxu0 %v15041_v12  ;;  %v15062_v12 = vld [vmem:[%s20739_s6 + $0x160] ss:$8 sps:$4 sm:$0xff]  }
 0x8e9   :  { %8731 = vmatprep.subr.bf16.mxu0 %v15046_v43 }
 0x8ec   :  { %v20037_v9 = vpop.eup %15165 }
 0x8f0   :  { %v20039_v61 = vpop.eup %15167 }
 0x929   :  { %v8216_v20 = vpop.f32.mrb[36].mxu1 }
 0x92a   :  { %v8247_v5 = vadd.f32 %v8238_v57, %v8216_v20  ;;  %v8218_v60 = vpop.f32.mrb[37].mxu1 }
 0x92b   :  { %v8248_v58 = vadd.f32 %v8238_v57, %v8218_v60 }
 0x92c   :  { %15169 = vtanh.f32 %v8247_v5 }
 0x92d   :  { %15171 = vtanh.f32 %v8248_v58  ;;  %v8222_v42 = vpop.f32.mrb[38].mxu1 }
 0x92e   :  { %15173 = vtanh.f32 %v8245_v7  ;;  %v8251_v44 = vadd.f32 %v8243_v62, %v8222_v42  ;;  %v8224_v6 = vpop.f32.mrb[39].mxu1 }
 0x92f   :  { %15175 = vtanh.f32 %v8249_v16  ;;  %v8252_v17 = vadd.f32 %v8243_v62, %v8224_v6 }
 0x930   :  { %15177 = vtanh.f32 %v8251_v44 }
 0x931   :  { %15179 = vtanh.f32 %v8252_v17 }
 0x936   :  { %v20041_v52 = vpop.eup %15169 }
 0x937   :  { %v20043_v63 = vpop.eup %15171  ;;  %v13879_v48 = vpack.i.bf16 %v20041_v52, %v20037_v9 }
 0x938   :  { %v20047_v53 = vpop.eup %15173  ;;  %v13884_v37 = vpack.i.bf16 %v20039_v61, %v20043_v63 }
 0x939   :  { %v20051_v50 = vpop.eup %15175  ;;  %13880 = vrot.lane.b32.xlu0 %v13879_v48, %s15275_s20 }
 0x93a   :  { %v20054_v27 = vpop.eup %15177  ;;  %13885 = vrot.lane.b32.xlu1 %v13884_v37, %s15275_s20  ;;  %v13894_v38 = vpack.i.bf16 %v20051_v50, %v20047_v53 }
 0x93b   :  { %v20057_v28 = vpop.eup %15179 }
 0x93c   :  { %v13889_v46 = vpack.i.bf16 %v20057_v28, %v20054_v27 }
 0x93e   :  { %13895 = vrot.lane.b32.xlu1 %v13894_v38, %s15275_s20  ;;  %13890 = vrot.lane.b32.xlu0 %v13889_v46, %s15275_s20 }
 0x9ab   :  { %v13881_v34 = vpop.permute.xlu0 %13880 }
 0x9ac   :  { %v13883_v29 = vunpack.i.h.bf16 %v13881_v34  ;;  %v13882_v2 = vunpack.i.l.bf16 %v13881_v34  ;;  %v13886_v45 = vpop.permute.xlu1 %13885  ;;  %v15050_v34 = vld [vmem:[%s20739_s6 + $0x120] ss:$8 sps:$4 sm:$0xff]  }
 0x9ad   :  { %v13887_v33 = vunpack.i.l.bf16 %v13886_v45  ;;  %v13888_v20 = vunpack.i.h.bf16 %v13886_v45  ;;  %v15058_v45 = vld [vmem:[%s20739_s6 + $0x144] ss:$8 sps:$4 sm:$0xff]  }
 0x9ae   :  { %v8286_v30 = vsel %vm169_vm0, %v13882_v2, %v13883_v29 }
 0x9af   :  { %v8300_v57 = vmax.f32 %v20037_v9, %v8286_v30  ;;  %v8287_v62 = vsel %vm169_vm0, %v13883_v29, %v13887_v33  ;;  %v15055_v29 = vld [vmem:[%s20739_s6 + $0x134] ss:$8 sps:$4 sm:$0xff]  }
 0x9b0   :  { %v20165_v7 = vmax.f32 %v20041_v52, %v8287_v62  ;;  %v13896_v5 = vpop.permute.xlu1 %13895  ;;  %v13891_v60 = vpop.permute.xlu0 %13890  ;;  %v15061_v30 = vld [vmem:[%s20739_s6 + $0x154] ss:$8 sps:$4 sm:$0xff]   ;;  %v15064_v62 = vld [vmem:[%s20739_s6 + $0x164] ss:$8 sps:$4 sm:$0xff]  }
 0x9b1   :  { %v13898_v16 = vunpack.i.h.bf16 %v13896_v5  ;;  %v13897_v58 = vunpack.i.l.bf16 %v13896_v5  ;;  %v13893_v42 = vunpack.i.h.bf16 %v13891_v60  ;;  %v13892_v44 = vunpack.i.l.bf16 %v13891_v60  ;;  %v15070_v5 = vld [vmem:[%s20739_s6 + $0x184] ss:$8 sps:$4 sm:$0xff]  }
 0x9b2   :  { %v13899_v6 = vpack.i.bf16 %v20165_v7, %v8300_v57  ;;  %v8409_v60 = vld [vmem:[%s20739_s6 + $0x1a0] sm:$0x11] }
 0x9b3   :  { %v8285_v17 = vsel %vm169_vm0, %v13897_v58, %v13882_v2  ;;  %v8288_v9 = vsel %vm169_vm0, %v13898_v16, %v13888_v20  ;;  %v8289_v48 = vsel %vm169_vm0, %v13888_v20, %v13892_v44  ;;  %v8290_v38 = vsel %vm169_vm0, %v13892_v44, %v13893_v42  ;;  %v15053_v2 = vld [vmem:[%s20739_s6 + $0x130] ss:$8 sps:$4 sm:$0xff]   ;;  %v15068_v16 = vld [vmem:[%s20739_s6 + $0x180] ss:$8 sps:$4 sm:$0xff]   ;;  %v15073_v58 = vld [vmem:[%s20739_s6 + $0x194] ss:$8 sps:$4 sm:$0xff]  }
 0x9b4   :  { %v8299_v37 = vmax.f32 %v20047_v53, %v8285_v17  ;;  %v8303_v52 = vmax.f32 %v20051_v50, %v8288_v9  ;;  %v8304_v46 = vmax.f32 %v20039_v61, %v8289_v48  ;;  %13900 = vrot.lane.b32.xlu0 %v13899_v6, %s15282_s5  ;;  %v20180_v1 = vmax.f32 %v20054_v27, %v8290_v38  ;;  %v15065_v20 = vld [vmem:[%s20739_s6 + $0x170] ss:$8 sps:$4 sm:$0xff]  }
 0x9b5   :  { %v8306_v32 = vmax.f32 %v20057_v28, %v13893_v42  ;;  %v8302_v50 = vmax.f32 %v20043_v63, %v13887_v33  ;;  %v15056_v33 = vld [vmem:[%s20739_s6 + $0x140] ss:$8 sps:$4 sm:$0xff]   ;;  %v11644_v42 = vcombine.high %v8409_v60, %v8409_v60  ;;  %v20264_v44 = vsel %vm8679_vm11, 65535, %v21040_v21  ;;  %v15071_v6 = vld [vmem:[%s20739_s6 + $0x190] ss:$8 sps:$4 sm:$0xff]  }
 0x9b6   :  { %v13909_v49 = vpack.i.bf16 %v8303_v52, %v8299_v37  ;;  %v13904_v53 = vpack.i.bf16 %v20180_v1, %v8304_v46  ;;  %v11643_v17 = vcombine.low %v8409_v60, %v8409_v60 }
 0x9b7   :  { %v13914_v61 = vpack.i.bf16 %v8306_v32, %v8302_v50  ;;  %v8686_v9 = vand.u32 %v11644_v42, %v20264_v44 }
 0x9b8   :  { %13910 = vrot.lane.b32.xlu0 %v13909_v49, %s15282_s5  ;;  %13905 = vrot.lane.b32.xlu1 %v13904_v53, %s15282_s5 }
 0x9bc   :  { %13915 = vrot.lane.b32.xlu1 %v13914_v61, %s15282_s5 }
 0xa26   :  { %v20188_v14 = vpop.permute.xlu0 %13900 }
 0xa27   :  { %v13903_v27 = vunpack.i.h.bf16 %v20188_v14  ;;  %v13902_v31 = vunpack.i.l.bf16 %v20188_v14 }
 0xa29   :  { %v8332_v63 = vsel %vm7581_vm8, %v13902_v31, %v13903_v27 }
 0xa2a   :  { %v13911_v24 = vpop.permute.xlu0 %13910  ;;  %v20192_v39 = vpop.permute.xlu1 %13905  ;;  %v8346_v40 = vmax.f32 %v8300_v57, %v8332_v63  ;;  %v15059_v57 = vld [vmem:[%s20739_s6 + $0x150] ss:$8 sps:$4 sm:$0xff]  }
 0xa2b   :  { %v13913_v23 = vunpack.i.h.bf16 %v13911_v24  ;;  %v13912_v28 = vunpack.i.l.bf16 %v13911_v24  ;;  %v13908_v22 = vunpack.i.h.bf16 %v20192_v39  ;;  %v13907_v19 = vunpack.i.l.bf16 %v20192_v39 }
 0xa2d   :  { %v8331_v54 = vsel %vm7581_vm8, %v13912_v28, %v13902_v31  ;;  %v8334_v26 = vsel %vm7581_vm8, %v13913_v23, %v13907_v19  ;;  %v8335_v13 = vsel %vm7581_vm8, %v13907_v19, %v13908_v22 }
 0xa2e   :  { %v8345_v56 = vmax.f32 %v8299_v37, %v8331_v54  ;;  %v8349_v47 = vmax.f32 %v8303_v52, %v8334_v26  ;;  %v13916_v4 = vpop.permute.xlu1 %13915  ;;  %v8350_v11 = vmax.f32 %v8304_v46, %v8335_v13  ;;  %v8683_v52 = vand.u32 %v11643_v17, %v20264_v44 }
 0xa2f   :  { %v13918_v0 = vunpack.i.h.bf16 %v13916_v4  ;;  %v13917_v35 = vunpack.i.l.bf16 %v13916_v4 }
 0xa30   :  { %v8354_v59 = vpack.c.bf16 %v8350_v11, %v8346_v40  ;;  %v8353_v18 = vpack.c.bf16 %v8349_v47, %v8345_v56 }
 0xa31   :  { %v8352_v51 = vmax.f32 %v8306_v32, %v13918_v0  ;;  %v8348_v25 = vmax.f32 %v8302_v50, %v13917_v35  ;;  %v8333_v48 = vsel %vm7581_vm8, %v13903_v27, %v13917_v35  ;;  %v8336_v37 = vsel %vm7581_vm8, %v13908_v22, %v13918_v0  ;;  %v11648_v35 = vld [vmem:[%s20736_s3 + $0x40] sm:$0xff] }
 0xa32   :  { %8720 = vmatprep.mubr.bf16.mxu0 %v8354_v59  ;;  %v8347_v38 = vmax.f32 %v20165_v7, %v8333_v48  ;;  %v8351_v46 = vmax.f32 %v20180_v1, %v8336_v37  ;;  %12029 = vmatprep.mubr.msk.f32.mxu1 %vm698_vm3, %v11648_v35 }
 0xa33   :  { %v8356_v3 = vpack.c.bf16 %v8352_v51, %v8348_v25  ;;  %8721 = vmatmul.mubr.bf16.vlgmr.msra.gmra.mrb[32].mxu0 %v8353_v18 }
 0xa34   :  { %8732 = vmatpush1.bf16.msra.mxu0 %v15044_v41  ;;  %v8355_v43 = vpack.c.bf16 %v8351_v46, %v8347_v38 }
 0xa35   :  { %11645 = vmatprep.mubr.msk.bf16.mxu0 %vm8675_vm10, %v8356_v3  ;;  %8733 = vmatprep.subr.bf16.mxu0 %v15049_v55 }
 0xa38   :  { %8734 = vmatpush1.bf16.msra.mxu0 %v15047_v36 }
 0xa39   :  { %8735 = vmatprep.subr.bf16.mxu0 %v15052_v10 }
 0xa3c   :  { %8736 = vmatpush1.bf16.msra.mxu0 %v15050_v34 }
 0xa3d   :  { %8737 = vmatprep.subr.bf16.mxu0 %v15055_v29 }
 0xa40   :  { %8738 = vmatpush1.bf16.msra.mxu0 %v15053_v2 }
 0xa41   :  { %8739 = vmatprep.subr.bf16.mxu0 %v15058_v45 }
 0xa44   :  { %8740 = vmatpush1.bf16.msra.mxu0 %v15056_v33 }
 0xa45   :  { %8741 = vmatprep.subr.bf16.mxu0 %v15061_v30  ;;  %v11653_v30 = vld [vmem:[%s20737_s4 + $0x18] sm:$0xff] }
 0xa48   :  { %8742 = vmatpush1.bf16.msra.mxu0 %v15059_v57  ;;  %v11652_v57 = vld [vmem:[%s20737_s4 + $0x10] sm:$0xff] }
 0xa49   :  { %8743 = vmatprep.subr.bf16.mxu0 %v15064_v62 }
 0xa4c   :  { %8744 = vmatpush1.bf16.msra.mxu0 %v15062_v12 }
 0xa4d   :  { %8745 = vmatprep.subr.bf16.mxu0 %v15067_v15 }
 0xa50   :  { %8746 = vmatpush1.bf16.msra.mxu0 %v15065_v20 }
 0xa51   :  { %8747 = vmatprep.subr.bf16.mxu0 %v15070_v5 }
 0xa54   :  { %8748 = vmatpush1.bf16.msra.mxu0 %v15068_v16 }
 0xa55   :  { %8749 = vmatprep.subr.bf16.mxu0 %v15073_v58 }
 0xa58   :  { %8750 = vmatpush1.bf16.msra.mxu0 %v15071_v6 }
 0xa59   :  { %8751 = vmatprep.subr.bf16.mxu0 %v8686_v9 }
 0xa5c   :  { %8752 = vmatpush1.bf16.msra.mxu0 %v8683_v52 }
 0xa5f   :  { %8764 = vmatmul.mubr.bf16.vlgmr.msra.gmra.mrb[32].mxu0 %v8355_v43 }
 0xb32   :  { %v20279_v49 = vpop.f32.mrb[32].mxu0 }
 0xb33   :  { %v20281_v32 = vpop.f32.mrb[33].mxu0 }
 0xb34   :  { %v20283_v53 = vpop.f32.mrb[34].mxu0  ;;  %v13939_v50 = vpack.i.bf16 %v20281_v32, %v20279_v49 }
 0xb35   :  { %v20287_v61 = vpop.f32.mrb[35].mxu0  ;;  %v13919_v7 = vpack.i.bf16 %v20283_v53, %v20279_v49  ;;  %v20293_v1 = vpack.c.bf16 %v20283_v53, %v20279_v49 }
 0xb36   :  { %v13929_v14 = vpack.i.bf16 %v20287_v61, %v20281_v32  ;;  %v13944_v27 = vpack.i.bf16 %v20287_v61, %v20283_v53 }
 0xb37   :  { %13920 = vrot.lane.b32.xlu0 %v13919_v7, %s15275_s20 }
 0xb38   :  { %13930 = vrot.lane.b32.xlu1 %v13929_v14, %s15275_s20 }
 0xb3b   :  { %13925 = vrot.lane.b32.xlu0 %v13919_v7, %s15276_s25 }
 0xb3c   :  { %13935 = vrot.lane.b32.xlu1 %v13929_v14, %s15276_s25  ;;  %v11649_v14 = vld [vmem:[%s20736_s3 + $0x48] sm:$0xff] }
 0xb3f   :  { %13940 = vrot.lane.b32.xlu0 %v13939_v50, %s15280_s23 }
 0xb40   :  { %13945 = vrot.lane.b32.xlu1 %v13944_v27, %s15280_s23 }
 0xba9   :  { %v13921_v31 = vpop.permute.xlu0 %13920 }
 0xbaa   :  { %v13923_v24 = vunpack.i.h.bf16 %v13921_v31  ;;  %v13922_v23 = vunpack.i.l.bf16 %v13921_v31  ;;  %v13931_v28 = vpop.permute.xlu1 %13930 }
 0xbab   :  { %v13933_v39 = vunpack.i.h.bf16 %v13931_v28  ;;  %v13932_v63 = vunpack.i.l.bf16 %v13931_v28 }
 0xbac   :  { %v20305_v22 = vpack.c.bf16 %v13923_v24, %v13922_v23 }
 0xbad   :  { %v8805_v19 = vsel %vm169_vm0, %v13923_v24, %v13933_v39  ;;  %v8804_v54 = vsel %vm169_vm0, %v13922_v23, %v13932_v63  ;;  %v13926_v56 = vpop.permute.xlu0 %13925 }
 0xbae   :  { %v13959_v26 = vpack.i.bf16 %v13933_v39, %v8805_v19  ;;  %v13949_v13 = vpack.i.bf16 %v13932_v63, %v8804_v54  ;;  %v13936_v47 = vpop.permute.xlu1 %13935  ;;  %v13928_v4 = vunpack.i.h.bf16 %v13926_v56  ;;  %v13927_v40 = vunpack.i.l.bf16 %v13926_v56 }
 0xbaf   :  { %v13938_v11 = vunpack.i.h.bf16 %v13936_v47  ;;  %v13937_v0 = vunpack.i.l.bf16 %v13936_v47 }
 0xbb0   :  { %13960 = vrot.lane.b32.xlu1 %v13959_v26, %s15280_s23  ;;  %13950 = vrot.lane.b32.xlu0 %v13949_v13, %s15280_s23  ;;  %v20314_v59 = vpack.c.bf16 %v13928_v4, %v13927_v40 }
 0xbb1   :  { %v8811_v41 = vsel %vm280_vm1, %v13928_v4, %v13938_v11  ;;  %v8810_v18 = vsel %vm280_vm1, %v13927_v40, %v13937_v0  ;;  %v13941_v51 = vpop.permute.xlu0 %13940 }
 0xbb2   :  { %v13964_v25 = vpack.i.bf16 %v13938_v11, %v8811_v41  ;;  %v13954_v55 = vpack.i.bf16 %v13937_v0, %v8810_v18  ;;  %v13946_v3 = vpop.permute.xlu1 %13945  ;;  %v13943_v36 = vunpack.i.h.bf16 %v13941_v51  ;;  %v13942_v10 = vunpack.i.l.bf16 %v13941_v51 }
 0xbb3   :  { %v13948_v34 = vunpack.i.h.bf16 %v13946_v3  ;;  %v13947_v29 = vunpack.i.l.bf16 %v13946_v3 }
 0xbb4   :  { %13965 = vrot.lane.b32.xlu1 %v13964_v25, %s15280_s23  ;;  %13955 = vrot.lane.b32.xlu0 %v13954_v55, %s15280_s23  ;;  %v8836_v2 = vsel %vm1983_vm4, %v13942_v10, %v13943_v36  ;;  %v15078_v10 = vld [vmem:[%s20740_s7 + $0x4] ss:$8 sps:$4 sm:$0xff]  }
 0xbb5   :  { %v8837_v45 = vsel %vm1983_vm4, %v13947_v29, %v13948_v34  ;;  %v11651_v34 = vld [vmem:[%s20736_s3 + $0x58] sm:$0xff]  ;;  %v15076_v29 = vld [vmem:[%s20740_s7] ss:$8 sps:$4 sm:$0xff]  }
 0xbb6   :  { %v12604_v33 = vpack.c.bf16 %v8837_v45, %v8836_v2  ;;  %v15081_v2 = vld [vmem:[%s20740_s7 + $0x14] ss:$8 sps:$4 sm:$0xff]   ;;  %v15079_v45 = vld [vmem:[%s20740_s7 + $0x10] ss:$8 sps:$4 sm:$0xff]  }
 0xbb8   :  { %12605 = vmatprep.subr.bf16.mxu1 %v12604_v33  ;;  %13975 = vrot.lane.b32.xlu1 %v13944_v27, %s15284_s14  ;;  %v11646_v27 = vld [vmem:[%s20736_s3 + $0x30] sm:$0xff] }
 0xbb9   :  { %13970 = vrot.lane.b32.xlu0 %v13939_v50, %s15284_s14  ;;  %12607 = vmatpush3.bf16.msra.mxu1 %v12604_v33  ;;  %v15084_v33 = vld [vmem:[%s20740_s7 + $0x24] ss:$8 sps:$4 sm:$0xff]  }
 0xbbc   :  { %13990 = vrot.lane.b32.xlu1 %v13959_v26, %s15284_s14 }
 0xbbd   :  { %13980 = vrot.lane.b32.xlu0 %v13949_v13, %s15284_s14 }
 0xbc0   :  { %13995 = vrot.lane.b32.xlu1 %v13964_v25, %s15284_s14  ;;  %v11650_v25 = vld [vmem:[%s20736_s3 + $0x50] sm:$0xff] }
 0xbc1   :  { %13985 = vrot.lane.b32.xlu0 %v13954_v55, %s15284_s14 }
 0xbc4   :  { %9137 = vperm.xlu1 %13483, %v11653_v30   ;;  %v15082_v30 = vld [vmem:[%s20740_s7 + $0x20] ss:$8 sps:$4 sm:$0xff]  }
 0xbc5   :  { %9132 = vperm.xlu0 %13482, %v11652_v57   ;;  %v15087_v57 = vld [vmem:[%s20740_s7 + $0x34] ss:$8 sps:$4 sm:$0xff]  }
 0xc22   :  { %v13961_v62 = vpop.permute.xlu1 %13960  ;;  %v13951_v12 = vpop.permute.xlu0 %13950 }
 0xc23   :  { %v13963_v15 = vunpack.i.h.bf16 %v13961_v62  ;;  %v13962_v20 = vunpack.i.l.bf16 %v13961_v62  ;;  %v13953_v5 = vunpack.i.h.bf16 %v13951_v12  ;;  %v13952_v60 = vunpack.i.l.bf16 %v13951_v12  ;;  %v15085_v62 = vld [vmem:[%s20740_s7 + $0x30] ss:$8 sps:$4 sm:$0xff]   ;;  %v15088_v12 = vld [vmem:[%s20740_s7 + $0x40] ss:$8 sps:$4 sm:$0xff]  }
 0xc25   :  { %v8838_v16 = vsel %vm1983_vm4, %v13952_v60, %v13953_v5  ;;  %v8839_v58 = vsel %vm1983_vm4, %v13962_v20, %v13963_v15  ;;  %v15090_v15 = vld [vmem:[%s20740_s7 + $0x44] ss:$8 sps:$4 sm:$0xff]   ;;  %v15093_v20 = vld [vmem:[%s20740_s7 + $0x54] ss:$8 sps:$4 sm:$0xff]   ;;  %v15091_v5 = vld [vmem:[%s20740_s7 + $0x50] ss:$8 sps:$4 sm:$0xff]  }
 0xc26   :  { %v13966_v42 = vpop.permute.xlu1 %13965  ;;  %v13956_v6 = vpop.permute.xlu0 %13955  ;;  %v12608_v17 = vpack.c.bf16 %v8839_v58, %v8838_v16  ;;  %v15096_v60 = vld [vmem:[%s20740_s7 + $0x64] ss:$8 sps:$4 sm:$0xff]   ;;  %v9159_v16 = vld [vmem:[%s20740_s7 + $0x70] sm:$0xff]  ;;  %v15094_v58 = vld [vmem:[%s20740_s7 + $0x60] ss:$8 sps:$4 sm:$0xff]  }
 0xc27   :  { %v13968_v9 = vunpack.i.h.bf16 %v13966_v42  ;;  %v13967_v48 = vunpack.i.l.bf16 %v13966_v42  ;;  %v13958_v37 = vunpack.i.h.bf16 %v13956_v6  ;;  %v13957_v52 = vunpack.i.l.bf16 %v13956_v6 }
 0xc28   :  { %12609 = vmatprep.subr.bf16.mxu1 %v12608_v17  ;;  %v11675_v42 = vcombine.high %v9159_v16, %v9159_v16  ;;  %v11674_v6 = vcombine.low %v9159_v16, %v9159_v16 }
 0xc29   :  { %12611 = vmatpush3.bf16.msra.mxu1 %v12608_v17  ;;  %v8840_v38 = vsel %vm1983_vm4, %v13957_v52, %v13958_v37  ;;  %v8841_v46 = vsel %vm1983_vm4, %v13967_v48, %v13968_v9 }
 0xc2a   :  { %v13976_v43 = vpop.permute.xlu1 %13975  ;;  %v12612_v50 = vpack.c.bf16 %v8841_v46, %v8840_v38  ;;  %v9241_v17 = vsel %vm9239_vm13, %v11674_v6, 0 }
 0xc2b   :  { %v13971_v7 = vpop.permute.xlu0 %13970  ;;  %v13978_v23 = vunpack.i.h.bf16 %v13976_v43  ;;  %v13977_v28 = vunpack.i.l.bf16 %v13976_v43 }
 0xc2c   :  { %12613 = vmatprep.subr.bf16.mxu1 %v12612_v50  ;;  %v13973_v39 = vunpack.i.h.bf16 %v13971_v7  ;;  %v13972_v63 = vunpack.i.l.bf16 %v13971_v7 }
 0xc2d   :  { %12615 = vmatpush3.bf16.msra.mxu1 %v12612_v50  ;;  %v9036_v47 = vsel %vm9034_vm12, %v13977_v28, %v13978_v23 }
 0xc2e   :  { %12617 = vmatprep.subr.bf16.mxu1 %v20293_v1  ;;  %v13991_v31 = vpop.permute.xlu1 %13990  ;;  %v9035_v13 = vsel %vm9034_vm12, %v13972_v63, %v13973_v39 }
 0xc2f   :  { %v13981_v24 = vpop.permute.xlu0 %13980  ;;  %v13993_v19 = vunpack.i.h.bf16 %v13991_v31  ;;  %v13992_v54 = vunpack.i.l.bf16 %v13991_v31 }
 0xc30   :  { %12030 = vmatmul.mubr.msk.f32.vlgmr.msra.gmra.mrb[40].mxu1 %vm698_vm3, %v11649_v14  ;;  %v13983_v56 = vunpack.i.h.bf16 %v13981_v24  ;;  %v13982_v26 = vunpack.i.l.bf16 %v13981_v24 }
 0xc31   :  { %12619 = vmatpush3.bf16.msra.mxu1 %v20293_v1  ;;  %12044 = vmatprep.mubr.msk.f32.mxu1 %vm698_vm3, %v11646_v27  ;;  %v12628_v1 = vpack.c.bf16 %v9036_v47, %v9035_v13  ;;  %v9038_v0 = vsel %vm9034_vm12, %v13992_v54, %v13993_v19 }
 0xc32   :  { %12621 = vmatprep.subr.bf16.mxu1 %v20305_v22  ;;  %v13996_v4 = vpop.permute.xlu1 %13995  ;;  %v9037_v11 = vsel %vm9034_vm12, %v13982_v26, %v13983_v56 }
 0xc33   :  { %v13986_v40 = vpop.permute.xlu0 %13985  ;;  %v13998_v35 = vunpack.i.h.bf16 %v13996_v4  ;;  %v13997_v41 = vunpack.i.l.bf16 %v13996_v4  ;;  %v12632_v55 = vpack.c.bf16 %v9038_v0, %v9037_v11 }
 0xc34   :  { %v13988_v18 = vunpack.i.h.bf16 %v13986_v40  ;;  %v13987_v51 = vunpack.i.l.bf16 %v13986_v40 }
 0xc35   :  { %12623 = vmatpush3.bf16.msra.mxu1 %v20305_v22  ;;  %v11647_v22 = vld [vmem:[%s20736_s3 + $0x38] sm:$0xff]  ;;  %v9040_v36 = vsel %vm9034_vm12, %v13997_v41, %v13998_v35 }
 0xc36   :  { %12625 = vmatprep.subr.bf16.mxu1 %v20314_v59  ;;  %v9039_v3 = vsel %vm9034_vm12, %v13987_v51, %v13988_v18 }
 0xc39   :  { %12627 = vmatpush3.bf16.msra.mxu1 %v20314_v59  ;;  %v12636_v59 = vpack.c.bf16 %v9040_v36, %v9039_v3 }
 0xc3a   :  { %12629 = vmatprep.subr.bf16.mxu1 %v12628_v1 }
 0xc3c   :  { %12045 = vmatmul.mubr.msk.f32.vlgmr.msra.gmra.mrb[40].mxu1 %vm698_vm3, %v11647_v22 }
 0xc3d   :  { %12631 = vmatpush3.bf16.msra.mxu1 %v12628_v1  ;;  %12059 = vmatprep.mubr.msk.f32.mxu1 %vm698_vm3, %v11650_v25 }
 0xc3e   :  { %12633 = vmatprep.subr.bf16.mxu1 %v12632_v55 }
 0xc41   :  { %12635 = vmatpush3.bf16.msra.mxu1 %v12632_v55  ;;  %v11680_v55 = vld [vmem:[%s20736_s3 + $0x70] sm:$0xff] }
 0xc42   :  { %12637 = vmatprep.subr.bf16.mxu1 %v12636_v59  ;;  %12074 = vmatprep.mubr.msk.f32.mxu0 %vm698_vm3, %v11680_v55 }
 0xc43   :  { %v9138_v9 = vpop.permute.xlu1 %9137 }
 0xc44   :  { %v9133_v37 = vpop.permute.xlu0 %9132 }
 0xc45   :  { %12639 = vmatpush3.bf16.msra.mxu1 %v12636_v59 }
 0xc46   :  { %9246 = vmatprep.subr.bf16.mxu1 %v15078_v10 }
 0xc48   :  { %12060 = vmatmul.mubr.msk.f32.vlgmr.msra.gmra.mrb[40].mxu1 %vm698_vm3, %v11651_v34 }
 0xc49   :  { %9247 = vmatpush1.bf16.msra.mxu1 %v15076_v29  ;;  %9278 = vmatprep.mubr.bf16.mxu1 %v21040_v21 }
 0xc4a   :  { %9248 = vmatprep.subr.bf16.mxu1 %v15081_v2 }
 0xc4d   :  { %9249 = vmatpush1.bf16.msra.mxu1 %v15079_v45 }
 0xc4e   :  { %9250 = vmatprep.subr.bf16.mxu1 %v15084_v33 }
 0xc51   :  { %9251 = vmatpush1.bf16.msra.mxu1 %v15082_v30 }
 0xc52   :  { %9252 = vmatprep.subr.bf16.mxu1 %v15087_v57 }
 0xc55   :  { %9253 = vmatpush1.bf16.msra.mxu1 %v15085_v62 }
 0xc56   :  { %9254 = vmatprep.subr.bf16.mxu1 %v15090_v15 }
 0xc59   :  { %9255 = vmatpush1.bf16.msra.mxu1 %v15088_v12 }
 0xc5a   :  { %9256 = vmatprep.subr.bf16.mxu1 %v15093_v20 }
 0xc5d   :  { %9257 = vmatpush1.bf16.msra.mxu1 %v15091_v5 }
 0xc5e   :  { %9258 = vmatprep.subr.bf16.mxu1 %v15096_v60 }
 0xc61   :  { %9259 = vmatpush1.bf16.msra.mxu1 %v15094_v58 }
 0xc62   :  { %11676 = vmatprep.subr.msk.bf16.mxu1 %vm9239_vm13, %v11675_v42 }
 0xc65   :  { %9261 = vmatpush1.bf16.msra.mxu1 %v9241_v17 }
 0xc66   :  { %9662 = vmatprep.subr.bf16.mxu1 %v15078_v10 }
 0xd1b   :  { %v12061_v48 = vpop.f32.mrb[40].mxu1 }
 0xd1c   :  { %v9141_v52 = vadd.f32 %v12061_v48, %v9138_v9  ;;  %v9119_v38 = vpop.f32.mrb[41].mxu1 }
 0xd1d   :  { %v9140_v46 = vadd.f32 %v9133_v37, %v9119_v38 }
 0xd1e   :  { %15181 = vtanh.f32 %v9141_v52 }
 0xd1f   :  { %15183 = vtanh.f32 %v9140_v46 }
 0xd28   :  { %v15182_v43 = vpop.eup %15181 }
 0xd29   :  { %v15184_v50 = vpop.eup %15183 }
 0xd2a   :  { %v9144_v7 = vpack.c.bf16 %v15182_v43, %v15184_v50 }
 0xd2c   :  { %11677 = vmatmul.mubr.msk.bf16.vlgmr.msra.gmra.mrb[44].mxu1 %vm9235_vm14, %v9144_v7 }
 0xd2d   :  { %9663 = vmatpush1.bf16.msra.mxu1 %v15076_v29  ;;  %9694 = vmatprep.mubr.bf16.mxu1 %v21040_v21 }
 0xd2e   :  { %9664 = vmatprep.subr.bf16.mxu1 %v15081_v2 }
 0xd31   :  { %9665 = vmatpush1.bf16.msra.mxu1 %v15079_v45 }
 0xd32   :  { %9666 = vmatprep.subr.bf16.mxu1 %v15084_v33 }
 0xd35   :  { %9667 = vmatpush1.bf16.msra.mxu1 %v15082_v30 }
 0xd36   :  { %9668 = vmatprep.subr.bf16.mxu1 %v15087_v57 }
 0xd39   :  { %9669 = vmatpush1.bf16.msra.mxu1 %v15085_v62 }
 0xd3a   :  { %9670 = vmatprep.subr.bf16.mxu1 %v15090_v15 }
 0xd3d   :  { %9671 = vmatpush1.bf16.msra.mxu1 %v15088_v12 }
 0xd3e   :  { %9672 = vmatprep.subr.bf16.mxu1 %v15093_v20  ;;  %v11685_v20 = vld [vmem:[%s20737_s4 + $0x28] sm:$0xff] }
 0xd41   :  { %9673 = vmatpush1.bf16.msra.mxu1 %v15091_v5  ;;  %v11684_v5 = vld [vmem:[%s20737_s4 + $0x20] sm:$0xff] }
 0xd42   :  { %9674 = vmatprep.subr.bf16.mxu1 %v15096_v60 }
 0xd45   :  { %9675 = vmatpush1.bf16.msra.mxu1 %v15094_v58 }
 0xd46   :  { %11692 = vmatprep.subr.msk.bf16.mxu1 %vm9239_vm13, %v11675_v42 }
 0xd49   :  { %9677 = vmatpush1.bf16.msra.mxu1 %v9241_v17 }
 0xd4a   :  { %12152 = vmatprep.subr.bf16.mxu1 %v20918_v8 }
 0xdff   :  { %v9280_v14 = vpop.f32.mrb[44].mxu1 }
 0xe00   :  { %v9282_v27 = vpop.f32.mrb[45].mxu1 }
 0xe01   :  { %v14049_v21 = vpack.i.bf16 %v9282_v27, %v9280_v14  ;;  %v9284_v31 = vpop.f32.mrb[46].mxu1 }
 0xe02   :  { %v9286_v24 = vpop.f32.mrb[47].mxu1  ;;  %v13999_v23 = vpack.i.bf16 %v9284_v31, %v9280_v14  ;;  %v20423_v28 = vpack.c.bf16 %v9284_v31, %v9280_v14 }
 0xe03   :  { %v14054_v39 = vpack.i.bf16 %v9286_v24, %v9284_v31  ;;  %v14014_v63 = vpack.i.bf16 %v9286_v24, %v9282_v27 }
 0xe04   :  { %14000 = vrot.lane.b32.xlu0 %v13999_v23, %s15275_s20 }
 0xe05   :  { %14010 = vrot.lane.b32.xlu1 %v14014_v63, %s15275_s20 }
 0xe08   :  { %14005 = vrot.lane.b32.xlu0 %v13999_v23, %s15276_s25  ;;  %v11681_v23 = vld [vmem:[%s20736_s3 + $0x78] sm:$0xff] }
 0xe09   :  { %14015 = vrot.lane.b32.xlu1 %v14014_v63, %s15276_s25 }
 0xe0c   :  { %14020 = vrot.lane.b32.xlu0 %v14049_v21, %s15280_s23 }
 0xe0d   :  { %14025 = vrot.lane.b32.xlu1 %v14054_v39, %s15280_s23 }
 0xe76   :  { %v14001_v19 = vpop.permute.xlu0 %14000 }
 0xe77   :  { %v14003_v54 = vunpack.i.h.bf16 %v14001_v19  ;;  %v14002_v56 = vunpack.i.l.bf16 %v14001_v19  ;;  %v14011_v26 = vpop.permute.xlu1 %14010 }
 0xe78   :  { %v14013_v13 = vunpack.i.h.bf16 %v14011_v26  ;;  %v14012_v47 = vunpack.i.l.bf16 %v14011_v26 }
 0xe79   :  { %v20431_v4 = vpack.c.bf16 %v14003_v54, %v14002_v56 }
 0xe7a   :  { %v9320_v40 = vsel %vm169_vm0, %v14003_v54, %v14013_v13  ;;  %v9319_v1 = vsel %vm169_vm0, %v14002_v56, %v14012_v47  ;;  %v14006_v11 = vpop.permute.xlu0 %14005 }
 0xe7b   :  { %v14039_v0 = vpack.i.bf16 %v14013_v13, %v9320_v40  ;;  %v14029_v35 = vpack.i.bf16 %v14012_v47, %v9319_v1  ;;  %v14016_v41 = vpop.permute.xlu1 %14015  ;;  %v14008_v18 = vunpack.i.h.bf16 %v14006_v11  ;;  %v14007_v51 = vunpack.i.l.bf16 %v14006_v11 }
 0xe7c   :  { %v14018_v22 = vunpack.i.h.bf16 %v14016_v41  ;;  %v14017_v25 = vunpack.i.l.bf16 %v14016_v41 }
 0xe7d   :  { %14040 = vrot.lane.b32.xlu1 %v14039_v0, %s15280_s23  ;;  %14030 = vrot.lane.b32.xlu0 %v14029_v35, %s15280_s23  ;;  %v20440_v3 = vpack.c.bf16 %v14008_v18, %v14007_v51 }
 0xe7e   :  { %v9326_v36 = vsel %vm280_vm1, %v14008_v18, %v14018_v22  ;;  %v9325_v59 = vsel %vm280_vm1, %v14007_v51, %v14017_v25  ;;  %v14021_v10 = vpop.permute.xlu0 %14020 }
 0xe7f   :  { %v14044_v34 = vpack.i.bf16 %v14018_v22, %v9326_v36  ;;  %v14034_v29 = vpack.i.bf16 %v14017_v25, %v9325_v59  ;;  %v14026_v2 = vpop.permute.xlu1 %14025  ;;  %v14023_v45 = vunpack.i.h.bf16 %v14021_v10  ;;  %v14022_v33 = vunpack.i.l.bf16 %v14021_v10  ;;  %v11682_v10 = vld [vmem:[%s20736_s3 + $0x80] sm:$0xff] }
 0xe80   :  { %v14028_v30 = vunpack.i.h.bf16 %v14026_v2  ;;  %v14027_v57 = vunpack.i.l.bf16 %v14026_v2 }
 0xe81   :  { %14045 = vrot.lane.b32.xlu1 %v14044_v34, %s15280_s23  ;;  %14035 = vrot.lane.b32.xlu0 %v14034_v29, %s15280_s23  ;;  %v9351_v62 = vsel %vm1983_vm4, %v14022_v33, %v14023_v45  ;;  %v11683_v45 = vld [vmem:[%s20736_s3 + $0x88] sm:$0xff] }
 0xe82   :  { %v9352_v12 = vsel %vm1983_vm4, %v14027_v57, %v14028_v30 }
 0xe83   :  { %v12640_v15 = vpack.c.bf16 %v9352_v12, %v9351_v62 }
 0xe85   :  { %12641 = vmatprep.subr.bf16.mxu0 %v12640_v15  ;;  %14055 = vrot.lane.b32.xlu1 %v14054_v39, %s15284_s14  ;;  %v11678_v39 = vld [vmem:[%s20736_s3 + $0x60] sm:$0xff] }
 0xe86   :  { %14050 = vrot.lane.b32.xlu0 %v14049_v21, %s15284_s14  ;;  %12643 = vmatpush3.bf16.msra.mxu0 %v12640_v15 }
 0xe89   :  { %14070 = vrot.lane.b32.xlu1 %v14039_v0, %s15284_s14 }
 0xe8a   :  { %14060 = vrot.lane.b32.xlu0 %v14029_v35, %s15284_s14 }
 0xe8d   :  { %14075 = vrot.lane.b32.xlu1 %v14044_v34, %s15284_s14 }
 0xe8e   :  { %14065 = vrot.lane.b32.xlu0 %v14034_v29, %s15284_s14 }
 0xe91   :  { %9651 = vperm.xlu1 %13483, %v11685_v20  }
 0xe92   :  { %9646 = vperm.xlu0 %13482, %v11684_v5  }
 0xeef   :  { %v14041_v60 = vpop.permute.xlu1 %14040  ;;  %v14031_v16 = vpop.permute.xlu0 %14030 }
 0xef0   :  { %v14043_v58 = vunpack.i.h.bf16 %v14041_v60  ;;  %v14042_v42 = vunpack.i.l.bf16 %v14041_v60  ;;  %v14033_v6 = vunpack.i.h.bf16 %v14031_v16  ;;  %v14032_v17 = vunpack.i.l.bf16 %v14031_v16 }
 0xef2   :  { %v9353_v9 = vsel %vm1983_vm4, %v14032_v17, %v14033_v6  ;;  %v9354_v48 = vsel %vm1983_vm4, %v14042_v42, %v14043_v58 }
 0xef3   :  { %v14046_v37 = vpop.permute.xlu1 %14045  ;;  %v14036_v52 = vpop.permute.xlu0 %14035  ;;  %v12644_v38 = vpack.c.bf16 %v9354_v48, %v9353_v9 }
 0xef4   :  { %v14048_v46 = vunpack.i.h.bf16 %v14046_v37  ;;  %v14047_v43 = vunpack.i.l.bf16 %v14046_v37  ;;  %v14038_v50 = vunpack.i.h.bf16 %v14036_v52  ;;  %v14037_v7 = vunpack.i.l.bf16 %v14036_v52 }
 0xef5   :  { %12645 = vmatprep.subr.bf16.mxu0 %v12644_v38 }
 0xef6   :  { %12647 = vmatpush3.bf16.msra.mxu0 %v12644_v38  ;;  %v9355_v14 = vsel %vm1983_vm4, %v14037_v7, %v14038_v50  ;;  %v9356_v27 = vsel %vm1983_vm4, %v14047_v43, %v14048_v46 }
 0xef7   :  { %v14056_v21 = vpop.permute.xlu1 %14055  ;;  %v12648_v31 = vpack.c.bf16 %v9356_v27, %v9355_v14 }
 0xef8   :  { %v14051_v24 = vpop.permute.xlu0 %14050  ;;  %v14058_v54 = vunpack.i.h.bf16 %v14056_v21  ;;  %v14057_v56 = vunpack.i.l.bf16 %v14056_v21 }
 0xef9   :  { %12649 = vmatprep.subr.bf16.mxu0 %v12648_v31  ;;  %v14053_v26 = vunpack.i.h.bf16 %v14051_v24  ;;  %v14052_v13 = vunpack.i.l.bf16 %v14051_v24 }
 0xefa   :  { %12651 = vmatpush3.bf16.msra.mxu0 %v12648_v31  ;;  %v9550_v35 = vsel %vm9034_vm12, %v14057_v56, %v14058_v54 }
 0xefb   :  { %12653 = vmatprep.subr.bf16.mxu0 %v20423_v28  ;;  %v14071_v63 = vpop.permute.xlu1 %14070  ;;  %v9549_v0 = vsel %vm9034_vm12, %v14052_v13, %v14053_v26  ;;  %v11696_v13 = vld [vmem:[%s20736_s3 + $0xa0] sm:$0xff] }
 0xefc   :  { %v14061_v19 = vpop.permute.xlu0 %14060  ;;  %v14073_v47 = vunpack.i.h.bf16 %v14071_v63  ;;  %v14072_v40 = vunpack.i.l.bf16 %v14071_v63  ;;  %v12664_v51 = vpack.c.bf16 %v9550_v35, %v9549_v0 }
 0xefd   :  { %12075 = vmatmul.mubr.msk.f32.vlgmr.msra.gmra.mrb[36].mxu0 %vm698_vm3, %v11681_v23  ;;  %v14063_v1 = vunpack.i.h.bf16 %v14061_v19  ;;  %v14062_v11 = vunpack.i.l.bf16 %v14061_v19 }
 0xefe   :  { %12655 = vmatpush3.bf16.msra.mxu0 %v20423_v28  ;;  %12089 = vmatprep.mubr.msk.f32.mxu0 %vm698_vm3, %v11678_v39  ;;  %v9552_v22 = vsel %vm9034_vm12, %v14072_v40, %v14073_v47 }
 0xeff   :  { %12657 = vmatprep.subr.bf16.mxu0 %v20431_v4  ;;  %v14076_v41 = vpop.permute.xlu1 %14075  ;;  %v9551_v28 = vsel %vm9034_vm12, %v14062_v11, %v14063_v1 }
 0xf00   :  { %v14066_v18 = vpop.permute.xlu0 %14065  ;;  %v14078_v25 = vunpack.i.h.bf16 %v14076_v41  ;;  %v14077_v55 = vunpack.i.l.bf16 %v14076_v41  ;;  %v12668_v34 = vpack.c.bf16 %v9552_v22, %v9551_v28 }
 0xf01   :  { %v14068_v36 = vunpack.i.h.bf16 %v14066_v18  ;;  %v14067_v59 = vunpack.i.l.bf16 %v14066_v18 }
 0xf02   :  { %12659 = vmatpush3.bf16.msra.mxu0 %v20431_v4  ;;  %v11679_v4 = vld [vmem:[%s20736_s3 + $0x68] sm:$0xff]  ;;  %v9554_v2 = vsel %vm9034_vm12, %v14077_v55, %v14078_v25 }
 0xf03   :  { %12661 = vmatprep.subr.bf16.mxu0 %v20440_v3  ;;  %v9553_v29 = vsel %vm9034_vm12, %v14067_v59, %v14068_v36  ;;  %v11701_v59 = vld [vmem:[%s20737_s4 + $0x38] sm:$0xff] }
 0xf06   :  { %12663 = vmatpush3.bf16.msra.mxu0 %v20440_v3  ;;  %v12672_v3 = vpack.c.bf16 %v9554_v2, %v9553_v29 }
 0xf07   :  { %12665 = vmatprep.subr.bf16.mxu0 %v12664_v51 }
 0xf09   :  { %12090 = vmatmul.mubr.msk.f32.vlgmr.msra.gmra.mrb[36].mxu0 %vm698_vm3, %v11679_v4  ;;  %v11700_v4 = vld [vmem:[%s20737_s4 + $0x30] sm:$0xff] }
 0xf0a   :  { %12667 = vmatpush3.bf16.msra.mxu0 %v12664_v51  ;;  %12104 = vmatprep.mubr.msk.f32.mxu0 %vm698_vm3, %v11682_v10 }
 0xf0b   :  { %12669 = vmatprep.subr.bf16.mxu0 %v12668_v34 }
 0xf0e   :  { %12671 = vmatpush3.bf16.msra.mxu0 %v12668_v34 }
 0xf0f   :  { %12673 = vmatprep.subr.bf16.mxu0 %v12672_v3 }
 0xf10   :  { %v9652_v33 = vpop.permute.xlu1 %9651 }
 0xf11   :  { %v9647_v57 = vpop.permute.xlu0 %9646 }
 0xf12   :  { %12675 = vmatpush3.bf16.msra.mxu0 %v12672_v3 }
 0xf15   :  { %12105 = vmatmul.mubr.msk.f32.vlgmr.msra.gmra.mrb[36].mxu0 %vm698_vm3, %v11683_v45 }
 0xf16   :  { %12119 = vmatprep.mubr.msk.f32.mxu0 %vm698_vm3, %v11696_v13 }
 0xfe8   :  { %v12106_v30 = vpop.f32.mrb[36].mxu0 }
 0xfe9   :  { %v9655_v62 = vadd.f32 %v12106_v30, %v9652_v33  ;;  %v9633_v12 = vpop.f32.mrb[37].mxu0 }
 0xfea   :  { %v9654_v15 = vadd.f32 %v9647_v57, %v9633_v12 }
 0xfeb   :  { %15185 = vtanh.f32 %v9655_v62 }
 0xfec   :  { %15187 = vtanh.f32 %v9654_v15 }
 0xff5   :  { %v15186_v20 = vpop.eup %15185 }
 0xff6   :  { %v15188_v5 = vpop.eup %15187 }
 0xff7   :  { %v9658_v60 = vpack.c.bf16 %v15186_v20, %v15188_v5 }
 0xff9   :  { %11693 = vmatmul.mubr.msk.bf16.vlgmr.msra.gmra.mrb[48].mxu1 %vm9235_vm14, %v9658_v60 }
 0xffa   :  { %12166 = vmatprep.mubr.msk.bf16.mxu1 %vm15285_vm15, %v20918_v8 }
0x10cc   :  { %v9696_v16 = vpop.f32.mrb[48].mxu1 }
0x10cd   :  { %v9697_v58 = vadd.f32 %v9696_v16, %v20279_v49  ;;  %v9698_v42 = vpop.f32.mrb[49].mxu1 }
0x10ce   :  { %v9699_v6 = vadd.f32 %v9698_v42, %v20281_v32  ;;  %v9700_v17 = vpop.f32.mrb[50].mxu1 }
0x10cf   :  { %v9701_v9 = vadd.f32 %v9700_v17, %v20283_v53  ;;  %v9702_v48 = vpop.f32.mrb[51].mxu1 }
0x10d0   :  { %v9703_v37 = vadd.f32 %v9702_v48, %v20287_v61  ;;  %v14099_v52 = vpack.i.bf16 %v9699_v6, %v9697_v58  ;;  %v11694_v48 = vld [vmem:[%s20736_s3 + $0x90] sm:$0xff] }
0x10d1   :  { %v14079_v38 = vpack.i.bf16 %v9701_v9, %v9697_v58  ;;  %v20502_v46 = vpack.c.bf16 %v9701_v9, %v9697_v58 }
0x10d2   :  { %v14089_v43 = vpack.i.bf16 %v9703_v37, %v9699_v6  ;;  %v14104_v50 = vpack.i.bf16 %v9703_v37, %v9701_v9  ;;  %v11697_v9 = vld [vmem:[%s20736_s3 + $0xa8] sm:$0xff] }
0x10d3   :  { %14080 = vrot.lane.b32.xlu0 %v14079_v38, %s15275_s20 }
0x10d4   :  { %14090 = vrot.lane.b32.xlu1 %v14089_v43, %s15275_s20 }
0x10d7   :  { %14085 = vrot.lane.b32.xlu0 %v14079_v38, %s15276_s25 }
0x10d8   :  { %14095 = vrot.lane.b32.xlu1 %v14089_v43, %s15276_s25 }
0x10db   :  { %14100 = vrot.lane.b32.xlu0 %v14099_v52, %s15280_s23 }
0x10dc   :  { %14105 = vrot.lane.b32.xlu1 %v14104_v50, %s15280_s23 }
0x1145   :  { %v14081_v49 = vpop.permute.xlu0 %14080 }
0x1146   :  { %v14083_v32 = vunpack.i.h.bf16 %v14081_v49  ;;  %v14082_v53 = vunpack.i.l.bf16 %v14081_v49  ;;  %v14091_v61 = vpop.permute.xlu1 %14090 }
0x1147   :  { %v14093_v7 = vunpack.i.h.bf16 %v14091_v61  ;;  %v14092_v14 = vunpack.i.l.bf16 %v14091_v61 }
0x1148   :  { %v20510_v27 = vpack.c.bf16 %v14083_v32, %v14082_v53 }
0x1149   :  { %v9736_v21 = vsel %vm169_vm0, %v14083_v32, %v14093_v7  ;;  %v9735_v31 = vsel %vm169_vm0, %v14082_v53, %v14092_v14  ;;  %v14086_v24 = vpop.permute.xlu0 %14085  ;;  %vm10147_vm0 = vcmask 809984  }
0x114a   :  { %v14119_v23 = vpack.i.bf16 %v14093_v7, %v9736_v21  ;;  %v14109_v39 = vpack.i.bf16 %v14092_v14, %v9735_v31  ;;  %v14096_v63 = vpop.permute.xlu1 %14095  ;;  %v14088_v19 = vunpack.i.h.bf16 %v14086_v24  ;;  %v14087_v54 = vunpack.i.l.bf16 %v14086_v24 }
0x114b   :  { %v14098_v56 = vunpack.i.h.bf16 %v14096_v63  ;;  %v14097_v26 = vunpack.i.l.bf16 %v14096_v63 }
0x114c   :  { %14120 = vrot.lane.b32.xlu1 %v14119_v23, %s15280_s23  ;;  %14110 = vrot.lane.b32.xlu0 %v14109_v39, %s15280_s23  ;;  %v20519_v47 = vpack.c.bf16 %v14088_v19, %v14087_v54 }
0x114d   :  { %v9742_v40 = vsel %vm280_vm1, %v14088_v19, %v14098_v56  ;;  %v9741_v1 = vsel %vm280_vm1, %v14087_v54, %v14097_v26  ;;  %v14101_v11 = vpop.permute.xlu0 %14100  ;;  %vm10950_vm1 = vcmask 465920  }
0x114e   :  { %v14124_v0 = vpack.i.bf16 %v14098_v56, %v9742_v40  ;;  %v14114_v35 = vpack.i.bf16 %v14097_v26, %v9741_v1  ;;  %v14106_v41 = vpop.permute.xlu1 %14105  ;;  %v14103_v18 = vunpack.i.h.bf16 %v14101_v11  ;;  %v14102_v51 = vunpack.i.l.bf16 %v14101_v11  ;;  %v11698_v26 = vld [vmem:[%s20736_s3 + $0xb0] sm:$0xff]  ;;  %v11699_v11 = vld [vmem:[%s20736_s3 + $0xb8] sm:$0xff] }
0x114f   :  { %v14108_v28 = vunpack.i.h.bf16 %v14106_v41  ;;  %v14107_v22 = vunpack.i.l.bf16 %v14106_v41 }
0x1150   :  { %14125 = vrot.lane.b32.xlu1 %v14124_v0, %s15280_s23  ;;  %14115 = vrot.lane.b32.xlu0 %v14114_v35, %s15280_s23  ;;  %v9767_v25 = vsel %vm1983_vm4, %v14102_v51, %v14103_v18 }
0x1151   :  { %v9768_v55 = vsel %vm1983_vm4, %v14107_v22, %v14108_v28  ;;  %v15099_v22 = vld [vmem:[%s20741_s8] sm:$0xff]  }
0x1152   :  { %v12676_v36 = vpack.c.bf16 %v9768_v55, %v9767_v25  ;;  %12153 = vmatpush3.bf16.msra.mxu1 %v15099_v22  ;;  %v15100_v25 = vld [vmem:[%s20741_s8 + $0x8] sm:$0xff]  }
0x1153   :  { %12154 = vmatprep.subr.bf16.mxu1 %v20918_v8 }
0x1154   :  { %12677 = vmatprep.subr.bf16.mxu0 %v12676_v36  ;;  %14135 = vrot.lane.b32.xlu1 %v14104_v50, %s15284_s14 }
0x1155   :  { %14130 = vrot.lane.b32.xlu0 %v14099_v52, %s15284_s14  ;;  %12679 = vmatpush3.bf16.msra.mxu0 %v12676_v36 }
0x1156   :  { %12155 = vmatpush3.bf16.msra.mxu1 %v15100_v25 }
0x1157   :  { %12156 = vmatprep.subr.bf16.mxu1 %v20918_v8 }
0x1158   :  { %14150 = vrot.lane.b32.xlu1 %v14119_v23, %s15284_s14 }
0x1159   :  { %14140 = vrot.lane.b32.xlu0 %v14109_v39, %s15284_s14 }
0x115c   :  { %14155 = vrot.lane.b32.xlu1 %v14124_v0, %s15284_s14 }
0x115d   :  { %14145 = vrot.lane.b32.xlu0 %v14114_v35, %s15284_s14 }
0x1160   :  { %10067 = vperm.xlu1 %13483, %v11701_v59  }
0x1161   :  { %10062 = vperm.xlu0 %13482, %v11700_v4   ;;  %v15101_v4 = vld [vmem:[%s20741_s8 + $0x10] sm:$0xff]  }
0x1162   :  { %12157 = vmatpush3.bf16.msra.mxu1 %v15101_v4 }
0x1163   :  { %12158 = vmatprep.subr.bf16.mxu1 %v20918_v8 }
0x11be   :  { %v14121_v10 = vpop.permute.xlu1 %14120  ;;  %v14111_v34 = vpop.permute.xlu0 %14110 }
0x11bf   :  { %v14123_v29 = vunpack.i.h.bf16 %v14121_v10  ;;  %v14122_v2 = vunpack.i.l.bf16 %v14121_v10  ;;  %v14113_v3 = vunpack.i.h.bf16 %v14111_v34  ;;  %v14112_v45 = vunpack.i.l.bf16 %v14111_v34  ;;  %v15102_v10 = vld [vmem:[%s20741_s8 + $0x18] sm:$0xff]   ;;  %v15103_v34 = vld [vmem:[%s20741_s8 + $0x20] sm:$0xff]  }
0x11c0   :  { %12159 = vmatpush3.bf16.msra.mxu1 %v15102_v10 }
0x11c1   :  { %v9769_v33 = vsel %vm1983_vm4, %v14112_v45, %v14113_v3  ;;  %v9770_v30 = vsel %vm1983_vm4, %v14122_v2, %v14123_v29  ;;  %12160 = vmatprep.subr.bf16.mxu1 %v20918_v8  ;;  %v15104_v29 = vld [vmem:[%s20741_s8 + $0x28] sm:$0xff]   ;;  %v21044_v2 = vmov 65535   ;;  %v15105_v45 = vld [vmem:[%s20741_s8 + $0x30] ss:$0 sps:$4 sm:$0x33]   ;;  %s15286_s8 = smov 117  }
0x11c2   :  { %v14126_v57 = vpop.permute.xlu1 %14125  ;;  %v14116_v62 = vpop.permute.xlu0 %14115  ;;  %v12680_v12 = vpack.c.bf16 %v9770_v30, %v9769_v33  ;;  %v10151_v3 = vsel %vm8679_vm11, 4294967295, %v21044_v2  ;;  %v11721_v2 = vld [vmem:[%s20736_s3 + $0xe8] sm:$0xff] }
0x11c3   :  { %v14128_v15 = vunpack.i.h.bf16 %v14126_v57  ;;  %v14127_v20 = vunpack.i.l.bf16 %v14126_v57  ;;  %v14118_v5 = vunpack.i.h.bf16 %v14116_v62  ;;  %v14117_v60 = vunpack.i.l.bf16 %v14116_v62 }
0x11c4   :  { %12681 = vmatprep.subr.bf16.mxu0 %v12680_v12  ;;  %12161 = vmatpush3.bf16.msra.mxu1 %v15103_v34  ;;  %v10152_v33 = vsel %vm6549_vm6, %v10151_v3, 0  ;;  %v15106_v3 = vld [vmem:[%s20742_s9] sm:$0xff]  }
0x11c5   :  { %12683 = vmatpush3.bf16.msra.mxu0 %v12680_v12  ;;  %v9771_v16 = vsel %vm1983_vm4, %v14117_v60, %v14118_v5  ;;  %v9772_v58 = vsel %vm1983_vm4, %v14127_v20, %v14128_v15  ;;  %12162 = vmatprep.subr.bf16.mxu1 %v20918_v8  ;;  %v10154_v57 = vand.u32 %v15105_v45, %v10152_v33  ;;  %v15107_v45 = vld [vmem:[%s20742_s9 + $0x8] sm:$0xff]   ;;  %v15108_v33 = vld [vmem:[%s20742_s9 + $0x10] ss:$0 sps:$4 sm:$0x11]  }
0x11c6   :  { %v14136_v42 = vpop.permute.xlu1 %14135  ;;  %v12684_v6 = vpack.c.bf16 %v9772_v58, %v9771_v16 }
0x11c7   :  { %v14131_v17 = vpop.permute.xlu0 %14130  ;;  %v14138_v38 = vunpack.i.h.bf16 %v14136_v42  ;;  %v14137_v43 = vunpack.i.l.bf16 %v14136_v42 }
0x11c8   :  { %12685 = vmatprep.subr.bf16.mxu0 %v12684_v6  ;;  %v14133_v50 = vunpack.i.h.bf16 %v14131_v17  ;;  %v14132_v49 = vunpack.i.l.bf16 %v14131_v17  ;;  %12163 = vmatpush3.bf16.msra.mxu1 %v15104_v29 }
0x11c9   :  { %12687 = vmatpush3.bf16.msra.mxu0 %v12684_v6  ;;  %v9966_v21 = vsel %vm9034_vm12, %v14137_v43, %v14138_v38  ;;  %12164 = vmatprep.subr.bf16.mxu1 %v20918_v8 }
0x11ca   :  { %12689 = vmatprep.subr.bf16.mxu0 %v20502_v46  ;;  %v14151_v37 = vpop.permute.xlu1 %14150  ;;  %v9965_v14 = vsel %vm9034_vm12, %v14132_v49, %v14133_v50 }
0x11cb   :  { %v14141_v52 = vpop.permute.xlu0 %14140  ;;  %v14153_v32 = vunpack.i.h.bf16 %v14151_v37  ;;  %v14152_v53 = vunpack.i.l.bf16 %v14151_v37  ;;  %v12700_v23 = vpack.c.bf16 %v9966_v21, %v9965_v14  ;;  %v11718_v14 = vld [vmem:[%s20736_s3 + $0xd0] sm:$0xff] }
0x11cc   :  { %12120 = vmatmul.mubr.msk.f32.vlgmr.msra.gmra.mrb[38].mxu0 %vm698_vm3, %v11697_v9  ;;  %v14143_v61 = vunpack.i.h.bf16 %v14141_v52  ;;  %v14142_v7 = vunpack.i.l.bf16 %v14141_v52  ;;  %12165 = vmatpush3.bf16.msra.mxu1 %v10154_v57 }
0x11cd   :  { %12691 = vmatpush3.bf16.msra.mxu0 %v20502_v46  ;;  %12134 = vmatprep.mubr.msk.f32.mxu0 %vm698_vm3, %v11694_v48  ;;  %v9968_v39 = vsel %vm9034_vm12, %v14152_v53, %v14153_v32 }
0x11ce   :  { %12693 = vmatprep.subr.bf16.mxu0 %v20510_v27  ;;  %v14156_v31 = vpop.permute.xlu1 %14155  ;;  %v9967_v46 = vsel %vm9034_vm12, %v14142_v7, %v14143_v61  ;;  %12215 = vmatprep.subr.bf16.mxu1 %v20918_v8 }
0x11cf   :  { %v14146_v24 = vpop.permute.xlu0 %14145  ;;  %v14158_v63 = vunpack.i.h.bf16 %v14156_v31  ;;  %v14157_v19 = vunpack.i.l.bf16 %v14156_v31  ;;  %v12704_v13 = vpack.c.bf16 %v9968_v39, %v9967_v46 }
0x11d0   :  { %v14148_v54 = vunpack.i.h.bf16 %v14146_v24  ;;  %v14147_v56 = vunpack.i.l.bf16 %v14146_v24 }
0x11d1   :  { %12695 = vmatpush3.bf16.msra.mxu0 %v20510_v27  ;;  %v11695_v27 = vld [vmem:[%s20736_s3 + $0x98] sm:$0xff]  ;;  %v9970_v1 = vsel %vm9034_vm12, %v14157_v19, %v14158_v63  ;;  %v11722_v63 = vld [vmem:[%s20737_s4 + $0x40] sm:$0xff]  ;;  %v11723_v19 = vld [vmem:[%s20737_s4 + $0x48] sm:$0xff] }
0x11d2   :  { %12697 = vmatprep.subr.bf16.mxu0 %v20519_v47  ;;  %v9969_v40 = vsel %vm9034_vm12, %v14147_v56, %v14148_v54 }
0x11d5   :  { %12699 = vmatpush3.bf16.msra.mxu0 %v20519_v47  ;;  %v12708_v47 = vpack.c.bf16 %v9970_v1, %v9969_v40 }
0x11d6   :  { %12701 = vmatprep.subr.bf16.mxu0 %v12700_v23 }
0x11d8   :  { %12135 = vmatmul.mubr.msk.f32.vlgmr.msra.gmra.mrb[38].mxu0 %vm698_vm3, %v11695_v27 }
0x11d9   :  { %12703 = vmatpush3.bf16.msra.mxu0 %v12700_v23  ;;  %12149 = vmatprep.mubr.msk.f32.mxu0 %vm698_vm3, %v11698_v26 }
0x11da   :  { %12705 = vmatprep.subr.bf16.mxu0 %v12704_v13 }
0x11dd   :  { %12707 = vmatpush3.bf16.msra.mxu0 %v12704_v13 }
0x11de   :  { %12709 = vmatprep.subr.bf16.mxu0 %v12708_v47 }
0x11df   :  { %v10068_v0 = vpop.permute.xlu1 %10067 }
0x11e0   :  { %v10063_v41 = vpop.permute.xlu0 %10062 }
0x11e1   :  { %12711 = vmatpush3.bf16.msra.mxu0 %v12708_v47 }
0x11e4   :  { %12150 = vmatmul.mubr.msk.f32.vlgmr.msra.gmra.mrb[38].mxu0 %vm698_vm3, %v11699_v11  ;;  %v11719_v11 = vld [vmem:[%s20736_s3 + $0xd8] sm:$0xff] }
0x11e5   :  { %12182 = vmatprep.mubr.msk.f32.mxu0 %vm698_vm3, %v11718_v14 }
0x12b7   :  { %v12151_v35 = vpop.f32.mrb[38].mxu0 }
0x12b8   :  { %v10071_v18 = vadd.f32 %v12151_v35, %v10068_v0  ;;  %v10049_v51 = vpop.f32.mrb[39].mxu0  ;;  %v11716_v0 = vld [vmem:[%s20736_s3 + $0xc0] sm:$0xff] }
0x12b9   :  { %v10070_v28 = vadd.f32 %v10063_v41, %v10049_v51 }
0x12ba   :  { %15189 = vtanh.f32 %v10071_v18 }
0x12bb   :  { %15191 = vtanh.f32 %v10070_v28 }
0x12c4   :  { %v15190_v55 = vpop.eup %15189 }
0x12c5   :  { %v15192_v36 = vpop.eup %15191 }
0x12c6   :  { %v14159_v59 = vpack.i.bf16 %v15190_v55, %v15192_v36 }
0x12c8   :  { %14160 = vrot.lane.b32.xlu0 %v14159_v59, %s15275_s20  ;;  %v11720_v59 = vld [vmem:[%s20736_s3 + $0xe0] sm:$0xff] }
0x133a   :  { %v14161_v30 = vpop.permute.xlu0 %14160 }
0x133b   :  { %v14163_v62 = vunpack.i.h.bf16 %v14161_v30  ;;  %v14162_v12 = vunpack.i.l.bf16 %v14161_v30  ;;  %v10541_v30 = vand.u32 %v15108_v33, %v20264_v44 }
0x133d   :  { %v10083_v15 = vmax.f32 %v15190_v55, %v14163_v62  ;;  %v10082_v20 = vmax.f32 %v15192_v36, %v14162_v12  ;;  %v11717_v36 = vld [vmem:[%s20736_s3 + $0xc8] sm:$0xff] }
0x133f   :  { %v14164_v5 = vpack.i.bf16 %v10083_v15, %v10082_v20 }
0x1341   :  { %14165 = vrot.lane.b32.xlu1 %v14164_v5, %s15280_s23 }
0x13b3   :  { %v14166_v60 = vpop.permute.xlu1 %14165 }
0x13b4   :  { %v14168_v16 = vunpack.i.h.bf16 %v14166_v60  ;;  %v14167_v58 = vunpack.i.l.bf16 %v14166_v60 }
0x13b6   :  { %v10093_v42 = vmax.f32 %v10083_v15, %v14168_v16  ;;  %v10092_v6 = vmax.f32 %v10082_v20, %v14167_v58 }
0x13b8   :  { %v10094_v17 = vpack.c.bf16 %v10093_v42, %v10092_v6 }
0x13ba   :  { %12167 = vmatmul.mubr.msk.bf16.vlgmr.msra.gmra.mrb[52].mxu1 %vm10147_vm0, %v10094_v17 }
0x13bb   :  { %12221 = vmatprep.mubr.msk.bf16.mxu1 %vm15285_vm15, %v20918_v8  ;;  %12216 = vmatpush3.bf16.msra.mxu1 %v15106_v3 }
0x13bc   :  { %12217 = vmatprep.subr.bf16.mxu1 %v20918_v8 }
0x13bf   :  { %12218 = vmatpush3.bf16.msra.mxu1 %v15107_v45 }
0x13c0   :  { %12219 = vmatprep.subr.bf16.mxu1 %v20918_v8 }
0x13c3   :  { %12220 = vmatpush3.bf16.msra.mxu1 %v10541_v30 }
0x148d   :  { %v20613_v9 = vpop.f32.mrb[52].mxu1 }
0x148e   :  { %v12168_v48 = vpop.f32.mrb[53].mxu1 }
0x148f   :  { %v20615_v37 = vpop.f32.mrb[54].mxu1 }
0x1490   :  { %v12169_v52 = vpop.f32.mrb[55].mxu1  ;;  %v14174_v38 = vpack.i.bf16 %v20615_v37, %v20613_v9  ;;  %v12724_v43 = vpack.c.bf16 %v20615_v37, %v20613_v9 }
0x1492   :  { %14175 = vrot.lane.b32.xlu1 %v14174_v38, %s15276_s25  ;;  %14170 = vrot.lane.b32.xlu0 %v14174_v38, %s15275_s20 }
0x1496   :  { %14180 = vrot.lane.b32.xlu0 %v14174_v38, %s15286_s8 }
0x1504   :  { %v14176_v50 = vpop.permute.xlu1 %14175  ;;  %v14171_v49 = vpop.permute.xlu0 %14170 }
0x1505   :  { %v14178_v32 = vunpack.i.h.bf16 %v14176_v50  ;;  %v14177_v53 = vunpack.i.l.bf16 %v14176_v50  ;;  %v14173_v61 = vunpack.i.h.bf16 %v14171_v49  ;;  %v14172_v7 = vunpack.i.l.bf16 %v14171_v49  ;;  %14190 = vrot.lane.b32.xlu0 %v14176_v50, %s15286_s8  ;;  %14185 = vrot.lane.b32.xlu1 %v14171_v49, %s15286_s8 }
0x1507   :  { %v12728_v31 = vpack.c.bf16 %v14173_v61, %v14172_v7  ;;  %v12732_v24 = vpack.c.bf16 %v14178_v32, %v14177_v53  ;;  %v11736_v53 = vld [vmem:[%s20736_s3 + $0x100] sm:$0xff] }
0x1508   :  { %v14181_v21 = vpop.permute.xlu0 %14180 }
0x1509   :  { %v14183_v23 = vunpack.i.h.bf16 %v14181_v21  ;;  %v14182_v46 = vunpack.i.l.bf16 %v14181_v21  ;;  %14200 = vrot.lane.b32.xlu0 %v14171_v49, %s15287_s19  ;;  %14195 = vrot.lane.b32.xlu1 %v14174_v38, %s15287_s19 }
0x150b   :  { %v12712_v39 = vpack.c.bf16 %v14183_v23, %v14182_v46  ;;  %v11740_v23 = vld [vmem:[%s20737_s4 + $0x50] sm:$0xff]  ;;  %v11741_v46 = vld [vmem:[%s20737_s4 + $0x58] sm:$0xff] }
0x150d   :  { %12713 = vmatprep.subr.bf16.mxu0 %v12712_v39  ;;  %10504 = vperm.xlu0 %13482, %v11722_v63  }
0x150e   :  { %12715 = vmatpush3.bf16.msra.mxu0 %v12712_v39  ;;  %14205 = vrot.lane.b32.xlu1 %v14176_v50, %s15287_s19 }
0x1512   :  { %10509 = vperm.xlu1 %13483, %v11723_v19  }
0x1577   :  { %v14191_v54 = vpop.permute.xlu0 %14190  ;;  %v14186_v56 = vpop.permute.xlu1 %14185 }
0x1578   :  { %v14193_v27 = vunpack.i.h.bf16 %v14191_v54  ;;  %v14192_v26 = vunpack.i.l.bf16 %v14191_v54  ;;  %v14188_v13 = vunpack.i.h.bf16 %v14186_v56  ;;  %v14187_v40 = vunpack.i.l.bf16 %v14186_v56 }
0x157a   :  { %v12716_v1 = vpack.c.bf16 %v14188_v13, %v14187_v40  ;;  %v12720_v47 = vpack.c.bf16 %v14193_v27, %v14192_v26  ;;  %v11737_v40 = vld [vmem:[%s20736_s3 + $0x108] sm:$0xff] }
0x157b   :  { %v14196_v35 = vpop.permute.xlu1 %14195  ;;  %v14201_v51 = vpop.permute.xlu0 %14200 }
0x157c   :  { %12717 = vmatprep.subr.bf16.mxu0 %v12716_v1  ;;  %v14198_v41 = vunpack.i.h.bf16 %v14196_v35  ;;  %v14197_v18 = vunpack.i.l.bf16 %v14196_v35  ;;  %v14203_v28 = vunpack.i.h.bf16 %v14201_v51  ;;  %v14202_v22 = vunpack.i.l.bf16 %v14201_v51 }
0x157d   :  { %12719 = vmatpush3.bf16.msra.mxu0 %v12716_v1  ;;  %v11734_v1 = vld [vmem:[%s20736_s3 + $0xf0] sm:$0xff] }
0x157e   :  { %12721 = vmatprep.subr.bf16.mxu0 %v12720_v47  ;;  %v12736_v25 = vpack.c.bf16 %v14198_v41, %v14197_v18  ;;  %v12740_v4 = vpack.c.bf16 %v14203_v28, %v14202_v22  ;;  %v11735_v22 = vld [vmem:[%s20736_s3 + $0xf8] sm:$0xff] }
0x1580   :  { %v14206_v55 = vpop.permute.xlu1 %14205 }
0x1581   :  { %12723 = vmatpush3.bf16.msra.mxu0 %v12720_v47  ;;  %v14208_v10 = vunpack.i.h.bf16 %v14206_v55  ;;  %v14207_v34 = vunpack.i.l.bf16 %v14206_v55 }
0x1582   :  { %12725 = vmatprep.subr.bf16.mxu0 %v12724_v43 }
0x1583   :  { %v12744_v29 = vpack.c.bf16 %v14208_v10, %v14207_v34  ;;  %v11739_v10 = vld [vmem:[%s20736_s3 + $0x118] sm:$0xff] }
0x1584   :  { %12183 = vmatmul.mubr.msk.f32.vlgmr.msra.gmra.mrb[40].mxu0 %vm698_vm3, %v11719_v11 }
0x1585   :  { %12727 = vmatpush3.bf16.msra.mxu0 %v12724_v43  ;;  %12197 = vmatprep.mubr.msk.f32.mxu0 %vm698_vm3, %v11716_v0 }
0x1586   :  { %12729 = vmatprep.subr.bf16.mxu0 %v12728_v31 }
0x1589   :  { %12731 = vmatpush3.bf16.msra.mxu0 %v12728_v31 }
0x158a   :  { %12733 = vmatprep.subr.bf16.mxu0 %v12732_v24 }
0x158c   :  { %v10505_v12 = vpop.permute.xlu0 %10504 }
0x158d   :  { %12735 = vmatpush3.bf16.msra.mxu0 %v12732_v24 }
0x158e   :  { %12737 = vmatprep.subr.bf16.mxu0 %v12736_v25 }
0x1590   :  { %12198 = vmatmul.mubr.msk.f32.vlgmr.msra.gmra.mrb[40].mxu0 %vm698_vm3, %v11717_v36 }
0x1591   :  { %12739 = vmatpush3.bf16.msra.mxu0 %v12736_v25  ;;  %12212 = vmatprep.mubr.msk.f32.mxu0 %vm698_vm3, %v11720_v59  ;;  %v10510_v57 = vpop.permute.xlu1 %10509  ;;  %v11738_v25 = vld [vmem:[%s20736_s3 + $0x110] sm:$0xff]  ;;  %s15288_s3 = smov [#allocation3]  }
0x1592   :  { %12741 = vmatprep.subr.bf16.mxu0 %v12740_v4 }
0x1595   :  { %12743 = vmatpush3.bf16.msra.mxu0 %v12740_v4 }
0x1596   :  { %12745 = vmatprep.subr.bf16.mxu0 %v12744_v29 }
0x1599   :  { %12747 = vmatpush3.bf16.msra.mxu0 %v12744_v29 }
0x159a   :  { %12270 = vmatprep.subr.bf16.mxu0 %v20918_v8 }
0x159c   :  { %12213 = vmatmul.mubr.msk.f32.vlgmr.msra.gmra.mrb[40].mxu0 %vm698_vm3, %v11721_v2 }
0x159d   :  { %12276 = vmatprep.mubr.msk.bf16.mxu0 %vm15285_vm15, %v20918_v8  ;;  %12271 = vmatpush3.bf16.msra.mxu0 %v15106_v3 }
0x159e   :  { %12272 = vmatprep.subr.bf16.mxu0 %v20918_v8 }
0x15a1   :  { %12273 = vmatpush3.bf16.msra.mxu0 %v15107_v45 }
0x15a2   :  { %12274 = vmatprep.subr.bf16.mxu0 %v20918_v8 }
0x15a5   :  { %12275 = vmatpush3.bf16.msra.mxu0 %v10541_v30 }
0x166f   :  { %v12214_v62 = vpop.f32.mrb[40].mxu0 }
0x1670   :  { %v10513_v15 = vadd.f32 %v12214_v62, %v10510_v57  ;;  %v10491_v20 = vpop.f32.mrb[41].mxu0 }
0x1671   :  { %v10512_v5 = vadd.f32 %v10505_v12, %v10491_v20 }
0x1672   :  { %15193 = vtanh.f32 %v10513_v15  ;;  %v10948_v15 = vld [vmem:[%s20743_s10] sm:$0xff]  ;;  %s10991_s10 = sshll.u32 %s15288_s3, 4  ;;  %s10992_s10 = int_to_ptr.vmem [resolvable:$true] %s10991_s10 }
0x1673   :  { %15195 = vtanh.f32 %v10512_v5  ;;  %s15251_s30 = scalar_lea.vmem %s10992_s10, 16  ;;  %s15255_s6 = scalar_lea.vmem %s10992_s10, 32 }
0x1674   :  { %p15252_p0 = scmp.ne.s32.totalorder %s10992_s10, %s15251_s30  ;;  %p15256_p1 = scmp.lt.s32.totalorder %s10992_s10, %s10992_s10 }
0x1675   :  { %p15257_p2 = scmp.lt.s32.totalorder %s15255_s6, %s15251_s30 }
0x1677   :  { %p15258_p3 = por %p15257_p2, %p15256_p1 }
0x1679   :  { %p15259_p4 = pnand %p15258_p3, %p15252_p0 }
0x167c   :  { %v15194_v60 = vpop.eup %15193 }
0x167d   :  { %v15196_v16 = vpop.eup %15195 }
0x167e   :  { %v10516_v58 = vpack.c.bf16 %v15194_v60, %v15196_v16 }
0x1680   :  { %12222 = vmatmul.mubr.msk.bf16.vlgmr.msra.gmra.mrb[56].mxu1 %vm8675_vm10, %v10516_v58 }
0x1681   :  { %12237 = vmatprep.mubr.msk.f32.mxu1 %vm698_vm3, %v11736_v53 }
0x1753   :  { %v10577_v44 = vpop.f32.mrb[56].mxu1 }
0x1754   :  { %v12223_v42 = vpop.f32.mrb[57].mxu1 }
0x1755   :  { %v10580_v6 = vpop.f32.mrb[58].mxu1 }
0x1756   :  { %v12224_v17 = vpop.f32.mrb[59].mxu1  ;;  %v14214_v8 = vpack.i.bf16 %v10580_v6, %v10577_v44  ;;  %v12760_v48 = vpack.c.bf16 %v10580_v6, %v10577_v44 }
0x1758   :  { %14215 = vrot.lane.b32.xlu1 %v14214_v8, %s15276_s25  ;;  %14210 = vrot.lane.b32.xlu0 %v14214_v8, %s15275_s20 }
0x175c   :  { %14220 = vrot.lane.b32.xlu0 %v14214_v8, %s15286_s8 }
0x17ca   :  { %v14216_v52 = vpop.permute.xlu1 %14215  ;;  %v14211_v38 = vpop.permute.xlu0 %14210 }
0x17cb   :  { %v14218_v43 = vunpack.i.h.bf16 %v14216_v52  ;;  %v14217_v50 = vunpack.i.l.bf16 %v14216_v52  ;;  %v14213_v49 = vunpack.i.h.bf16 %v14211_v38  ;;  %v14212_v32 = vunpack.i.l.bf16 %v14211_v38  ;;  %14230 = vrot.lane.b32.xlu0 %v14216_v52, %s15286_s8  ;;  %14225 = vrot.lane.b32.xlu1 %v14211_v38, %s15286_s8 }
0x17cd   :  { %v12764_v7 = vpack.c.bf16 %v14213_v49, %v14212_v32  ;;  %v12768_v14 = vpack.c.bf16 %v14218_v43, %v14217_v50  ;;  %v10978_v43 = vlaneseq }
0x17ce   :  { %v14221_v61 = vpop.permute.xlu0 %14220 }
0x17cf   :  { %v14223_v21 = vunpack.i.h.bf16 %v14221_v61  ;;  %v14222_v31 = vunpack.i.l.bf16 %v14221_v61  ;;  %14240 = vrot.lane.b32.xlu0 %v14211_v38, %s15287_s19  ;;  %14235 = vrot.lane.b32.xlu1 %v14214_v8, %s15287_s19  ;;  %v10972_v8 = vld [vmem:[#allocation2] sm:$0x1]  ;;  %v10979_v53 = vshrl.u32 %v10978_v43, 7 }
0x17d1   :  { %v12748_v24 = vpack.c.bf16 %v14223_v21, %v14222_v31  ;;  %v10980_v21 = vsub.s32 0, %v10979_v53 }
0x17d3   :  { %12749 = vmatprep.subr.bf16.mxu1 %v12748_v24  ;;  %10891 = vperm.xlu0 %13482, %v11740_v23  }
0x17d4   :  { %12751 = vmatpush3.bf16.msra.mxu1 %v12748_v24  ;;  %14245 = vrot.lane.b32.xlu1 %v14216_v52, %s15287_s19 }
0x17d8   :  { %10896 = vperm.xlu1 %13483, %v11741_v46  }
0x183d   :  { %v14231_v39 = vpop.permute.xlu0 %14230  ;;  %v14226_v63 = vpop.permute.xlu1 %14225 }
0x183e   :  { %v14233_v19 = vunpack.i.h.bf16 %v14231_v39  ;;  %v14232_v54 = vunpack.i.l.bf16 %v14231_v39  ;;  %v14228_v56 = vunpack.i.h.bf16 %v14226_v63  ;;  %v14227_v27 = vunpack.i.l.bf16 %v14226_v63 }
0x1840   :  { %v12752_v26 = vpack.c.bf16 %v14228_v56, %v14227_v27  ;;  %v12756_v13 = vpack.c.bf16 %v14233_v19, %v14232_v54 }
0x1841   :  { %v14236_v47 = vpop.permute.xlu1 %14235  ;;  %v14241_v35 = vpop.permute.xlu0 %14240 }
0x1842   :  { %12753 = vmatprep.subr.bf16.mxu1 %v12752_v26  ;;  %v14238_v11 = vunpack.i.h.bf16 %v14236_v47  ;;  %v14237_v0 = vunpack.i.l.bf16 %v14236_v47  ;;  %v14243_v41 = vunpack.i.h.bf16 %v14241_v35  ;;  %v14242_v18 = vunpack.i.l.bf16 %v14241_v35 }
0x1843   :  { %12755 = vmatpush3.bf16.msra.mxu1 %v12752_v26 }
0x1844   :  { %12757 = vmatprep.subr.bf16.mxu1 %v12756_v13  ;;  %v12772_v51 = vpack.c.bf16 %v14238_v11, %v14237_v0  ;;  %v12776_v55 = vpack.c.bf16 %v14243_v41, %v14242_v18 }
0x1846   :  { %v14246_v28 = vpop.permute.xlu1 %14245 }
0x1847   :  { %12759 = vmatpush3.bf16.msra.mxu1 %v12756_v13  ;;  %v14248_v36 = vunpack.i.h.bf16 %v14246_v28  ;;  %v14247_v59 = vunpack.i.l.bf16 %v14246_v28 }
0x1848   :  { %12761 = vmatprep.subr.bf16.mxu1 %v12760_v48 }
0x1849   :  { %v12780_v4 = vpack.c.bf16 %v14248_v36, %v14247_v59 }
0x184a   :  { %12238 = vmatmul.mubr.msk.f32.vlgmr.msra.gmra.mrb[42].mxu1 %vm698_vm3, %v11737_v40 }
0x184b   :  { %12763 = vmatpush3.bf16.msra.mxu1 %v12760_v48  ;;  %12252 = vmatprep.mubr.msk.f32.mxu1 %vm698_vm3, %v11734_v1 }
0x184c   :  { %12765 = vmatprep.subr.bf16.mxu1 %v12764_v7 }
0x184f   :  { %12767 = vmatpush3.bf16.msra.mxu1 %v12764_v7 }
0x1850   :  { %12769 = vmatprep.subr.bf16.mxu1 %v12768_v14 }
0x1852   :  { %v10892_v2 = vpop.permute.xlu0 %10891 }
0x1853   :  { %12771 = vmatpush3.bf16.msra.mxu1 %v12768_v14 }
0x1854   :  { %12773 = vmatprep.subr.bf16.mxu1 %v12772_v51 }
0x1856   :  { %12253 = vmatmul.mubr.msk.f32.vlgmr.msra.gmra.mrb[42].mxu1 %vm698_vm3, %v11735_v22 }
0x1857   :  { %12775 = vmatpush3.bf16.msra.mxu1 %v12772_v51  ;;  %12267 = vmatprep.mubr.msk.f32.mxu1 %vm698_vm3, %v11738_v25  ;;  %v10897_v34 = vpop.permute.xlu1 %10896 }
0x1858   :  { %12777 = vmatprep.subr.bf16.mxu1 %v12776_v55 }
0x185b   :  { %12779 = vmatpush3.bf16.msra.mxu1 %v12776_v55 }
0x185c   :  { %12781 = vmatprep.subr.bf16.mxu1 %v12780_v4 }
0x185f   :  { %12783 = vmatpush3.bf16.msra.mxu1 %v12780_v4 }
0x1862   :  { %12268 = vmatmul.mubr.msk.f32.vlgmr.msra.gmra.mrb[42].mxu1 %vm698_vm3, %v11739_v10  ;;  %vm10983_vm3 = vcmask 8192  }
0x1935   :  { %v12269_v29 = vpop.f32.mrb[42].mxu1 }
0x1936   :  { %v10900_v3 = vadd.f32 %v12269_v29, %v10897_v34  ;;  %v10878_v45 = vpop.f32.mrb[43].mxu1 }
0x1937   :  { %v10899_v33 = vadd.f32 %v10892_v2, %v10878_v45 }
0x1938   :  { %15197 = vtanh.f32 %v10900_v3 }
0x1939   :  { %15199 = vtanh.f32 %v10899_v33 }
0x1942   :  { %v15198_v30 = vpop.eup %15197 }
0x1943   :  { %v15200_v57 = vpop.eup %15199 }
0x1944   :  { %v10903_v62 = vpack.c.bf16 %v15198_v30, %v15200_v57 }
0x1946   :  { %12277 = vmatmul.mubr.msk.bf16.vlgmr.msra.gmra.mrb[44].mxu0 %vm8675_vm10, %v10903_v62 }
0x1a19   :  { %v10941_v12 = vpop.f32.mrb[44].mxu0 }
0x1a1a   :  { %v10942_v20 = vadd.f32 %v10941_v12, %v20613_v9  ;;  %v12278_v5 = vpop.f32.mrb[45].mxu0 }
0x1a1b   :  { %v10944_v60 = vpop.f32.mrb[46].mxu0 }
0x1a1c   :  { %v10949_v16 = vmul.f32 %v10948_v15, %v10942_v20  ;;  %v10945_v58 = vadd.f32 %v10944_v60, %v20615_v37  ;;  %v12279_v44 = vpop.f32.mrb[47].mxu0 }
0x1a1e   :  { %v10960_v42 = vmul.f32 %v10948_v15, %v10945_v58  ;;  %v10951_v6 = vsel %vm10950_vm1, %v10949_v16, 0.0 }
0x1a1f   :  { %10952 = vadd.xlane.f32.xlu0 %v10951_v6 }
0x1a20   :  { %v10961_v17 = vsel %vm10950_vm1, %v10960_v42, 0.0 }
0x1a21   :  { %10962 = vadd.xlane.f32.xlu1 %v10961_v17 }
0x1a35   :  { %10975 = vperm.xlu0 %13482, %v10972_v8  }
0x1aac   :  { %v10953_v48 = vpop.xlane.xlu0 %10952 }
0x1aad   :  { %v10954_v52 = vrot.slane %v10953_v48, 4 }
0x1aae   :  { %v10963_v38 = vpop.xlane.xlu1 %10962 }
0x1aaf   :  { %v10955_v50 = vadd.f32 %v10954_v52, %v10953_v48  ;;  %v10964_v9 = vrot.slane %v10963_v38, 4 }
0x1ab1   :  { %v10956_v49 = vrot.slane %v10955_v50, 2  ;;  %v10965_v32 = vadd.f32 %v10964_v9, %v10963_v38 }
0x1ab3   :  { %v10957_v61 = vadd.f32 %v10956_v49, %v10955_v50  ;;  %v10966_v7 = vrot.slane %v10965_v32, 2 }
0x1ab4   :  { %v10976_v24 = vpop.permute.xlu0 %10975 }
0x1ab5   :  { %v10958_v37 = vrot.slane %v10957_v61, 1  ;;  %v10967_v14 = vadd.f32 %v10966_v7, %v10965_v32  ;;  %v10981_v39 = vrot.slane %v10976_v24, %v10980_v21 }
0x1ab7   :  { %v10968_v31 = vrot.slane %v10967_v14, 1  ;;  %v10959_v23 = vadd.f32 %v10958_v37, %v10957_v61 }
0x1ab9   :  { %v10969_v46 = vadd.f32 %v10968_v31, %v10967_v14 }
0x1abb   :  { %v10971_v63 = vsel %vm10970_vm2, %v10959_v23, %v10969_v46 }
0x1abc   :  { %v10982_v19 = vadd.f32 %v10981_v39, %v10971_v63 }
0x1abe   :  { %10984 = vst.msk [vmem:[#allocation3] sm:$0x1] %vm10983_vm3, %v10982_v19 }
0x1abf   :  { %15262 = shalt.err (!%p15259_p4)
}
0x1ac0   :  { %s15263_s16 = scalar_lea.hbm %s20745_s12, 16 }
0x1ac1   :  { %p15264_p5 = scmp.ne.s32.totalorder %s20745_s12, %s15263_s16  ;;  %p15267_p6 = scmp.lt.u32.totalorder %s15263_s16, %s20745_s12 }
0x1ac3   :  { %p15269_p7 = pnand %p15267_p6, %p15264_p5 }
0x1ac5   :  { %15272 = shalt.err (!%p15269_p7)
}
0x1ac6   :  { %10994 = dma.vmem_to_hbm [thread:$0]  %s10992_s10, 16, %s20745_s12, [#allocation4]  }
0x1ac7   :  { %15273 = dma.done.wait [#allocation4], 16  }
0x1ac8   :  { %15274 = vsyncadd [#allocation4], 4294967280 }
0x1ac9   :  { %10998 = vsyncpa [#allocation4], 1 }

</bundles_post_ra>
